<compile_context>
chip_gen: v6e
topology: v6e:2x2x1
jax: 0.10.0
libtpu: 0.0.40
codegen_flags: <defaults>
</compile_context>

<pallas_src>
import jax
import jax.numpy as jnp
from jax.experimental import pallas as pl
from jax.experimental.pallas import tpu as pltpu


# ---------------------------------------------------------------------------
# Pallas kernel: relu(x @ w + b), tiled over M (conv GEMMs), bf16 in/out
# ---------------------------------------------------------------------------

def _matmul_bias_relu_kernel(x_ref, w_ref, b_ref, o_ref):
    acc = jnp.dot(x_ref[...], w_ref[...], preferred_element_type=jnp.float32)
    o_ref[...] = jnp.maximum(acc + b_ref[...], 0.0).astype(o_ref.dtype)


def matmul_bias_relu(x, w, b, *, tm):
    """relu(x @ w + b). x:[M,K] bf16, w:[K,N] bf16, b:[1,N] f32 -> [M,N] bf16."""
    M, K = x.shape
    _, N = w.shape
    return pl.pallas_call(
        _matmul_bias_relu_kernel,
        out_shape=jax.ShapeDtypeStruct((M, N), jnp.bfloat16),
        grid=(M // tm,),
        in_specs=[
            pl.BlockSpec((tm, K), lambda i: (i, 0)),
            pl.BlockSpec((K, N), lambda i: (0, 0)),
            pl.BlockSpec((1, N), lambda i: (0, 0)),
        ],
        out_specs=pl.BlockSpec((tm, N), lambda i: (i, 0)),
        compiler_params=pltpu.CompilerParams(
            dimension_semantics=("parallel",)),
    )(x, w, b)


# ---------------------------------------------------------------------------
# Pallas kernel: fused dueling head, tiled over the hidden (N1 = 2*hidden) dim
# ---------------------------------------------------------------------------
# w1 = [fc1_w || fcv1_w]        : [K, 2H]   bf16, streamed in tn-wide tiles
# w2 = blockdiag(fc2_w, fcv2_w) : [2H, A+1] f32
# Per tile j:  h_j = relu(feat @ w1[:, j*tn:(j+1)*tn] + b1_j)
#              acc += h_j @ w2[j*tn:(j+1)*tn, :]
# Last tile:   out = acc + b2;  q = v + adv - adv.mean(-1)

def _dueling_head_kernel(x_ref, w1_ref, b1_ref, w2_ref, b2_ref, q_ref, acc_ref):
    j = pl.program_id(0)

    @pl.when(j == 0)
    def _():
        acc_ref[...] = jnp.zeros_like(acc_ref)

    h = jnp.dot(x_ref[...], w1_ref[...], preferred_element_type=jnp.float32)
    h = jnp.maximum(h + b1_ref[...], 0.0)
    acc_ref[...] += jnp.dot(h, w2_ref[...], preferred_element_type=jnp.float32)

    @pl.when(j == pl.num_programs(0) - 1)
    def _():
        a = q_ref.shape[-1]
        out = acc_ref[...] + b2_ref[...]          # [M, A+1]: adv cols, then v
        adv = out[:, :a]
        v = out[:, a:a + 1]
        q_ref[...] = v + adv - jnp.mean(adv, axis=-1, keepdims=True)


def dueling_head(x, w1, b1, w2, b2, *, tn=512):
    M, K = x.shape
    N1 = w1.shape[1]                 # 2 * hidden
    NO = w2.shape[1]                 # num_actions + 1
    A = NO - 1
    assert N1 % tn == 0
    return pl.pallas_call(
        _dueling_head_kernel,
        out_shape=jax.ShapeDtypeStruct((M, A), jnp.float32),
        grid=(N1 // tn,),
        in_specs=[
            pl.BlockSpec((M, K), lambda j: (0, 0)),    # feat (bf16), resident
            pl.BlockSpec((K, tn), lambda j: (0, j)),   # big bf16 weight, streamed
            pl.BlockSpec((1, tn), lambda j: (0, j)),
            pl.BlockSpec((tn, NO), lambda j: (j, 0)),
            pl.BlockSpec((1, NO), lambda j: (0, 0)),
        ],
        out_specs=pl.BlockSpec((M, A), lambda j: (0, 0)),
        scratch_shapes=[pltpu.VMEM((M, NO), jnp.float32)],
        compiler_params=pltpu.CompilerParams(
            dimension_semantics=("arbitrary",)),       # accumulator axis: keep
    )(x, w1, b1, w2, b2)


# ---------------------------------------------------------------------------
# Conv via strided-slice im2col (XLA glue) + Pallas GEMM (NHWC in/out, bf16)
# ---------------------------------------------------------------------------

def _im2col(x_nhwc, k, s):
    """Patch matrix via k*k static strided slices (no gather).

    Row element order is (kh, kw, cin), matching the (KH, KW, Cin, Cout)
    weight reshape in pack_params."""
    n, h, w, c = x_nhwc.shape
    oh = (h - k) // s + 1
    ow = (w - k) // s + 1
    pieces = []
    for di in range(k):
        for dj in range(k):
            pieces.append(
                x_nhwc[:, di:di + (oh - 1) * s + 1:s,
                       dj:dj + (ow - 1) * s + 1:s, :])       # [N, OH, OW, C]
    patches = jnp.concatenate(pieces, axis=-1)               # [N, OH, OW, k*k*C]
    return patches.reshape(n * oh * ow, k * k * c), oh, ow


def conv2d_relu_pallas(x_nhwc, w_mat, b_row, *, k, s, m_tiles=1):
    """relu(conv2d(x)) with NHWC bf16 activations in and out."""
    n = x_nhwc.shape[0]
    cout = w_mat.shape[1]                                    # static (array shape)
    patches, oh, ow = _im2col(x_nhwc, k, s)
    m = patches.shape[0]
    # Split over M only when asked (v7x megacore) and only if it splits cleanly
    # into 8-row-aligned tiles; otherwise one full-extent block (no padding).
    if m_tiles > 1 and m % (8 * m_tiles) == 0:
        tm = m // m_tiles
    else:
        tm = m
    out = matmul_bias_relu(patches, w_mat, b_row, tm=tm)     # [m, cout] bf16
    return out.reshape(n, oh, ow, cout)


def _conv1_m_tiles():
    # v7x has two TensorCores per chip: give each half of conv1's rows.
    # Single-TC generations (v5e/v6e) use one full-size tile (no per-step
    # overhead on a microsecond-scale kernel).
    try:
        kind = jax.devices()[0].device_kind.lower()
    except Exception:
        return 1
    return 2 if "v7" in kind else 1


_CONV1_M_TILES = _conv1_m_tiles()


# ---------------------------------------------------------------------------
# Module forward (num_rnn_layers=0, dueling=True)
# ---------------------------------------------------------------------------

def atari_dqn_forward(packed, x, hx=None):
    shape = x.shape
    x = x.reshape((-1,) + shape[-3:])                    # collapse leading dims
    x = jnp.transpose(x, (0, 2, 3, 1)).astype(jnp.bfloat16)   # NCHW -> NHWC, once
    x = conv2d_relu_pallas(x, *packed["conv1"], k=8, s=4, m_tiles=_CONV1_M_TILES)
    x = conv2d_relu_pallas(x, *packed["conv2"], k=4, s=2)
    x = conv2d_relu_pallas(x, *packed["conv3"], k=3, s=1)
    # (H,W,C)-order flatten; head_w1's rows were permuted at pack time to this
    # order, so no transpose is needed here and the reshape is free.
    feat = x.reshape(x.shape[0], -1)                     # [M, 3136] bf16
    q = dueling_head(feat, packed["head_w1"], packed["head_b1"],
                     packed["head_w2"], packed["head_b2"], tn=512)
    q = q.reshape(shape[:-3] + (q.shape[-1],))
    return q, hx


# ---------------------------------------------------------------------------
# Deterministic parameter init (synthetic; PyTorch-Linear-style uniform bounds)
# and one-time packing into the inference layout used by the kernels.
# ---------------------------------------------------------------------------

def init_params(key, num_actions=6, hidden_dim=512):
    ks = jax.random.split(key, 14)

    def u(k, shape, fan_in):
        bound = 1.0 / jnp.sqrt(jnp.float32(fan_in))
        return jax.random.uniform(k, shape, jnp.float32, -bound, bound)

    fc_in = 7 * 7 * 64
    return {
        "conv1_w": u(ks[0], (32, 4, 8, 8), 4 * 8 * 8),
        "conv1_b": u(ks[1], (32,), 4 * 8 * 8),
        "conv2_w": u(ks[2], (64, 32, 4, 4), 32 * 4 * 4),
        "conv2_b": u(ks[3], (64,), 32 * 4 * 4),
        "conv3_w": u(ks[4], (64, 64, 3, 3), 64 * 3 * 3),
        "conv3_b": u(ks[5], (64,), 64 * 3 * 3),
        # fc (advantage) head: Linear(fc_in, hidden) -> ReLU -> Linear(hidden, A)
        "fc1_w": u(ks[6], (fc_in, hidden_dim), fc_in),
        "fc1_b": u(ks[7], (1, hidden_dim), fc_in),
        "fc2_w": u(ks[8], (hidden_dim, num_actions), hidden_dim),
        "fc2_b": u(ks[9], (1, num_actions), hidden_dim),
        # fc_v (value) head: Linear(fc_in, hidden) -> ReLU -> Linear(hidden, 1)
        "fcv1_w": u(ks[10], (fc_in, hidden_dim), fc_in),
        "fcv1_b": u(ks[11], (1, hidden_dim), fc_in),
        "fcv2_w": u(ks[12], (hidden_dim, 1), hidden_dim),
        "fcv2_b": u(ks[13], (1, 1), hidden_dim),
    }


def pack_params(p, num_actions=6, hidden_dim=512):
    # NOTE: only jnp arrays go into this dict (no Python ints) so it can be
    # passed straight through jax.jit without turning shapes into tracers.
    def conv_pack(w, b):
        cout, cin, kh, kw = w.shape
        # [Cout, Cin, KH, KW] -> [KH*KW*Cin, Cout], bf16, no lane padding.
        w_mat = jnp.transpose(w, (2, 3, 1, 0)).reshape(kh * kw * cin, cout)
        return (w_mat.astype(jnp.bfloat16),
                b.reshape(1, cout).astype(jnp.float32))

    a, h = num_actions, hidden_dim
    # Second-layer weights packed block-diagonally: [adv cols | value col].
    w2 = jnp.zeros((2 * h, a + 1), jnp.float32)
    w2 = w2.at[:h, :a].set(p["fc2_w"])
    w2 = w2.at[h:, a:].set(p["fcv2_w"])

    # First-layer head weight: concat [fc1 | fcv1] along the output dim, then
    # permute the 3136 K rows from PyTorch's (C,H,W) flatten order to the
    # (H,W,C) order produced by flattening the NHWC conv3 output (this removes
    # the activation transpose from the forward pass).  bf16 halves HBM
    # traffic on the bandwidth-bound weight stream (f32 accumulation kept).
    w1 = jnp.concatenate([p["fc1_w"], p["fcv1_w"]], axis=1)        # [3136, 2H]
    w1 = w1.reshape(64, 7 * 7, 2 * h).transpose(1, 0, 2).reshape(7 * 7 * 64, 2 * h)

    return {
        "conv1": conv_pack(p["conv1_w"], p["conv1_b"]),
        "conv2": conv_pack(p["conv2_w"], p["conv2_b"]),
        "conv3": conv_pack(p["conv3_w"], p["conv3_b"]),
        "head_w1": w1.astype(jnp.bfloat16),                        # [K, 2H]
        "head_b1": jnp.concatenate([p["fc1_b"], p["fcv1_b"]], axis=1),
        "head_w2": w2,                                             # [2H, A+1]
        "head_b2": jnp.concatenate([p["fc2_b"], p["fcv2_b"]], axis=1),
    }


if __name__ == "__main__":
    key = jax.random.PRNGKey(0)
    pkey, xkey = jax.random.split(key)
    num_actions = 6

    params = init_params(pkey, num_actions=num_actions, hidden_dim=512)
    packed = pack_params(params, num_actions=num_actions, hidden_dim=512)
    # batch=2, channels=4, spatial=84 (84x84 is required by the module so the
    # conv stack produces the 7*7*64 = 3136 fc input dim).
    x = jax.random.uniform(xkey, (2, 4, 84, 84), jnp.float32)

    fwd = jax.jit(atari_dqn_forward)
    q, hx = fwd(packed, x)
    q = jax.block_until_ready(q)
    assert q.shape == (2, num_actions), q.shape
    assert bool(jnp.all(jnp.isfinite(q)))
    print("KERNEL_OK")
</pallas_src>

<mosaic_0001>
module attributes {stable_mosaic.version = 11 : i64} {
  func.func @_matmul_bias_relu_kernel(%arg0: i32, %arg1: memref<800x256xbf16, #tpu.memory_space<vmem>>, %arg2: memref<256x32xbf16, #tpu.memory_space<vmem>>, %arg3: memref<1x32xf32, #tpu.memory_space<vmem>>, %arg4: memref<800x32xbf16, #tpu.memory_space<vmem>>) attributes {dimension_semantics = [#tpu.dimension_semantics<parallel>], iteration_bounds = array<i64: 1>, scalar_prefetch = 0 : i64, scratch_operands = 0 : i64, tpu.core_type = #tpu.core_type<tc>, window_params = [{transform_indices = @transform_0, window_bounds = array<i64: 800, 256>}, {pipeline_mode = #tpu.pipeline_mode<synchronous>, transform_indices = @transform_1, window_bounds = array<i64: 256, 32>}, {pipeline_mode = #tpu.pipeline_mode<synchronous>, transform_indices = @transform_2, window_bounds = array<i64: 1, 32>}, {transform_indices = @transform_3, window_bounds = array<i64: 800, 32>}]} {
    %c0 = arith.constant 0 : index
    %c0_0 = arith.constant 0 : index
    %0 = vector.load %arg1[%c0, %c0_0] : memref<800x256xbf16, #tpu.memory_space<vmem>>, vector<800x256xbf16>
    %c0_1 = arith.constant 0 : index
    %c0_2 = arith.constant 0 : index
    %1 = vector.load %arg2[%c0_1, %c0_2] : memref<256x32xbf16, #tpu.memory_space<vmem>>, vector<256x32xbf16>
    %cst = arith.constant dense<0.000000e+00> : vector<800x32xf32>
    %2 = tpu.matmul %0, %1, %cst {dimension_numbers = #tpu.dot_dimension_numbers<[1], [0], [0], [1], [0, 0, 1, 1], [], []>} : vector<800x256xbf16>, vector<256x32xbf16>, vector<800x32xf32> -> vector<800x32xf32>
    %c0_3 = arith.constant 0 : index
    %c0_4 = arith.constant 0 : index
    %3 = vector.load %arg3[%c0_3, %c0_4] : memref<1x32xf32, #tpu.memory_space<vmem>>, vector<1x32xf32>
    %4 = vector.broadcast %3 : vector<1x32xf32> to vector<800x32xf32>
    %5 = arith.addf %2, %4 : vector<800x32xf32>
    %cst_5 = arith.constant 0.000000e+00 : f32
    %6 = vector.broadcast %cst_5 : f32 to vector<800x32xf32>
    %7 = arith.maximumf %5, %6 : vector<800x32xf32>
    %8 = arith.truncf %7 : vector<800x32xf32> to vector<800x32xbf16>
    %c0_6 = arith.constant 0 : index
    %c0_7 = arith.constant 0 : index
    %9 = vector.load %arg4[%c0_6, %c0_7] : memref<800x32xbf16, #tpu.memory_space<vmem>>, vector<800x32xbf16>
    tpu.vector_store %arg4[%c0_6, %c0_7], %8 {strides = array<i32>} : memref<800x32xbf16, #tpu.memory_space<vmem>>, vector<800x32xbf16>,
    return
  }
  func.func @transform_0(%arg0: i32) -> (i32, i32) {
    %c0_i32 = arith.constant 0 : i32
    %c0_i32_0 = arith.constant 0 : i32
    return %arg0, %c0_i32 : i32, i32
  }
  func.func @transform_1(%arg0: i32) -> (i32, i32) {
    %c0_i32 = arith.constant 0 : i32
    %c0_i32_0 = arith.constant 0 : i32
    %c0_i32_1 = arith.constant 0 : i32
    return %c0_i32, %c0_i32_0 : i32, i32
  }
  func.func @transform_2(%arg0: i32) -> (i32, i32) {
    %c0_i32 = arith.constant 0 : i32
    %c0_i32_0 = arith.constant 0 : i32
    %c0_i32_1 = arith.constant 0 : i32
    return %c0_i32, %c0_i32_0 : i32, i32
  }
  func.func @transform_3(%arg0: i32) -> (i32, i32) {
    %c0_i32 = arith.constant 0 : i32
    %c0_i32_0 = arith.constant 0 : i32
    return %arg0, %c0_i32 : i32, i32
  }
}

module attributes {stable_mosaic.version = 11 : i64} {
  func.func @_matmul_bias_relu_kernel(%arg0: i32, %arg1: memref<162x512xbf16, #tpu.memory_space<vmem>>, %arg2: memref<512x64xbf16, #tpu.memory_space<vmem>>, %arg3: memref<1x64xf32, #tpu.memory_space<vmem>>, %arg4: memref<162x64xbf16, #tpu.memory_space<vmem>>) attributes {dimension_semantics = [#tpu.dimension_semantics<parallel>], iteration_bounds = array<i64: 1>, scalar_prefetch = 0 : i64, scratch_operands = 0 : i64, tpu.core_type = #tpu.core_type<tc>, window_params = [{transform_indices = @transform_0, window_bounds = array<i64: 162, 512>}, {pipeline_mode = #tpu.pipeline_mode<synchronous>, transform_indices = @transform_1, window_bounds = array<i64: 512, 64>}, {pipeline_mode = #tpu.pipeline_mode<synchronous>, transform_indices = @transform_2, window_bounds = array<i64: 1, 64>}, {transform_indices = @transform_3, window_bounds = array<i64: 162, 64>}]} {
    %c0 = arith.constant 0 : index
    %c0_0 = arith.constant 0 : index
    %0 = vector.load %arg1[%c0, %c0_0] : memref<162x512xbf16, #tpu.memory_space<vmem>>, vector<162x512xbf16>
    %c0_1 = arith.constant 0 : index
    %c0_2 = arith.constant 0 : index
    %1 = vector.load %arg2[%c0_1, %c0_2] : memref<512x64xbf16, #tpu.memory_space<vmem>>, vector<512x64xbf16>
    %cst = arith.constant dense<0.000000e+00> : vector<162x64xf32>
    %2 = tpu.matmul %0, %1, %cst {dimension_numbers = #tpu.dot_dimension_numbers<[1], [0], [0], [1], [0, 0, 1, 1], [], []>} : vector<162x512xbf16>, vector<512x64xbf16>, vector<162x64xf32> -> vector<162x64xf32>
    %c0_3 = arith.constant 0 : index
    %c0_4 = arith.constant 0 : index
    %3 = vector.load %arg3[%c0_3, %c0_4] : memref<1x64xf32, #tpu.memory_space<vmem>>, vector<1x64xf32>
    %4 = vector.broadcast %3 : vector<1x64xf32> to vector<162x64xf32>
    %5 = arith.addf %2, %4 : vector<162x64xf32>
    %cst_5 = arith.constant 0.000000e+00 : f32
    %6 = vector.broadcast %cst_5 : f32 to vector<162x64xf32>
    %7 = arith.maximumf %5, %6 : vector<162x64xf32>
    %8 = arith.truncf %7 : vector<162x64xf32> to vector<162x64xbf16>
    %c0_6 = arith.constant 0 : index
    %c0_7 = arith.constant 0 : index
    %9 = vector.load %arg4[%c0_6, %c0_7] : memref<162x64xbf16, #tpu.memory_space<vmem>>, vector<162x64xbf16>
    tpu.vector_store %arg4[%c0_6, %c0_7], %8 {strides = array<i32>} : memref<162x64xbf16, #tpu.memory_space<vmem>>, vector<162x64xbf16>,
    return
  }
  func.func @transform_0(%arg0: i32) -> (i32, i32) {
    %c0_i32 = arith.constant 0 : i32
    %c0_i32_0 = arith.constant 0 : i32
    return %arg0, %c0_i32 : i32, i32
  }
  func.func @transform_1(%arg0: i32) -> (i32, i32) {
    %c0_i32 = arith.constant 0 : i32
    %c0_i32_0 = arith.constant 0 : i32
    %c0_i32_1 = arith.constant 0 : i32
    return %c0_i32, %c0_i32_0 : i32, i32
  }
  func.func @transform_2(%arg0: i32) -> (i32, i32) {
    %c0_i32 = arith.constant 0 : i32
    %c0_i32_0 = arith.constant 0 : i32
    %c0_i32_1 = arith.constant 0 : i32
    return %c0_i32, %c0_i32_0 : i32, i32
  }
  func.func @transform_3(%arg0: i32) -> (i32, i32) {
    %c0_i32 = arith.constant 0 : i32
    %c0_i32_0 = arith.constant 0 : i32
    return %arg0, %c0_i32 : i32, i32
  }
}

module attributes {stable_mosaic.version = 11 : i64} {
  func.func @_matmul_bias_relu_kernel(%arg0: i32, %arg1: memref<98x576xbf16, #tpu.memory_space<vmem>>, %arg2: memref<576x64xbf16, #tpu.memory_space<vmem>>, %arg3: memref<1x64xf32, #tpu.memory_space<vmem>>, %arg4: memref<98x64xbf16, #tpu.memory_space<vmem>>) attributes {dimension_semantics = [#tpu.dimension_semantics<parallel>], iteration_bounds = array<i64: 1>, scalar_prefetch = 0 : i64, scratch_operands = 0 : i64, tpu.core_type = #tpu.core_type<tc>, window_params = [{transform_indices = @transform_0, window_bounds = array<i64: 98, 576>}, {pipeline_mode = #tpu.pipeline_mode<synchronous>, transform_indices = @transform_1, window_bounds = array<i64: 576, 64>}, {pipeline_mode = #tpu.pipeline_mode<synchronous>, transform_indices = @transform_2, window_bounds = array<i64: 1, 64>}, {transform_indices = @transform_3, window_bounds = array<i64: 98, 64>}]} {
    %c0 = arith.constant 0 : index
    %c0_0 = arith.constant 0 : index
    %0 = vector.load %arg1[%c0, %c0_0] : memref<98x576xbf16, #tpu.memory_space<vmem>>, vector<98x576xbf16>
    %c0_1 = arith.constant 0 : index
    %c0_2 = arith.constant 0 : index
    %1 = vector.load %arg2[%c0_1, %c0_2] : memref<576x64xbf16, #tpu.memory_space<vmem>>, vector<576x64xbf16>
    %cst = arith.constant dense<0.000000e+00> : vector<98x64xf32>
    %2 = tpu.matmul %0, %1, %cst {dimension_numbers = #tpu.dot_dimension_numbers<[1], [0], [0], [1], [0, 0, 1, 1], [], []>} : vector<98x576xbf16>, vector<576x64xbf16>, vector<98x64xf32> -> vector<98x64xf32>
    %c0_3 = arith.constant 0 : index
    %c0_4 = arith.constant 0 : index
    %3 = vector.load %arg3[%c0_3, %c0_4] : memref<1x64xf32, #tpu.memory_space<vmem>>, vector<1x64xf32>
    %4 = vector.broadcast %3 : vector<1x64xf32> to vector<98x64xf32>
    %5 = arith.addf %2, %4 : vector<98x64xf32>
    %cst_5 = arith.constant 0.000000e+00 : f32
    %6 = vector.broadcast %cst_5 : f32 to vector<98x64xf32>
    %7 = arith.maximumf %5, %6 : vector<98x64xf32>
    %8 = arith.truncf %7 : vector<98x64xf32> to vector<98x64xbf16>
    %c0_6 = arith.constant 0 : index
    %c0_7 = arith.constant 0 : index
    %9 = vector.load %arg4[%c0_6, %c0_7] : memref<98x64xbf16, #tpu.memory_space<vmem>>, vector<98x64xbf16>
    tpu.vector_store %arg4[%c0_6, %c0_7], %8 {strides = array<i32>} : memref<98x64xbf16, #tpu.memory_space<vmem>>, vector<98x64xbf16>,
    return
  }
  func.func @transform_0(%arg0: i32) -> (i32, i32) {
    %c0_i32 = arith.constant 0 : i32
    %c0_i32_0 = arith.constant 0 : i32
    return %arg0, %c0_i32 : i32, i32
  }
  func.func @transform_1(%arg0: i32) -> (i32, i32) {
    %c0_i32 = arith.constant 0 : i32
    %c0_i32_0 = arith.constant 0 : i32
    %c0_i32_1 = arith.constant 0 : i32
    return %c0_i32, %c0_i32_0 : i32, i32
  }
  func.func @transform_2(%arg0: i32) -> (i32, i32) {
    %c0_i32 = arith.constant 0 : i32
    %c0_i32_0 = arith.constant 0 : i32
    %c0_i32_1 = arith.constant 0 : i32
    return %c0_i32, %c0_i32_0 : i32, i32
  }
  func.func @transform_3(%arg0: i32) -> (i32, i32) {
    %c0_i32 = arith.constant 0 : i32
    %c0_i32_0 = arith.constant 0 : i32
    return %arg0, %c0_i32 : i32, i32
  }
}

module attributes {stable_mosaic.version = 11 : i64} {
  func.func @_dueling_head_kernel(%arg0: i32, %arg1: memref<2x3136xbf16, #tpu.memory_space<vmem>>, %arg2: memref<3136x512xbf16, #tpu.memory_space<vmem>>, %arg3: memref<1x512xf32, #tpu.memory_space<vmem>>, %arg4: memref<512x7xf32, #tpu.memory_space<vmem>>, %arg5: memref<1x7xf32, #tpu.memory_space<vmem>>, %arg6: memref<2x6xf32, #tpu.memory_space<vmem>>, %arg7: memref<2x7xf32, #tpu.memory_space<vmem>>) attributes {dimension_semantics = [#tpu.dimension_semantics<arbitrary>], iteration_bounds = array<i64: 2>, scalar_prefetch = 0 : i64, scratch_operands = 1 : i64, tpu.core_type = #tpu.core_type<tc>, window_params = [{pipeline_mode = #tpu.pipeline_mode<synchronous>, transform_indices = @transform_0, window_bounds = array<i64: 2, 3136>}, {transform_indices = @transform_1, window_bounds = array<i64: 3136, 512>}, {transform_indices = @transform_2, window_bounds = array<i64: 1, 512>}, {transform_indices = @transform_3, window_bounds = array<i64: 512, 7>}, {pipeline_mode = #tpu.pipeline_mode<synchronous>, transform_indices = @transform_4, window_bounds = array<i64: 1, 7>}, {pipeline_mode = #tpu.pipeline_mode<synchronous>, transform_indices = @transform_5, window_bounds = array<i64: 2, 6>}]} {
    %c0_i32 = arith.constant 0 : i32
    %0 = arith.cmpi eq, %arg0, %c0_i32 : i32
    %1 = arith.extui %0 : i1 to i32
    %c0_i32_0 = arith.constant 0 : i32
    %2 = arith.cmpi ne, %1, %c0_i32_0 : i32
    scf.if %2 {
      %cst_15 = arith.constant 0.000000e+00 : f32
      %19 = vector.broadcast %cst_15 : f32 to vector<2x7xf32>
      %c0_16 = arith.constant 0 : index
      %c0_17 = arith.constant 0 : index
      %20 = vector.load %arg7[%c0_16, %c0_17] : memref<2x7xf32, #tpu.memory_space<vmem>>, vector<2x7xf32>
      tpu.vector_store %arg7[%c0_16, %c0_17], %19 {strides = array<i32>} : memref<2x7xf32, #tpu.memory_space<vmem>>, vector<2x7xf32>,
    } else {
    }
    %c0 = arith.constant 0 : index
    %c0_1 = arith.constant 0 : index
    %3 = vector.load %arg1[%c0, %c0_1] : memref<2x3136xbf16, #tpu.memory_space<vmem>>, vector<2x3136xbf16>
    %c0_2 = arith.constant 0 : index
    %c0_3 = arith.constant 0 : index
    %4 = vector.load %arg2[%c0_2, %c0_3] : memref<3136x512xbf16, #tpu.memory_space<vmem>>, vector<3136x512xbf16>
    %cst = arith.constant dense<0.000000e+00> : vector<2x512xf32>
    %5 = tpu.matmul %3, %4, %cst {dimension_numbers = #tpu.dot_dimension_numbers<[1], [0], [0], [1], [0, 0, 1, 1], [], []>} : vector<2x3136xbf16>, vector<3136x512xbf16>, vector<2x512xf32> -> vector<2x512xf32>
    %c0_4 = arith.constant 0 : index
    %c0_5 = arith.constant 0 : index
    %6 = vector.load %arg3[%c0_4, %c0_5] : memref<1x512xf32, #tpu.memory_space<vmem>>, vector<1x512xf32>
    %7 = vector.broadcast %6 : vector<1x512xf32> to vector<2x512xf32>
    %8 = arith.addf %5, %7 : vector<2x512xf32>
    %cst_6 = arith.constant 0.000000e+00 : f32
    %9 = vector.broadcast %cst_6 : f32 to vector<2x512xf32>
    %10 = arith.maximumf %8, %9 : vector<2x512xf32>
    %c0_7 = arith.constant 0 : index
    %c0_8 = arith.constant 0 : index
    %11 = vector.load %arg7[%c0_7, %c0_8] : memref<2x7xf32, #tpu.memory_space<vmem>>, vector<2x7xf32>
    %c0_9 = arith.constant 0 : index
    %c0_10 = arith.constant 0 : index
    %12 = vector.load %arg4[%c0_9, %c0_10] : memref<512x7xf32, #tpu.memory_space<vmem>>, vector<512x7xf32>
    %cst_11 = arith.constant dense<0.000000e+00> : vector<2x7xf32>
    %13 = tpu.matmul %10, %12, %cst_11 {dimension_numbers = #tpu.dot_dimension_numbers<[1], [0], [0], [1], [0, 0, 1, 1], [], []>} : vector<2x512xf32>, vector<512x7xf32>, vector<2x7xf32> -> vector<2x7xf32>
    %14 = arith.addf %11, %13 : vector<2x7xf32>
    %c0_12 = arith.constant 0 : index
    %c0_13 = arith.constant 0 : index
    %15 = vector.load %arg7[%c0_12, %c0_13] : memref<2x7xf32, #tpu.memory_space<vmem>>, vector<2x7xf32>
    tpu.vector_store %arg7[%c0_12, %c0_13], %14 {strides = array<i32>} : memref<2x7xf32, #tpu.memory_space<vmem>>, vector<2x7xf32>,
    %c1_i32 = arith.constant 1 : i32
    %16 = arith.cmpi eq, %arg0, %c1_i32 : i32
    %17 = arith.extui %16 : i1 to i32
    %c0_i32_14 = arith.constant 0 : i32
    %18 = arith.cmpi ne, %17, %c0_i32_14 : i32
    scf.if %18 {
      %c0_15 = arith.constant 0 : index
      %c0_16 = arith.constant 0 : index
      %19 = vector.load %arg7[%c0_15, %c0_16] : memref<2x7xf32, #tpu.memory_space<vmem>>, vector<2x7xf32>
      %c0_17 = arith.constant 0 : index
      %c0_18 = arith.constant 0 : index
      %20 = vector.load %arg5[%c0_17, %c0_18] : memref<1x7xf32, #tpu.memory_space<vmem>>, vector<1x7xf32>
      %21 = vector.broadcast %20 : vector<1x7xf32> to vector<2x7xf32>
      %22 = arith.addf %19, %21 : vector<2x7xf32>
      %23 = vector.extract_strided_slice %22 {offsets = [0, 0], sizes = [2, 6], strides = [1, 1]} : vector<2x7xf32> to vector<2x6xf32>
      %24 = vector.extract_strided_slice %22 {offsets = [0, 6], sizes = [2, 1], strides = [1, 1]} : vector<2x7xf32> to vector<2x1xf32>
      %25 = vector.broadcast %24 : vector<2x1xf32> to vector<2x6xf32>
      %26 = arith.addf %25, %23 : vector<2x6xf32>
      %cst_19 = arith.constant dense<0.000000e+00> : vector<2xf32>
      %27 = vector.multi_reduction <add>, %23, %cst_19 [1] : vector<2x6xf32> to vector<2xf32>
      %28 = vector.shape_cast %27 : vector<2xf32> to vector<2x1xf32>
      %cst_20 = arith.constant 6.000000e+00 : f32
      %29 = vector.broadcast %cst_20 : f32 to vector<2x1xf32>
      %30 = arith.divf %28, %29 : vector<2x1xf32>
      %31 = vector.broadcast %30 : vector<2x1xf32> to vector<2x6xf32>
      %32 = arith.subf %26, %31 : vector<2x6xf32>
      %c0_21 = arith.constant 0 : index
      %c0_22 = arith.constant 0 : index
      %33 = vector.load %arg6[%c0_21, %c0_22] : memref<2x6xf32, #tpu.memory_space<vmem>>, vector<2x6xf32>
      tpu.vector_store %arg6[%c0_21, %c0_22], %32 {strides = array<i32>} : memref<2x6xf32, #tpu.memory_space<vmem>>, vector<2x6xf32>,
    } else {
    }
    return
  }
  func.func @transform_0(%arg0: i32) -> (i32, i32) {
    %c0_i32 = arith.constant 0 : i32
    %c0_i32_0 = arith.constant 0 : i32
    %c0_i32_1 = arith.constant 0 : i32
    return %c0_i32, %c0_i32_0 : i32, i32
  }
  func.func @transform_1(%arg0: i32) -> (i32, i32) {
    %c0_i32 = arith.constant 0 : i32
    %c0_i32_0 = arith.constant 0 : i32
    return %c0_i32, %arg0 : i32, i32
  }
  func.func @transform_2(%arg0: i32) -> (i32, i32) {
    %c0_i32 = arith.constant 0 : i32
    %c0_i32_0 = arith.constant 0 : i32
    return %c0_i32, %arg0 : i32, i32
  }
  func.func @transform_3(%arg0: i32) -> (i32, i32) {
    %c0_i32 = arith.constant 0 : i32
    %c0_i32_0 = arith.constant 0 : i32
    return %arg0, %c0_i32 : i32, i32
  }
  func.func @transform_4(%arg0: i32) -> (i32, i32) {
    %c0_i32 = arith.constant 0 : i32
    %c0_i32_0 = arith.constant 0 : i32
    %c0_i32_1 = arith.constant 0 : i32
    return %c0_i32, %c0_i32_0 : i32, i32
  }
  func.func @transform_5(%arg0: i32) -> (i32, i32) {
    %c0_i32 = arith.constant 0 : i32
    %c0_i32_0 = arith.constant 0 : i32
    %c0_i32_1 = arith.constant 0 : i32
    return %c0_i32, %c0_i32_0 : i32, i32
  }
}

</mosaic_0001>

<bundles_post_ra>
// kernel: atari_dqn_forward.4
= control target key start
LH: loop header
LB: loop body
LE: loop exit
PB: predicated region body
PF: predicated region fallthrough
CT: control target
= control target key end

     0   :  { %v2303_v0 = vmov 0   ;;  %vm1683_vm0 = vcmask 257024   ;;  %s3220_s1 = inlined_call_operand.vmem [shape: bf16[256,32], index: 1, kind: input, shape index: {}]   ;;  %s3221_s0 = inlined_call_operand.vmem [shape: bf16[800,256], index: 0, kind: input, shape index: {}]   ;;  %s3222_s2 = inlined_call_operand.vmem [shape: f32[1,32], index: 2, kind: input, shape index: {}]   ;;  %s3223_s3 = inlined_call_operand.vmem [shape: bf16[800,32], index: 3, kind: output, shape index: {}]  }
   0x1   :  { %750 = vmatprep.subr.bf16.mxu0 %v2303_v0  ;;  %2105 = vmatprep.subr.bf16.mxu1 %v2303_v0  ;;  %v2138_v1 = vld [vmem:[%s3220_s1 + $0x38] sm:$0xff]   ;;  %v2139_v2 = vld [vmem:[%s3220_s1 + $0x30] sm:$0xff]   ;;  %v2140_v3 = vld [vmem:[%s3220_s1 + $0x28] sm:$0xff]  }
   0x2   :  { %751 = vmatpush1.bf16.msra.mxu0 %v2138_v1  ;;  %2121 = vmatpush1.bf16.msra.mxu1 %v2138_v1  ;;  %v2141_v4 = vld [vmem:[%s3220_s1 + $0x20] sm:$0xff]   ;;  %v2142_v5 = vld [vmem:[%s3220_s1 + $0x18] sm:$0xff]   ;;  %v2143_v7 = vld [vmem:[%s3220_s1 + $0x10] sm:$0xff]  }
   0x3   :  { %752 = vmatprep.subr.bf16.mxu0 %v2303_v0  ;;  %2106 = vmatprep.subr.bf16.mxu1 %v2303_v0  ;;  %v2156_v6 = vld [vmem:[%s3221_s0 + $0x4] ss:$8 sps:$4 sm:$0xff]   ;;  %v2159_v8 = vld [vmem:[%s3221_s0 + $0x194] ss:$8 sps:$4 sm:$0xff]   ;;  %v2154_v19 = vld [vmem:[%s3221_s0] ss:$8 sps:$4 sm:$0xff]  }
   0x4   :  { %782 = vmatprep.mubr.bf16.mxu0 %v2156_v6  ;;  %982 = vmatprep.mubr.bf16.mxu1 %v2159_v8  ;;  %v2144_v9 = vld [vmem:[%s3220_s1 + $0x8] sm:$0xff]   ;;  %v2145_v10 = vld [vmem:[%s3220_s1] sm:$0xff]   ;;  %v2146_v11 = vld [vmem:[%s3220_s1 + $0x78] sm:$0xff]  }
   0x5   :  { %v2147_v12 = vld [vmem:[%s3220_s1 + $0x70] sm:$0xff]   ;;  %v2148_v13 = vld [vmem:[%s3220_s1 + $0x68] sm:$0xff]   ;;  %v2149_v14 = vld [vmem:[%s3220_s1 + $0x60] sm:$0xff]  }
   0x6   :  { %753 = vmatpush1.bf16.msra.mxu0 %v2139_v2  ;;  %2122 = vmatpush1.bf16.msra.mxu1 %v2139_v2  ;;  %v2150_v15 = vld [vmem:[%s3220_s1 + $0x58] sm:$0xff]   ;;  %v2151_v16 = vld [vmem:[%s3220_s1 + $0x50] sm:$0xff]   ;;  %v2152_v17 = vld [vmem:[%s3220_s1 + $0x48] sm:$0xff]  }
   0x7   :  { %754 = vmatprep.subr.bf16.mxu0 %v2303_v0  ;;  %2107 = vmatprep.subr.bf16.mxu1 %v2303_v0  ;;  %v2153_v18 = vld [vmem:[%s3220_s1 + $0x40] sm:$0xff]   ;;  %v2157_v20 = vld [vmem:[%s3221_s0 + $0x190] ss:$8 sps:$4 sm:$0xff]   ;;  %v2160_v21 = vld [vmem:[%s3221_s0 + $0x14] ss:$8 sps:$4 sm:$0xff]  }
   0x8   :  { %v2162_v22 = vld [vmem:[%s3221_s0 + $0x1a4] ss:$8 sps:$4 sm:$0xff]   ;;  %v2164_v23 = vld [vmem:[%s3221_s0 + $0x10] ss:$8 sps:$4 sm:$0xff]   ;;  %v2165_v24 = vld [vmem:[%s3221_s0 + $0x1a0] ss:$8 sps:$4 sm:$0xff]  }
   0x9   :  { %v2166_v25 = vld [vmem:[%s3221_s0 + $0x24] ss:$8 sps:$4 sm:$0xff]   ;;  %v2168_v26 = vld [vmem:[%s3221_s0 + $0x1b4] ss:$8 sps:$4 sm:$0xff]   ;;  %v2170_v27 = vld [vmem:[%s3221_s0 + $0x20] ss:$8 sps:$4 sm:$0xff]  }
   0xa   :  { %755 = vmatpush1.bf16.msra.mxu0 %v2140_v3  ;;  %2123 = vmatpush1.bf16.msra.mxu1 %v2140_v3  ;;  %v2171_v28 = vld [vmem:[%s3221_s0 + $0x1b0] ss:$8 sps:$4 sm:$0xff]   ;;  %v2172_v29 = vld [vmem:[%s3221_s0 + $0x34] ss:$8 sps:$4 sm:$0xff]   ;;  %v2174_v30 = vld [vmem:[%s3221_s0 + $0x1c4] ss:$8 sps:$4 sm:$0xff]  }
   0xb   :  { %756 = vmatprep.subr.bf16.mxu0 %v2303_v0  ;;  %2108 = vmatprep.subr.bf16.mxu1 %v2303_v0  ;;  %v2176_v31 = vld [vmem:[%s3221_s0 + $0x30] ss:$8 sps:$4 sm:$0xff]   ;;  %v2177_v32 = vld [vmem:[%s3221_s0 + $0x1c0] ss:$8 sps:$4 sm:$0xff]   ;;  %v2178_v33 = vld [vmem:[%s3221_s0 + $0x44] ss:$8 sps:$4 sm:$0xff]  }
   0xc   :  { %v2180_v34 = vld [vmem:[%s3221_s0 + $0x1d4] ss:$8 sps:$4 sm:$0xff]   ;;  %v2182_v35 = vld [vmem:[%s3221_s0 + $0x40] ss:$8 sps:$4 sm:$0xff]   ;;  %v2183_v36 = vld [vmem:[%s3221_s0 + $0x1d0] ss:$8 sps:$4 sm:$0xff]  }
   0xd   :  { %v2184_v37 = vld [vmem:[%s3221_s0 + $0x54] ss:$8 sps:$4 sm:$0xff]   ;;  %v2186_v38 = vld [vmem:[%s3221_s0 + $0x1e4] ss:$8 sps:$4 sm:$0xff]   ;;  %v2188_v39 = vld [vmem:[%s3221_s0 + $0x50] ss:$8 sps:$4 sm:$0xff]  }
   0xe   :  { %757 = vmatpush1.bf16.msra.mxu0 %v2141_v4  ;;  %2124 = vmatpush1.bf16.msra.mxu1 %v2141_v4  ;;  %v2189_v40 = vld [vmem:[%s3221_s0 + $0x1e0] ss:$8 sps:$4 sm:$0xff]   ;;  %v2190_v41 = vld [vmem:[%s3221_s0 + $0x64] ss:$8 sps:$4 sm:$0xff]   ;;  %v2192_v42 = vld [vmem:[%s3221_s0 + $0x1f4] ss:$8 sps:$4 sm:$0xff]  }
   0xf   :  { %758 = vmatprep.subr.bf16.mxu0 %v2303_v0  ;;  %2109 = vmatprep.subr.bf16.mxu1 %v2303_v0  ;;  %v2194_v43 = vld [vmem:[%s3221_s0 + $0x60] ss:$8 sps:$4 sm:$0xff]   ;;  %v2195_v44 = vld [vmem:[%s3221_s0 + $0x1f0] ss:$8 sps:$4 sm:$0xff]   ;;  %v2196_v45 = vld [vmem:[%s3221_s0 + $0x74] ss:$8 sps:$4 sm:$0xff]  }
  0x10   :  { %v2198_v46 = vld [vmem:[%s3221_s0 + $0x204] ss:$8 sps:$4 sm:$0xff]   ;;  %v2200_v47 = vld [vmem:[%s3221_s0 + $0x70] ss:$8 sps:$4 sm:$0xff]   ;;  %v2201_v48 = vld [vmem:[%s3221_s0 + $0x200] ss:$8 sps:$4 sm:$0xff]  }
  0x11   :  { %v2202_v49 = vld [vmem:[%s3221_s0 + $0x84] ss:$8 sps:$4 sm:$0xff]   ;;  %v2204_v50 = vld [vmem:[%s3221_s0 + $0x214] ss:$8 sps:$4 sm:$0xff]   ;;  %v2206_v51 = vld [vmem:[%s3221_s0 + $0x80] ss:$8 sps:$4 sm:$0xff]  }
  0x12   :  { %759 = vmatpush1.bf16.msra.mxu0 %v2142_v5  ;;  %2125 = vmatpush1.bf16.msra.mxu1 %v2142_v5  ;;  %v2207_v52 = vld [vmem:[%s3221_s0 + $0x210] ss:$8 sps:$4 sm:$0xff]   ;;  %v2208_v53 = vld [vmem:[%s3221_s0 + $0x94] ss:$8 sps:$4 sm:$0xff]   ;;  %v2210_v54 = vld [vmem:[%s3221_s0 + $0x224] ss:$8 sps:$4 sm:$0xff]  }
  0x13   :  { %760 = vmatprep.subr.bf16.mxu0 %v2303_v0  ;;  %2110 = vmatprep.subr.bf16.mxu1 %v2303_v0  ;;  %v2212_v55 = vld [vmem:[%s3221_s0 + $0x90] ss:$8 sps:$4 sm:$0xff]   ;;  %v2213_v56 = vld [vmem:[%s3221_s0 + $0x220] ss:$8 sps:$4 sm:$0xff]   ;;  %v2214_v57 = vld [vmem:[%s3221_s0 + $0xa4] ss:$8 sps:$4 sm:$0xff]  }
  0x14   :  { %v2216_v58 = vld [vmem:[%s3221_s0 + $0x234] ss:$8 sps:$4 sm:$0xff]   ;;  %v2218_v59 = vld [vmem:[%s3221_s0 + $0xa0] ss:$8 sps:$4 sm:$0xff]   ;;  %v2219_v60 = vld [vmem:[%s3221_s0 + $0x230] ss:$8 sps:$4 sm:$0xff]  }
  0x15   :  { %v2220_v61 = vld [vmem:[%s3221_s0 + $0xb4] ss:$8 sps:$4 sm:$0xff]   ;;  %v2222_v62 = vld [vmem:[%s3221_s0 + $0x244] ss:$8 sps:$4 sm:$0xff]   ;;  %v2224_v63 = vld [vmem:[%s3221_s0 + $0xb0] ss:$8 sps:$4 sm:$0xff]  }
  0x16   :  { %761 = vmatpush1.bf16.msra.mxu0 %v2143_v7  ;;  %2126 = vmatpush1.bf16.msra.mxu1 %v2143_v7  ;;  %v2226_v1 = vld [vmem:[%s3221_s0 + $0xc4] ss:$8 sps:$4 sm:$0xff]   ;;  %v2228_v2 = vld [vmem:[%s3221_s0 + $0x254] ss:$8 sps:$4 sm:$0xff]   ;;  %v2230_v3 = vld [vmem:[%s3221_s0 + $0xc0] ss:$8 sps:$4 sm:$0xff]  }
  0x17   :  { %762 = vmatprep.subr.bf16.mxu0 %v2303_v0  ;;  %2111 = vmatprep.subr.bf16.mxu1 %v2303_v0  ;;  %v2231_v4 = vld [vmem:[%s3221_s0 + $0x250] ss:$8 sps:$4 sm:$0xff]   ;;  %v2232_v5 = vld [vmem:[%s3221_s0 + $0xd4] ss:$8 sps:$4 sm:$0xff]   ;;  %v2234_v6 = vld [vmem:[%s3221_s0 + $0x264] ss:$8 sps:$4 sm:$0xff]  }
  0x18   :  { %v2236_v7 = vld [vmem:[%s3221_s0 + $0xd0] ss:$8 sps:$4 sm:$0xff]   ;;  %v2237_v8 = vld [vmem:[%s3221_s0 + $0x260] ss:$8 sps:$4 sm:$0xff]  }
  0x1a   :  { %763 = vmatpush1.bf16.msra.mxu0 %v2144_v9  ;;  %2127 = vmatpush1.bf16.msra.mxu1 %v2144_v9  ;;  %v2238_v9 = vld [vmem:[%s3221_s0 + $0xe4] ss:$8 sps:$4 sm:$0xff]  }
  0x1b   :  { %764 = vmatprep.subr.bf16.mxu0 %v2303_v0  ;;  %2112 = vmatprep.subr.bf16.mxu1 %v2303_v0 }
  0x1e   :  { %765 = vmatpush1.bf16.msra.mxu0 %v2145_v10  ;;  %2128 = vmatpush1.bf16.msra.mxu1 %v2145_v10  ;;  %v2240_v10 = vld [vmem:[%s3221_s0 + $0x274] ss:$8 sps:$4 sm:$0xff]  }
  0x1f   :  { %766 = vmatprep.subr.bf16.mxu0 %v2303_v0  ;;  %2113 = vmatprep.subr.bf16.mxu1 %v2303_v0 }
  0x22   :  { %767 = vmatpush2.bf16.msra.mxu0 %v2146_v11  ;;  %2129 = vmatpush2.bf16.msra.mxu1 %v2146_v11  ;;  %v2242_v11 = vld [vmem:[%s3221_s0 + $0xe0] ss:$8 sps:$4 sm:$0xff]  }
  0x23   :  { %768 = vmatprep.subr.bf16.mxu0 %v2303_v0  ;;  %2114 = vmatprep.subr.bf16.mxu1 %v2303_v0 }
  0x26   :  { %769 = vmatpush2.bf16.msra.mxu0 %v2147_v12  ;;  %2130 = vmatpush2.bf16.msra.mxu1 %v2147_v12  ;;  %v2243_v12 = vld [vmem:[%s3221_s0 + $0x270] ss:$8 sps:$4 sm:$0xff]  }
  0x27   :  { %770 = vmatprep.subr.bf16.mxu0 %v2303_v0  ;;  %2115 = vmatprep.subr.bf16.mxu1 %v2303_v0 }
  0x2a   :  { %771 = vmatpush2.bf16.msra.mxu0 %v2148_v13  ;;  %2131 = vmatpush2.bf16.msra.mxu1 %v2148_v13  ;;  %v2244_v13 = vld [vmem:[%s3221_s0 + $0xf4] ss:$8 sps:$4 sm:$0xff]  }
  0x2b   :  { %772 = vmatprep.subr.bf16.mxu0 %v2303_v0  ;;  %2116 = vmatprep.subr.bf16.mxu1 %v2303_v0 }
  0x2e   :  { %773 = vmatpush2.bf16.msra.mxu0 %v2149_v14  ;;  %2132 = vmatpush2.bf16.msra.mxu1 %v2149_v14  ;;  %v2246_v14 = vld [vmem:[%s3221_s0 + $0x284] ss:$8 sps:$4 sm:$0xff]  }
  0x2f   :  { %774 = vmatprep.subr.bf16.mxu0 %v2303_v0  ;;  %2117 = vmatprep.subr.bf16.mxu1 %v2303_v0 }
  0x32   :  { %775 = vmatpush2.bf16.msra.mxu0 %v2150_v15  ;;  %2133 = vmatpush2.bf16.msra.mxu1 %v2150_v15  ;;  %v2248_v15 = vld [vmem:[%s3221_s0 + $0xf0] ss:$8 sps:$4 sm:$0xff]  }
  0x33   :  { %776 = vmatprep.subr.bf16.mxu0 %v2303_v0  ;;  %2118 = vmatprep.subr.bf16.mxu1 %v2303_v0 }
  0x36   :  { %777 = vmatpush2.bf16.msra.mxu0 %v2151_v16  ;;  %2134 = vmatpush2.bf16.msra.mxu1 %v2151_v16  ;;  %v2249_v16 = vld [vmem:[%s3221_s0 + $0x280] ss:$8 sps:$4 sm:$0xff]  }
  0x37   :  { %778 = vmatprep.subr.bf16.mxu0 %v2303_v0  ;;  %2119 = vmatprep.subr.bf16.mxu1 %v2303_v0 }
  0x3a   :  { %779 = vmatpush2.bf16.msra.mxu0 %v2152_v17  ;;  %2135 = vmatpush2.bf16.msra.mxu1 %v2152_v17  ;;  %v2250_v17 = vld [vmem:[%s3221_s0 + $0x104] ss:$8 sps:$4 sm:$0xff]  }
  0x3b   :  { %780 = vmatprep.subr.bf16.mxu0 %v2303_v0  ;;  %2120 = vmatprep.subr.bf16.mxu1 %v2303_v0  ;;  %v2225_v0 = vld [vmem:[%s3221_s0 + $0x240] ss:$8 sps:$4 sm:$0xff]  }
  0x3e   :  { %781 = vmatpush2.bf16.msra.mxu0 %v2153_v18  ;;  %2136 = vmatpush2.bf16.msra.mxu1 %v2153_v18  ;;  %v2252_v18 = vld [vmem:[%s3221_s0 + $0x294] ss:$8 sps:$4 sm:$0xff]  }
  0x41   :  { %783 = vmatmul.mubr.bf16.vlgmr.msra.gmra.mxu0 %v2154_v19  ;;  %983 = vmatmul.mubr.bf16.vlgmr.msra.gmra.mxu1 %v2157_v20  ;;  %v2254_v19 = vld [vmem:[%s3221_s0 + $0x100] ss:$8 sps:$4 sm:$0xff]   ;;  %v2255_v20 = vld [vmem:[%s3221_s0 + $0x290] ss:$8 sps:$4 sm:$0xff]  }
  0x42   :  { %790 = vmatprep.mubr.bf16.mxu0 %v2160_v21  ;;  %990 = vmatprep.mubr.bf16.mxu1 %v2162_v22  ;;  %v2256_v21 = vld [vmem:[%s3221_s0 + $0x114] ss:$8 sps:$4 sm:$0xff]   ;;  %v2258_v22 = vld [vmem:[%s3221_s0 + $0x2a4] ss:$8 sps:$4 sm:$0xff]  }
  0x49   :  { %791 = vmatmul.mubr.bf16.gmra.mxu0 %v2164_v23  ;;  %991 = vmatmul.mubr.bf16.gmra.mxu1 %v2165_v24  ;;  %v2260_v23 = vld [vmem:[%s3221_s0 + $0x110] ss:$8 sps:$4 sm:$0xff]   ;;  %v2261_v24 = vld [vmem:[%s3221_s0 + $0x2a0] ss:$8 sps:$4 sm:$0xff]  }
  0x4a   :  { %798 = vmatprep.mubr.bf16.mxu0 %v2166_v25  ;;  %998 = vmatprep.mubr.bf16.mxu1 %v2168_v26  ;;  %v2262_v25 = vld [vmem:[%s3221_s0 + $0x124] ss:$8 sps:$4 sm:$0xff]   ;;  %v2264_v26 = vld [vmem:[%s3221_s0 + $0x2b4] ss:$8 sps:$4 sm:$0xff]  }
  0x51   :  { %799 = vmatmul.mubr.bf16.gmra.mxu0 %v2170_v27  ;;  %999 = vmatmul.mubr.bf16.gmra.mxu1 %v2171_v28  ;;  %v2266_v27 = vld [vmem:[%s3221_s0 + $0x120] ss:$8 sps:$4 sm:$0xff]   ;;  %v2267_v28 = vld [vmem:[%s3221_s0 + $0x2b0] ss:$8 sps:$4 sm:$0xff]  }
  0x52   :  { %806 = vmatprep.mubr.bf16.mxu0 %v2172_v29  ;;  %1006 = vmatprep.mubr.bf16.mxu1 %v2174_v30  ;;  %v2268_v29 = vld [vmem:[%s3221_s0 + $0x134] ss:$8 sps:$4 sm:$0xff]   ;;  %v2270_v30 = vld [vmem:[%s3221_s0 + $0x2c4] ss:$8 sps:$4 sm:$0xff]  }
  0x59   :  { %807 = vmatmul.mubr.bf16.gmra.mxu0 %v2176_v31  ;;  %1007 = vmatmul.mubr.bf16.gmra.mxu1 %v2177_v32  ;;  %v2272_v31 = vld [vmem:[%s3221_s0 + $0x130] ss:$8 sps:$4 sm:$0xff]   ;;  %v2273_v32 = vld [vmem:[%s3221_s0 + $0x2c0] ss:$8 sps:$4 sm:$0xff]  }
  0x5a   :  { %814 = vmatprep.mubr.bf16.mxu0 %v2178_v33  ;;  %1014 = vmatprep.mubr.bf16.mxu1 %v2180_v34  ;;  %v2274_v33 = vld [vmem:[%s3221_s0 + $0x144] ss:$8 sps:$4 sm:$0xff]   ;;  %v2276_v34 = vld [vmem:[%s3221_s0 + $0x2d4] ss:$8 sps:$4 sm:$0xff]  }
  0x61   :  { %815 = vmatmul.mubr.bf16.gmra.mxu0 %v2182_v35  ;;  %1015 = vmatmul.mubr.bf16.gmra.mxu1 %v2183_v36  ;;  %v2278_v35 = vld [vmem:[%s3221_s0 + $0x140] ss:$8 sps:$4 sm:$0xff]   ;;  %v2279_v36 = vld [vmem:[%s3221_s0 + $0x2d0] ss:$8 sps:$4 sm:$0xff]  }
  0x62   :  { %822 = vmatprep.mubr.bf16.mxu0 %v2184_v37  ;;  %1022 = vmatprep.mubr.bf16.mxu1 %v2186_v38  ;;  %v2280_v37 = vld [vmem:[%s3221_s0 + $0x154] ss:$8 sps:$4 sm:$0xff]   ;;  %v2282_v38 = vld [vmem:[%s3221_s0 + $0x2e4] ss:$8 sps:$4 sm:$0xff]  }
  0x69   :  { %823 = vmatmul.mubr.bf16.gmra.mxu0 %v2188_v39  ;;  %1023 = vmatmul.mubr.bf16.gmra.mxu1 %v2189_v40  ;;  %v2284_v39 = vld [vmem:[%s3221_s0 + $0x150] ss:$8 sps:$4 sm:$0xff]   ;;  %v2285_v40 = vld [vmem:[%s3221_s0 + $0x2e0] ss:$8 sps:$4 sm:$0xff]  }
  0x6a   :  { %830 = vmatprep.mubr.bf16.mxu0 %v2190_v41  ;;  %1030 = vmatprep.mubr.bf16.mxu1 %v2192_v42  ;;  %v2286_v41 = vld [vmem:[%s3221_s0 + $0x164] ss:$8 sps:$4 sm:$0xff]   ;;  %v2288_v42 = vld [vmem:[%s3221_s0 + $0x2f4] ss:$8 sps:$4 sm:$0xff]  }
  0x71   :  { %831 = vmatmul.mubr.bf16.gmra.mxu0 %v2194_v43  ;;  %1031 = vmatmul.mubr.bf16.gmra.mxu1 %v2195_v44  ;;  %v2290_v43 = vld [vmem:[%s3221_s0 + $0x160] ss:$8 sps:$4 sm:$0xff]   ;;  %v2291_v44 = vld [vmem:[%s3221_s0 + $0x2f0] ss:$8 sps:$4 sm:$0xff]  }
  0x72   :  { %838 = vmatprep.mubr.bf16.mxu0 %v2196_v45  ;;  %1038 = vmatprep.mubr.bf16.mxu1 %v2198_v46  ;;  %v2292_v45 = vld [vmem:[%s3221_s0 + $0x174] ss:$8 sps:$4 sm:$0xff]   ;;  %v2294_v46 = vld [vmem:[%s3221_s0 + $0x304] ss:$8 sps:$4 sm:$0xff]  }
  0x79   :  { %839 = vmatmul.mubr.bf16.gmra.mxu0 %v2200_v47  ;;  %1039 = vmatmul.mubr.bf16.gmra.mxu1 %v2201_v48  ;;  %v2296_v47 = vld [vmem:[%s3221_s0 + $0x170] ss:$8 sps:$4 sm:$0xff]   ;;  %v2297_v48 = vld [vmem:[%s3221_s0 + $0x300] ss:$8 sps:$4 sm:$0xff]  }
  0x7a   :  { %846 = vmatprep.mubr.bf16.mxu0 %v2202_v49  ;;  %1046 = vmatprep.mubr.bf16.mxu1 %v2204_v50  ;;  %v2298_v49 = vld [vmem:[%s3221_s0 + $0x184] ss:$8 sps:$4 sm:$0xff]   ;;  %v2300_v50 = vld [vmem:[%s3221_s0 + $0x314] ss:$8 sps:$4 sm:$0xff]  }
  0x81   :  { %847 = vmatmul.mubr.bf16.gmra.mxu0 %v2206_v51  ;;  %1047 = vmatmul.mubr.bf16.gmra.mxu1 %v2207_v52  ;;  %v63_v51 = vld [vmem:[%s3221_s0 + $0x180] sm:$0xff]  ;;  %v64_v52 = vld [vmem:[%s3221_s0 + $0x188] sm:$0xff] }
  0x82   :  { %854 = vmatprep.mubr.bf16.mxu0 %v2208_v53  ;;  %1054 = vmatprep.mubr.bf16.mxu1 %v2210_v54  ;;  %v113_v53 = vld [vmem:[%s3221_s0 + $0x310] sm:$0xff]  ;;  %v114_v54 = vld [vmem:[%s3221_s0 + $0x318] sm:$0xff] }
  0x89   :  { %855 = vmatmul.mubr.bf16.gmra.mxu0 %v2212_v55  ;;  %1055 = vmatmul.mubr.bf16.gmra.mxu1 %v2213_v56  ;;  %v1837_v55 = vcombine.low %v63_v51, %v64_v52  ;;  %v1887_v56 = vcombine.low %v113_v53, %v114_v54 }
  0x8a   :  { %862 = vmatprep.mubr.bf16.mxu0 %v2214_v57  ;;  %1062 = vmatprep.mubr.bf16.mxu1 %v2216_v58  ;;  %v2713_v57 = vld [vmem:[%s3222_s2] ss:$0 sm:$0xff] }
  0x91   :  { %863 = vmatmul.mubr.bf16.gmra.mxu0 %v2218_v59  ;;  %1063 = vmatmul.mubr.bf16.gmra.mxu1 %v2219_v60 }
  0x92   :  { %870 = vmatprep.mubr.bf16.mxu0 %v2220_v61  ;;  %1070 = vmatprep.mubr.bf16.mxu1 %v2222_v62 }
  0x99   :  { %871 = vmatmul.mubr.bf16.gmra.mxu0 %v2224_v63  ;;  %1071 = vmatmul.mubr.bf16.gmra.mxu1 %v2225_v0 }
  0x9a   :  { %878 = vmatprep.mubr.bf16.mxu0 %v2226_v1  ;;  %1078 = vmatprep.mubr.bf16.mxu1 %v2228_v2 }
  0xa1   :  { %879 = vmatmul.mubr.bf16.gmra.mxu0 %v2230_v3  ;;  %1079 = vmatmul.mubr.bf16.gmra.mxu1 %v2231_v4 }
  0xa2   :  { %886 = vmatprep.mubr.bf16.mxu0 %v2232_v5  ;;  %1086 = vmatprep.mubr.bf16.mxu1 %v2234_v6 }
  0xa9   :  { %887 = vmatmul.mubr.bf16.gmra.mxu0 %v2236_v7  ;;  %1087 = vmatmul.mubr.bf16.gmra.mxu1 %v2237_v8 }
  0xaa   :  { %894 = vmatprep.mubr.bf16.mxu0 %v2238_v9  ;;  %1094 = vmatprep.mubr.bf16.mxu1 %v2240_v10 }
  0xb1   :  { %895 = vmatmul.mubr.bf16.gmra.mxu0 %v2242_v11  ;;  %1095 = vmatmul.mubr.bf16.gmra.mxu1 %v2243_v12 }
  0xb2   :  { %902 = vmatprep.mubr.bf16.mxu0 %v2244_v13  ;;  %1102 = vmatprep.mubr.bf16.mxu1 %v2246_v14 }
  0xb9   :  { %903 = vmatmul.mubr.bf16.gmra.mxu0 %v2248_v15  ;;  %1103 = vmatmul.mubr.bf16.gmra.mxu1 %v2249_v16 }
  0xba   :  { %910 = vmatprep.mubr.bf16.mxu0 %v2250_v17  ;;  %1110 = vmatprep.mubr.bf16.mxu1 %v2252_v18 }
  0xc1   :  { %911 = vmatmul.mubr.bf16.gmra.mxu0 %v2254_v19  ;;  %1111 = vmatmul.mubr.bf16.gmra.mxu1 %v2255_v20 }
  0xc2   :  { %918 = vmatprep.mubr.bf16.mxu0 %v2256_v21  ;;  %1118 = vmatprep.mubr.bf16.mxu1 %v2258_v22 }
  0xc9   :  { %919 = vmatmul.mubr.bf16.gmra.mxu0 %v2260_v23  ;;  %1119 = vmatmul.mubr.bf16.gmra.mxu1 %v2261_v24 }
  0xca   :  { %926 = vmatprep.mubr.bf16.mxu0 %v2262_v25  ;;  %1126 = vmatprep.mubr.bf16.mxu1 %v2264_v26 }
  0xd1   :  { %927 = vmatmul.mubr.bf16.gmra.mxu0 %v2266_v27  ;;  %1127 = vmatmul.mubr.bf16.gmra.mxu1 %v2267_v28 }
  0xd2   :  { %934 = vmatprep.mubr.bf16.mxu0 %v2268_v29  ;;  %1134 = vmatprep.mubr.bf16.mxu1 %v2270_v30 }
  0xd9   :  { %935 = vmatmul.mubr.bf16.gmra.mxu0 %v2272_v31  ;;  %1135 = vmatmul.mubr.bf16.gmra.mxu1 %v2273_v32 }
  0xda   :  { %942 = vmatprep.mubr.bf16.mxu0 %v2274_v33  ;;  %1142 = vmatprep.mubr.bf16.mxu1 %v2276_v34 }
  0xe1   :  { %943 = vmatmul.mubr.bf16.gmra.mxu0 %v2278_v35  ;;  %1143 = vmatmul.mubr.bf16.gmra.mxu1 %v2279_v36 }
  0xe2   :  { %950 = vmatprep.mubr.bf16.mxu0 %v2280_v37  ;;  %1150 = vmatprep.mubr.bf16.mxu1 %v2282_v38 }
  0xe9   :  { %951 = vmatmul.mubr.bf16.gmra.mxu0 %v2284_v39  ;;  %1151 = vmatmul.mubr.bf16.gmra.mxu1 %v2285_v40 }
  0xea   :  { %958 = vmatprep.mubr.bf16.mxu0 %v2286_v41  ;;  %1158 = vmatprep.mubr.bf16.mxu1 %v2288_v42 }
  0xf1   :  { %959 = vmatmul.mubr.bf16.gmra.mxu0 %v2290_v43  ;;  %1159 = vmatmul.mubr.bf16.gmra.mxu1 %v2291_v44 }
  0xf2   :  { %966 = vmatprep.mubr.bf16.mxu0 %v2292_v45  ;;  %1166 = vmatprep.mubr.bf16.mxu1 %v2294_v46 }
  0xf9   :  { %967 = vmatmul.mubr.bf16.gmra.mxu0 %v2296_v47  ;;  %1167 = vmatmul.mubr.bf16.gmra.mxu1 %v2297_v48 }
  0xfa   :  { %974 = vmatprep.mubr.bf16.mxu0 %v2298_v49  ;;  %1174 = vmatprep.mubr.bf16.mxu1 %v2300_v50 }
 0x101   :  { %v784_v58 = vpop.f32.mrf.mxu0  ;;  %975 = vmatmul.mubr.bf16.gmra.mxu0 %v1837_v55  ;;  %v984_v59 = vpop.f32.mrf.mxu1  ;;  %1175 = vmatmul.mubr.bf16.gmra.mxu1 %v1887_v56 }
 0x102   :  { %v785_v60 = vadd.f32 %v2713_v57, %v784_v58  ;;  %v985_v61 = vadd.f32 %v2713_v57, %v984_v59 }
 0x103   :  { %v786_v62 = vpop.f32.mrf.mxu0  ;;  %v986_v63 = vpop.f32.mrf.mxu1 }
 0x104   :  { %v1183_v0 = vmax.f32 %v785_v60, 0.0  ;;  %v1233_v1 = vmax.f32 %v985_v61, 0.0 }
 0x105   :  { %v787_v2 = vpop.f32.mrf.mxu0  ;;  %v987_v3 = vpop.f32.mrf.mxu1 }
 0x106   :  { %v2005_v4 = vpack.c.bf16 %v1183_v0, %v1183_v0  ;;  %v2055_v5 = vpack.c.bf16 %v1233_v1, %v1233_v1  ;;  %v788_v6 = vadd.f32 %v2713_v57, %v787_v2  ;;  %v988_v7 = vadd.f32 %v2713_v57, %v987_v3 }
 0x107   :  { %v789_v8 = vpop.f32.mrf.mxu0  ;;  %v989_v9 = vpop.f32.mrf.mxu1 }
 0x108   :  { %1684 = vst.msk [vmem:[%s3223_s3] sm:$0xf] %vm1683_vm0, %v2005_v4  ;;  %1734 = vst.msk [vmem:[%s3223_s3 + $0xc8] sm:$0xf] %vm1683_vm0, %v2055_v5  ;;  %v1184_v10 = vmax.f32 %v788_v6, 0.0  ;;  %v1234_v11 = vmax.f32 %v988_v7, 0.0 }
 0x109   :  { %v792_v12 = vpop.f32.mrf.mxu0  ;;  %v992_v13 = vpop.f32.mrf.mxu1 }
 0x10a   :  { %v2006_v14 = vpack.c.bf16 %v1184_v10, %v1184_v10  ;;  %v2056_v15 = vpack.c.bf16 %v1234_v11, %v1234_v11  ;;  %v793_v16 = vadd.f32 %v2713_v57, %v792_v12  ;;  %v993_v17 = vadd.f32 %v2713_v57, %v992_v13 }
 0x10b   :  { %v794_v18 = vpop.f32.mrf.mxu0  ;;  %v994_v19 = vpop.f32.mrf.mxu1 }
 0x10c   :  { %1685 = vst.msk [vmem:[%s3223_s3 + $0x4] sm:$0xf] %vm1683_vm0, %v2006_v14  ;;  %1735 = vst.msk [vmem:[%s3223_s3 + $0xcc] sm:$0xf] %vm1683_vm0, %v2056_v15  ;;  %v1185_v20 = vmax.f32 %v793_v16, 0.0  ;;  %v1235_v21 = vmax.f32 %v993_v17, 0.0 }
 0x10d   :  { %v795_v22 = vpop.f32.mrf.mxu0  ;;  %v995_v23 = vpop.f32.mrf.mxu1 }
 0x10e   :  { %v2007_v24 = vpack.c.bf16 %v1185_v20, %v1185_v20  ;;  %v2057_v25 = vpack.c.bf16 %v1235_v21, %v1235_v21  ;;  %v796_v26 = vadd.f32 %v2713_v57, %v795_v22  ;;  %v996_v27 = vadd.f32 %v2713_v57, %v995_v23 }
 0x10f   :  { %v797_v28 = vpop.f32.mrf.mxu0  ;;  %v997_v29 = vpop.f32.mrf.mxu1 }
 0x110   :  { %1686 = vst.msk [vmem:[%s3223_s3 + $0x8] sm:$0xf] %vm1683_vm0, %v2007_v24  ;;  %1736 = vst.msk [vmem:[%s3223_s3 + $0xd0] sm:$0xf] %vm1683_vm0, %v2057_v25  ;;  %v1186_v30 = vmax.f32 %v796_v26, 0.0  ;;  %v1236_v31 = vmax.f32 %v996_v27, 0.0 }
 0x111   :  { %v800_v32 = vpop.f32.mrf.mxu0  ;;  %v1000_v33 = vpop.f32.mrf.mxu1 }
 0x112   :  { %v2008_v34 = vpack.c.bf16 %v1186_v30, %v1186_v30  ;;  %v2058_v35 = vpack.c.bf16 %v1236_v31, %v1236_v31  ;;  %v801_v36 = vadd.f32 %v2713_v57, %v800_v32  ;;  %v1001_v37 = vadd.f32 %v2713_v57, %v1000_v33 }
 0x113   :  { %v802_v38 = vpop.f32.mrf.mxu0  ;;  %v1002_v39 = vpop.f32.mrf.mxu1 }
 0x114   :  { %1687 = vst.msk [vmem:[%s3223_s3 + $0xc] sm:$0xf] %vm1683_vm0, %v2008_v34  ;;  %1737 = vst.msk [vmem:[%s3223_s3 + $0xd4] sm:$0xf] %vm1683_vm0, %v2058_v35  ;;  %v1187_v40 = vmax.f32 %v801_v36, 0.0  ;;  %v1237_v41 = vmax.f32 %v1001_v37, 0.0 }
 0x115   :  { %v803_v42 = vpop.f32.mrf.mxu0  ;;  %v1003_v43 = vpop.f32.mrf.mxu1 }
 0x116   :  { %v2009_v44 = vpack.c.bf16 %v1187_v40, %v1187_v40  ;;  %v2059_v45 = vpack.c.bf16 %v1237_v41, %v1237_v41  ;;  %v804_v46 = vadd.f32 %v2713_v57, %v803_v42  ;;  %v1004_v47 = vadd.f32 %v2713_v57, %v1003_v43 }
 0x117   :  { %v805_v48 = vpop.f32.mrf.mxu0  ;;  %v1005_v49 = vpop.f32.mrf.mxu1 }
 0x118   :  { %1688 = vst.msk [vmem:[%s3223_s3 + $0x10] sm:$0xf] %vm1683_vm0, %v2009_v44  ;;  %1738 = vst.msk [vmem:[%s3223_s3 + $0xd8] sm:$0xf] %vm1683_vm0, %v2059_v45  ;;  %v1188_v50 = vmax.f32 %v804_v46, 0.0  ;;  %v1238_v51 = vmax.f32 %v1004_v47, 0.0 }
 0x119   :  { %v808_v52 = vpop.f32.mrf.mxu0  ;;  %v1008_v53 = vpop.f32.mrf.mxu1 }
 0x11a   :  { %v2010_v54 = vpack.c.bf16 %v1188_v50, %v1188_v50  ;;  %v2060_v55 = vpack.c.bf16 %v1238_v51, %v1238_v51  ;;  %v809_v56 = vadd.f32 %v2713_v57, %v808_v52  ;;  %v1009_v58 = vadd.f32 %v2713_v57, %v1008_v53 }
 0x11b   :  { %v810_v59 = vpop.f32.mrf.mxu0  ;;  %v1010_v60 = vpop.f32.mrf.mxu1 }
 0x11c   :  { %1689 = vst.msk [vmem:[%s3223_s3 + $0x14] sm:$0xf] %vm1683_vm0, %v2010_v54  ;;  %1739 = vst.msk [vmem:[%s3223_s3 + $0xdc] sm:$0xf] %vm1683_vm0, %v2060_v55  ;;  %v1189_v61 = vmax.f32 %v809_v56, 0.0  ;;  %v1239_v62 = vmax.f32 %v1009_v58, 0.0 }
 0x11d   :  { %v811_v63 = vpop.f32.mrf.mxu0  ;;  %v1011_v0 = vpop.f32.mrf.mxu1 }
 0x11e   :  { %v2011_v1 = vpack.c.bf16 %v1189_v61, %v1189_v61  ;;  %v2061_v2 = vpack.c.bf16 %v1239_v62, %v1239_v62  ;;  %v812_v3 = vadd.f32 %v2713_v57, %v811_v63  ;;  %v1012_v4 = vadd.f32 %v2713_v57, %v1011_v0 }
 0x11f   :  { %v813_v5 = vpop.f32.mrf.mxu0  ;;  %v1013_v6 = vpop.f32.mrf.mxu1 }
 0x120   :  { %1690 = vst.msk [vmem:[%s3223_s3 + $0x18] sm:$0xf] %vm1683_vm0, %v2011_v1  ;;  %1740 = vst.msk [vmem:[%s3223_s3 + $0xe0] sm:$0xf] %vm1683_vm0, %v2061_v2  ;;  %v1190_v7 = vmax.f32 %v812_v3, 0.0  ;;  %v1240_v8 = vmax.f32 %v1012_v4, 0.0 }
 0x121   :  { %v816_v9 = vpop.f32.mrf.mxu0  ;;  %v1016_v10 = vpop.f32.mrf.mxu1 }
 0x122   :  { %v2012_v11 = vpack.c.bf16 %v1190_v7, %v1190_v7  ;;  %v2062_v12 = vpack.c.bf16 %v1240_v8, %v1240_v8  ;;  %v817_v13 = vadd.f32 %v2713_v57, %v816_v9  ;;  %v1017_v14 = vadd.f32 %v2713_v57, %v1016_v10 }
 0x123   :  { %v818_v15 = vpop.f32.mrf.mxu0  ;;  %v1018_v16 = vpop.f32.mrf.mxu1 }
 0x124   :  { %1691 = vst.msk [vmem:[%s3223_s3 + $0x1c] sm:$0xf] %vm1683_vm0, %v2012_v11  ;;  %1741 = vst.msk [vmem:[%s3223_s3 + $0xe4] sm:$0xf] %vm1683_vm0, %v2062_v12  ;;  %v1191_v17 = vmax.f32 %v817_v13, 0.0  ;;  %v1241_v18 = vmax.f32 %v1017_v14, 0.0 }
 0x125   :  { %v819_v19 = vpop.f32.mrf.mxu0  ;;  %v1019_v20 = vpop.f32.mrf.mxu1 }
 0x126   :  { %v2013_v21 = vpack.c.bf16 %v1191_v17, %v1191_v17  ;;  %v2063_v22 = vpack.c.bf16 %v1241_v18, %v1241_v18  ;;  %v820_v23 = vadd.f32 %v2713_v57, %v819_v19  ;;  %v1020_v24 = vadd.f32 %v2713_v57, %v1019_v20 }
 0x127   :  { %v821_v25 = vpop.f32.mrf.mxu0  ;;  %v1021_v26 = vpop.f32.mrf.mxu1 }
 0x128   :  { %1692 = vst.msk [vmem:[%s3223_s3 + $0x20] sm:$0xf] %vm1683_vm0, %v2013_v21  ;;  %1742 = vst.msk [vmem:[%s3223_s3 + $0xe8] sm:$0xf] %vm1683_vm0, %v2063_v22  ;;  %v1192_v27 = vmax.f32 %v820_v23, 0.0  ;;  %v1242_v28 = vmax.f32 %v1020_v24, 0.0 }
 0x129   :  { %v824_v29 = vpop.f32.mrf.mxu0  ;;  %v1024_v30 = vpop.f32.mrf.mxu1 }
 0x12a   :  { %v2014_v31 = vpack.c.bf16 %v1192_v27, %v1192_v27  ;;  %v2064_v32 = vpack.c.bf16 %v1242_v28, %v1242_v28  ;;  %v825_v33 = vadd.f32 %v2713_v57, %v824_v29  ;;  %v1025_v34 = vadd.f32 %v2713_v57, %v1024_v30 }
 0x12b   :  { %v826_v35 = vpop.f32.mrf.mxu0  ;;  %v1026_v36 = vpop.f32.mrf.mxu1 }
 0x12c   :  { %1693 = vst.msk [vmem:[%s3223_s3 + $0x24] sm:$0xf] %vm1683_vm0, %v2014_v31  ;;  %1743 = vst.msk [vmem:[%s3223_s3 + $0xec] sm:$0xf] %vm1683_vm0, %v2064_v32  ;;  %v1193_v37 = vmax.f32 %v825_v33, 0.0  ;;  %v1243_v38 = vmax.f32 %v1025_v34, 0.0 }
 0x12d   :  { %v827_v39 = vpop.f32.mrf.mxu0  ;;  %v1027_v40 = vpop.f32.mrf.mxu1 }
 0x12e   :  { %v2015_v41 = vpack.c.bf16 %v1193_v37, %v1193_v37  ;;  %v2065_v42 = vpack.c.bf16 %v1243_v38, %v1243_v38  ;;  %v828_v43 = vadd.f32 %v2713_v57, %v827_v39  ;;  %v1028_v44 = vadd.f32 %v2713_v57, %v1027_v40 }
 0x12f   :  { %v829_v45 = vpop.f32.mrf.mxu0  ;;  %v1029_v46 = vpop.f32.mrf.mxu1 }
 0x130   :  { %1694 = vst.msk [vmem:[%s3223_s3 + $0x28] sm:$0xf] %vm1683_vm0, %v2015_v41  ;;  %1744 = vst.msk [vmem:[%s3223_s3 + $0xf0] sm:$0xf] %vm1683_vm0, %v2065_v42  ;;  %v1194_v47 = vmax.f32 %v828_v43, 0.0  ;;  %v1244_v48 = vmax.f32 %v1028_v44, 0.0 }
 0x131   :  { %v832_v49 = vpop.f32.mrf.mxu0  ;;  %v1032_v50 = vpop.f32.mrf.mxu1 }
 0x132   :  { %v2016_v51 = vpack.c.bf16 %v1194_v47, %v1194_v47  ;;  %v2066_v52 = vpack.c.bf16 %v1244_v48, %v1244_v48  ;;  %v833_v53 = vadd.f32 %v2713_v57, %v832_v49  ;;  %v1033_v54 = vadd.f32 %v2713_v57, %v1032_v50 }
 0x133   :  { %v834_v55 = vpop.f32.mrf.mxu0  ;;  %v1034_v56 = vpop.f32.mrf.mxu1 }
 0x134   :  { %1695 = vst.msk [vmem:[%s3223_s3 + $0x2c] sm:$0xf] %vm1683_vm0, %v2016_v51  ;;  %1745 = vst.msk [vmem:[%s3223_s3 + $0xf4] sm:$0xf] %vm1683_vm0, %v2066_v52  ;;  %v1195_v58 = vmax.f32 %v833_v53, 0.0  ;;  %v1245_v59 = vmax.f32 %v1033_v54, 0.0 }
 0x135   :  { %v835_v60 = vpop.f32.mrf.mxu0  ;;  %v1035_v61 = vpop.f32.mrf.mxu1 }
 0x136   :  { %v2017_v62 = vpack.c.bf16 %v1195_v58, %v1195_v58  ;;  %v2067_v63 = vpack.c.bf16 %v1245_v59, %v1245_v59  ;;  %v836_v0 = vadd.f32 %v2713_v57, %v835_v60  ;;  %v1036_v1 = vadd.f32 %v2713_v57, %v1035_v61 }
 0x137   :  { %v837_v2 = vpop.f32.mrf.mxu0  ;;  %v1037_v3 = vpop.f32.mrf.mxu1 }
 0x138   :  { %1696 = vst.msk [vmem:[%s3223_s3 + $0x30] sm:$0xf] %vm1683_vm0, %v2017_v62  ;;  %1746 = vst.msk [vmem:[%s3223_s3 + $0xf8] sm:$0xf] %vm1683_vm0, %v2067_v63  ;;  %v1196_v4 = vmax.f32 %v836_v0, 0.0  ;;  %v1246_v5 = vmax.f32 %v1036_v1, 0.0 }
 0x139   :  { %v840_v6 = vpop.f32.mrf.mxu0  ;;  %v1040_v7 = vpop.f32.mrf.mxu1 }
 0x13a   :  { %v2018_v8 = vpack.c.bf16 %v1196_v4, %v1196_v4  ;;  %v2068_v9 = vpack.c.bf16 %v1246_v5, %v1246_v5  ;;  %v841_v10 = vadd.f32 %v2713_v57, %v840_v6  ;;  %v1041_v11 = vadd.f32 %v2713_v57, %v1040_v7 }
 0x13b   :  { %v842_v12 = vpop.f32.mrf.mxu0  ;;  %v1042_v13 = vpop.f32.mrf.mxu1 }
 0x13c   :  { %1697 = vst.msk [vmem:[%s3223_s3 + $0x34] sm:$0xf] %vm1683_vm0, %v2018_v8  ;;  %1747 = vst.msk [vmem:[%s3223_s3 + $0xfc] sm:$0xf] %vm1683_vm0, %v2068_v9  ;;  %v1197_v14 = vmax.f32 %v841_v10, 0.0  ;;  %v1247_v15 = vmax.f32 %v1041_v11, 0.0 }
 0x13d   :  { %v843_v16 = vpop.f32.mrf.mxu0  ;;  %v1043_v17 = vpop.f32.mrf.mxu1 }
 0x13e   :  { %v2019_v18 = vpack.c.bf16 %v1197_v14, %v1197_v14  ;;  %v2069_v19 = vpack.c.bf16 %v1247_v15, %v1247_v15  ;;  %v844_v20 = vadd.f32 %v2713_v57, %v843_v16  ;;  %v1044_v21 = vadd.f32 %v2713_v57, %v1043_v17 }
 0x13f   :  { %v845_v22 = vpop.f32.mrf.mxu0  ;;  %v1045_v23 = vpop.f32.mrf.mxu1 }
 0x140   :  { %1698 = vst.msk [vmem:[%s3223_s3 + $0x38] sm:$0xf] %vm1683_vm0, %v2019_v18  ;;  %1748 = vst.msk [vmem:[%s3223_s3 + $0x100] sm:$0xf] %vm1683_vm0, %v2069_v19  ;;  %v1198_v24 = vmax.f32 %v844_v20, 0.0  ;;  %v1248_v25 = vmax.f32 %v1044_v21, 0.0 }
 0x141   :  { %v848_v26 = vpop.f32.mrf.mxu0  ;;  %v1048_v27 = vpop.f32.mrf.mxu1 }
 0x142   :  { %v2020_v28 = vpack.c.bf16 %v1198_v24, %v1198_v24  ;;  %v2070_v29 = vpack.c.bf16 %v1248_v25, %v1248_v25  ;;  %v849_v30 = vadd.f32 %v2713_v57, %v848_v26  ;;  %v1049_v31 = vadd.f32 %v2713_v57, %v1048_v27 }
 0x143   :  { %v850_v32 = vpop.f32.mrf.mxu0  ;;  %v1050_v33 = vpop.f32.mrf.mxu1 }
 0x144   :  { %1699 = vst.msk [vmem:[%s3223_s3 + $0x3c] sm:$0xf] %vm1683_vm0, %v2020_v28  ;;  %1749 = vst.msk [vmem:[%s3223_s3 + $0x104] sm:$0xf] %vm1683_vm0, %v2070_v29  ;;  %v1199_v34 = vmax.f32 %v849_v30, 0.0  ;;  %v1249_v35 = vmax.f32 %v1049_v31, 0.0 }
 0x145   :  { %v851_v36 = vpop.f32.mrf.mxu0  ;;  %v1051_v37 = vpop.f32.mrf.mxu1 }
 0x146   :  { %v2021_v38 = vpack.c.bf16 %v1199_v34, %v1199_v34  ;;  %v2071_v39 = vpack.c.bf16 %v1249_v35, %v1249_v35  ;;  %v852_v40 = vadd.f32 %v2713_v57, %v851_v36  ;;  %v1052_v41 = vadd.f32 %v2713_v57, %v1051_v37 }
 0x147   :  { %v853_v42 = vpop.f32.mrf.mxu0  ;;  %v1053_v43 = vpop.f32.mrf.mxu1 }
 0x148   :  { %1700 = vst.msk [vmem:[%s3223_s3 + $0x40] sm:$0xf] %vm1683_vm0, %v2021_v38  ;;  %1750 = vst.msk [vmem:[%s3223_s3 + $0x108] sm:$0xf] %vm1683_vm0, %v2071_v39  ;;  %v1200_v44 = vmax.f32 %v852_v40, 0.0  ;;  %v1250_v45 = vmax.f32 %v1052_v41, 0.0 }
 0x149   :  { %v856_v46 = vpop.f32.mrf.mxu0  ;;  %v1056_v47 = vpop.f32.mrf.mxu1 }
 0x14a   :  { %v2022_v48 = vpack.c.bf16 %v1200_v44, %v1200_v44  ;;  %v2072_v49 = vpack.c.bf16 %v1250_v45, %v1250_v45  ;;  %v857_v50 = vadd.f32 %v2713_v57, %v856_v46  ;;  %v1057_v51 = vadd.f32 %v2713_v57, %v1056_v47 }
 0x14b   :  { %v858_v52 = vpop.f32.mrf.mxu0  ;;  %v1058_v53 = vpop.f32.mrf.mxu1 }
 0x14c   :  { %1701 = vst.msk [vmem:[%s3223_s3 + $0x44] sm:$0xf] %vm1683_vm0, %v2022_v48  ;;  %1751 = vst.msk [vmem:[%s3223_s3 + $0x10c] sm:$0xf] %vm1683_vm0, %v2072_v49  ;;  %v1201_v54 = vmax.f32 %v857_v50, 0.0  ;;  %v1251_v55 = vmax.f32 %v1057_v51, 0.0 }
 0x14d   :  { %v859_v56 = vpop.f32.mrf.mxu0  ;;  %v1059_v58 = vpop.f32.mrf.mxu1 }
 0x14e   :  { %v2023_v59 = vpack.c.bf16 %v1201_v54, %v1201_v54  ;;  %v2073_v60 = vpack.c.bf16 %v1251_v55, %v1251_v55  ;;  %v860_v61 = vadd.f32 %v2713_v57, %v859_v56  ;;  %v1060_v62 = vadd.f32 %v2713_v57, %v1059_v58 }
 0x14f   :  { %v861_v63 = vpop.f32.mrf.mxu0  ;;  %v1061_v0 = vpop.f32.mrf.mxu1 }
 0x150   :  { %1702 = vst.msk [vmem:[%s3223_s3 + $0x48] sm:$0xf] %vm1683_vm0, %v2023_v59  ;;  %1752 = vst.msk [vmem:[%s3223_s3 + $0x110] sm:$0xf] %vm1683_vm0, %v2073_v60  ;;  %v1202_v1 = vmax.f32 %v860_v61, 0.0  ;;  %v1252_v2 = vmax.f32 %v1060_v62, 0.0 }
 0x151   :  { %v864_v3 = vpop.f32.mrf.mxu0  ;;  %v1064_v4 = vpop.f32.mrf.mxu1 }
 0x152   :  { %v2024_v5 = vpack.c.bf16 %v1202_v1, %v1202_v1  ;;  %v2074_v6 = vpack.c.bf16 %v1252_v2, %v1252_v2  ;;  %v865_v7 = vadd.f32 %v2713_v57, %v864_v3  ;;  %v1065_v8 = vadd.f32 %v2713_v57, %v1064_v4 }
 0x153   :  { %v866_v9 = vpop.f32.mrf.mxu0  ;;  %v1066_v10 = vpop.f32.mrf.mxu1 }
 0x154   :  { %1703 = vst.msk [vmem:[%s3223_s3 + $0x4c] sm:$0xf] %vm1683_vm0, %v2024_v5  ;;  %1753 = vst.msk [vmem:[%s3223_s3 + $0x114] sm:$0xf] %vm1683_vm0, %v2074_v6  ;;  %v1203_v11 = vmax.f32 %v865_v7, 0.0  ;;  %v1253_v12 = vmax.f32 %v1065_v8, 0.0 }
 0x155   :  { %v867_v13 = vpop.f32.mrf.mxu0  ;;  %v1067_v14 = vpop.f32.mrf.mxu1 }
 0x156   :  { %v2025_v15 = vpack.c.bf16 %v1203_v11, %v1203_v11  ;;  %v2075_v16 = vpack.c.bf16 %v1253_v12, %v1253_v12  ;;  %v868_v17 = vadd.f32 %v2713_v57, %v867_v13  ;;  %v1068_v18 = vadd.f32 %v2713_v57, %v1067_v14 }
 0x157   :  { %v869_v19 = vpop.f32.mrf.mxu0  ;;  %v1069_v20 = vpop.f32.mrf.mxu1 }
 0x158   :  { %1704 = vst.msk [vmem:[%s3223_s3 + $0x50] sm:$0xf] %vm1683_vm0, %v2025_v15  ;;  %1754 = vst.msk [vmem:[%s3223_s3 + $0x118] sm:$0xf] %vm1683_vm0, %v2075_v16  ;;  %v1204_v21 = vmax.f32 %v868_v17, 0.0  ;;  %v1254_v22 = vmax.f32 %v1068_v18, 0.0 }
 0x159   :  { %v872_v23 = vpop.f32.mrf.mxu0  ;;  %v1072_v24 = vpop.f32.mrf.mxu1 }
 0x15a   :  { %v2026_v25 = vpack.c.bf16 %v1204_v21, %v1204_v21  ;;  %v2076_v26 = vpack.c.bf16 %v1254_v22, %v1254_v22  ;;  %v873_v27 = vadd.f32 %v2713_v57, %v872_v23  ;;  %v1073_v28 = vadd.f32 %v2713_v57, %v1072_v24 }
 0x15b   :  { %v874_v29 = vpop.f32.mrf.mxu0  ;;  %v1074_v30 = vpop.f32.mrf.mxu1 }
 0x15c   :  { %1705 = vst.msk [vmem:[%s3223_s3 + $0x54] sm:$0xf] %vm1683_vm0, %v2026_v25  ;;  %1755 = vst.msk [vmem:[%s3223_s3 + $0x11c] sm:$0xf] %vm1683_vm0, %v2076_v26  ;;  %v1205_v31 = vmax.f32 %v873_v27, 0.0  ;;  %v1255_v32 = vmax.f32 %v1073_v28, 0.0 }
 0x15d   :  { %v875_v33 = vpop.f32.mrf.mxu0  ;;  %v1075_v34 = vpop.f32.mrf.mxu1 }
 0x15e   :  { %v2027_v35 = vpack.c.bf16 %v1205_v31, %v1205_v31  ;;  %v2077_v36 = vpack.c.bf16 %v1255_v32, %v1255_v32  ;;  %v876_v37 = vadd.f32 %v2713_v57, %v875_v33  ;;  %v1076_v38 = vadd.f32 %v2713_v57, %v1075_v34 }
 0x15f   :  { %v877_v39 = vpop.f32.mrf.mxu0  ;;  %v1077_v40 = vpop.f32.mrf.mxu1 }
 0x160   :  { %1706 = vst.msk [vmem:[%s3223_s3 + $0x58] sm:$0xf] %vm1683_vm0, %v2027_v35  ;;  %1756 = vst.msk [vmem:[%s3223_s3 + $0x120] sm:$0xf] %vm1683_vm0, %v2077_v36  ;;  %v1206_v41 = vmax.f32 %v876_v37, 0.0  ;;  %v1256_v42 = vmax.f32 %v1076_v38, 0.0 }
 0x161   :  { %v880_v43 = vpop.f32.mrf.mxu0  ;;  %v1080_v44 = vpop.f32.mrf.mxu1 }
 0x162   :  { %v2028_v45 = vpack.c.bf16 %v1206_v41, %v1206_v41  ;;  %v2078_v46 = vpack.c.bf16 %v1256_v42, %v1256_v42  ;;  %v881_v47 = vadd.f32 %v2713_v57, %v880_v43  ;;  %v1081_v48 = vadd.f32 %v2713_v57, %v1080_v44 }
 0x163   :  { %v882_v49 = vpop.f32.mrf.mxu0  ;;  %v1082_v50 = vpop.f32.mrf.mxu1 }
 0x164   :  { %1707 = vst.msk [vmem:[%s3223_s3 + $0x5c] sm:$0xf] %vm1683_vm0, %v2028_v45  ;;  %1757 = vst.msk [vmem:[%s3223_s3 + $0x124] sm:$0xf] %vm1683_vm0, %v2078_v46  ;;  %v1207_v51 = vmax.f32 %v881_v47, 0.0  ;;  %v1257_v52 = vmax.f32 %v1081_v48, 0.0 }
 0x165   :  { %v883_v53 = vpop.f32.mrf.mxu0  ;;  %v1083_v54 = vpop.f32.mrf.mxu1 }
 0x166   :  { %v2029_v55 = vpack.c.bf16 %v1207_v51, %v1207_v51  ;;  %v2079_v56 = vpack.c.bf16 %v1257_v52, %v1257_v52  ;;  %v884_v58 = vadd.f32 %v2713_v57, %v883_v53  ;;  %v1084_v59 = vadd.f32 %v2713_v57, %v1083_v54 }
 0x167   :  { %v885_v60 = vpop.f32.mrf.mxu0  ;;  %v1085_v61 = vpop.f32.mrf.mxu1 }
 0x168   :  { %1708 = vst.msk [vmem:[%s3223_s3 + $0x60] sm:$0xf] %vm1683_vm0, %v2029_v55  ;;  %1758 = vst.msk [vmem:[%s3223_s3 + $0x128] sm:$0xf] %vm1683_vm0, %v2079_v56  ;;  %v1208_v62 = vmax.f32 %v884_v58, 0.0  ;;  %v1258_v63 = vmax.f32 %v1084_v59, 0.0 }
 0x169   :  { %v888_v0 = vpop.f32.mrf.mxu0  ;;  %v1088_v1 = vpop.f32.mrf.mxu1 }
 0x16a   :  { %v2030_v2 = vpack.c.bf16 %v1208_v62, %v1208_v62  ;;  %v2080_v3 = vpack.c.bf16 %v1258_v63, %v1258_v63  ;;  %v889_v4 = vadd.f32 %v2713_v57, %v888_v0  ;;  %v1089_v5 = vadd.f32 %v2713_v57, %v1088_v1 }
 0x16b   :  { %v890_v6 = vpop.f32.mrf.mxu0  ;;  %v1090_v7 = vpop.f32.mrf.mxu1 }
 0x16c   :  { %1709 = vst.msk [vmem:[%s3223_s3 + $0x64] sm:$0xf] %vm1683_vm0, %v2030_v2  ;;  %1759 = vst.msk [vmem:[%s3223_s3 + $0x12c] sm:$0xf] %vm1683_vm0, %v2080_v3  ;;  %v1209_v8 = vmax.f32 %v889_v4, 0.0  ;;  %v1259_v9 = vmax.f32 %v1089_v5, 0.0 }
 0x16d   :  { %v891_v10 = vpop.f32.mrf.mxu0  ;;  %v1091_v11 = vpop.f32.mrf.mxu1 }
 0x16e   :  { %v2031_v12 = vpack.c.bf16 %v1209_v8, %v1209_v8  ;;  %v2081_v13 = vpack.c.bf16 %v1259_v9, %v1259_v9  ;;  %v892_v14 = vadd.f32 %v2713_v57, %v891_v10  ;;  %v1092_v15 = vadd.f32 %v2713_v57, %v1091_v11 }
 0x16f   :  { %v893_v16 = vpop.f32.mrf.mxu0  ;;  %v1093_v17 = vpop.f32.mrf.mxu1 }
 0x170   :  { %1710 = vst.msk [vmem:[%s3223_s3 + $0x68] sm:$0xf] %vm1683_vm0, %v2031_v12  ;;  %1760 = vst.msk [vmem:[%s3223_s3 + $0x130] sm:$0xf] %vm1683_vm0, %v2081_v13  ;;  %v1210_v18 = vmax.f32 %v892_v14, 0.0  ;;  %v1260_v19 = vmax.f32 %v1092_v15, 0.0 }
 0x171   :  { %v896_v20 = vpop.f32.mrf.mxu0  ;;  %v1096_v21 = vpop.f32.mrf.mxu1 }
 0x172   :  { %v2032_v22 = vpack.c.bf16 %v1210_v18, %v1210_v18  ;;  %v2082_v23 = vpack.c.bf16 %v1260_v19, %v1260_v19  ;;  %v897_v24 = vadd.f32 %v2713_v57, %v896_v20  ;;  %v1097_v25 = vadd.f32 %v2713_v57, %v1096_v21 }
 0x173   :  { %v898_v26 = vpop.f32.mrf.mxu0  ;;  %v1098_v27 = vpop.f32.mrf.mxu1 }
 0x174   :  { %1711 = vst.msk [vmem:[%s3223_s3 + $0x6c] sm:$0xf] %vm1683_vm0, %v2032_v22  ;;  %1761 = vst.msk [vmem:[%s3223_s3 + $0x134] sm:$0xf] %vm1683_vm0, %v2082_v23  ;;  %v1211_v28 = vmax.f32 %v897_v24, 0.0  ;;  %v1261_v29 = vmax.f32 %v1097_v25, 0.0 }
 0x175   :  { %v899_v30 = vpop.f32.mrf.mxu0  ;;  %v1099_v31 = vpop.f32.mrf.mxu1 }
 0x176   :  { %v2033_v32 = vpack.c.bf16 %v1211_v28, %v1211_v28  ;;  %v2083_v33 = vpack.c.bf16 %v1261_v29, %v1261_v29  ;;  %v900_v34 = vadd.f32 %v2713_v57, %v899_v30  ;;  %v1100_v35 = vadd.f32 %v2713_v57, %v1099_v31 }
 0x177   :  { %v901_v36 = vpop.f32.mrf.mxu0  ;;  %v1101_v37 = vpop.f32.mrf.mxu1 }
 0x178   :  { %1712 = vst.msk [vmem:[%s3223_s3 + $0x70] sm:$0xf] %vm1683_vm0, %v2033_v32  ;;  %1762 = vst.msk [vmem:[%s3223_s3 + $0x138] sm:$0xf] %vm1683_vm0, %v2083_v33  ;;  %v1212_v38 = vmax.f32 %v900_v34, 0.0  ;;  %v1262_v39 = vmax.f32 %v1100_v35, 0.0 }
 0x179   :  { %v904_v40 = vpop.f32.mrf.mxu0  ;;  %v1104_v41 = vpop.f32.mrf.mxu1 }
 0x17a   :  { %v2034_v42 = vpack.c.bf16 %v1212_v38, %v1212_v38  ;;  %v2084_v43 = vpack.c.bf16 %v1262_v39, %v1262_v39  ;;  %v905_v44 = vadd.f32 %v2713_v57, %v904_v40  ;;  %v1105_v45 = vadd.f32 %v2713_v57, %v1104_v41 }
 0x17b   :  { %v906_v46 = vpop.f32.mrf.mxu0  ;;  %v1106_v47 = vpop.f32.mrf.mxu1 }
 0x17c   :  { %1713 = vst.msk [vmem:[%s3223_s3 + $0x74] sm:$0xf] %vm1683_vm0, %v2034_v42  ;;  %1763 = vst.msk [vmem:[%s3223_s3 + $0x13c] sm:$0xf] %vm1683_vm0, %v2084_v43  ;;  %v1213_v48 = vmax.f32 %v905_v44, 0.0  ;;  %v1263_v49 = vmax.f32 %v1105_v45, 0.0 }
 0x17d   :  { %v907_v50 = vpop.f32.mrf.mxu0  ;;  %v1107_v51 = vpop.f32.mrf.mxu1 }
 0x17e   :  { %v2035_v52 = vpack.c.bf16 %v1213_v48, %v1213_v48  ;;  %v2085_v53 = vpack.c.bf16 %v1263_v49, %v1263_v49  ;;  %v908_v54 = vadd.f32 %v2713_v57, %v907_v50  ;;  %v1108_v55 = vadd.f32 %v2713_v57, %v1107_v51 }
 0x17f   :  { %v909_v56 = vpop.f32.mrf.mxu0  ;;  %v1109_v58 = vpop.f32.mrf.mxu1 }
 0x180   :  { %1714 = vst.msk [vmem:[%s3223_s3 + $0x78] sm:$0xf] %vm1683_vm0, %v2035_v52  ;;  %1764 = vst.msk [vmem:[%s3223_s3 + $0x140] sm:$0xf] %vm1683_vm0, %v2085_v53  ;;  %v1214_v59 = vmax.f32 %v908_v54, 0.0  ;;  %v1264_v60 = vmax.f32 %v1108_v55, 0.0 }
 0x181   :  { %v912_v61 = vpop.f32.mrf.mxu0  ;;  %v1112_v62 = vpop.f32.mrf.mxu1 }
 0x182   :  { %v2036_v63 = vpack.c.bf16 %v1214_v59, %v1214_v59  ;;  %v2086_v0 = vpack.c.bf16 %v1264_v60, %v1264_v60  ;;  %v913_v1 = vadd.f32 %v2713_v57, %v912_v61  ;;  %v1113_v2 = vadd.f32 %v2713_v57, %v1112_v62 }
 0x183   :  { %v914_v3 = vpop.f32.mrf.mxu0  ;;  %v1114_v4 = vpop.f32.mrf.mxu1 }
 0x184   :  { %1715 = vst.msk [vmem:[%s3223_s3 + $0x7c] sm:$0xf] %vm1683_vm0, %v2036_v63  ;;  %1765 = vst.msk [vmem:[%s3223_s3 + $0x144] sm:$0xf] %vm1683_vm0, %v2086_v0  ;;  %v1215_v5 = vmax.f32 %v913_v1, 0.0  ;;  %v1265_v6 = vmax.f32 %v1113_v2, 0.0 }
 0x185   :  { %v915_v7 = vpop.f32.mrf.mxu0  ;;  %v1115_v8 = vpop.f32.mrf.mxu1 }
 0x186   :  { %v2037_v9 = vpack.c.bf16 %v1215_v5, %v1215_v5  ;;  %v2087_v10 = vpack.c.bf16 %v1265_v6, %v1265_v6  ;;  %v916_v11 = vadd.f32 %v2713_v57, %v915_v7  ;;  %v1116_v12 = vadd.f32 %v2713_v57, %v1115_v8 }
 0x187   :  { %v917_v13 = vpop.f32.mrf.mxu0  ;;  %v1117_v14 = vpop.f32.mrf.mxu1 }
 0x188   :  { %1716 = vst.msk [vmem:[%s3223_s3 + $0x80] sm:$0xf] %vm1683_vm0, %v2037_v9  ;;  %1766 = vst.msk [vmem:[%s3223_s3 + $0x148] sm:$0xf] %vm1683_vm0, %v2087_v10  ;;  %v1216_v15 = vmax.f32 %v916_v11, 0.0  ;;  %v1266_v16 = vmax.f32 %v1116_v12, 0.0 }
 0x189   :  { %v920_v17 = vpop.f32.mrf.mxu0  ;;  %v1120_v18 = vpop.f32.mrf.mxu1 }
 0x18a   :  { %v2038_v19 = vpack.c.bf16 %v1216_v15, %v1216_v15  ;;  %v2088_v20 = vpack.c.bf16 %v1266_v16, %v1266_v16  ;;  %v921_v21 = vadd.f32 %v2713_v57, %v920_v17  ;;  %v1121_v22 = vadd.f32 %v2713_v57, %v1120_v18 }
 0x18b   :  { %v922_v23 = vpop.f32.mrf.mxu0  ;;  %v1122_v24 = vpop.f32.mrf.mxu1 }
 0x18c   :  { %1717 = vst.msk [vmem:[%s3223_s3 + $0x84] sm:$0xf] %vm1683_vm0, %v2038_v19  ;;  %1767 = vst.msk [vmem:[%s3223_s3 + $0x14c] sm:$0xf] %vm1683_vm0, %v2088_v20  ;;  %v1217_v25 = vmax.f32 %v921_v21, 0.0  ;;  %v1267_v26 = vmax.f32 %v1121_v22, 0.0 }
 0x18d   :  { %v923_v27 = vpop.f32.mrf.mxu0  ;;  %v1123_v28 = vpop.f32.mrf.mxu1 }
 0x18e   :  { %v2039_v29 = vpack.c.bf16 %v1217_v25, %v1217_v25  ;;  %v2089_v30 = vpack.c.bf16 %v1267_v26, %v1267_v26  ;;  %v924_v31 = vadd.f32 %v2713_v57, %v923_v27  ;;  %v1124_v32 = vadd.f32 %v2713_v57, %v1123_v28 }
 0x18f   :  { %v925_v33 = vpop.f32.mrf.mxu0  ;;  %v1125_v34 = vpop.f32.mrf.mxu1 }
 0x190   :  { %1718 = vst.msk [vmem:[%s3223_s3 + $0x88] sm:$0xf] %vm1683_vm0, %v2039_v29  ;;  %1768 = vst.msk [vmem:[%s3223_s3 + $0x150] sm:$0xf] %vm1683_vm0, %v2089_v30  ;;  %v1218_v35 = vmax.f32 %v924_v31, 0.0  ;;  %v1268_v36 = vmax.f32 %v1124_v32, 0.0 }
 0x191   :  { %v928_v37 = vpop.f32.mrf.mxu0  ;;  %v1128_v38 = vpop.f32.mrf.mxu1 }
 0x192   :  { %v2040_v39 = vpack.c.bf16 %v1218_v35, %v1218_v35  ;;  %v2090_v40 = vpack.c.bf16 %v1268_v36, %v1268_v36  ;;  %v929_v41 = vadd.f32 %v2713_v57, %v928_v37  ;;  %v1129_v42 = vadd.f32 %v2713_v57, %v1128_v38 }
 0x193   :  { %v930_v43 = vpop.f32.mrf.mxu0  ;;  %v1130_v44 = vpop.f32.mrf.mxu1 }
 0x194   :  { %1719 = vst.msk [vmem:[%s3223_s3 + $0x8c] sm:$0xf] %vm1683_vm0, %v2040_v39  ;;  %1769 = vst.msk [vmem:[%s3223_s3 + $0x154] sm:$0xf] %vm1683_vm0, %v2090_v40  ;;  %v1219_v45 = vmax.f32 %v929_v41, 0.0  ;;  %v1269_v46 = vmax.f32 %v1129_v42, 0.0 }
 0x195   :  { %v931_v47 = vpop.f32.mrf.mxu0  ;;  %v1131_v48 = vpop.f32.mrf.mxu1 }
 0x196   :  { %v2041_v49 = vpack.c.bf16 %v1219_v45, %v1219_v45  ;;  %v2091_v50 = vpack.c.bf16 %v1269_v46, %v1269_v46  ;;  %v932_v51 = vadd.f32 %v2713_v57, %v931_v47  ;;  %v1132_v52 = vadd.f32 %v2713_v57, %v1131_v48 }
 0x197   :  { %v933_v53 = vpop.f32.mrf.mxu0  ;;  %v1133_v54 = vpop.f32.mrf.mxu1 }
 0x198   :  { %1720 = vst.msk [vmem:[%s3223_s3 + $0x90] sm:$0xf] %vm1683_vm0, %v2041_v49  ;;  %1770 = vst.msk [vmem:[%s3223_s3 + $0x158] sm:$0xf] %vm1683_vm0, %v2091_v50  ;;  %v1220_v55 = vmax.f32 %v932_v51, 0.0  ;;  %v1270_v56 = vmax.f32 %v1132_v52, 0.0 }
 0x199   :  { %v936_v58 = vpop.f32.mrf.mxu0  ;;  %v1136_v59 = vpop.f32.mrf.mxu1 }
 0x19a   :  { %v2042_v60 = vpack.c.bf16 %v1220_v55, %v1220_v55  ;;  %v2092_v61 = vpack.c.bf16 %v1270_v56, %v1270_v56  ;;  %v937_v62 = vadd.f32 %v2713_v57, %v936_v58  ;;  %v1137_v63 = vadd.f32 %v2713_v57, %v1136_v59 }
 0x19b   :  { %v938_v0 = vpop.f32.mrf.mxu0  ;;  %v1138_v1 = vpop.f32.mrf.mxu1 }
 0x19c   :  { %1721 = vst.msk [vmem:[%s3223_s3 + $0x94] sm:$0xf] %vm1683_vm0, %v2042_v60  ;;  %1771 = vst.msk [vmem:[%s3223_s3 + $0x15c] sm:$0xf] %vm1683_vm0, %v2092_v61  ;;  %v1221_v2 = vmax.f32 %v937_v62, 0.0  ;;  %v1271_v3 = vmax.f32 %v1137_v63, 0.0 }
 0x19d   :  { %v939_v4 = vpop.f32.mrf.mxu0  ;;  %v1139_v5 = vpop.f32.mrf.mxu1 }
 0x19e   :  { %v2043_v6 = vpack.c.bf16 %v1221_v2, %v1221_v2  ;;  %v2093_v7 = vpack.c.bf16 %v1271_v3, %v1271_v3  ;;  %v940_v8 = vadd.f32 %v2713_v57, %v939_v4  ;;  %v1140_v9 = vadd.f32 %v2713_v57, %v1139_v5 }
 0x19f   :  { %v941_v10 = vpop.f32.mrf.mxu0  ;;  %v1141_v11 = vpop.f32.mrf.mxu1 }
 0x1a0   :  { %1722 = vst.msk [vmem:[%s3223_s3 + $0x98] sm:$0xf] %vm1683_vm0, %v2043_v6  ;;  %1772 = vst.msk [vmem:[%s3223_s3 + $0x160] sm:$0xf] %vm1683_vm0, %v2093_v7  ;;  %v1222_v12 = vmax.f32 %v940_v8, 0.0  ;;  %v1272_v13 = vmax.f32 %v1140_v9, 0.0 }
 0x1a1   :  { %v944_v14 = vpop.f32.mrf.mxu0  ;;  %v1144_v15 = vpop.f32.mrf.mxu1 }
 0x1a2   :  { %v2044_v16 = vpack.c.bf16 %v1222_v12, %v1222_v12  ;;  %v2094_v17 = vpack.c.bf16 %v1272_v13, %v1272_v13  ;;  %v945_v18 = vadd.f32 %v2713_v57, %v944_v14  ;;  %v1145_v19 = vadd.f32 %v2713_v57, %v1144_v15 }
 0x1a3   :  { %v946_v20 = vpop.f32.mrf.mxu0  ;;  %v1146_v21 = vpop.f32.mrf.mxu1 }
 0x1a4   :  { %1723 = vst.msk [vmem:[%s3223_s3 + $0x9c] sm:$0xf] %vm1683_vm0, %v2044_v16  ;;  %1773 = vst.msk [vmem:[%s3223_s3 + $0x164] sm:$0xf] %vm1683_vm0, %v2094_v17  ;;  %v1223_v22 = vmax.f32 %v945_v18, 0.0  ;;  %v1273_v23 = vmax.f32 %v1145_v19, 0.0 }
 0x1a5   :  { %v947_v24 = vpop.f32.mrf.mxu0  ;;  %v1147_v25 = vpop.f32.mrf.mxu1 }
 0x1a6   :  { %v2045_v26 = vpack.c.bf16 %v1223_v22, %v1223_v22  ;;  %v2095_v27 = vpack.c.bf16 %v1273_v23, %v1273_v23  ;;  %v948_v28 = vadd.f32 %v2713_v57, %v947_v24  ;;  %v1148_v29 = vadd.f32 %v2713_v57, %v1147_v25 }
 0x1a7   :  { %v949_v30 = vpop.f32.mrf.mxu0  ;;  %v1149_v31 = vpop.f32.mrf.mxu1 }
 0x1a8   :  { %1724 = vst.msk [vmem:[%s3223_s3 + $0xa0] sm:$0xf] %vm1683_vm0, %v2045_v26  ;;  %1774 = vst.msk [vmem:[%s3223_s3 + $0x168] sm:$0xf] %vm1683_vm0, %v2095_v27  ;;  %v1224_v32 = vmax.f32 %v948_v28, 0.0  ;;  %v1274_v33 = vmax.f32 %v1148_v29, 0.0 }
 0x1a9   :  { %v952_v34 = vpop.f32.mrf.mxu0  ;;  %v1152_v35 = vpop.f32.mrf.mxu1 }
 0x1aa   :  { %v2046_v36 = vpack.c.bf16 %v1224_v32, %v1224_v32  ;;  %v2096_v37 = vpack.c.bf16 %v1274_v33, %v1274_v33  ;;  %v953_v38 = vadd.f32 %v2713_v57, %v952_v34  ;;  %v1153_v39 = vadd.f32 %v2713_v57, %v1152_v35  ;;  %v3140_v57 = vld [vmem:[%s3222_s2] ss:$0 sm:$0xff] }
 0x1ab   :  { %v954_v40 = vpop.f32.mrf.mxu0  ;;  %v1154_v41 = vpop.f32.mrf.mxu1 }
 0x1ac   :  { %1725 = vst.msk [vmem:[%s3223_s3 + $0xa4] sm:$0xf] %vm1683_vm0, %v2046_v36  ;;  %1775 = vst.msk [vmem:[%s3223_s3 + $0x16c] sm:$0xf] %vm1683_vm0, %v2096_v37  ;;  %v1225_v42 = vmax.f32 %v953_v38, 0.0  ;;  %v1275_v43 = vmax.f32 %v1153_v39, 0.0 }
 0x1ad   :  { %v955_v44 = vpop.f32.mrf.mxu0  ;;  %v1155_v45 = vpop.f32.mrf.mxu1 }
 0x1ae   :  { %v2047_v46 = vpack.c.bf16 %v1225_v42, %v1225_v42  ;;  %v2097_v47 = vpack.c.bf16 %v1275_v43, %v1275_v43  ;;  %v956_v48 = vadd.f32 %v3140_v57, %v955_v44  ;;  %v1156_v49 = vadd.f32 %v3140_v57, %v1155_v45 }
 0x1af   :  { %v957_v50 = vpop.f32.mrf.mxu0  ;;  %v1157_v51 = vpop.f32.mrf.mxu1 }
 0x1b0   :  { %1726 = vst.msk [vmem:[%s3223_s3 + $0xa8] sm:$0xf] %vm1683_vm0, %v2047_v46  ;;  %1776 = vst.msk [vmem:[%s3223_s3 + $0x170] sm:$0xf] %vm1683_vm0, %v2097_v47  ;;  %v1226_v52 = vmax.f32 %v956_v48, 0.0  ;;  %v1276_v53 = vmax.f32 %v1156_v49, 0.0 }
 0x1b1   :  { %v960_v54 = vpop.f32.mrf.mxu0  ;;  %v1160_v55 = vpop.f32.mrf.mxu1 }
 0x1b2   :  { %v2048_v56 = vpack.c.bf16 %v1226_v52, %v1226_v52  ;;  %v2098_v58 = vpack.c.bf16 %v1276_v53, %v1276_v53  ;;  %v961_v59 = vadd.f32 %v3140_v57, %v960_v54  ;;  %v1161_v60 = vadd.f32 %v3140_v57, %v1160_v55 }
 0x1b3   :  { %v962_v61 = vpop.f32.mrf.mxu0  ;;  %v1162_v62 = vpop.f32.mrf.mxu1 }
 0x1b4   :  { %1727 = vst.msk [vmem:[%s3223_s3 + $0xac] sm:$0xf] %vm1683_vm0, %v2048_v56  ;;  %1777 = vst.msk [vmem:[%s3223_s3 + $0x174] sm:$0xf] %vm1683_vm0, %v2098_v58  ;;  %v1227_v63 = vmax.f32 %v961_v59, 0.0  ;;  %v1277_v0 = vmax.f32 %v1161_v60, 0.0 }
 0x1b5   :  { %v963_v1 = vpop.f32.mrf.mxu0  ;;  %v1163_v2 = vpop.f32.mrf.mxu1 }
 0x1b6   :  { %v2049_v3 = vpack.c.bf16 %v1227_v63, %v1227_v63  ;;  %v2099_v4 = vpack.c.bf16 %v1277_v0, %v1277_v0  ;;  %v964_v5 = vadd.f32 %v3140_v57, %v963_v1  ;;  %v1164_v6 = vadd.f32 %v3140_v57, %v1163_v2 }
 0x1b7   :  { %v965_v7 = vpop.f32.mrf.mxu0  ;;  %v1165_v8 = vpop.f32.mrf.mxu1 }
 0x1b8   :  { %1728 = vst.msk [vmem:[%s3223_s3 + $0xb0] sm:$0xf] %vm1683_vm0, %v2049_v3  ;;  %1778 = vst.msk [vmem:[%s3223_s3 + $0x178] sm:$0xf] %vm1683_vm0, %v2099_v4  ;;  %v1228_v9 = vmax.f32 %v964_v5, 0.0  ;;  %v1278_v10 = vmax.f32 %v1164_v6, 0.0 }
 0x1b9   :  { %v968_v11 = vpop.f32.mrf.mxu0  ;;  %v1168_v12 = vpop.f32.mrf.mxu1 }
 0x1ba   :  { %v2050_v13 = vpack.c.bf16 %v1228_v9, %v1228_v9  ;;  %v2100_v14 = vpack.c.bf16 %v1278_v10, %v1278_v10  ;;  %v969_v15 = vadd.f32 %v3140_v57, %v968_v11  ;;  %v1169_v16 = vadd.f32 %v3140_v57, %v1168_v12 }
 0x1bb   :  { %v970_v17 = vpop.f32.mrf.mxu0  ;;  %v1170_v18 = vpop.f32.mrf.mxu1 }
 0x1bc   :  { %1729 = vst.msk [vmem:[%s3223_s3 + $0xb4] sm:$0xf] %vm1683_vm0, %v2050_v13  ;;  %1779 = vst.msk [vmem:[%s3223_s3 + $0x17c] sm:$0xf] %vm1683_vm0, %v2100_v14  ;;  %v1229_v19 = vmax.f32 %v969_v15, 0.0  ;;  %v1279_v20 = vmax.f32 %v1169_v16, 0.0 }
 0x1bd   :  { %v971_v21 = vpop.f32.mrf.mxu0  ;;  %v1171_v22 = vpop.f32.mrf.mxu1 }
 0x1be   :  { %v2051_v23 = vpack.c.bf16 %v1229_v19, %v1229_v19  ;;  %v2101_v24 = vpack.c.bf16 %v1279_v20, %v1279_v20  ;;  %v972_v25 = vadd.f32 %v3140_v57, %v971_v21  ;;  %v1172_v26 = vadd.f32 %v3140_v57, %v1171_v22 }
 0x1bf   :  { %v973_v27 = vpop.f32.mrf.mxu0  ;;  %v1173_v28 = vpop.f32.mrf.mxu1 }
 0x1c0   :  { %1730 = vst.msk [vmem:[%s3223_s3 + $0xb8] sm:$0xf] %vm1683_vm0, %v2051_v23  ;;  %1780 = vst.msk [vmem:[%s3223_s3 + $0x180] sm:$0xf] %vm1683_vm0, %v2101_v24  ;;  %v1230_v29 = vmax.f32 %v972_v25, 0.0  ;;  %v1280_v30 = vmax.f32 %v1172_v26, 0.0 }
 0x1c1   :  { %v976_v31 = vpop.f32.mrf.mxu0  ;;  %v1176_v32 = vpop.f32.mrf.mxu1 }
 0x1c2   :  { %v2052_v33 = vpack.c.bf16 %v1230_v29, %v1230_v29  ;;  %v2102_v34 = vpack.c.bf16 %v1280_v30, %v1280_v30  ;;  %v977_v35 = vadd.f32 %v3140_v57, %v976_v31  ;;  %v1177_v36 = vadd.f32 %v3140_v57, %v1176_v32 }
 0x1c3   :  { %v978_v37 = vpop.f32.mrf.mxu0  ;;  %v1178_v38 = vpop.f32.mrf.mxu1 }
 0x1c4   :  { %1731 = vst.msk [vmem:[%s3223_s3 + $0xbc] sm:$0xf] %vm1683_vm0, %v2052_v33  ;;  %1781 = vst.msk [vmem:[%s3223_s3 + $0x184] sm:$0xf] %vm1683_vm0, %v2102_v34  ;;  %v1231_v39 = vmax.f32 %v977_v35, 0.0  ;;  %v1281_v40 = vmax.f32 %v1177_v36, 0.0 }
 0x1c5   :  { %v979_v41 = vpop.f32.mrf.mxu0  ;;  %v1179_v42 = vpop.f32.mrf.mxu1 }
 0x1c6   :  { %v2053_v43 = vpack.c.bf16 %v1231_v39, %v1231_v39  ;;  %v2103_v44 = vpack.c.bf16 %v1281_v40, %v1281_v40  ;;  %v980_v45 = vadd.f32 %v3140_v57, %v979_v41  ;;  %v1180_v46 = vadd.f32 %v3140_v57, %v1179_v42 }
 0x1c7   :  { %v981_v47 = vpop.f32.mrf.mxu0  ;;  %v1181_v48 = vpop.f32.mrf.mxu1 }
 0x1c8   :  { %1732 = vst.msk [vmem:[%s3223_s3 + $0xc0] sm:$0xf] %vm1683_vm0, %v2053_v43  ;;  %1782 = vst.msk [vmem:[%s3223_s3 + $0x188] sm:$0xf] %vm1683_vm0, %v2103_v44  ;;  %v1232_v49 = vmax.f32 %v980_v45, 0.0  ;;  %v1282_v50 = vmax.f32 %v1180_v46, 0.0 }
 0x1ca   :  { %v2054_v51 = vpack.c.bf16 %v1232_v49, %v1232_v49  ;;  %v2104_v52 = vpack.c.bf16 %v1282_v50, %v1282_v50 }
 0x1cc   :  { %1733 = vst.msk [vmem:[%s3223_s3 + $0xc4] sm:$0xf] %vm1683_vm0, %v2054_v51  ;;  %1783 = vst.msk [vmem:[%s3223_s3 + $0x18c] sm:$0xf] %vm1683_vm0, %v2104_v52 }

// kernel: atari_dqn_forward.5
= control target key start
LH: loop header
LB: loop body
LE: loop exit
PB: predicated region body
PF: predicated region fallthrough
CT: control target
= control target key end

     0   :  { %vm880_vm0 = vcmask 519168   ;;  %vm901_vm1 = vcmask 516096   ;;  %s1637_s1 = inlined_call_operand.vmem [shape: bf16[512,64], index: 1, kind: input, shape index: {}]   ;;  %s1638_s0 = inlined_call_operand.vmem [shape: bf16[162,512], index: 0, kind: input, shape index: {}]   ;;  %s1639_s2 = inlined_call_operand.vmem [shape: f32[1,64], index: 2, kind: input, shape index: {}]   ;;  %s1640_s3 = inlined_call_operand.vmem [shape: bf16[162,64], index: 3, kind: output, shape index: {}]  }
   0x1   :  { %v1190_v0 = vld [vmem:[%s1637_s1 + $0x78] sm:$0xff]   ;;  %v1194_v4 = vld [vmem:[%s1637_s1 + $0x70] sm:$0xff]   ;;  %v1198_v8 = vld [vmem:[%s1637_s1 + $0x68] sm:$0xff]  }
   0x2   :  { %v1191_v1 = vld [vmem:[%s1637_s1 + $0xf8] sm:$0xff]   ;;  %1026 = vmatprep.subr.bf16.mxu0 %v1190_v0  ;;  %v1195_v5 = vld [vmem:[%s1637_s1 + $0xf0] sm:$0xff]   ;;  %v1199_v9 = vld [vmem:[%s1637_s1 + $0xe8] sm:$0xff]  }
   0x3   :  { %v1192_v2 = vld [vmem:[%s1637_s1 + $0x38] sm:$0xff]   ;;  %1108 = vmatprep.subr.bf16.mxu1 %v1191_v1  ;;  %v1196_v6 = vld [vmem:[%s1637_s1 + $0x30] sm:$0xff]   ;;  %v1200_v10 = vld [vmem:[%s1637_s1 + $0x28] sm:$0xff]  }
   0x4   :  { %v1193_v3 = vld [vmem:[%s1637_s1 + $0xb8] sm:$0xff]   ;;  %1027 = vmatpush3.bf16.msra.mxu0 %v1192_v2  ;;  %v1197_v7 = vld [vmem:[%s1637_s1 + $0xb0] sm:$0xff]   ;;  %v1201_v11 = vld [vmem:[%s1637_s1 + $0xa8] sm:$0xff]  }
   0x5   :  { %1109 = vmatpush3.bf16.msra.mxu1 %v1193_v3  ;;  %1028 = vmatprep.subr.bf16.mxu0 %v1194_v4  ;;  %v1202_v12 = vld [vmem:[%s1637_s1 + $0x60] sm:$0xff]   ;;  %v1206_v16 = vld [vmem:[%s1637_s1 + $0x58] sm:$0xff]   ;;  %v1210_v20 = vld [vmem:[%s1637_s1 + $0x50] sm:$0xff]  }
   0x6   :  { %1110 = vmatprep.subr.bf16.mxu1 %v1195_v5  ;;  %v1203_v13 = vld [vmem:[%s1637_s1 + $0xe0] sm:$0xff]   ;;  %v1207_v17 = vld [vmem:[%s1637_s1 + $0xd8] sm:$0xff]   ;;  %v1211_v21 = vld [vmem:[%s1637_s1 + $0xd0] sm:$0xff]  }
   0x7   :  { %v1204_v14 = vld [vmem:[%s1637_s1 + $0x20] sm:$0xff]   ;;  %v1208_v18 = vld [vmem:[%s1637_s1 + $0x18] sm:$0xff]   ;;  %v1212_v22 = vld [vmem:[%s1637_s1 + $0x10] sm:$0xff]  }
   0x8   :  { %1029 = vmatpush3.bf16.msra.mxu0 %v1196_v6  ;;  %v1205_v15 = vld [vmem:[%s1637_s1 + $0xa0] sm:$0xff]   ;;  %v1209_v19 = vld [vmem:[%s1637_s1 + $0x98] sm:$0xff]   ;;  %v1213_v23 = vld [vmem:[%s1637_s1 + $0x90] sm:$0xff]  }
   0x9   :  { %1111 = vmatpush3.bf16.msra.mxu1 %v1197_v7  ;;  %1030 = vmatprep.subr.bf16.mxu0 %v1198_v8  ;;  %v1214_v24 = vld [vmem:[%s1637_s1 + $0x48] sm:$0xff]   ;;  %v1218_v28 = vld [vmem:[%s1637_s1 + $0x40] sm:$0xff]  }
   0xa   :  { %1112 = vmatprep.subr.bf16.mxu1 %v1199_v9  ;;  %v1215_v25 = vld [vmem:[%s1637_s1 + $0xc8] sm:$0xff]   ;;  %v1219_v29 = vld [vmem:[%s1637_s1 + $0xc0] sm:$0xff]  }
   0xb   :  { %v1216_v26 = vld [vmem:[%s1637_s1 + $0x8] sm:$0xff]   ;;  %v1220_v30 = vld [vmem:[%s1637_s1] sm:$0xff]  }
   0xc   :  { %1031 = vmatpush3.bf16.msra.mxu0 %v1200_v10  ;;  %v1217_v27 = vld [vmem:[%s1637_s1 + $0x88] sm:$0xff]   ;;  %v1221_v31 = vld [vmem:[%s1637_s1 + $0x80] sm:$0xff]  }
   0xd   :  { %1113 = vmatpush3.bf16.msra.mxu1 %v1201_v11  ;;  %1032 = vmatprep.subr.bf16.mxu0 %v1202_v12  ;;  %v1222_v32 = vld [vmem:[%s1638_s0] ss:$16 sps:$4 sm:$0xff]   ;;  %v1224_v33 = vld [vmem:[%s1638_s0 + $0x4] ss:$16 sps:$4 sm:$0xff]   ;;  %v1225_v34 = vld [vmem:[%s1638_s0 + $0x8] ss:$16 sps:$4 sm:$0xff]  }
   0xe   :  { %1114 = vmatprep.subr.bf16.mxu1 %v1203_v13  ;;  %v1227_v35 = vld [vmem:[%s1638_s0 + $0xc] ss:$16 sps:$4 sm:$0xff]   ;;  %566 = vmatprep.mubr.bf16.mxu0 %v1224_v33  ;;  %v1228_v36 = vld [vmem:[%s1638_s0 + $0x24] ss:$16 sps:$4 sm:$0xff]   ;;  %v1232_v38 = vld [vmem:[%s1638_s0 + $0x20] ss:$16 sps:$4 sm:$0xff]  }
   0xf   :  { %686 = vmatprep.mubr.bf16.mxu1 %v1227_v35  ;;  %v1230_v37 = vld [vmem:[%s1638_s0 + $0x2c] ss:$16 sps:$4 sm:$0xff]   ;;  %v1233_v39 = vld [vmem:[%s1638_s0 + $0x28] ss:$16 sps:$4 sm:$0xff]   ;;  %v1234_v40 = vld [vmem:[%s1638_s0 + $0x44] ss:$16 sps:$4 sm:$0xff]  }
  0x10   :  { %1033 = vmatpush3.bf16.msra.mxu0 %v1204_v14  ;;  %v1236_v41 = vld [vmem:[%s1638_s0 + $0x4c] ss:$16 sps:$4 sm:$0xff]   ;;  %v1238_v42 = vld [vmem:[%s1638_s0 + $0x40] ss:$16 sps:$4 sm:$0xff]   ;;  %v1239_v43 = vld [vmem:[%s1638_s0 + $0x48] ss:$16 sps:$4 sm:$0xff]  }
  0x11   :  { %1115 = vmatpush3.bf16.msra.mxu1 %v1205_v15  ;;  %1034 = vmatprep.subr.bf16.mxu0 %v1206_v16  ;;  %v1240_v44 = vld [vmem:[%s1638_s0 + $0x64] ss:$16 sps:$4 sm:$0xff]   ;;  %v1242_v45 = vld [vmem:[%s1638_s0 + $0x6c] ss:$16 sps:$4 sm:$0xff]   ;;  %v1244_v46 = vld [vmem:[%s1638_s0 + $0x60] ss:$16 sps:$4 sm:$0xff]  }
  0x12   :  { %1116 = vmatprep.subr.bf16.mxu1 %v1207_v17  ;;  %v1245_v47 = vld [vmem:[%s1638_s0 + $0x68] ss:$16 sps:$4 sm:$0xff]   ;;  %v1246_v48 = vld [vmem:[%s1638_s0 + $0x84] ss:$16 sps:$4 sm:$0xff]   ;;  %v1248_v49 = vld [vmem:[%s1638_s0 + $0x8c] ss:$16 sps:$4 sm:$0xff]  }
  0x13   :  { %v1250_v50 = vld [vmem:[%s1638_s0 + $0x80] ss:$16 sps:$4 sm:$0xff]   ;;  %v1251_v51 = vld [vmem:[%s1638_s0 + $0x88] ss:$16 sps:$4 sm:$0xff]   ;;  %v1252_v52 = vld [vmem:[%s1638_s0 + $0xa4] ss:$16 sps:$4 sm:$0xff]  }
  0x14   :  { %1035 = vmatpush3.bf16.msra.mxu0 %v1208_v18  ;;  %v1254_v53 = vld [vmem:[%s1638_s0 + $0xac] ss:$16 sps:$4 sm:$0xff]   ;;  %v1256_v54 = vld [vmem:[%s1638_s0 + $0xa0] ss:$16 sps:$4 sm:$0xff]   ;;  %v1257_v55 = vld [vmem:[%s1638_s0 + $0xa8] ss:$16 sps:$4 sm:$0xff]  }
  0x15   :  { %1117 = vmatpush3.bf16.msra.mxu1 %v1209_v19  ;;  %1036 = vmatprep.subr.bf16.mxu0 %v1210_v20  ;;  %v1258_v56 = vld [vmem:[%s1638_s0 + $0xc4] ss:$16 sps:$4 sm:$0xff]   ;;  %v1260_v57 = vld [vmem:[%s1638_s0 + $0xcc] ss:$16 sps:$4 sm:$0xff]   ;;  %v1262_v58 = vld [vmem:[%s1638_s0 + $0xc0] ss:$16 sps:$4 sm:$0xff]  }
  0x16   :  { %1118 = vmatprep.subr.bf16.mxu1 %v1211_v21  ;;  %v1263_v59 = vld [vmem:[%s1638_s0 + $0xc8] ss:$16 sps:$4 sm:$0xff]   ;;  %v1264_v60 = vld [vmem:[%s1638_s0 + $0xe4] ss:$16 sps:$4 sm:$0xff]   ;;  %v1266_v61 = vld [vmem:[%s1638_s0 + $0xec] ss:$16 sps:$4 sm:$0xff]  }
  0x17   :  { %v1268_v62 = vld [vmem:[%s1638_s0 + $0xe0] ss:$16 sps:$4 sm:$0xff]   ;;  %v1269_v63 = vld [vmem:[%s1638_s0 + $0xe8] ss:$16 sps:$4 sm:$0xff]   ;;  %v1270_v0 = vld [vmem:[%s1638_s0 + $0x104] ss:$16 sps:$4 sm:$0xff]  }
  0x18   :  { %1037 = vmatpush3.bf16.msra.mxu0 %v1212_v22  ;;  %v1272_v1 = vld [vmem:[%s1638_s0 + $0x10c] ss:$16 sps:$4 sm:$0xff]   ;;  %v1274_v2 = vld [vmem:[%s1638_s0 + $0x100] ss:$16 sps:$4 sm:$0xff]   ;;  %v1275_v3 = vld [vmem:[%s1638_s0 + $0x108] ss:$16 sps:$4 sm:$0xff]  }
  0x19   :  { %1119 = vmatpush3.bf16.msra.mxu1 %v1213_v23  ;;  %1038 = vmatprep.subr.bf16.mxu0 %v1214_v24  ;;  %v1276_v4 = vld [vmem:[%s1638_s0 + $0x124] ss:$16 sps:$4 sm:$0xff]   ;;  %v1278_v5 = vld [vmem:[%s1638_s0 + $0x12c] ss:$16 sps:$4 sm:$0xff]   ;;  %v1280_v8 = vld [vmem:[%s1638_s0 + $0x120] ss:$16 sps:$4 sm:$0xff]  }
  0x1a   :  { %1120 = vmatprep.subr.bf16.mxu1 %v1215_v25  ;;  %v55_v6 = vld [vmem:[%s1638_s0 + $0x140] sm:$0x11]  ;;  %v56_v7 = vld [vmem:[%s1638_s0 + $0x148] sm:$0x11] }
  0x1b   :  { %v1281_v9 = vld [vmem:[%s1638_s0 + $0x128] ss:$16 sps:$4 sm:$0xff]   ;;  %v949_v10 = vcombine.high %v55_v6, %v55_v6  ;;  %v951_v11 = vcombine.high %v56_v7, %v56_v7  ;;  %v948_v12 = vcombine.low %v55_v6, %v55_v6  ;;  %v950_v13 = vcombine.low %v56_v7, %v56_v7  ;;  %v1531_v16 = vld [vmem:[%s1639_s2] ss:$0 sm:$0xff] }
  0x1c   :  { %1039 = vmatpush3.bf16.msra.mxu0 %v1216_v26 }
  0x1d   :  { %1121 = vmatpush3.bf16.msra.mxu1 %v1217_v27  ;;  %1040 = vmatprep.subr.bf16.mxu0 %v1218_v28 }
  0x1e   :  { %1122 = vmatprep.subr.bf16.mxu1 %v1219_v29 }
  0x20   :  { %1041 = vmatpush3.bf16.msra.mxu0 %v1220_v30 }
  0x21   :  { %1123 = vmatpush3.bf16.msra.mxu1 %v1221_v31 }
  0x23   :  { %567 = vmatmul.mubr.bf16.vlgmr.msra.gmra.mxu0 %v1222_v32 }
  0x24   :  { %687 = vmatmul.mubr.bf16.vlgmr.msra.gmra.mxu1 %v1225_v34  ;;  %574 = vmatprep.mubr.bf16.mxu0 %v1228_v36 }
  0x25   :  { %694 = vmatprep.mubr.bf16.mxu1 %v1230_v37 }
  0x2b   :  { %575 = vmatmul.mubr.bf16.gmra.mxu0 %v1232_v38 }
  0x2c   :  { %695 = vmatmul.mubr.bf16.gmra.mxu1 %v1233_v39  ;;  %582 = vmatprep.mubr.bf16.mxu0 %v1234_v40 }
  0x2d   :  { %702 = vmatprep.mubr.bf16.mxu1 %v1236_v41 }
  0x33   :  { %583 = vmatmul.mubr.bf16.gmra.mxu0 %v1238_v42 }
  0x34   :  { %703 = vmatmul.mubr.bf16.gmra.mxu1 %v1239_v43  ;;  %590 = vmatprep.mubr.bf16.mxu0 %v1240_v44 }
  0x35   :  { %710 = vmatprep.mubr.bf16.mxu1 %v1242_v45 }
  0x3b   :  { %591 = vmatmul.mubr.bf16.gmra.mxu0 %v1244_v46 }
  0x3c   :  { %711 = vmatmul.mubr.bf16.gmra.mxu1 %v1245_v47  ;;  %598 = vmatprep.mubr.bf16.mxu0 %v1246_v48 }
  0x3d   :  { %718 = vmatprep.mubr.bf16.mxu1 %v1248_v49 }
  0x43   :  { %599 = vmatmul.mubr.bf16.gmra.mxu0 %v1250_v50 }
  0x44   :  { %719 = vmatmul.mubr.bf16.gmra.mxu1 %v1251_v51  ;;  %606 = vmatprep.mubr.bf16.mxu0 %v1252_v52 }
  0x45   :  { %726 = vmatprep.mubr.bf16.mxu1 %v1254_v53 }
  0x4b   :  { %607 = vmatmul.mubr.bf16.gmra.mxu0 %v1256_v54 }
  0x4c   :  { %727 = vmatmul.mubr.bf16.gmra.mxu1 %v1257_v55  ;;  %614 = vmatprep.mubr.bf16.mxu0 %v1258_v56 }
  0x4d   :  { %734 = vmatprep.mubr.bf16.mxu1 %v1260_v57 }
  0x53   :  { %615 = vmatmul.mubr.bf16.gmra.mxu0 %v1262_v58 }
  0x54   :  { %735 = vmatmul.mubr.bf16.gmra.mxu1 %v1263_v59  ;;  %622 = vmatprep.mubr.bf16.mxu0 %v1264_v60 }
  0x55   :  { %742 = vmatprep.mubr.bf16.mxu1 %v1266_v61 }
  0x5b   :  { %623 = vmatmul.mubr.bf16.gmra.mxu0 %v1268_v62 }
  0x5c   :  { %743 = vmatmul.mubr.bf16.gmra.mxu1 %v1269_v63  ;;  %630 = vmatprep.mubr.bf16.mxu0 %v1270_v0 }
  0x5d   :  { %750 = vmatprep.mubr.bf16.mxu1 %v1272_v1 }
  0x63   :  { %631 = vmatmul.mubr.bf16.gmra.mxu0 %v1274_v2 }
  0x64   :  { %751 = vmatmul.mubr.bf16.gmra.mxu1 %v1275_v3  ;;  %638 = vmatprep.mubr.bf16.mxu0 %v1276_v4 }
  0x65   :  { %758 = vmatprep.mubr.bf16.mxu1 %v1278_v5 }
  0x6b   :  { %639 = vmatmul.mubr.bf16.gmra.mxu0 %v1280_v8 }
  0x6c   :  { %759 = vmatmul.mubr.bf16.gmra.mxu1 %v1281_v9  ;;  %646 = vmatprep.mubr.bf16.mxu0 %v949_v10 }
  0x6d   :  { %766 = vmatprep.mubr.bf16.mxu1 %v951_v11 }
  0x73   :  { %647 = vmatmul.mubr.bf16.gmra.mxu0 %v948_v12 }
  0x74   :  { %767 = vmatmul.mubr.bf16.gmra.mxu1 %v950_v13 }
  0xe3   :  { %v1042_v14 = vpop.f32.mrf.mxu0 }
  0xe4   :  { %v1124_v15 = vpop.f32.mrf.mxu1 }
  0xe5   :  { %v1043_v17 = vpop.f32.mrf.mxu0 }
  0xe6   :  { %v1044_v18 = vadd.f32 %v1043_v17, %v1042_v14  ;;  %v1125_v19 = vpop.f32.mrf.mxu1 }
  0xe7   :  { %v1045_v20 = vpop.f32.mrf.mxu0  ;;  %v1126_v22 = vadd.f32 %v1125_v19, %v1124_v15 }
  0xe8   :  { %v569_v21 = vadd.f32 %v1044_v18, %v1531_v16  ;;  %v1127_v23 = vpop.f32.mrf.mxu1 }
  0xe9   :  { %v1046_v24 = vpop.f32.mrf.mxu0 }
  0xea   :  { %v689_v25 = vadd.f32 %v1126_v22, %v569_v21  ;;  %v1047_v26 = vadd.f32 %v1046_v24, %v1045_v20  ;;  %v1128_v27 = vpop.f32.mrf.mxu1 }
  0xeb   :  { %v1048_v28 = vpop.f32.mrf.mxu0  ;;  %v1129_v31 = vadd.f32 %v1128_v27, %v1127_v23 }
  0xec   :  { %v774_v29 = vmax.f32 %v689_v25, 0.0  ;;  %v572_v30 = vadd.f32 %v1047_v26, %v1531_v16  ;;  %v1130_v32 = vpop.f32.mrf.mxu1 }
  0xed   :  { %v1049_v33 = vpop.f32.mrf.mxu0 }
  0xee   :  { %v1005_v34 = vpack.c.bf16 %v774_v29, %v774_v29  ;;  %v692_v35 = vadd.f32 %v1129_v31, %v572_v30  ;;  %v1050_v36 = vadd.f32 %v1049_v33, %v1048_v28  ;;  %v1131_v37 = vpop.f32.mrf.mxu1 }
  0xef   :  { %v1051_v38 = vpop.f32.mrf.mxu0  ;;  %v1132_v41 = vadd.f32 %v1131_v37, %v1130_v32 }
  0xf0   :  { %881 = vst.msk [vmem:[%s1640_s3] sm:$0xf] %vm880_vm0, %v1005_v34  ;;  %v775_v39 = vmax.f32 %v692_v35, 0.0  ;;  %v577_v40 = vadd.f32 %v1050_v36, %v1531_v16  ;;  %v1133_v42 = vpop.f32.mrf.mxu1 }
  0xf1   :  { %v1052_v43 = vpop.f32.mrf.mxu0 }
  0xf2   :  { %v1006_v44 = vpack.c.bf16 %v775_v39, %v775_v39  ;;  %v697_v45 = vadd.f32 %v1132_v41, %v577_v40  ;;  %v1053_v46 = vadd.f32 %v1052_v43, %v1051_v38  ;;  %v1134_v47 = vpop.f32.mrf.mxu1 }
  0xf3   :  { %v1054_v48 = vpop.f32.mrf.mxu0  ;;  %v1135_v51 = vadd.f32 %v1134_v47, %v1133_v42 }
  0xf4   :  { %882 = vst.msk [vmem:[%s1640_s3 + $0x4] sm:$0xf] %vm880_vm0, %v1006_v44  ;;  %v776_v49 = vmax.f32 %v697_v45, 0.0  ;;  %v580_v50 = vadd.f32 %v1053_v46, %v1531_v16  ;;  %v1136_v52 = vpop.f32.mrf.mxu1 }
  0xf5   :  { %v1055_v53 = vpop.f32.mrf.mxu0 }
  0xf6   :  { %v1007_v54 = vpack.c.bf16 %v776_v49, %v776_v49  ;;  %v700_v55 = vadd.f32 %v1135_v51, %v580_v50  ;;  %v1056_v56 = vadd.f32 %v1055_v53, %v1054_v48  ;;  %v1137_v57 = vpop.f32.mrf.mxu1 }
  0xf7   :  { %v1057_v58 = vpop.f32.mrf.mxu0  ;;  %v1138_v61 = vadd.f32 %v1137_v57, %v1136_v52 }
  0xf8   :  { %883 = vst.msk [vmem:[%s1640_s3 + $0x8] sm:$0xf] %vm880_vm0, %v1007_v54  ;;  %v777_v59 = vmax.f32 %v700_v55, 0.0  ;;  %v585_v60 = vadd.f32 %v1056_v56, %v1531_v16  ;;  %v1139_v62 = vpop.f32.mrf.mxu1 }
  0xf9   :  { %v1058_v63 = vpop.f32.mrf.mxu0 }
  0xfa   :  { %v1008_v0 = vpack.c.bf16 %v777_v59, %v777_v59  ;;  %v705_v1 = vadd.f32 %v1138_v61, %v585_v60  ;;  %v1059_v2 = vadd.f32 %v1058_v63, %v1057_v58  ;;  %v1140_v3 = vpop.f32.mrf.mxu1 }
  0xfb   :  { %v1060_v4 = vpop.f32.mrf.mxu0  ;;  %v1141_v7 = vadd.f32 %v1140_v3, %v1139_v62 }
  0xfc   :  { %884 = vst.msk [vmem:[%s1640_s3 + $0xc] sm:$0xf] %vm880_vm0, %v1008_v0  ;;  %v778_v5 = vmax.f32 %v705_v1, 0.0  ;;  %v588_v6 = vadd.f32 %v1059_v2, %v1531_v16  ;;  %v1142_v8 = vpop.f32.mrf.mxu1 }
  0xfd   :  { %v1061_v9 = vpop.f32.mrf.mxu0 }
  0xfe   :  { %v1009_v10 = vpack.c.bf16 %v778_v5, %v778_v5  ;;  %v708_v11 = vadd.f32 %v1141_v7, %v588_v6  ;;  %v1062_v12 = vadd.f32 %v1061_v9, %v1060_v4  ;;  %v1143_v13 = vpop.f32.mrf.mxu1 }
  0xff   :  { %v1063_v14 = vpop.f32.mrf.mxu0  ;;  %v1144_v18 = vadd.f32 %v1143_v13, %v1142_v8 }
 0x100   :  { %885 = vst.msk [vmem:[%s1640_s3 + $0x10] sm:$0xf] %vm880_vm0, %v1009_v10  ;;  %v779_v15 = vmax.f32 %v708_v11, 0.0  ;;  %v593_v17 = vadd.f32 %v1062_v12, %v1531_v16  ;;  %v1145_v19 = vpop.f32.mrf.mxu1 }
 0x101   :  { %v1064_v20 = vpop.f32.mrf.mxu0 }
 0x102   :  { %v1010_v21 = vpack.c.bf16 %v779_v15, %v779_v15  ;;  %v713_v22 = vadd.f32 %v1144_v18, %v593_v17  ;;  %v1065_v23 = vadd.f32 %v1064_v20, %v1063_v14  ;;  %v1146_v24 = vpop.f32.mrf.mxu1 }
 0x103   :  { %v1066_v25 = vpop.f32.mrf.mxu0  ;;  %v1147_v28 = vadd.f32 %v1146_v24, %v1145_v19 }
 0x104   :  { %886 = vst.msk [vmem:[%s1640_s3 + $0x14] sm:$0xf] %vm880_vm0, %v1010_v21  ;;  %v780_v26 = vmax.f32 %v713_v22, 0.0  ;;  %v596_v27 = vadd.f32 %v1065_v23, %v1531_v16  ;;  %v1148_v29 = vpop.f32.mrf.mxu1 }
 0x105   :  { %v1067_v30 = vpop.f32.mrf.mxu0 }
 0x106   :  { %v1011_v31 = vpack.c.bf16 %v780_v26, %v780_v26  ;;  %v716_v32 = vadd.f32 %v1147_v28, %v596_v27  ;;  %v1068_v33 = vadd.f32 %v1067_v30, %v1066_v25  ;;  %v1149_v34 = vpop.f32.mrf.mxu1 }
 0x107   :  { %v1069_v35 = vpop.f32.mrf.mxu0  ;;  %v1150_v38 = vadd.f32 %v1149_v34, %v1148_v29 }
 0x108   :  { %887 = vst.msk [vmem:[%s1640_s3 + $0x18] sm:$0xf] %vm880_vm0, %v1011_v31  ;;  %v781_v36 = vmax.f32 %v716_v32, 0.0  ;;  %v601_v37 = vadd.f32 %v1068_v33, %v1531_v16  ;;  %v1151_v39 = vpop.f32.mrf.mxu1 }
 0x109   :  { %v1070_v40 = vpop.f32.mrf.mxu0 }
 0x10a   :  { %v1012_v41 = vpack.c.bf16 %v781_v36, %v781_v36  ;;  %v721_v42 = vadd.f32 %v1150_v38, %v601_v37  ;;  %v1071_v43 = vadd.f32 %v1070_v40, %v1069_v35  ;;  %v1152_v44 = vpop.f32.mrf.mxu1 }
 0x10b   :  { %v1072_v45 = vpop.f32.mrf.mxu0  ;;  %v1153_v48 = vadd.f32 %v1152_v44, %v1151_v39 }
 0x10c   :  { %888 = vst.msk [vmem:[%s1640_s3 + $0x1c] sm:$0xf] %vm880_vm0, %v1012_v41  ;;  %v782_v46 = vmax.f32 %v721_v42, 0.0  ;;  %v604_v47 = vadd.f32 %v1071_v43, %v1531_v16  ;;  %v1154_v49 = vpop.f32.mrf.mxu1 }
 0x10d   :  { %v1073_v50 = vpop.f32.mrf.mxu0 }
 0x10e   :  { %v1013_v51 = vpack.c.bf16 %v782_v46, %v782_v46  ;;  %v724_v52 = vadd.f32 %v1153_v48, %v604_v47  ;;  %v1074_v53 = vadd.f32 %v1073_v50, %v1072_v45  ;;  %v1155_v54 = vpop.f32.mrf.mxu1 }
 0x10f   :  { %v1075_v55 = vpop.f32.mrf.mxu0  ;;  %v1156_v58 = vadd.f32 %v1155_v54, %v1154_v49 }
 0x110   :  { %889 = vst.msk [vmem:[%s1640_s3 + $0x20] sm:$0xf] %vm880_vm0, %v1013_v51  ;;  %v783_v56 = vmax.f32 %v724_v52, 0.0  ;;  %v609_v57 = vadd.f32 %v1074_v53, %v1531_v16  ;;  %v1157_v59 = vpop.f32.mrf.mxu1 }
 0x111   :  { %v1076_v60 = vpop.f32.mrf.mxu0 }
 0x112   :  { %v1014_v61 = vpack.c.bf16 %v783_v56, %v783_v56  ;;  %v729_v62 = vadd.f32 %v1156_v58, %v609_v57  ;;  %v1077_v63 = vadd.f32 %v1076_v60, %v1075_v55  ;;  %v1158_v0 = vpop.f32.mrf.mxu1 }
 0x113   :  { %v1078_v1 = vpop.f32.mrf.mxu0  ;;  %v1159_v4 = vadd.f32 %v1158_v0, %v1157_v59 }
 0x114   :  { %890 = vst.msk [vmem:[%s1640_s3 + $0x24] sm:$0xf] %vm880_vm0, %v1014_v61  ;;  %v784_v2 = vmax.f32 %v729_v62, 0.0  ;;  %v612_v3 = vadd.f32 %v1077_v63, %v1531_v16  ;;  %v1160_v5 = vpop.f32.mrf.mxu1 }
 0x115   :  { %v1079_v6 = vpop.f32.mrf.mxu0 }
 0x116   :  { %v1015_v7 = vpack.c.bf16 %v784_v2, %v784_v2  ;;  %v732_v8 = vadd.f32 %v1159_v4, %v612_v3  ;;  %v1080_v9 = vadd.f32 %v1079_v6, %v1078_v1  ;;  %v1161_v10 = vpop.f32.mrf.mxu1 }
 0x117   :  { %v1081_v11 = vpop.f32.mrf.mxu0  ;;  %v1162_v14 = vadd.f32 %v1161_v10, %v1160_v5 }
 0x118   :  { %891 = vst.msk [vmem:[%s1640_s3 + $0x28] sm:$0xf] %vm880_vm0, %v1015_v7  ;;  %v785_v12 = vmax.f32 %v732_v8, 0.0  ;;  %v617_v13 = vadd.f32 %v1080_v9, %v1531_v16  ;;  %v1163_v15 = vpop.f32.mrf.mxu1 }
 0x119   :  { %v1082_v17 = vpop.f32.mrf.mxu0 }
 0x11a   :  { %v1016_v18 = vpack.c.bf16 %v785_v12, %v785_v12  ;;  %v737_v19 = vadd.f32 %v1162_v14, %v617_v13  ;;  %v1083_v20 = vadd.f32 %v1082_v17, %v1081_v11  ;;  %v1164_v21 = vpop.f32.mrf.mxu1 }
 0x11b   :  { %v1084_v22 = vpop.f32.mrf.mxu0  ;;  %v1165_v25 = vadd.f32 %v1164_v21, %v1163_v15 }
 0x11c   :  { %892 = vst.msk [vmem:[%s1640_s3 + $0x2c] sm:$0xf] %vm880_vm0, %v1016_v18  ;;  %v786_v23 = vmax.f32 %v737_v19, 0.0  ;;  %v620_v24 = vadd.f32 %v1083_v20, %v1531_v16  ;;  %v1166_v26 = vpop.f32.mrf.mxu1 }
 0x11d   :  { %v1085_v27 = vpop.f32.mrf.mxu0 }
 0x11e   :  { %v1017_v28 = vpack.c.bf16 %v786_v23, %v786_v23  ;;  %v740_v29 = vadd.f32 %v1165_v25, %v620_v24  ;;  %v1086_v30 = vadd.f32 %v1085_v27, %v1084_v22  ;;  %v1167_v31 = vpop.f32.mrf.mxu1 }
 0x11f   :  { %v1087_v32 = vpop.f32.mrf.mxu0  ;;  %v1168_v35 = vadd.f32 %v1167_v31, %v1166_v26 }
 0x120   :  { %893 = vst.msk [vmem:[%s1640_s3 + $0x30] sm:$0xf] %vm880_vm0, %v1017_v28  ;;  %v787_v33 = vmax.f32 %v740_v29, 0.0  ;;  %v625_v34 = vadd.f32 %v1086_v30, %v1531_v16  ;;  %v1169_v36 = vpop.f32.mrf.mxu1 }
 0x121   :  { %v1088_v37 = vpop.f32.mrf.mxu0 }
 0x122   :  { %v1018_v38 = vpack.c.bf16 %v787_v33, %v787_v33  ;;  %v745_v39 = vadd.f32 %v1168_v35, %v625_v34  ;;  %v1089_v40 = vadd.f32 %v1088_v37, %v1087_v32  ;;  %v1170_v41 = vpop.f32.mrf.mxu1 }
 0x123   :  { %v1090_v42 = vpop.f32.mrf.mxu0  ;;  %v1171_v45 = vadd.f32 %v1170_v41, %v1169_v36 }
 0x124   :  { %894 = vst.msk [vmem:[%s1640_s3 + $0x34] sm:$0xf] %vm880_vm0, %v1018_v38  ;;  %v788_v43 = vmax.f32 %v745_v39, 0.0  ;;  %v628_v44 = vadd.f32 %v1089_v40, %v1531_v16  ;;  %v1172_v46 = vpop.f32.mrf.mxu1 }
 0x125   :  { %v1091_v47 = vpop.f32.mrf.mxu0 }
 0x126   :  { %v1019_v48 = vpack.c.bf16 %v788_v43, %v788_v43  ;;  %v748_v49 = vadd.f32 %v1171_v45, %v628_v44  ;;  %v1092_v50 = vadd.f32 %v1091_v47, %v1090_v42  ;;  %v1173_v51 = vpop.f32.mrf.mxu1 }
 0x127   :  { %v1093_v52 = vpop.f32.mrf.mxu0  ;;  %v1174_v55 = vadd.f32 %v1173_v51, %v1172_v46 }
 0x128   :  { %895 = vst.msk [vmem:[%s1640_s3 + $0x38] sm:$0xf] %vm880_vm0, %v1019_v48  ;;  %v789_v53 = vmax.f32 %v748_v49, 0.0  ;;  %v633_v54 = vadd.f32 %v1092_v50, %v1531_v16  ;;  %v1175_v56 = vpop.f32.mrf.mxu1 }
 0x129   :  { %v1094_v57 = vpop.f32.mrf.mxu0 }
 0x12a   :  { %v1020_v58 = vpack.c.bf16 %v789_v53, %v789_v53  ;;  %v753_v59 = vadd.f32 %v1174_v55, %v633_v54  ;;  %v1095_v60 = vadd.f32 %v1094_v57, %v1093_v52  ;;  %v1176_v61 = vpop.f32.mrf.mxu1 }
 0x12b   :  { %v1096_v62 = vpop.f32.mrf.mxu0  ;;  %v1177_v1 = vadd.f32 %v1176_v61, %v1175_v56 }
 0x12c   :  { %896 = vst.msk [vmem:[%s1640_s3 + $0x3c] sm:$0xf] %vm880_vm0, %v1020_v58  ;;  %v790_v63 = vmax.f32 %v753_v59, 0.0  ;;  %v636_v0 = vadd.f32 %v1095_v60, %v1531_v16  ;;  %v1178_v2 = vpop.f32.mrf.mxu1 }
 0x12d   :  { %v1097_v3 = vpop.f32.mrf.mxu0 }
 0x12e   :  { %v1021_v4 = vpack.c.bf16 %v790_v63, %v790_v63  ;;  %v756_v5 = vadd.f32 %v1177_v1, %v636_v0  ;;  %v1098_v6 = vadd.f32 %v1097_v3, %v1096_v62  ;;  %v1179_v7 = vpop.f32.mrf.mxu1 }
 0x12f   :  { %v1099_v8 = vpop.f32.mrf.mxu0  ;;  %v1180_v11 = vadd.f32 %v1179_v7, %v1178_v2 }
 0x130   :  { %897 = vst.msk [vmem:[%s1640_s3 + $0x40] sm:$0xf] %vm880_vm0, %v1021_v4  ;;  %v791_v9 = vmax.f32 %v756_v5, 0.0  ;;  %v641_v10 = vadd.f32 %v1098_v6, %v1531_v16  ;;  %v1181_v12 = vpop.f32.mrf.mxu1 }
 0x131   :  { %v1100_v13 = vpop.f32.mrf.mxu0 }
 0x132   :  { %v1022_v14 = vpack.c.bf16 %v791_v9, %v791_v9  ;;  %v761_v15 = vadd.f32 %v1180_v11, %v641_v10  ;;  %v1101_v17 = vadd.f32 %v1100_v13, %v1099_v8  ;;  %v1182_v18 = vpop.f32.mrf.mxu1 }
 0x133   :  { %v1102_v19 = vpop.f32.mrf.mxu0  ;;  %v1183_v22 = vadd.f32 %v1182_v18, %v1181_v12 }
 0x134   :  { %898 = vst.msk [vmem:[%s1640_s3 + $0x44] sm:$0xf] %vm880_vm0, %v1022_v14  ;;  %v792_v20 = vmax.f32 %v761_v15, 0.0  ;;  %v644_v21 = vadd.f32 %v1101_v17, %v1531_v16  ;;  %v1184_v23 = vpop.f32.mrf.mxu1 }
 0x135   :  { %v1103_v24 = vpop.f32.mrf.mxu0 }
 0x136   :  { %v1023_v25 = vpack.c.bf16 %v792_v20, %v792_v20  ;;  %v764_v26 = vadd.f32 %v1183_v22, %v644_v21  ;;  %v1104_v27 = vadd.f32 %v1103_v24, %v1102_v19  ;;  %v1185_v28 = vpop.f32.mrf.mxu1 }
 0x137   :  { %v1105_v29 = vpop.f32.mrf.mxu0  ;;  %v1186_v32 = vadd.f32 %v1185_v28, %v1184_v23 }
 0x138   :  { %899 = vst.msk [vmem:[%s1640_s3 + $0x48] sm:$0xf] %vm880_vm0, %v1023_v25  ;;  %v793_v30 = vmax.f32 %v764_v26, 0.0  ;;  %v649_v31 = vadd.f32 %v1104_v27, %v1531_v16  ;;  %v1187_v33 = vpop.f32.mrf.mxu1 }
 0x139   :  { %v1106_v34 = vpop.f32.mrf.mxu0 }
 0x13a   :  { %v1024_v35 = vpack.c.bf16 %v793_v30, %v793_v30  ;;  %v769_v36 = vadd.f32 %v1186_v32, %v649_v31  ;;  %v1188_v37 = vpop.f32.mrf.mxu1 }
 0x13c   :  { %900 = vst.msk [vmem:[%s1640_s3 + $0x4c] sm:$0xf] %vm880_vm0, %v1024_v35  ;;  %v794_v38 = vmax.f32 %v769_v36, 0.0 }
 0x13e   :  { %v1025_v39 = vpack.c.bf16 %v794_v38, %v794_v38 }
 0x140   :  { %902 = vst.msk [vmem:[%s1640_s3 + $0x50] sm:$0x1] %vm901_vm1, %v1025_v39 }

// kernel: atari_dqn_forward.6
= control target key start
LH: loop header
LB: loop body
LE: loop exit
PB: predicated region body
PF: predicated region fallthrough
CT: control target
= control target key end

     0   :  { %v1248_v34 = vmov 0.0   ;;  %vm1249_vm0 = vmmov 0   ;;  %vm516_vm1 = vcmask 523264   ;;  %vm868_vm2 = vcmask 519168   ;;  %s1647_s1 = inlined_call_operand.vmem [shape: bf16[576,64], index: 1, kind: input, shape index: {}]   ;;  %s1648_s0 = inlined_call_operand.vmem [shape: bf16[98,576], index: 0, kind: input, shape index: {}]   ;;  %s1649_s2 = inlined_call_operand.vmem [shape: f32[1,64], index: 2, kind: input, shape index: {}]   ;;  %s1650_s3 = inlined_call_operand.vmem [shape: bf16[98,64], index: 3, kind: output, shape index: {}]  }
   0x1   :  { %v1165_v0 = vld [vmem:[%s1647_s1 + $0x78] sm:$0xff]   ;;  %v1169_v4 = vld [vmem:[%s1647_s1 + $0x70] sm:$0xff]   ;;  %v1173_v8 = vld [vmem:[%s1647_s1 + $0x68] sm:$0xff]   ;;  %vm881_vm3 = vcmask 516096  }
   0x2   :  { %v1166_v1 = vld [vmem:[%s1647_s1 + $0xf8] sm:$0xff]   ;;  %992 = vmatprep.subr.bf16.mxu0 %v1165_v0  ;;  %v1170_v5 = vld [vmem:[%s1647_s1 + $0xf0] sm:$0xff]   ;;  %v1174_v9 = vld [vmem:[%s1647_s1 + $0xe8] sm:$0xff]  }
   0x3   :  { %v1167_v2 = vld [vmem:[%s1647_s1 + $0x38] sm:$0xff]   ;;  %1050 = vmatprep.subr.bf16.mxu1 %v1166_v1  ;;  %v1171_v6 = vld [vmem:[%s1647_s1 + $0x30] sm:$0xff]   ;;  %v1175_v10 = vld [vmem:[%s1647_s1 + $0x28] sm:$0xff]  }
   0x4   :  { %v1168_v3 = vld [vmem:[%s1647_s1 + $0xb8] sm:$0xff]   ;;  %993 = vmatpush3.bf16.msra.mxu0 %v1167_v2  ;;  %v1172_v7 = vld [vmem:[%s1647_s1 + $0xb0] sm:$0xff]   ;;  %v1176_v11 = vld [vmem:[%s1647_s1 + $0xa8] sm:$0xff]  }
   0x5   :  { %1051 = vmatpush3.bf16.msra.mxu1 %v1168_v3  ;;  %994 = vmatprep.subr.bf16.mxu0 %v1169_v4  ;;  %v1177_v12 = vld [vmem:[%s1647_s1 + $0x60] sm:$0xff]   ;;  %v1181_v16 = vld [vmem:[%s1647_s1 + $0x58] sm:$0xff]   ;;  %v1185_v20 = vld [vmem:[%s1647_s1 + $0x50] sm:$0xff]  }
   0x6   :  { %1052 = vmatprep.subr.bf16.mxu1 %v1170_v5  ;;  %v1178_v13 = vld [vmem:[%s1647_s1 + $0xe0] sm:$0xff]   ;;  %v1182_v17 = vld [vmem:[%s1647_s1 + $0xd8] sm:$0xff]   ;;  %v1186_v21 = vld [vmem:[%s1647_s1 + $0xd0] sm:$0xff]  }
   0x7   :  { %v1179_v14 = vld [vmem:[%s1647_s1 + $0x20] sm:$0xff]   ;;  %v1183_v18 = vld [vmem:[%s1647_s1 + $0x18] sm:$0xff]   ;;  %v1187_v22 = vld [vmem:[%s1647_s1 + $0x10] sm:$0xff]  }
   0x8   :  { %995 = vmatpush3.bf16.msra.mxu0 %v1171_v6  ;;  %v1180_v15 = vld [vmem:[%s1647_s1 + $0xa0] sm:$0xff]   ;;  %v1184_v19 = vld [vmem:[%s1647_s1 + $0x98] sm:$0xff]   ;;  %v1188_v23 = vld [vmem:[%s1647_s1 + $0x90] sm:$0xff]  }
   0x9   :  { %1053 = vmatpush3.bf16.msra.mxu1 %v1172_v7  ;;  %996 = vmatprep.subr.bf16.mxu0 %v1173_v8  ;;  %v1189_v24 = vld [vmem:[%s1647_s1 + $0x48] sm:$0xff]   ;;  %v1193_v28 = vld [vmem:[%s1647_s1 + $0x40] sm:$0xff]   ;;  %v1203_v37 = vld [vmem:[%s1647_s1 + $0x118] sm:$0xff]  }
   0xa   :  { %1054 = vmatprep.subr.bf16.mxu1 %v1174_v9  ;;  %v1190_v25 = vld [vmem:[%s1647_s1 + $0xc8] sm:$0xff]   ;;  %v1194_v29 = vld [vmem:[%s1647_s1 + $0xc0] sm:$0xff]   ;;  %v1214_v43 = vld [vmem:[%s1647_s1 + $0x110] sm:$0xff]  }
   0xb   :  { %v1191_v26 = vld [vmem:[%s1647_s1 + $0x8] sm:$0xff]   ;;  %v1195_v30 = vld [vmem:[%s1647_s1] sm:$0xff]   ;;  %v1212_v44 = vld [vmem:[%s1648_s0 + $0x5c] ss:$20 sps:$4 sm:$0xff]  }
   0xc   :  { %997 = vmatpush3.bf16.msra.mxu0 %v1175_v10  ;;  %v1192_v27 = vld [vmem:[%s1647_s1 + $0x88] sm:$0xff]   ;;  %v1196_v31 = vld [vmem:[%s1647_s1 + $0x80] sm:$0xff]   ;;  %v1217_v48 = vld [vmem:[%s1648_s0 + $0x7c] ss:$20 sps:$4 sm:$0xff]  }
   0xd   :  { %1055 = vmatpush3.bf16.msra.mxu1 %v1176_v11  ;;  %998 = vmatprep.subr.bf16.mxu0 %v1177_v12  ;;  %v1197_v32 = vld [vmem:[%s1648_s0] ss:$20 sps:$4 sm:$0xff]   ;;  %v1199_v33 = vld [vmem:[%s1648_s0 + $0x4] ss:$20 sps:$4 sm:$0xff]   ;;  %v1200_v35 = vld [vmem:[%s1648_s0 + $0x8] ss:$20 sps:$4 sm:$0xff]  }
   0xe   :  { %1056 = vmatprep.subr.bf16.mxu1 %v1178_v13  ;;  %v1202_v36 = vld [vmem:[%s1648_s0 + $0xc] ss:$20 sps:$4 sm:$0xff]   ;;  %570 = vmatprep.mubr.bf16.mxu0 %v1199_v33  ;;  %v1206_v39 = vld [vmem:[%s1648_s0 + $0x34] ss:$20 sps:$4 sm:$0xff]   ;;  %v1209_v41 = vld [vmem:[%s1648_s0 + $0x30] ss:$20 sps:$4 sm:$0xff]  }
   0xf   :  { %658 = vmatprep.mubr.bf16.mxu1 %v1202_v36  ;;  %v1204_v38 = vld [vmem:[%s1648_s0 + $0x2c] ss:$20 sps:$4 sm:$0xff]   ;;  %v1208_v40 = vld [vmem:[%s1648_s0 + $0x28] ss:$20 sps:$4 sm:$0xff]   ;;  %v1215_v46 = vld [vmem:[%s1648_s0 + $0x50] ss:$20 sps:$4 sm:$0xff]  }
  0x10   :  { %999 = vmatpush3.bf16.msra.mxu0 %v1179_v14  ;;  %v1210_v42 = vld [vmem:[%s1648_s0 + $0x54] ss:$20 sps:$4 sm:$0xff]   ;;  %v1216_v47 = vld [vmem:[%s1648_s0 + $0x58] ss:$20 sps:$4 sm:$0xff]   ;;  %v1236_v50 = vld [vmem:[%s1647_s1 + $0x100] sm:$0xff]  }
  0x11   :  { %1057 = vmatpush3.bf16.msra.mxu1 %v1180_v15  ;;  %1000 = vmatprep.subr.bf16.mxu0 %v1181_v16  ;;  %v1223_v45 = vld [vmem:[%s1647_s1 + $0x108] sm:$0xff]   ;;  %v1219_v49 = vld [vmem:[%s1648_s0 + $0x84] ss:$20 sps:$4 sm:$0xff]   ;;  %v1222_v52 = vld [vmem:[%s1648_s0 + $0x80] ss:$20 sps:$4 sm:$0xff]  }
  0x12   :  { %1058 = vmatprep.subr.bf16.mxu1 %v1182_v17  ;;  %v1221_v51 = vld [vmem:[%s1648_s0 + $0x78] ss:$20 sps:$4 sm:$0xff]   ;;  %v1228_v55 = vld [vmem:[%s1648_s0 + $0xa0] ss:$20 sps:$4 sm:$0xff]   ;;  %v1229_v56 = vld [vmem:[%s1648_s0 + $0xa8] ss:$20 sps:$4 sm:$0xff]  }
  0x13   :  { %v1224_v53 = vld [vmem:[%s1648_s0 + $0xa4] ss:$20 sps:$4 sm:$0xff]   ;;  %v1226_v54 = vld [vmem:[%s1648_s0 + $0xac] ss:$20 sps:$4 sm:$0xff]   ;;  %v1232_v58 = vld [vmem:[%s1648_s0 + $0xd4] ss:$20 sps:$4 sm:$0xff]  }
  0x14   :  { %1001 = vmatpush3.bf16.msra.mxu0 %v1183_v18  ;;  %v1230_v57 = vld [vmem:[%s1648_s0 + $0xcc] ss:$20 sps:$4 sm:$0xff]   ;;  %v51_v59 = vld [vmem:[%s1648_s0 + $0xf0] sm:$0x11]  ;;  %v52_v60 = vld [vmem:[%s1648_s0 + $0xf8] sm:$0x11] }
  0x15   :  { %1059 = vmatpush3.bf16.msra.mxu1 %v1184_v19  ;;  %1002 = vmatprep.subr.bf16.mxu0 %v1185_v20  ;;  %v1234_v61 = vld [vmem:[%s1648_s0 + $0xc8] ss:$20 sps:$4 sm:$0xff]   ;;  %v1235_v62 = vld [vmem:[%s1648_s0 + $0xd0] ss:$20 sps:$4 sm:$0xff]   ;;  %v919_v63 = vcombine.high %v51_v59, %v51_v59  ;;  %v921_v0 = vcombine.high %v52_v60, %v52_v60  ;;  %v918_v1 = vcombine.low %v51_v59, %v51_v59  ;;  %v1243_v5 = vld [vmem:[%s1648_s0 + $0x38] ss:$20 sps:$4 sm:$0xff]  }
  0x16   :  { %1060 = vmatprep.subr.bf16.mxu1 %v1186_v21  ;;  %v920_v2 = vcombine.low %v52_v60, %v52_v60  ;;  %v1241_v3 = vld [vmem:[%s1648_s0 + $0x10] ss:$20 sps:$4 sm:$0xff]   ;;  %v1244_v6 = vld [vmem:[%s1648_s0 + $0xd8] ss:$20 sps:$4 sm:$0xff]   ;;  %v1245_v7 = vld [vmem:[%s1648_s0 + $0x60] ss:$20 sps:$4 sm:$0xff]  }
  0x17   :  { %v1242_v4 = vld [vmem:[%s1648_s0 + $0xb0] ss:$20 sps:$4 sm:$0xff]   ;;  %v1246_v8 = vld [vmem:[%s1648_s0 + $0x100] ss:$0 sps:$4 sm:$0x11]  }
  0x18   :  { %1003 = vmatpush3.bf16.msra.mxu0 %v1187_v22  ;;  %v1247_v9 = vld [vmem:[%s1648_s0 + $0x88] ss:$20 sps:$4 sm:$0xff]   ;;  %v1553_v59 = vld [vmem:[%s1649_s2] ss:$0 sm:$0xff] }
  0x19   :  { %1061 = vmatpush3.bf16.msra.mxu1 %v1188_v23  ;;  %1004 = vmatprep.subr.bf16.mxu0 %v1189_v24 }
  0x1a   :  { %1062 = vmatprep.subr.bf16.mxu1 %v1190_v25 }
  0x1c   :  { %1005 = vmatpush3.bf16.msra.mxu0 %v1191_v26 }
  0x1d   :  { %1063 = vmatpush3.bf16.msra.mxu1 %v1192_v27  ;;  %1006 = vmatprep.subr.bf16.mxu0 %v1193_v28 }
  0x1e   :  { %1064 = vmatprep.subr.bf16.mxu1 %v1194_v29 }
  0x20   :  { %1007 = vmatpush3.bf16.msra.mxu0 %v1195_v30 }
  0x21   :  { %1065 = vmatpush3.bf16.msra.mxu1 %v1196_v31  ;;  %1119 = vmatprep.subr.bf16.mxu0 %v1248_v34 }
  0x22   :  { %1155 = vmatprep.subr.bf16.mxu1 %v1248_v34 }
  0x23   :  { %571 = vmatmul.mubr.bf16.vlgmr.msra.gmra.mxu0 %v1197_v32 }
  0x24   :  { %659 = vmatmul.mubr.bf16.vlgmr.msra.gmra.mxu1 %v1200_v35  ;;  %1120 = vmatpush3.bf16.msra.mxu0 %v1203_v37 }
  0x25   :  { %578 = vmatprep.mubr.bf16.mxu0 %v1204_v38  ;;  %1159 = vmatpush3.bf16.msra.mxu1 %v1203_v37 }
  0x26   :  { %666 = vmatprep.mubr.bf16.mxu1 %v1206_v39  ;;  %1121 = vmatprep.subr.bf16.mxu0 %v1248_v34 }
  0x27   :  { %1156 = vmatprep.subr.bf16.mxu1 %v1248_v34 }
  0x28   :  { %1122 = vmatpush3.bf16.msra.mxu0 %v1214_v43 }
  0x29   :  { %1160 = vmatpush3.bf16.msra.mxu1 %v1214_v43  ;;  %1123 = vmatprep.subr.bf16.mxu0 %v1248_v34 }
  0x2a   :  { %1157 = vmatprep.subr.bf16.mxu1 %v1248_v34 }
  0x2b   :  { %579 = vmatmul.mubr.bf16.gmra.mxu0 %v1208_v40 }
  0x2c   :  { %667 = vmatmul.mubr.bf16.gmra.mxu1 %v1209_v41  ;;  %586 = vmatprep.mubr.bf16.mxu0 %v1210_v42 }
  0x2d   :  { %674 = vmatprep.mubr.bf16.mxu1 %v1212_v44  ;;  %1124 = vmatpush3.bf16.msra.mxu0 %v1223_v45 }
  0x2e   :  { %1161 = vmatpush3.bf16.msra.mxu1 %v1223_v45  ;;  %1125 = vmatprep.subr.bf16.mxu0 %v1248_v34 }
  0x2f   :  { %1158 = vmatprep.subr.bf16.mxu1 %v1248_v34 }
  0x31   :  { %1126 = vmatpush3.bf16.msra.mxu0 %v1236_v50 }
  0x32   :  { %1162 = vmatpush3.bf16.msra.mxu1 %v1236_v50 }
  0x33   :  { %587 = vmatmul.mubr.bf16.gmra.mxu0 %v1215_v46 }
  0x34   :  { %675 = vmatmul.mubr.bf16.gmra.mxu1 %v1216_v47  ;;  %594 = vmatprep.mubr.bf16.mxu0 %v1217_v48 }
  0x35   :  { %682 = vmatprep.mubr.bf16.mxu1 %v1219_v49 }
  0x3b   :  { %595 = vmatmul.mubr.bf16.gmra.mxu0 %v1221_v51 }
  0x3c   :  { %683 = vmatmul.mubr.bf16.gmra.mxu1 %v1222_v52  ;;  %602 = vmatprep.mubr.bf16.mxu0 %v1224_v53 }
  0x3d   :  { %690 = vmatprep.mubr.bf16.mxu1 %v1226_v54 }
  0x43   :  { %603 = vmatmul.mubr.bf16.gmra.mxu0 %v1228_v55 }
  0x44   :  { %691 = vmatmul.mubr.bf16.gmra.mxu1 %v1229_v56  ;;  %610 = vmatprep.mubr.bf16.mxu0 %v1230_v57 }
  0x45   :  { %698 = vmatprep.mubr.bf16.mxu1 %v1232_v58 }
  0x4b   :  { %611 = vmatmul.mubr.bf16.gmra.mxu0 %v1234_v61 }
  0x4c   :  { %699 = vmatmul.mubr.bf16.gmra.mxu1 %v1235_v62  ;;  %618 = vmatprep.mubr.bf16.mxu0 %v919_v63 }
  0x4d   :  { %706 = vmatprep.mubr.bf16.mxu1 %v921_v0 }
  0x53   :  { %619 = vmatmul.mubr.bf16.gmra.mxu0 %v918_v1 }
  0x54   :  { %707 = vmatmul.mubr.bf16.gmra.mxu1 %v920_v2  ;;  %1127 = vmatprep.mubr.msk.bf16.mxu0 %vm1249_vm0, %v1248_v34 }
  0x55   :  { %1143 = vmatprep.mubr.msk.bf16.mxu1 %vm1249_vm0, %v1248_v34 }
  0x5b   :  { %1128 = vmatmul.mubr.msk.bf16.vlgmr.msra.gmra.mxu0 %vm516_vm1, %v1241_v3 }
  0x5c   :  { %1144 = vmatmul.mubr.msk.bf16.vlgmr.msra.gmra.mxu1 %vm516_vm1, %v1242_v4  ;;  %1131 = vmatprep.mubr.msk.bf16.mxu0 %vm1249_vm0, %v1248_v34 }
  0x5d   :  { %1147 = vmatprep.mubr.msk.bf16.mxu1 %vm1249_vm0, %v1248_v34 }
  0x63   :  { %1132 = vmatmul.mubr.msk.bf16.gmra.mxu0 %vm516_vm1, %v1243_v5 }
  0x64   :  { %1148 = vmatmul.mubr.msk.bf16.gmra.mxu1 %vm516_vm1, %v1244_v6  ;;  %1135 = vmatprep.mubr.msk.bf16.mxu0 %vm1249_vm0, %v1248_v34 }
  0x65   :  { %1151 = vmatprep.mubr.msk.bf16.mxu1 %vm1249_vm0, %v1248_v34 }
  0x6b   :  { %1136 = vmatmul.mubr.msk.bf16.gmra.mxu0 %vm516_vm1, %v1245_v7 }
  0x6c   :  { %1152 = vmatmul.mubr.msk.bf16.gmra.mxu1 %vm516_vm1, %v1246_v8  ;;  %1139 = vmatprep.mubr.msk.bf16.mxu0 %vm1249_vm0, %v1248_v34 }
  0x73   :  { %1140 = vmatmul.mubr.msk.bf16.gmra.mxu0 %vm516_vm1, %v1247_v9 }
  0xe3   :  { %v1008_v10 = vpop.f32.mrf.mxu0 }
  0xe4   :  { %v1066_v11 = vpop.f32.mrf.mxu1 }
  0xe5   :  { %v1009_v12 = vpop.f32.mrf.mxu0 }
  0xe6   :  { %v1067_v13 = vpop.f32.mrf.mxu1  ;;  %v1010_v57 = vadd.f32 %v1009_v12, %v1008_v10 }
  0xe7   :  { %v1011_v14 = vpop.f32.mrf.mxu0  ;;  %v1068_v2 = vadd.f32 %v1067_v13, %v1066_v11 }
  0xe8   :  { %v1069_v15 = vpop.f32.mrf.mxu1  ;;  %v573_v1 = vadd.f32 %v1010_v57, %v1553_v59 }
  0xe9   :  { %v1012_v16 = vpop.f32.mrf.mxu0 }
  0xea   :  { %v1070_v17 = vpop.f32.mrf.mxu1  ;;  %v1013_v63 = vadd.f32 %v1012_v16, %v1011_v14  ;;  %v661_v14 = vadd.f32 %v1068_v2, %v573_v1 }
  0xeb   :  { %v1014_v18 = vpop.f32.mrf.mxu0  ;;  %v1071_v10 = vadd.f32 %v1070_v17, %v1069_v15 }
  0xec   :  { %v1506_v19 = vpop.f32.mrf.mxu1  ;;  %v576_v9 = vadd.f32 %v1013_v63, %v1553_v59 }
  0xed   :  { %v1015_v20 = vpop.f32.mrf.mxu0 }
  0xee   :  { %v1508_v21 = vpop.f32.mrf.mxu1  ;;  %v1016_v12 = vadd.f32 %v1015_v20, %v1014_v18  ;;  %v664_v15 = vadd.f32 %v1071_v10, %v576_v9 }
  0xef   :  { %v1510_v22 = vpop.f32.mrf.mxu0 }
  0xf0   :  { %v1512_v23 = vpop.f32.mrf.mxu1 }
  0xf1   :  { %v1514_v24 = vpop.f32.mrf.mxu0 }
  0xf2   :  { %v1516_v25 = vpop.f32.mrf.mxu1  ;;  %v1019_v17 = vadd.f32 %v1514_v24, %v1510_v22 }
  0xf3   :  { %v1518_v26 = vpop.f32.mrf.mxu0 }
  0xf4   :  { %v1520_v27 = vpop.f32.mrf.mxu1  ;;  %v584_v24 = vadd.f32 %v1019_v17, %v1553_v59 }
  0xf5   :  { %v1522_v28 = vpop.f32.mrf.mxu0 }
  0xf6   :  { %v1524_v29 = vpop.f32.mrf.mxu1 }
  0xf7   :  { %v1526_v30 = vpop.f32.mrf.mxu0 }
  0xf8   :  { %v1528_v31 = vpop.f32.mrf.mxu1 }
  0xf9   :  { %v1530_v32 = vpop.f32.mrf.mxu0 }
  0xfa   :  { %v1532_v33 = vpop.f32.mrf.mxu1 }
  0xfb   :  { %v1534_v34 = vpop.f32.mrf.mxu0 }
  0xfc   :  { %v1536_v35 = vpop.f32.mrf.mxu1 }
  0xfd   :  { %v1538_v36 = vpop.f32.mrf.mxu0 }
  0xfe   :  { %v1540_v37 = vpop.f32.mrf.mxu1 }
  0xff   :  { %v1542_v38 = vpop.f32.mrf.mxu0 }
 0x100   :  { %v1544_v39 = vpop.f32.mrf.mxu1 }
 0x101   :  { %1651 = vst [vmem:[#allocation2_spill] sm:$0xff] %v1544_v39  ;;  %v1546_v40 = vpop.f32.mrf.mxu0 }
 0x102   :  { %1652 = vst [vmem:[#allocation3_spill] sm:$0xff] %v1546_v40  ;;  %v1548_v41 = vpop.f32.mrf.mxu1 }
 0x103   :  { %1653 = vst [vmem:[#allocation4_spill] sm:$0xff] %v1548_v41  ;;  %v1032_v42 = vpop.f32.mrf.mxu0 }
 0x104   :  { %v1090_v43 = vpop.f32.mrf.mxu1 }
 0x105   :  { %v1033_v44 = vpop.f32.mrf.mxu0 }
 0x106   :  { %v1091_v45 = vpop.f32.mrf.mxu1  ;;  %v1034_v60 = vadd.f32 %v1033_v44, %v1032_v42 }
 0x107   :  { %v1035_v46 = vpop.f32.mrf.mxu0  ;;  %v1092_v5 = vadd.f32 %v1091_v45, %v1090_v43  ;;  %v581_v43 = vadd.f32 %v1016_v12, %v1553_v59  ;;  %v1074_v45 = vadd.f32 %v1508_v21, %v1506_v19  ;;  %v1077_v19 = vadd.f32 %v1516_v25, %v1512_v23 }
 0x108   :  { %v1093_v47 = vpop.f32.mrf.mxu1  ;;  %v605_v4 = vadd.f32 %v1034_v60, %v1553_v59 }
 0x109   :  { %v1036_v48 = vpop.f32.mrf.mxu0  ;;  %v669_v22 = vadd.f32 %v1074_v45, %v581_v43 }
 0x10a   :  { %v1094_v49 = vpop.f32.mrf.mxu1  ;;  %v1037_v6 = vadd.f32 %v1036_v48, %v1035_v46  ;;  %v693_v13 = vadd.f32 %v1092_v5, %v605_v4 }
 0x10b   :  { %v1038_v50 = vpop.f32.mrf.mxu0  ;;  %v1095_v57 = vadd.f32 %v1094_v49, %v1093_v47 }
 0x10c   :  { %v1096_v51 = vpop.f32.mrf.mxu1  ;;  %v608_v16 = vadd.f32 %v1037_v6, %v1553_v59 }
 0x10d   :  { %v1039_v52 = vpop.f32.mrf.mxu0 }
 0x10e   :  { %v1097_v53 = vpop.f32.mrf.mxu1  ;;  %v1040_v44 = vadd.f32 %v1039_v52, %v1038_v50  ;;  %v696_v60 = vadd.f32 %v1095_v57, %v608_v16 }
 0x10f   :  { %v1041_v54 = vpop.f32.mrf.mxu0  ;;  %v1098_v20 = vadd.f32 %v1097_v53, %v1096_v51 }
 0x110   :  { %v1099_v55 = vpop.f32.mrf.mxu1  ;;  %v613_v18 = vadd.f32 %v1040_v44, %v1553_v59 }
 0x111   :  { %v1042_v56 = vpop.f32.mrf.mxu0 }
 0x112   :  { %v1100_v58 = vpop.f32.mrf.mxu1  ;;  %v1043_v49 = vadd.f32 %v1042_v56, %v1041_v54  ;;  %v701_v54 = vadd.f32 %v1098_v20, %v613_v18 }
 0x113   :  { %v1044_v61 = vpop.f32.mrf.mxu0  ;;  %v1101_v23 = vadd.f32 %v1100_v58, %v1099_v55  ;;  %v1080_v55 = vadd.f32 %v1524_v29, %v1520_v27 }
 0x114   :  { %v1555_v62 = vpop.f32.mrf.mxu1  ;;  %v616_v56 = vadd.f32 %v1043_v49, %v1553_v59 }
 0x115   :  { %v1045_v0 = vpop.f32.mrf.mxu0 }
 0x116   :  { %v1558_v3 = vpop.f32.mrf.mxu1  ;;  %v1046_v25 = vadd.f32 %v1045_v0, %v1044_v61  ;;  %v672_v0 = vadd.f32 %v1077_v19, %v584_v24  ;;  %v704_v29 = vadd.f32 %v1101_v23, %v616_v56  ;;  %v1655_v24 = vld [vmem:[#allocation2_spill] sm:$0xff] }
 0x117   :  { %v1047_v7 = vpop.f32.mrf.mxu0 }
 0x118   :  { %v1105_v8 = vpop.f32.mrf.mxu1  ;;  %v621_v44 = vadd.f32 %v1046_v25, %v1553_v59 }
 0x119   :  { %v1048_v42 = vpop.f32.mrf.mxu0  ;;  %v1025_v8 = vadd.f32 %v1530_v32, %v1526_v30  ;;  %v1104_v30 = vadd.f32 %v1558_v3, %v1555_v62  ;;  %v1028_v62 = vadd.f32 %v1538_v36, %v1534_v34 }
 0x11a   :  { %v1106_v41 = vpop.f32.mrf.mxu1 }
 0x11b   :  { %v748_v11 = vpop.f32.mrf.mxu0  ;;  %v709_v17 = vadd.f32 %v1104_v30, %v621_v44 }
 0x11c   :  { %v749_v39 = vadd.f32 %v748_v11, %v661_v14  ;;  %v780_v40 = vpop.f32.mrf.mxu1  ;;  %v592_v11 = vadd.f32 %v1025_v8, %v1553_v59 }
 0x11d   :  { %v781_v46 = vadd.f32 %v780_v40, %v693_v13  ;;  %v1129_v48 = vpop.f32.mrf.mxu0  ;;  %v1083_v13 = vadd.f32 %v1532_v33, %v1528_v31 }
 0x11e   :  { %v802_v41 = vmax.f32 %v749_v39, 0.0  ;;  %v1145_v47 = vpop.f32.mrf.mxu1  ;;  %v1022_v39 = vadd.f32 %v1522_v28, %v1518_v26 }
 0x11f   :  { %v810_v50 = vmax.f32 %v781_v46, 0.0  ;;  %v751_v52 = vpop.f32.mrf.mxu0  ;;  %v680_v49 = vadd.f32 %v1083_v13, %v592_v11 }
 0x120   :  { %v979_v63 = vpack.c.bf16 %v802_v41, %v802_v41  ;;  %v752_v1 = vadd.f32 %v751_v52, %v664_v15  ;;  %v783_v2 = vpop.f32.mrf.mxu1  ;;  %v589_v42 = vadd.f32 %v1022_v39, %v1553_v59  ;;  %v1086_v52 = vadd.f32 %v1540_v37, %v1536_v35  ;;  %v1656_v39 = vld [vmem:[#allocation4_spill] sm:$0xff] }
 0x121   :  { %v987_v21 = vpack.c.bf16 %v810_v50, %v810_v50  ;;  %v784_v40 = vadd.f32 %v783_v2, %v696_v60  ;;  %v1130_v4 = vpop.f32.mrf.mxu0  ;;  %v597_v50 = vadd.f32 %v1028_v62, %v1553_v59  ;;  %v1654_v60 = vld [vmem:[#allocation3_spill] sm:$0xff] }
 0x122   :  { %869 = vst.msk [vmem:[%s1650_s3] sm:$0xf] %vm868_vm2, %v979_v63  ;;  %v803_v51 = vmax.f32 %v752_v1, 0.0  ;;  %v1146_v53 = vpop.f32.mrf.mxu1  ;;  %v677_v15 = vadd.f32 %v1080_v55, %v589_v42  ;;  %v1031_v63 = vadd.f32 %v1654_v60, %v1542_v38 }
 0x123   :  { %877 = vst.msk [vmem:[%s1650_s3 + $0x20] sm:$0xf] %vm868_vm2, %v987_v21  ;;  %v811_v5 = vmax.f32 %v784_v40, 0.0  ;;  %v756_v6 = vpop.f32.mrf.mxu0 }
 0x124   :  { %v980_v26 = vpack.c.bf16 %v803_v51, %v803_v51  ;;  %v757_v28 = vadd.f32 %v756_v6, %v669_v22  ;;  %v788_v7 = vpop.f32.mrf.mxu1  ;;  %v600_v22 = vadd.f32 %v1031_v63, %v1553_v59  ;;  %v1089_v51 = vadd.f32 %v1656_v39, %v1655_v24 }
 0x125   :  { %v988_v9 = vpack.c.bf16 %v811_v5, %v811_v5  ;;  %v789_v10 = vadd.f32 %v788_v7, %v701_v54  ;;  %v1133_v12 = vpop.f32.mrf.mxu0  ;;  %v685_v54 = vadd.f32 %v1086_v52, %v597_v50 }
 0x126   :  { %870 = vst.msk [vmem:[%s1650_s3 + $0x4] sm:$0xf] %vm868_vm2, %v980_v26  ;;  %v804_v58 = vmax.f32 %v757_v28, 0.0  ;;  %v1149_v61 = vpop.f32.mrf.mxu1  ;;  %v688_v26 = vadd.f32 %v1089_v51, %v600_v22 }
 0x127   :  { %878 = vst.msk [vmem:[%s1650_s3 + $0x24] sm:$0xf] %vm868_vm2, %v988_v9  ;;  %v812_v32 = vmax.f32 %v789_v10, 0.0  ;;  %v759_v27 = vpop.f32.mrf.mxu0 }
 0x128   :  { %v981_v14 = vpack.c.bf16 %v804_v58, %v804_v58  ;;  %v760_v16 = vadd.f32 %v759_v27, %v672_v0  ;;  %v791_v57 = vpop.f32.mrf.mxu1 }
 0x129   :  { %v989_v43 = vpack.c.bf16 %v812_v32, %v812_v32  ;;  %v792_v45 = vadd.f32 %v791_v57, %v704_v29  ;;  %v1134_v46 = vpop.f32.mrf.mxu0 }
 0x12a   :  { %871 = vst.msk [vmem:[%s1650_s3 + $0x8] sm:$0xf] %vm868_vm2, %v981_v14  ;;  %v805_v3 = vmax.f32 %v760_v16, 0.0  ;;  %v1150_v48 = vpop.f32.mrf.mxu1 }
 0x12b   :  { %879 = vst.msk [vmem:[%s1650_s3 + $0x28] sm:$0xf] %vm868_vm2, %v989_v43  ;;  %v813_v31 = vmax.f32 %v792_v45, 0.0  ;;  %v764_v33 = vpop.f32.mrf.mxu0 }
 0x12c   :  { %v982_v18 = vpack.c.bf16 %v805_v3, %v805_v3  ;;  %v765_v20 = vadd.f32 %v764_v33, %v677_v15  ;;  %v796_v41 = vpop.f32.mrf.mxu1 }
 0x12d   :  { %v990_v34 = vpack.c.bf16 %v813_v31, %v813_v31  ;;  %v797_v36 = vadd.f32 %v796_v41, %v709_v17  ;;  %v1137_v47 = vpop.f32.mrf.mxu0 }
 0x12e   :  { %872 = vst.msk [vmem:[%s1650_s3 + $0xc] sm:$0xf] %vm868_vm2, %v982_v18  ;;  %v806_v1 = vmax.f32 %v765_v20, 0.0  ;;  %v1153_v2 = vpop.f32.mrf.mxu1 }
 0x12f   :  { %880 = vst.msk [vmem:[%s1650_s3 + $0x2c] sm:$0xf] %vm868_vm2, %v990_v34  ;;  %v814_v19 = vmax.f32 %v797_v36, 0.0  ;;  %v767_v21 = vpop.f32.mrf.mxu0 }
 0x130   :  { %v983_v40 = vpack.c.bf16 %v806_v1, %v806_v1  ;;  %v768_v35 = vadd.f32 %v767_v21, %v680_v49  ;;  %v799_v37 = vpop.f32.mrf.mxu1 }
 0x131   :  { %v991_v4 = vpack.c.bf16 %v814_v19, %v814_v19  ;;  %v1138_v38 = vpop.f32.mrf.mxu0 }
 0x132   :  { %873 = vst.msk [vmem:[%s1650_s3 + $0x10] sm:$0xf] %vm868_vm2, %v983_v40  ;;  %v807_v53 = vmax.f32 %v768_v35, 0.0  ;;  %v1154_v56 = vpop.f32.mrf.mxu1 }
 0x133   :  { %882 = vst.msk [vmem:[%s1650_s3 + $0x30] sm:$0x1] %vm881_vm3, %v991_v4  ;;  %v772_v23 = vpop.f32.mrf.mxu0 }
 0x134   :  { %v984_v25 = vpack.c.bf16 %v807_v53, %v807_v53  ;;  %v773_v5 = vadd.f32 %v772_v23, %v685_v54 }
 0x135   :  { %v1141_v6 = vpop.f32.mrf.mxu0 }
 0x136   :  { %874 = vst.msk [vmem:[%s1650_s3 + $0x14] sm:$0xf] %vm868_vm2, %v984_v25  ;;  %v808_v59 = vmax.f32 %v773_v5, 0.0 }
 0x137   :  { %v775_v28 = vpop.f32.mrf.mxu0 }
 0x138   :  { %v985_v7 = vpack.c.bf16 %v808_v59, %v808_v59  ;;  %v776_v8 = vadd.f32 %v775_v28, %v688_v26 }
 0x139   :  { %v1142_v9 = vpop.f32.mrf.mxu0 }
 0x13a   :  { %875 = vst.msk [vmem:[%s1650_s3 + $0x18] sm:$0xf] %vm868_vm2, %v985_v7  ;;  %v809_v10 = vmax.f32 %v776_v8, 0.0 }
 0x13c   :  { %v986_v12 = vpack.c.bf16 %v809_v10, %v809_v10 }
 0x13e   :  { %876 = vst.msk [vmem:[%s1650_s3 + $0x1c] sm:$0xf] %vm868_vm2, %v986_v12 }

// kernel: atari_dqn_forward.7
= control target key start
LH: loop header
LB: loop body
LE: loop exit
PB: predicated region body
PF: predicated region fallthrough
CT: control target
= control target key end

     0   :  { %10 = vsyncpa [#allocation5], 0  ;;  %s10326_s18 = smov 0   ;;  %s10328_s19 = smov 0   ;;  %s13085_s0 = inlined_call_operand.vmem [shape: bf16[2,3136], index: 0, kind: input, shape index: {}]   ;;  %s13086_s1 = inlined_call_operand.vmem [shape: bf16[3136,1024], index: 1, kind: input, shape index: {}]   ;;  %s13087_s2 = inlined_call_operand.vmem [shape: f32[1,1024], index: 2, kind: input, shape index: {}]   ;;  %s13088_s3 = inlined_call_operand.vmem [shape: f32[1024,7], index: 3, kind: input, shape index: {}]   ;;  %s13089_s4 = inlined_call_operand.vmem [shape: f32[1,7], index: 4, kind: input, shape index: {}]   ;;  %s13090_s5 = inlined_call_operand.hbm [shape: f32[2,6], index: 5, kind: output, shape index: {}]  }
   0x1   :  { %s10330_s20 = smov 0  }
   0x2 LB: > { %s10342_s21 = sadd.s32 4294967295, %s10289_s20   ;;  %s10345_s22 = sadd.s32 1, %s10289_s20   ;;  %s10289_s20 = sphi %s10330_s20, %s13093_s20   ;;  %s10285_s19 = sphi %s10328_s19, %s13092_s19   ;;  %s10281_s18 = sphi %s10326_s18, %s13091_s18  }
   0x3   : > { %s41_s23 = ssub.s32 %s10289_s20, %s10345_s22  ;;  %s44_s24 = sadd.s32 1, %s10285_s19 }
   0x4   : > { %p42_p0 = scmp.eq.s32.totalorder %s41_s23, 0  ;;  %p51_p1 = scmp.ne.s32.totalorder %s10285_s19, %s10281_s18 }
   0x5   : > { %p52_p2 = scmp.eq.s32.totalorder %s10289_s20, 0  ;;  %p8149_p4 = scmp.ge.s32.totalorder %s10289_s20, 2 }
   0x6   : > { %s10354_s25 = scalar_select %p42_p0, %s10285_s19, %s44_s24  }
   0x7   : > { %p53_p3 = por %p52_p2, %p51_p1  ;;  %177 = sbr.rel (%p8149_p4) target bundleno = 408 (0x198), region = 24 }
   0xc   : > { %180 = sbr.rel (!%p53_p3) target bundleno = 408 (0x198), region = 28  ;;  %s182_s26 = sand.u32 (%p53_p3), 1, %s10285_s19  }
   0xd   : > { %s8950_s27 = sshll.u32 (%p53_p3), %s10289_s20, 4  ;;  %s9021_s28 = smul.u32 (%p53_p3), 6272, %s182_s26 }
   0xe   : > { %s10362_s6 = scalar_lea.vmem (%p53_p3), %s13086_s1, %s8950_s27 }
   0xf   : > { %v200_v0 = vld [vmem:[%s10362_s6] sm:$0xff] (%p53_p3)  ;;  %v202_v1 = vld [vmem:[%s10362_s6 + $0x8] sm:$0xff] (%p53_p3)  ;;  %s10370_s7 = scalar_lea.vmem (%p53_p3), [#allocation3], %s9021_s28 }
  0x10   : > { %v204_v2 = vld [vmem:[%s10362_s6 + $0x20] sm:$0xff] (%p53_p3)  ;;  %v206_v3 = vld [vmem:[%s10362_s6 + $0x28] sm:$0xff] (%p53_p3)  ;;  %201 = vst [vmem:[%s10370_s7] sm:$0xff] (%p53_p3), %v200_v0  ;;  %203 = vst [vmem:[%s10370_s7 + $0x8] sm:$0xff] (%p53_p3), %v202_v1 }
  0x11   : > { %v208_v4 = vld [vmem:[%s10362_s6 + $0x40] sm:$0xff]  ;;  %v210_v5 = vld [vmem:[%s10362_s6 + $0x48] sm:$0xff]  ;;  %205 = vst [vmem:[%s10370_s7 + $0x10] sm:$0xff] %v204_v2  ;;  %207 = vst [vmem:[%s10370_s7 + $0x18] sm:$0xff] %v206_v3 }
  0x12   : > { %209 = vst [vmem:[%s10370_s7 + $0x20] sm:$0xff] %v208_v4  ;;  %211 = vst [vmem:[%s10370_s7 + $0x28] sm:$0xff] %v210_v5  ;;  %v212_v6 = vld [vmem:[%s10362_s6 + $0x60] sm:$0xff]  ;;  %v214_v7 = vld [vmem:[%s10362_s6 + $0x68] sm:$0xff] }
  0x13   : > { %v216_v8 = vld [vmem:[%s10362_s6 + $0x80] sm:$0xff]  ;;  %213 = vst [vmem:[%s10370_s7 + $0x30] sm:$0xff] %v212_v6  ;;  %215 = vst [vmem:[%s10370_s7 + $0x38] sm:$0xff] %v214_v7  ;;  %v218_v9 = vld [vmem:[%s10362_s6 + $0x88] sm:$0xff] }
  0x14   : > { %217 = vst [vmem:[%s10370_s7 + $0x40] sm:$0xff] %v216_v8  ;;  %v220_v10 = vld [vmem:[%s10362_s6 + $0xa0] sm:$0xff]  ;;  %v222_v11 = vld [vmem:[%s10362_s6 + $0xa8] sm:$0xff]  ;;  %219 = vst [vmem:[%s10370_s7 + $0x48] sm:$0xff] %v218_v9 }
  0x15   : > { %221 = vst [vmem:[%s10370_s7 + $0x50] sm:$0xff] %v220_v10  ;;  %223 = vst [vmem:[%s10370_s7 + $0x58] sm:$0xff] %v222_v11  ;;  %v224_v12 = vld [vmem:[%s10362_s6 + $0xc0] sm:$0xff]  ;;  %v226_v13 = vld [vmem:[%s10362_s6 + $0xc8] sm:$0xff] }
  0x16   : > { %v228_v14 = vld [vmem:[%s10362_s6 + $0xe0] sm:$0xff]  ;;  %225 = vst [vmem:[%s10370_s7 + $0x60] sm:$0xff] %v224_v12  ;;  %227 = vst [vmem:[%s10370_s7 + $0x68] sm:$0xff] %v226_v13  ;;  %v230_v15 = vld [vmem:[%s10362_s6 + $0xe8] sm:$0xff] }
  0x17   : > { %229 = vst [vmem:[%s10370_s7 + $0x70] sm:$0xff] %v228_v14  ;;  %v232_v16 = vld [vmem:[%s10362_s6 + $0x100] sm:$0xff]  ;;  %v234_v17 = vld [vmem:[%s10362_s6 + $0x108] sm:$0xff]  ;;  %231 = vst [vmem:[%s10370_s7 + $0x78] sm:$0xff] %v230_v15 }
  0x18   : > { %233 = vst [vmem:[%s10370_s7 + $0x80] sm:$0xff] %v232_v16  ;;  %235 = vst [vmem:[%s10370_s7 + $0x88] sm:$0xff] %v234_v17  ;;  %v236_v18 = vld [vmem:[%s10362_s6 + $0x120] sm:$0xff]  ;;  %v238_v19 = vld [vmem:[%s10362_s6 + $0x128] sm:$0xff] }
  0x19   : > { %v240_v20 = vld [vmem:[%s10362_s6 + $0x140] sm:$0xff]  ;;  %237 = vst [vmem:[%s10370_s7 + $0x90] sm:$0xff] %v236_v18  ;;  %239 = vst [vmem:[%s10370_s7 + $0x98] sm:$0xff] %v238_v19  ;;  %v242_v21 = vld [vmem:[%s10362_s6 + $0x148] sm:$0xff] }
  0x1a   : > { %241 = vst [vmem:[%s10370_s7 + $0xa0] sm:$0xff] %v240_v20  ;;  %v244_v22 = vld [vmem:[%s10362_s6 + $0x160] sm:$0xff]  ;;  %v246_v23 = vld [vmem:[%s10362_s6 + $0x168] sm:$0xff]  ;;  %243 = vst [vmem:[%s10370_s7 + $0xa8] sm:$0xff] %v242_v21 }
  0x1b   : > { %245 = vst [vmem:[%s10370_s7 + $0xb0] sm:$0xff] %v244_v22  ;;  %247 = vst [vmem:[%s10370_s7 + $0xb8] sm:$0xff] %v246_v23  ;;  %v248_v24 = vld [vmem:[%s10362_s6 + $0x180] sm:$0xff]  ;;  %v250_v25 = vld [vmem:[%s10362_s6 + $0x188] sm:$0xff] }
  0x1c   : > { %v252_v26 = vld [vmem:[%s10362_s6 + $0x1a0] sm:$0xff]  ;;  %249 = vst [vmem:[%s10370_s7 + $0xc0] sm:$0xff] %v248_v24  ;;  %251 = vst [vmem:[%s10370_s7 + $0xc8] sm:$0xff] %v250_v25  ;;  %v254_v27 = vld [vmem:[%s10362_s6 + $0x1a8] sm:$0xff] }
  0x1d   : > { %253 = vst [vmem:[%s10370_s7 + $0xd0] sm:$0xff] %v252_v26  ;;  %v256_v28 = vld [vmem:[%s10362_s6 + $0x1c0] sm:$0xff]  ;;  %v258_v29 = vld [vmem:[%s10362_s6 + $0x1c8] sm:$0xff]  ;;  %255 = vst [vmem:[%s10370_s7 + $0xd8] sm:$0xff] %v254_v27 }
  0x1e   : > { %257 = vst [vmem:[%s10370_s7 + $0xe0] sm:$0xff] %v256_v28  ;;  %259 = vst [vmem:[%s10370_s7 + $0xe8] sm:$0xff] %v258_v29  ;;  %v260_v30 = vld [vmem:[%s10362_s6 + $0x1e0] sm:$0xff]  ;;  %v262_v31 = vld [vmem:[%s10362_s6 + $0x1e8] sm:$0xff] }
  0x1f   : > { %v264_v32 = vld [vmem:[%s10362_s6 + $0x200] sm:$0xff]  ;;  %261 = vst [vmem:[%s10370_s7 + $0xf0] sm:$0xff] %v260_v30  ;;  %263 = vst [vmem:[%s10370_s7 + $0xf8] sm:$0xff] %v262_v31  ;;  %v266_v33 = vld [vmem:[%s10362_s6 + $0x208] sm:$0xff] }
  0x20   : > { %265 = vst [vmem:[%s10370_s7 + $0x100] sm:$0xff] %v264_v32  ;;  %v268_v34 = vld [vmem:[%s10362_s6 + $0x220] sm:$0xff]  ;;  %v270_v35 = vld [vmem:[%s10362_s6 + $0x228] sm:$0xff]  ;;  %267 = vst [vmem:[%s10370_s7 + $0x108] sm:$0xff] %v266_v33 }
  0x21   : > { %269 = vst [vmem:[%s10370_s7 + $0x110] sm:$0xff] %v268_v34  ;;  %271 = vst [vmem:[%s10370_s7 + $0x118] sm:$0xff] %v270_v35  ;;  %v272_v36 = vld [vmem:[%s10362_s6 + $0x240] sm:$0xff]  ;;  %v274_v37 = vld [vmem:[%s10362_s6 + $0x248] sm:$0xff] }
  0x22   : > { %v276_v38 = vld [vmem:[%s10362_s6 + $0x260] sm:$0xff]  ;;  %273 = vst [vmem:[%s10370_s7 + $0x120] sm:$0xff] %v272_v36  ;;  %275 = vst [vmem:[%s10370_s7 + $0x128] sm:$0xff] %v274_v37  ;;  %v278_v39 = vld [vmem:[%s10362_s6 + $0x268] sm:$0xff] }
  0x23   : > { %277 = vst [vmem:[%s10370_s7 + $0x130] sm:$0xff] %v276_v38  ;;  %v280_v40 = vld [vmem:[%s10362_s6 + $0x280] sm:$0xff]  ;;  %v282_v41 = vld [vmem:[%s10362_s6 + $0x288] sm:$0xff]  ;;  %279 = vst [vmem:[%s10370_s7 + $0x138] sm:$0xff] %v278_v39 }
  0x24   : > { %281 = vst [vmem:[%s10370_s7 + $0x140] sm:$0xff] %v280_v40  ;;  %283 = vst [vmem:[%s10370_s7 + $0x148] sm:$0xff] %v282_v41  ;;  %v284_v42 = vld [vmem:[%s10362_s6 + $0x2a0] sm:$0xff]  ;;  %v286_v43 = vld [vmem:[%s10362_s6 + $0x2a8] sm:$0xff] }
  0x25   : > { %v288_v44 = vld [vmem:[%s10362_s6 + $0x2c0] sm:$0xff]  ;;  %285 = vst [vmem:[%s10370_s7 + $0x150] sm:$0xff] %v284_v42  ;;  %287 = vst [vmem:[%s10370_s7 + $0x158] sm:$0xff] %v286_v43  ;;  %v290_v45 = vld [vmem:[%s10362_s6 + $0x2c8] sm:$0xff] }
  0x26   : > { %289 = vst [vmem:[%s10370_s7 + $0x160] sm:$0xff] %v288_v44  ;;  %v292_v46 = vld [vmem:[%s10362_s6 + $0x2e0] sm:$0xff]  ;;  %v294_v47 = vld [vmem:[%s10362_s6 + $0x2e8] sm:$0xff]  ;;  %291 = vst [vmem:[%s10370_s7 + $0x168] sm:$0xff] %v290_v45 }
  0x27   : > { %293 = vst [vmem:[%s10370_s7 + $0x170] sm:$0xff] %v292_v46  ;;  %295 = vst [vmem:[%s10370_s7 + $0x178] sm:$0xff] %v294_v47  ;;  %v296_v48 = vld [vmem:[%s10362_s6 + $0x300] sm:$0xff]  ;;  %v298_v49 = vld [vmem:[%s10362_s6 + $0x308] sm:$0xff] }
  0x28   : > { %v300_v50 = vld [vmem:[%s10362_s6 + $0x320] sm:$0xff]  ;;  %297 = vst [vmem:[%s10370_s7 + $0x180] sm:$0xff] %v296_v48  ;;  %299 = vst [vmem:[%s10370_s7 + $0x188] sm:$0xff] %v298_v49  ;;  %v302_v51 = vld [vmem:[%s10362_s6 + $0x328] sm:$0xff] }
  0x29   : > { %301 = vst [vmem:[%s10370_s7 + $0x190] sm:$0xff] %v300_v50  ;;  %v304_v52 = vld [vmem:[%s10362_s6 + $0x340] sm:$0xff]  ;;  %v306_v53 = vld [vmem:[%s10362_s6 + $0x348] sm:$0xff]  ;;  %303 = vst [vmem:[%s10370_s7 + $0x198] sm:$0xff] %v302_v51 }
  0x2a   : > { %305 = vst [vmem:[%s10370_s7 + $0x1a0] sm:$0xff] %v304_v52  ;;  %307 = vst [vmem:[%s10370_s7 + $0x1a8] sm:$0xff] %v306_v53  ;;  %v308_v54 = vld [vmem:[%s10362_s6 + $0x360] sm:$0xff]  ;;  %v310_v55 = vld [vmem:[%s10362_s6 + $0x368] sm:$0xff] }
  0x2b   : > { %v312_v56 = vld [vmem:[%s10362_s6 + $0x380] sm:$0xff]  ;;  %309 = vst [vmem:[%s10370_s7 + $0x1b0] sm:$0xff] %v308_v54  ;;  %311 = vst [vmem:[%s10370_s7 + $0x1b8] sm:$0xff] %v310_v55  ;;  %v314_v57 = vld [vmem:[%s10362_s6 + $0x388] sm:$0xff] }
  0x2c   : > { %313 = vst [vmem:[%s10370_s7 + $0x1c0] sm:$0xff] %v312_v56  ;;  %v316_v58 = vld [vmem:[%s10362_s6 + $0x3a0] sm:$0xff]  ;;  %v318_v59 = vld [vmem:[%s10362_s6 + $0x3a8] sm:$0xff]  ;;  %315 = vst [vmem:[%s10370_s7 + $0x1c8] sm:$0xff] %v314_v57 }
  0x2d   : > { %317 = vst [vmem:[%s10370_s7 + $0x1d0] sm:$0xff] %v316_v58  ;;  %319 = vst [vmem:[%s10370_s7 + $0x1d8] sm:$0xff] %v318_v59  ;;  %v320_v60 = vld [vmem:[%s10362_s6 + $0x3c0] sm:$0xff]  ;;  %v322_v61 = vld [vmem:[%s10362_s6 + $0x3c8] sm:$0xff] }
  0x2e   : > { %v324_v62 = vld [vmem:[%s10362_s6 + $0x3e0] sm:$0xff]  ;;  %321 = vst [vmem:[%s10370_s7 + $0x1e0] sm:$0xff] %v320_v60  ;;  %323 = vst [vmem:[%s10370_s7 + $0x1e8] sm:$0xff] %v322_v61  ;;  %v326_v63 = vld [vmem:[%s10362_s6 + $0x3e8] sm:$0xff] }
  0x2f   : > { %325 = vst [vmem:[%s10370_s7 + $0x1f0] sm:$0xff] %v324_v62  ;;  %v328_v0 = vld [vmem:[%s10362_s6 + $0x400] sm:$0xff]  ;;  %v330_v1 = vld [vmem:[%s10362_s6 + $0x408] sm:$0xff]  ;;  %327 = vst [vmem:[%s10370_s7 + $0x1f8] sm:$0xff] %v326_v63 }
  0x30   : > { %329 = vst [vmem:[%s10370_s7 + $0x200] sm:$0xff] %v328_v0  ;;  %331 = vst [vmem:[%s10370_s7 + $0x208] sm:$0xff] %v330_v1  ;;  %v332_v2 = vld [vmem:[%s10362_s6 + $0x420] sm:$0xff]  ;;  %v334_v3 = vld [vmem:[%s10362_s6 + $0x428] sm:$0xff] }
  0x31   : > { %v336_v4 = vld [vmem:[%s10362_s6 + $0x440] sm:$0xff]  ;;  %333 = vst [vmem:[%s10370_s7 + $0x210] sm:$0xff] %v332_v2  ;;  %335 = vst [vmem:[%s10370_s7 + $0x218] sm:$0xff] %v334_v3  ;;  %v338_v5 = vld [vmem:[%s10362_s6 + $0x448] sm:$0xff] }
  0x32   : > { %337 = vst [vmem:[%s10370_s7 + $0x220] sm:$0xff] %v336_v4  ;;  %v340_v6 = vld [vmem:[%s10362_s6 + $0x460] sm:$0xff]  ;;  %v342_v7 = vld [vmem:[%s10362_s6 + $0x468] sm:$0xff]  ;;  %339 = vst [vmem:[%s10370_s7 + $0x228] sm:$0xff] %v338_v5 }
  0x33   : > { %341 = vst [vmem:[%s10370_s7 + $0x230] sm:$0xff] %v340_v6  ;;  %343 = vst [vmem:[%s10370_s7 + $0x238] sm:$0xff] %v342_v7  ;;  %v344_v8 = vld [vmem:[%s10362_s6 + $0x480] sm:$0xff]  ;;  %v346_v9 = vld [vmem:[%s10362_s6 + $0x488] sm:$0xff] }
  0x34   : > { %v348_v10 = vld [vmem:[%s10362_s6 + $0x4a0] sm:$0xff]  ;;  %345 = vst [vmem:[%s10370_s7 + $0x240] sm:$0xff] %v344_v8  ;;  %347 = vst [vmem:[%s10370_s7 + $0x248] sm:$0xff] %v346_v9  ;;  %v350_v11 = vld [vmem:[%s10362_s6 + $0x4a8] sm:$0xff] }
  0x35   : > { %349 = vst [vmem:[%s10370_s7 + $0x250] sm:$0xff] %v348_v10  ;;  %v352_v12 = vld [vmem:[%s10362_s6 + $0x4c0] sm:$0xff]  ;;  %v354_v13 = vld [vmem:[%s10362_s6 + $0x4c8] sm:$0xff]  ;;  %351 = vst [vmem:[%s10370_s7 + $0x258] sm:$0xff] %v350_v11 }
  0x36   : > { %353 = vst [vmem:[%s10370_s7 + $0x260] sm:$0xff] %v352_v12  ;;  %355 = vst [vmem:[%s10370_s7 + $0x268] sm:$0xff] %v354_v13  ;;  %v356_v14 = vld [vmem:[%s10362_s6 + $0x4e0] sm:$0xff]  ;;  %v358_v15 = vld [vmem:[%s10362_s6 + $0x4e8] sm:$0xff] }
  0x37   : > { %v360_v16 = vld [vmem:[%s10362_s6 + $0x500] sm:$0xff]  ;;  %357 = vst [vmem:[%s10370_s7 + $0x270] sm:$0xff] %v356_v14  ;;  %359 = vst [vmem:[%s10370_s7 + $0x278] sm:$0xff] %v358_v15  ;;  %v362_v17 = vld [vmem:[%s10362_s6 + $0x508] sm:$0xff] }
  0x38   : > { %361 = vst [vmem:[%s10370_s7 + $0x280] sm:$0xff] %v360_v16  ;;  %v364_v18 = vld [vmem:[%s10362_s6 + $0x520] sm:$0xff]  ;;  %v366_v19 = vld [vmem:[%s10362_s6 + $0x528] sm:$0xff]  ;;  %363 = vst [vmem:[%s10370_s7 + $0x288] sm:$0xff] %v362_v17 }
  0x39   : > { %365 = vst [vmem:[%s10370_s7 + $0x290] sm:$0xff] %v364_v18  ;;  %367 = vst [vmem:[%s10370_s7 + $0x298] sm:$0xff] %v366_v19  ;;  %v368_v20 = vld [vmem:[%s10362_s6 + $0x540] sm:$0xff]  ;;  %v370_v21 = vld [vmem:[%s10362_s6 + $0x548] sm:$0xff] }
  0x3a   : > { %v372_v22 = vld [vmem:[%s10362_s6 + $0x560] sm:$0xff]  ;;  %369 = vst [vmem:[%s10370_s7 + $0x2a0] sm:$0xff] %v368_v20  ;;  %371 = vst [vmem:[%s10370_s7 + $0x2a8] sm:$0xff] %v370_v21  ;;  %v374_v23 = vld [vmem:[%s10362_s6 + $0x568] sm:$0xff] }
  0x3b   : > { %373 = vst [vmem:[%s10370_s7 + $0x2b0] sm:$0xff] %v372_v22  ;;  %v376_v24 = vld [vmem:[%s10362_s6 + $0x580] sm:$0xff]  ;;  %v378_v25 = vld [vmem:[%s10362_s6 + $0x588] sm:$0xff]  ;;  %375 = vst [vmem:[%s10370_s7 + $0x2b8] sm:$0xff] %v374_v23 }
  0x3c   : > { %377 = vst [vmem:[%s10370_s7 + $0x2c0] sm:$0xff] %v376_v24  ;;  %379 = vst [vmem:[%s10370_s7 + $0x2c8] sm:$0xff] %v378_v25  ;;  %v380_v26 = vld [vmem:[%s10362_s6 + $0x5a0] sm:$0xff]  ;;  %v382_v27 = vld [vmem:[%s10362_s6 + $0x5a8] sm:$0xff] }
  0x3d   : > { %v384_v28 = vld [vmem:[%s10362_s6 + $0x5c0] sm:$0xff]  ;;  %381 = vst [vmem:[%s10370_s7 + $0x2d0] sm:$0xff] %v380_v26  ;;  %383 = vst [vmem:[%s10370_s7 + $0x2d8] sm:$0xff] %v382_v27  ;;  %v386_v29 = vld [vmem:[%s10362_s6 + $0x5c8] sm:$0xff] }
  0x3e   : > { %385 = vst [vmem:[%s10370_s7 + $0x2e0] sm:$0xff] %v384_v28  ;;  %v388_v30 = vld [vmem:[%s10362_s6 + $0x5e0] sm:$0xff]  ;;  %v390_v31 = vld [vmem:[%s10362_s6 + $0x5e8] sm:$0xff]  ;;  %387 = vst [vmem:[%s10370_s7 + $0x2e8] sm:$0xff] %v386_v29 }
  0x3f   : > { %389 = vst [vmem:[%s10370_s7 + $0x2f0] sm:$0xff] %v388_v30  ;;  %391 = vst [vmem:[%s10370_s7 + $0x2f8] sm:$0xff] %v390_v31  ;;  %v392_v32 = vld [vmem:[%s10362_s6 + $0x600] sm:$0xff]  ;;  %v394_v33 = vld [vmem:[%s10362_s6 + $0x608] sm:$0xff] }
  0x40   : > { %v396_v34 = vld [vmem:[%s10362_s6 + $0x620] sm:$0xff]  ;;  %393 = vst [vmem:[%s10370_s7 + $0x300] sm:$0xff] %v392_v32  ;;  %395 = vst [vmem:[%s10370_s7 + $0x308] sm:$0xff] %v394_v33  ;;  %v398_v35 = vld [vmem:[%s10362_s6 + $0x628] sm:$0xff] }
  0x41   : > { %397 = vst [vmem:[%s10370_s7 + $0x310] sm:$0xff] %v396_v34  ;;  %v400_v36 = vld [vmem:[%s10362_s6 + $0x640] sm:$0xff]  ;;  %v402_v37 = vld [vmem:[%s10362_s6 + $0x648] sm:$0xff]  ;;  %399 = vst [vmem:[%s10370_s7 + $0x318] sm:$0xff] %v398_v35 }
  0x42   : > { %401 = vst [vmem:[%s10370_s7 + $0x320] sm:$0xff] %v400_v36  ;;  %403 = vst [vmem:[%s10370_s7 + $0x328] sm:$0xff] %v402_v37  ;;  %v404_v38 = vld [vmem:[%s10362_s6 + $0x660] sm:$0xff]  ;;  %v406_v39 = vld [vmem:[%s10362_s6 + $0x668] sm:$0xff] }
  0x43   : > { %v408_v40 = vld [vmem:[%s10362_s6 + $0x680] sm:$0xff]  ;;  %405 = vst [vmem:[%s10370_s7 + $0x330] sm:$0xff] %v404_v38  ;;  %407 = vst [vmem:[%s10370_s7 + $0x338] sm:$0xff] %v406_v39  ;;  %v410_v41 = vld [vmem:[%s10362_s6 + $0x688] sm:$0xff] }
  0x44   : > { %409 = vst [vmem:[%s10370_s7 + $0x340] sm:$0xff] %v408_v40  ;;  %v412_v42 = vld [vmem:[%s10362_s6 + $0x6a0] sm:$0xff]  ;;  %v414_v43 = vld [vmem:[%s10362_s6 + $0x6a8] sm:$0xff]  ;;  %411 = vst [vmem:[%s10370_s7 + $0x348] sm:$0xff] %v410_v41 }
  0x45   : > { %413 = vst [vmem:[%s10370_s7 + $0x350] sm:$0xff] %v412_v42  ;;  %415 = vst [vmem:[%s10370_s7 + $0x358] sm:$0xff] %v414_v43  ;;  %v416_v44 = vld [vmem:[%s10362_s6 + $0x6c0] sm:$0xff]  ;;  %v418_v45 = vld [vmem:[%s10362_s6 + $0x6c8] sm:$0xff] }
  0x46   : > { %v420_v46 = vld [vmem:[%s10362_s6 + $0x6e0] sm:$0xff]  ;;  %417 = vst [vmem:[%s10370_s7 + $0x360] sm:$0xff] %v416_v44  ;;  %419 = vst [vmem:[%s10370_s7 + $0x368] sm:$0xff] %v418_v45  ;;  %v422_v47 = vld [vmem:[%s10362_s6 + $0x6e8] sm:$0xff] }
  0x47   : > { %421 = vst [vmem:[%s10370_s7 + $0x370] sm:$0xff] %v420_v46  ;;  %v424_v48 = vld [vmem:[%s10362_s6 + $0x700] sm:$0xff]  ;;  %v426_v49 = vld [vmem:[%s10362_s6 + $0x708] sm:$0xff]  ;;  %423 = vst [vmem:[%s10370_s7 + $0x378] sm:$0xff] %v422_v47 }
  0x48   : > { %425 = vst [vmem:[%s10370_s7 + $0x380] sm:$0xff] %v424_v48  ;;  %427 = vst [vmem:[%s10370_s7 + $0x388] sm:$0xff] %v426_v49  ;;  %v428_v50 = vld [vmem:[%s10362_s6 + $0x720] sm:$0xff]  ;;  %v430_v51 = vld [vmem:[%s10362_s6 + $0x728] sm:$0xff] }
  0x49   : > { %v432_v52 = vld [vmem:[%s10362_s6 + $0x740] sm:$0xff]  ;;  %429 = vst [vmem:[%s10370_s7 + $0x390] sm:$0xff] %v428_v50  ;;  %431 = vst [vmem:[%s10370_s7 + $0x398] sm:$0xff] %v430_v51  ;;  %v434_v53 = vld [vmem:[%s10362_s6 + $0x748] sm:$0xff] }
  0x4a   : > { %433 = vst [vmem:[%s10370_s7 + $0x3a0] sm:$0xff] %v432_v52  ;;  %v436_v54 = vld [vmem:[%s10362_s6 + $0x760] sm:$0xff]  ;;  %v438_v55 = vld [vmem:[%s10362_s6 + $0x768] sm:$0xff]  ;;  %435 = vst [vmem:[%s10370_s7 + $0x3a8] sm:$0xff] %v434_v53 }
  0x4b   : > { %437 = vst [vmem:[%s10370_s7 + $0x3b0] sm:$0xff] %v436_v54  ;;  %439 = vst [vmem:[%s10370_s7 + $0x3b8] sm:$0xff] %v438_v55  ;;  %v440_v56 = vld [vmem:[%s10362_s6 + $0x780] sm:$0xff]  ;;  %v442_v57 = vld [vmem:[%s10362_s6 + $0x788] sm:$0xff] }
  0x4c   : > { %v444_v58 = vld [vmem:[%s10362_s6 + $0x7a0] sm:$0xff]  ;;  %441 = vst [vmem:[%s10370_s7 + $0x3c0] sm:$0xff] %v440_v56  ;;  %443 = vst [vmem:[%s10370_s7 + $0x3c8] sm:$0xff] %v442_v57  ;;  %v446_v59 = vld [vmem:[%s10362_s6 + $0x7a8] sm:$0xff] }
  0x4d   : > { %445 = vst [vmem:[%s10370_s7 + $0x3d0] sm:$0xff] %v444_v58  ;;  %v448_v60 = vld [vmem:[%s10362_s6 + $0x7c0] sm:$0xff]  ;;  %v450_v61 = vld [vmem:[%s10362_s6 + $0x7c8] sm:$0xff]  ;;  %447 = vst [vmem:[%s10370_s7 + $0x3d8] sm:$0xff] %v446_v59 }
  0x4e   : > { %449 = vst [vmem:[%s10370_s7 + $0x3e0] sm:$0xff] %v448_v60  ;;  %451 = vst [vmem:[%s10370_s7 + $0x3e8] sm:$0xff] %v450_v61  ;;  %v452_v62 = vld [vmem:[%s10362_s6 + $0x7e0] sm:$0xff]  ;;  %v454_v63 = vld [vmem:[%s10362_s6 + $0x7e8] sm:$0xff] }
  0x4f   : > { %v456_v0 = vld [vmem:[%s10362_s6 + $0x800] sm:$0xff]  ;;  %453 = vst [vmem:[%s10370_s7 + $0x3f0] sm:$0xff] %v452_v62  ;;  %455 = vst [vmem:[%s10370_s7 + $0x3f8] sm:$0xff] %v454_v63  ;;  %v458_v1 = vld [vmem:[%s10362_s6 + $0x808] sm:$0xff] }
  0x50   : > { %457 = vst [vmem:[%s10370_s7 + $0x400] sm:$0xff] %v456_v0  ;;  %v460_v2 = vld [vmem:[%s10362_s6 + $0x820] sm:$0xff]  ;;  %v462_v3 = vld [vmem:[%s10362_s6 + $0x828] sm:$0xff]  ;;  %459 = vst [vmem:[%s10370_s7 + $0x408] sm:$0xff] %v458_v1 }
  0x51   : > { %461 = vst [vmem:[%s10370_s7 + $0x410] sm:$0xff] %v460_v2  ;;  %463 = vst [vmem:[%s10370_s7 + $0x418] sm:$0xff] %v462_v3  ;;  %v464_v4 = vld [vmem:[%s10362_s6 + $0x840] sm:$0xff]  ;;  %v466_v5 = vld [vmem:[%s10362_s6 + $0x848] sm:$0xff] }
  0x52   : > { %v468_v6 = vld [vmem:[%s10362_s6 + $0x860] sm:$0xff]  ;;  %465 = vst [vmem:[%s10370_s7 + $0x420] sm:$0xff] %v464_v4  ;;  %467 = vst [vmem:[%s10370_s7 + $0x428] sm:$0xff] %v466_v5  ;;  %v470_v7 = vld [vmem:[%s10362_s6 + $0x868] sm:$0xff] }
  0x53   : > { %469 = vst [vmem:[%s10370_s7 + $0x430] sm:$0xff] %v468_v6  ;;  %v472_v8 = vld [vmem:[%s10362_s6 + $0x880] sm:$0xff]  ;;  %v474_v9 = vld [vmem:[%s10362_s6 + $0x888] sm:$0xff]  ;;  %471 = vst [vmem:[%s10370_s7 + $0x438] sm:$0xff] %v470_v7 }
  0x54   : > { %473 = vst [vmem:[%s10370_s7 + $0x440] sm:$0xff] %v472_v8  ;;  %475 = vst [vmem:[%s10370_s7 + $0x448] sm:$0xff] %v474_v9  ;;  %v476_v10 = vld [vmem:[%s10362_s6 + $0x8a0] sm:$0xff]  ;;  %v478_v11 = vld [vmem:[%s10362_s6 + $0x8a8] sm:$0xff] }
  0x55   : > { %v480_v12 = vld [vmem:[%s10362_s6 + $0x8c0] sm:$0xff]  ;;  %477 = vst [vmem:[%s10370_s7 + $0x450] sm:$0xff] %v476_v10  ;;  %479 = vst [vmem:[%s10370_s7 + $0x458] sm:$0xff] %v478_v11  ;;  %v482_v13 = vld [vmem:[%s10362_s6 + $0x8c8] sm:$0xff] }
  0x56   : > { %481 = vst [vmem:[%s10370_s7 + $0x460] sm:$0xff] %v480_v12  ;;  %v484_v14 = vld [vmem:[%s10362_s6 + $0x8e0] sm:$0xff]  ;;  %v486_v15 = vld [vmem:[%s10362_s6 + $0x8e8] sm:$0xff]  ;;  %483 = vst [vmem:[%s10370_s7 + $0x468] sm:$0xff] %v482_v13 }
  0x57   : > { %485 = vst [vmem:[%s10370_s7 + $0x470] sm:$0xff] %v484_v14  ;;  %487 = vst [vmem:[%s10370_s7 + $0x478] sm:$0xff] %v486_v15  ;;  %v488_v16 = vld [vmem:[%s10362_s6 + $0x900] sm:$0xff]  ;;  %v490_v17 = vld [vmem:[%s10362_s6 + $0x908] sm:$0xff] }
  0x58   : > { %v492_v18 = vld [vmem:[%s10362_s6 + $0x920] sm:$0xff]  ;;  %489 = vst [vmem:[%s10370_s7 + $0x480] sm:$0xff] %v488_v16  ;;  %491 = vst [vmem:[%s10370_s7 + $0x488] sm:$0xff] %v490_v17  ;;  %v494_v19 = vld [vmem:[%s10362_s6 + $0x928] sm:$0xff] }
  0x59   : > { %493 = vst [vmem:[%s10370_s7 + $0x490] sm:$0xff] %v492_v18  ;;  %v496_v20 = vld [vmem:[%s10362_s6 + $0x940] sm:$0xff]  ;;  %v498_v21 = vld [vmem:[%s10362_s6 + $0x948] sm:$0xff]  ;;  %495 = vst [vmem:[%s10370_s7 + $0x498] sm:$0xff] %v494_v19 }
  0x5a   : > { %497 = vst [vmem:[%s10370_s7 + $0x4a0] sm:$0xff] %v496_v20  ;;  %499 = vst [vmem:[%s10370_s7 + $0x4a8] sm:$0xff] %v498_v21  ;;  %v500_v22 = vld [vmem:[%s10362_s6 + $0x960] sm:$0xff]  ;;  %v502_v23 = vld [vmem:[%s10362_s6 + $0x968] sm:$0xff] }
  0x5b   : > { %v504_v24 = vld [vmem:[%s10362_s6 + $0x980] sm:$0xff]  ;;  %501 = vst [vmem:[%s10370_s7 + $0x4b0] sm:$0xff] %v500_v22  ;;  %503 = vst [vmem:[%s10370_s7 + $0x4b8] sm:$0xff] %v502_v23  ;;  %v506_v25 = vld [vmem:[%s10362_s6 + $0x988] sm:$0xff] }
  0x5c   : > { %505 = vst [vmem:[%s10370_s7 + $0x4c0] sm:$0xff] %v504_v24  ;;  %v508_v26 = vld [vmem:[%s10362_s6 + $0x9a0] sm:$0xff]  ;;  %v510_v27 = vld [vmem:[%s10362_s6 + $0x9a8] sm:$0xff]  ;;  %507 = vst [vmem:[%s10370_s7 + $0x4c8] sm:$0xff] %v506_v25 }
  0x5d   : > { %509 = vst [vmem:[%s10370_s7 + $0x4d0] sm:$0xff] %v508_v26  ;;  %511 = vst [vmem:[%s10370_s7 + $0x4d8] sm:$0xff] %v510_v27  ;;  %v512_v28 = vld [vmem:[%s10362_s6 + $0x9c0] sm:$0xff]  ;;  %v514_v29 = vld [vmem:[%s10362_s6 + $0x9c8] sm:$0xff] }
  0x5e   : > { %v516_v30 = vld [vmem:[%s10362_s6 + $0x9e0] sm:$0xff]  ;;  %513 = vst [vmem:[%s10370_s7 + $0x4e0] sm:$0xff] %v512_v28  ;;  %515 = vst [vmem:[%s10370_s7 + $0x4e8] sm:$0xff] %v514_v29  ;;  %v518_v31 = vld [vmem:[%s10362_s6 + $0x9e8] sm:$0xff] }
  0x5f   : > { %517 = vst [vmem:[%s10370_s7 + $0x4f0] sm:$0xff] %v516_v30  ;;  %v520_v32 = vld [vmem:[%s10362_s6 + $0xa00] sm:$0xff]  ;;  %v522_v33 = vld [vmem:[%s10362_s6 + $0xa08] sm:$0xff]  ;;  %519 = vst [vmem:[%s10370_s7 + $0x4f8] sm:$0xff] %v518_v31 }
  0x60   : > { %521 = vst [vmem:[%s10370_s7 + $0x500] sm:$0xff] %v520_v32  ;;  %523 = vst [vmem:[%s10370_s7 + $0x508] sm:$0xff] %v522_v33  ;;  %v524_v34 = vld [vmem:[%s10362_s6 + $0xa20] sm:$0xff]  ;;  %v526_v35 = vld [vmem:[%s10362_s6 + $0xa28] sm:$0xff] }
  0x61   : > { %v528_v36 = vld [vmem:[%s10362_s6 + $0xa40] sm:$0xff]  ;;  %525 = vst [vmem:[%s10370_s7 + $0x510] sm:$0xff] %v524_v34  ;;  %527 = vst [vmem:[%s10370_s7 + $0x518] sm:$0xff] %v526_v35  ;;  %v530_v37 = vld [vmem:[%s10362_s6 + $0xa48] sm:$0xff] }
  0x62   : > { %529 = vst [vmem:[%s10370_s7 + $0x520] sm:$0xff] %v528_v36  ;;  %v532_v38 = vld [vmem:[%s10362_s6 + $0xa60] sm:$0xff]  ;;  %v534_v39 = vld [vmem:[%s10362_s6 + $0xa68] sm:$0xff]  ;;  %531 = vst [vmem:[%s10370_s7 + $0x528] sm:$0xff] %v530_v37 }
  0x63   : > { %533 = vst [vmem:[%s10370_s7 + $0x530] sm:$0xff] %v532_v38  ;;  %535 = vst [vmem:[%s10370_s7 + $0x538] sm:$0xff] %v534_v39  ;;  %v536_v40 = vld [vmem:[%s10362_s6 + $0xa80] sm:$0xff]  ;;  %v538_v41 = vld [vmem:[%s10362_s6 + $0xa88] sm:$0xff] }
  0x64   : > { %v540_v42 = vld [vmem:[%s10362_s6 + $0xaa0] sm:$0xff]  ;;  %537 = vst [vmem:[%s10370_s7 + $0x540] sm:$0xff] %v536_v40  ;;  %539 = vst [vmem:[%s10370_s7 + $0x548] sm:$0xff] %v538_v41  ;;  %v542_v43 = vld [vmem:[%s10362_s6 + $0xaa8] sm:$0xff] }
  0x65   : > { %541 = vst [vmem:[%s10370_s7 + $0x550] sm:$0xff] %v540_v42  ;;  %v544_v44 = vld [vmem:[%s10362_s6 + $0xac0] sm:$0xff]  ;;  %v546_v45 = vld [vmem:[%s10362_s6 + $0xac8] sm:$0xff]  ;;  %543 = vst [vmem:[%s10370_s7 + $0x558] sm:$0xff] %v542_v43 }
  0x66   : > { %545 = vst [vmem:[%s10370_s7 + $0x560] sm:$0xff] %v544_v44  ;;  %547 = vst [vmem:[%s10370_s7 + $0x568] sm:$0xff] %v546_v45  ;;  %v548_v46 = vld [vmem:[%s10362_s6 + $0xae0] sm:$0xff]  ;;  %v550_v47 = vld [vmem:[%s10362_s6 + $0xae8] sm:$0xff] }
  0x67   : > { %v552_v48 = vld [vmem:[%s10362_s6 + $0xb00] sm:$0xff]  ;;  %549 = vst [vmem:[%s10370_s7 + $0x570] sm:$0xff] %v548_v46  ;;  %551 = vst [vmem:[%s10370_s7 + $0x578] sm:$0xff] %v550_v47  ;;  %v554_v49 = vld [vmem:[%s10362_s6 + $0xb08] sm:$0xff] }
  0x68   : > { %553 = vst [vmem:[%s10370_s7 + $0x580] sm:$0xff] %v552_v48  ;;  %v556_v50 = vld [vmem:[%s10362_s6 + $0xb20] sm:$0xff]  ;;  %v558_v51 = vld [vmem:[%s10362_s6 + $0xb28] sm:$0xff]  ;;  %555 = vst [vmem:[%s10370_s7 + $0x588] sm:$0xff] %v554_v49 }
  0x69   : > { %557 = vst [vmem:[%s10370_s7 + $0x590] sm:$0xff] %v556_v50  ;;  %559 = vst [vmem:[%s10370_s7 + $0x598] sm:$0xff] %v558_v51  ;;  %v560_v52 = vld [vmem:[%s10362_s6 + $0xb40] sm:$0xff]  ;;  %v562_v53 = vld [vmem:[%s10362_s6 + $0xb48] sm:$0xff] }
  0x6a   : > { %v564_v54 = vld [vmem:[%s10362_s6 + $0xb60] sm:$0xff]  ;;  %561 = vst [vmem:[%s10370_s7 + $0x5a0] sm:$0xff] %v560_v52  ;;  %563 = vst [vmem:[%s10370_s7 + $0x5a8] sm:$0xff] %v562_v53  ;;  %v566_v55 = vld [vmem:[%s10362_s6 + $0xb68] sm:$0xff] }
  0x6b   : > { %565 = vst [vmem:[%s10370_s7 + $0x5b0] sm:$0xff] %v564_v54  ;;  %v568_v56 = vld [vmem:[%s10362_s6 + $0xb80] sm:$0xff]  ;;  %v570_v57 = vld [vmem:[%s10362_s6 + $0xb88] sm:$0xff]  ;;  %567 = vst [vmem:[%s10370_s7 + $0x5b8] sm:$0xff] %v566_v55 }
  0x6c   : > { %569 = vst [vmem:[%s10370_s7 + $0x5c0] sm:$0xff] %v568_v56  ;;  %571 = vst [vmem:[%s10370_s7 + $0x5c8] sm:$0xff] %v570_v57  ;;  %v572_v58 = vld [vmem:[%s10362_s6 + $0xba0] sm:$0xff]  ;;  %v574_v59 = vld [vmem:[%s10362_s6 + $0xba8] sm:$0xff] }
  0x6d   : > { %v576_v60 = vld [vmem:[%s10362_s6 + $0xbc0] sm:$0xff]  ;;  %573 = vst [vmem:[%s10370_s7 + $0x5d0] sm:$0xff] %v572_v58  ;;  %575 = vst [vmem:[%s10370_s7 + $0x5d8] sm:$0xff] %v574_v59  ;;  %v578_v61 = vld [vmem:[%s10362_s6 + $0xbc8] sm:$0xff] }
  0x6e   : > { %577 = vst [vmem:[%s10370_s7 + $0x5e0] sm:$0xff] %v576_v60  ;;  %v580_v62 = vld [vmem:[%s10362_s6 + $0xbe0] sm:$0xff]  ;;  %v582_v63 = vld [vmem:[%s10362_s6 + $0xbe8] sm:$0xff]  ;;  %579 = vst [vmem:[%s10370_s7 + $0x5e8] sm:$0xff] %v578_v61 }
  0x6f   : > { %581 = vst [vmem:[%s10370_s7 + $0x5f0] sm:$0xff] %v580_v62  ;;  %583 = vst [vmem:[%s10370_s7 + $0x5f8] sm:$0xff] %v582_v63  ;;  %v584_v0 = vld [vmem:[%s10362_s6 + $0xc00] sm:$0xff]  ;;  %v586_v1 = vld [vmem:[%s10362_s6 + $0xc08] sm:$0xff] }
  0x70   : > { %v588_v2 = vld [vmem:[%s10362_s6 + $0xc20] sm:$0xff]  ;;  %585 = vst [vmem:[%s10370_s7 + $0x600] sm:$0xff] %v584_v0  ;;  %587 = vst [vmem:[%s10370_s7 + $0x608] sm:$0xff] %v586_v1  ;;  %v590_v3 = vld [vmem:[%s10362_s6 + $0xc28] sm:$0xff] }
  0x71   : > { %589 = vst [vmem:[%s10370_s7 + $0x610] sm:$0xff] %v588_v2  ;;  %v592_v4 = vld [vmem:[%s10362_s6 + $0xc40] sm:$0xff]  ;;  %v594_v5 = vld [vmem:[%s10362_s6 + $0xc48] sm:$0xff]  ;;  %591 = vst [vmem:[%s10370_s7 + $0x618] sm:$0xff] %v590_v3 }
  0x72   : > { %593 = vst [vmem:[%s10370_s7 + $0x620] sm:$0xff] %v592_v4  ;;  %595 = vst [vmem:[%s10370_s7 + $0x628] sm:$0xff] %v594_v5  ;;  %v596_v6 = vld [vmem:[%s10362_s6 + $0xc60] sm:$0xff]  ;;  %v598_v7 = vld [vmem:[%s10362_s6 + $0xc68] sm:$0xff] }
  0x73   : > { %v600_v8 = vld [vmem:[%s10362_s6 + $0xc80] sm:$0xff]  ;;  %597 = vst [vmem:[%s10370_s7 + $0x630] sm:$0xff] %v596_v6  ;;  %599 = vst [vmem:[%s10370_s7 + $0x638] sm:$0xff] %v598_v7  ;;  %v602_v9 = vld [vmem:[%s10362_s6 + $0xc88] sm:$0xff] }
  0x74   : > { %601 = vst [vmem:[%s10370_s7 + $0x640] sm:$0xff] %v600_v8  ;;  %v604_v10 = vld [vmem:[%s10362_s6 + $0xca0] sm:$0xff]  ;;  %v606_v11 = vld [vmem:[%s10362_s6 + $0xca8] sm:$0xff]  ;;  %603 = vst [vmem:[%s10370_s7 + $0x648] sm:$0xff] %v602_v9 }
  0x75   : > { %605 = vst [vmem:[%s10370_s7 + $0x650] sm:$0xff] %v604_v10  ;;  %607 = vst [vmem:[%s10370_s7 + $0x658] sm:$0xff] %v606_v11  ;;  %v608_v12 = vld [vmem:[%s10362_s6 + $0xcc0] sm:$0xff]  ;;  %v610_v13 = vld [vmem:[%s10362_s6 + $0xcc8] sm:$0xff] }
  0x76   : > { %v612_v14 = vld [vmem:[%s10362_s6 + $0xce0] sm:$0xff]  ;;  %609 = vst [vmem:[%s10370_s7 + $0x660] sm:$0xff] %v608_v12  ;;  %611 = vst [vmem:[%s10370_s7 + $0x668] sm:$0xff] %v610_v13  ;;  %v614_v15 = vld [vmem:[%s10362_s6 + $0xce8] sm:$0xff] }
  0x77   : > { %613 = vst [vmem:[%s10370_s7 + $0x670] sm:$0xff] %v612_v14  ;;  %v616_v16 = vld [vmem:[%s10362_s6 + $0xd00] sm:$0xff]  ;;  %v618_v17 = vld [vmem:[%s10362_s6 + $0xd08] sm:$0xff]  ;;  %615 = vst [vmem:[%s10370_s7 + $0x678] sm:$0xff] %v614_v15 }
  0x78   : > { %617 = vst [vmem:[%s10370_s7 + $0x680] sm:$0xff] %v616_v16  ;;  %619 = vst [vmem:[%s10370_s7 + $0x688] sm:$0xff] %v618_v17  ;;  %v620_v18 = vld [vmem:[%s10362_s6 + $0xd20] sm:$0xff]  ;;  %v622_v19 = vld [vmem:[%s10362_s6 + $0xd28] sm:$0xff] }
  0x79   : > { %v624_v20 = vld [vmem:[%s10362_s6 + $0xd40] sm:$0xff]  ;;  %621 = vst [vmem:[%s10370_s7 + $0x690] sm:$0xff] %v620_v18  ;;  %623 = vst [vmem:[%s10370_s7 + $0x698] sm:$0xff] %v622_v19  ;;  %v626_v21 = vld [vmem:[%s10362_s6 + $0xd48] sm:$0xff] }
  0x7a   : > { %625 = vst [vmem:[%s10370_s7 + $0x6a0] sm:$0xff] %v624_v20  ;;  %v628_v22 = vld [vmem:[%s10362_s6 + $0xd60] sm:$0xff]  ;;  %v630_v23 = vld [vmem:[%s10362_s6 + $0xd68] sm:$0xff]  ;;  %627 = vst [vmem:[%s10370_s7 + $0x6a8] sm:$0xff] %v626_v21 }
  0x7b   : > { %629 = vst [vmem:[%s10370_s7 + $0x6b0] sm:$0xff] %v628_v22  ;;  %631 = vst [vmem:[%s10370_s7 + $0x6b8] sm:$0xff] %v630_v23  ;;  %v632_v24 = vld [vmem:[%s10362_s6 + $0xd80] sm:$0xff]  ;;  %v634_v25 = vld [vmem:[%s10362_s6 + $0xd88] sm:$0xff] }
  0x7c   : > { %v636_v26 = vld [vmem:[%s10362_s6 + $0xda0] sm:$0xff]  ;;  %633 = vst [vmem:[%s10370_s7 + $0x6c0] sm:$0xff] %v632_v24  ;;  %635 = vst [vmem:[%s10370_s7 + $0x6c8] sm:$0xff] %v634_v25  ;;  %v638_v27 = vld [vmem:[%s10362_s6 + $0xda8] sm:$0xff] }
  0x7d   : > { %637 = vst [vmem:[%s10370_s7 + $0x6d0] sm:$0xff] %v636_v26  ;;  %v640_v28 = vld [vmem:[%s10362_s6 + $0xdc0] sm:$0xff]  ;;  %v642_v29 = vld [vmem:[%s10362_s6 + $0xdc8] sm:$0xff]  ;;  %639 = vst [vmem:[%s10370_s7 + $0x6d8] sm:$0xff] %v638_v27 }
  0x7e   : > { %641 = vst [vmem:[%s10370_s7 + $0x6e0] sm:$0xff] %v640_v28  ;;  %643 = vst [vmem:[%s10370_s7 + $0x6e8] sm:$0xff] %v642_v29  ;;  %v644_v30 = vld [vmem:[%s10362_s6 + $0xde0] sm:$0xff]  ;;  %v646_v31 = vld [vmem:[%s10362_s6 + $0xde8] sm:$0xff] }
  0x7f   : > { %v648_v32 = vld [vmem:[%s10362_s6 + $0xe00] sm:$0xff]  ;;  %645 = vst [vmem:[%s10370_s7 + $0x6f0] sm:$0xff] %v644_v30  ;;  %647 = vst [vmem:[%s10370_s7 + $0x6f8] sm:$0xff] %v646_v31  ;;  %v650_v33 = vld [vmem:[%s10362_s6 + $0xe08] sm:$0xff] }
  0x80   : > { %649 = vst [vmem:[%s10370_s7 + $0x700] sm:$0xff] %v648_v32  ;;  %v652_v34 = vld [vmem:[%s10362_s6 + $0xe20] sm:$0xff]  ;;  %v654_v35 = vld [vmem:[%s10362_s6 + $0xe28] sm:$0xff]  ;;  %651 = vst [vmem:[%s10370_s7 + $0x708] sm:$0xff] %v650_v33 }
  0x81   : > { %653 = vst [vmem:[%s10370_s7 + $0x710] sm:$0xff] %v652_v34  ;;  %655 = vst [vmem:[%s10370_s7 + $0x718] sm:$0xff] %v654_v35  ;;  %v656_v36 = vld [vmem:[%s10362_s6 + $0xe40] sm:$0xff]  ;;  %v658_v37 = vld [vmem:[%s10362_s6 + $0xe48] sm:$0xff] }
  0x82   : > { %v660_v38 = vld [vmem:[%s10362_s6 + $0xe60] sm:$0xff]  ;;  %657 = vst [vmem:[%s10370_s7 + $0x720] sm:$0xff] %v656_v36  ;;  %659 = vst [vmem:[%s10370_s7 + $0x728] sm:$0xff] %v658_v37  ;;  %v662_v39 = vld [vmem:[%s10362_s6 + $0xe68] sm:$0xff] }
  0x83   : > { %661 = vst [vmem:[%s10370_s7 + $0x730] sm:$0xff] %v660_v38  ;;  %v664_v40 = vld [vmem:[%s10362_s6 + $0xe80] sm:$0xff]  ;;  %v666_v41 = vld [vmem:[%s10362_s6 + $0xe88] sm:$0xff]  ;;  %663 = vst [vmem:[%s10370_s7 + $0x738] sm:$0xff] %v662_v39 }
  0x84   : > { %665 = vst [vmem:[%s10370_s7 + $0x740] sm:$0xff] %v664_v40  ;;  %667 = vst [vmem:[%s10370_s7 + $0x748] sm:$0xff] %v666_v41  ;;  %v668_v42 = vld [vmem:[%s10362_s6 + $0xea0] sm:$0xff]  ;;  %v670_v43 = vld [vmem:[%s10362_s6 + $0xea8] sm:$0xff] }
  0x85   : > { %v672_v44 = vld [vmem:[%s10362_s6 + $0xec0] sm:$0xff]  ;;  %669 = vst [vmem:[%s10370_s7 + $0x750] sm:$0xff] %v668_v42  ;;  %671 = vst [vmem:[%s10370_s7 + $0x758] sm:$0xff] %v670_v43  ;;  %v674_v45 = vld [vmem:[%s10362_s6 + $0xec8] sm:$0xff] }
  0x86   : > { %673 = vst [vmem:[%s10370_s7 + $0x760] sm:$0xff] %v672_v44  ;;  %v676_v46 = vld [vmem:[%s10362_s6 + $0xee0] sm:$0xff]  ;;  %v678_v47 = vld [vmem:[%s10362_s6 + $0xee8] sm:$0xff]  ;;  %675 = vst [vmem:[%s10370_s7 + $0x768] sm:$0xff] %v674_v45 }
  0x87   : > { %677 = vst [vmem:[%s10370_s7 + $0x770] sm:$0xff] %v676_v46  ;;  %679 = vst [vmem:[%s10370_s7 + $0x778] sm:$0xff] %v678_v47  ;;  %v680_v48 = vld [vmem:[%s10362_s6 + $0xf00] sm:$0xff]  ;;  %v682_v49 = vld [vmem:[%s10362_s6 + $0xf08] sm:$0xff] }
  0x88   : > { %v684_v50 = vld [vmem:[%s10362_s6 + $0xf20] sm:$0xff]  ;;  %681 = vst [vmem:[%s10370_s7 + $0x780] sm:$0xff] %v680_v48  ;;  %683 = vst [vmem:[%s10370_s7 + $0x788] sm:$0xff] %v682_v49  ;;  %v686_v51 = vld [vmem:[%s10362_s6 + $0xf28] sm:$0xff] }
  0x89   : > { %685 = vst [vmem:[%s10370_s7 + $0x790] sm:$0xff] %v684_v50  ;;  %v688_v52 = vld [vmem:[%s10362_s6 + $0xf40] sm:$0xff]  ;;  %v690_v53 = vld [vmem:[%s10362_s6 + $0xf48] sm:$0xff]  ;;  %687 = vst [vmem:[%s10370_s7 + $0x798] sm:$0xff] %v686_v51 }
  0x8a   : > { %689 = vst [vmem:[%s10370_s7 + $0x7a0] sm:$0xff] %v688_v52  ;;  %691 = vst [vmem:[%s10370_s7 + $0x7a8] sm:$0xff] %v690_v53  ;;  %v692_v54 = vld [vmem:[%s10362_s6 + $0xf60] sm:$0xff]  ;;  %v694_v55 = vld [vmem:[%s10362_s6 + $0xf68] sm:$0xff] }
  0x8b   : > { %v696_v56 = vld [vmem:[%s10362_s6 + $0xf80] sm:$0xff]  ;;  %693 = vst [vmem:[%s10370_s7 + $0x7b0] sm:$0xff] %v692_v54  ;;  %695 = vst [vmem:[%s10370_s7 + $0x7b8] sm:$0xff] %v694_v55  ;;  %v698_v57 = vld [vmem:[%s10362_s6 + $0xf88] sm:$0xff] }
  0x8c   : > { %697 = vst [vmem:[%s10370_s7 + $0x7c0] sm:$0xff] %v696_v56  ;;  %v700_v58 = vld [vmem:[%s10362_s6 + $0xfa0] sm:$0xff]  ;;  %v702_v59 = vld [vmem:[%s10362_s6 + $0xfa8] sm:$0xff]  ;;  %699 = vst [vmem:[%s10370_s7 + $0x7c8] sm:$0xff] %v698_v57 }
  0x8d   : > { %701 = vst [vmem:[%s10370_s7 + $0x7d0] sm:$0xff] %v700_v58  ;;  %703 = vst [vmem:[%s10370_s7 + $0x7d8] sm:$0xff] %v702_v59  ;;  %v704_v60 = vld [vmem:[%s10362_s6 + $0xfc0] sm:$0xff]  ;;  %v706_v61 = vld [vmem:[%s10362_s6 + $0xfc8] sm:$0xff] }
  0x8e   : > { %v708_v62 = vld [vmem:[%s10362_s6 + $0xfe0] sm:$0xff]  ;;  %705 = vst [vmem:[%s10370_s7 + $0x7e0] sm:$0xff] %v704_v60  ;;  %707 = vst [vmem:[%s10370_s7 + $0x7e8] sm:$0xff] %v706_v61  ;;  %v710_v63 = vld [vmem:[%s10362_s6 + $0xfe8] sm:$0xff] }
  0x8f   : > { %709 = vst [vmem:[%s10370_s7 + $0x7f0] sm:$0xff] %v708_v62  ;;  %v712_v0 = vld [vmem:[%s10362_s6 + $0x1000] sm:$0xff]  ;;  %v714_v1 = vld [vmem:[%s10362_s6 + $0x1008] sm:$0xff]  ;;  %711 = vst [vmem:[%s10370_s7 + $0x7f8] sm:$0xff] %v710_v63 }
  0x90   : > { %713 = vst [vmem:[%s10370_s7 + $0x800] sm:$0xff] %v712_v0  ;;  %715 = vst [vmem:[%s10370_s7 + $0x808] sm:$0xff] %v714_v1  ;;  %v716_v2 = vld [vmem:[%s10362_s6 + $0x1020] sm:$0xff]  ;;  %v718_v3 = vld [vmem:[%s10362_s6 + $0x1028] sm:$0xff] }
  0x91   : > { %v720_v4 = vld [vmem:[%s10362_s6 + $0x1040] sm:$0xff]  ;;  %717 = vst [vmem:[%s10370_s7 + $0x810] sm:$0xff] %v716_v2  ;;  %719 = vst [vmem:[%s10370_s7 + $0x818] sm:$0xff] %v718_v3  ;;  %v722_v5 = vld [vmem:[%s10362_s6 + $0x1048] sm:$0xff] }
  0x92   : > { %721 = vst [vmem:[%s10370_s7 + $0x820] sm:$0xff] %v720_v4  ;;  %v724_v6 = vld [vmem:[%s10362_s6 + $0x1060] sm:$0xff]  ;;  %v726_v7 = vld [vmem:[%s10362_s6 + $0x1068] sm:$0xff]  ;;  %723 = vst [vmem:[%s10370_s7 + $0x828] sm:$0xff] %v722_v5 }
  0x93   : > { %725 = vst [vmem:[%s10370_s7 + $0x830] sm:$0xff] %v724_v6  ;;  %727 = vst [vmem:[%s10370_s7 + $0x838] sm:$0xff] %v726_v7  ;;  %v728_v8 = vld [vmem:[%s10362_s6 + $0x1080] sm:$0xff]  ;;  %v730_v9 = vld [vmem:[%s10362_s6 + $0x1088] sm:$0xff] }
  0x94   : > { %v732_v10 = vld [vmem:[%s10362_s6 + $0x10a0] sm:$0xff]  ;;  %729 = vst [vmem:[%s10370_s7 + $0x840] sm:$0xff] %v728_v8  ;;  %731 = vst [vmem:[%s10370_s7 + $0x848] sm:$0xff] %v730_v9  ;;  %v734_v11 = vld [vmem:[%s10362_s6 + $0x10a8] sm:$0xff] }
  0x95   : > { %733 = vst [vmem:[%s10370_s7 + $0x850] sm:$0xff] %v732_v10  ;;  %v736_v12 = vld [vmem:[%s10362_s6 + $0x10c0] sm:$0xff]  ;;  %v738_v13 = vld [vmem:[%s10362_s6 + $0x10c8] sm:$0xff]  ;;  %735 = vst [vmem:[%s10370_s7 + $0x858] sm:$0xff] %v734_v11 }
  0x96   : > { %737 = vst [vmem:[%s10370_s7 + $0x860] sm:$0xff] %v736_v12  ;;  %739 = vst [vmem:[%s10370_s7 + $0x868] sm:$0xff] %v738_v13  ;;  %v740_v14 = vld [vmem:[%s10362_s6 + $0x10e0] sm:$0xff]  ;;  %v742_v15 = vld [vmem:[%s10362_s6 + $0x10e8] sm:$0xff] }
  0x97   : > { %v744_v16 = vld [vmem:[%s10362_s6 + $0x1100] sm:$0xff]  ;;  %741 = vst [vmem:[%s10370_s7 + $0x870] sm:$0xff] %v740_v14  ;;  %743 = vst [vmem:[%s10370_s7 + $0x878] sm:$0xff] %v742_v15  ;;  %v746_v17 = vld [vmem:[%s10362_s6 + $0x1108] sm:$0xff] }
  0x98   : > { %745 = vst [vmem:[%s10370_s7 + $0x880] sm:$0xff] %v744_v16  ;;  %v748_v18 = vld [vmem:[%s10362_s6 + $0x1120] sm:$0xff]  ;;  %v750_v19 = vld [vmem:[%s10362_s6 + $0x1128] sm:$0xff]  ;;  %747 = vst [vmem:[%s10370_s7 + $0x888] sm:$0xff] %v746_v17 }
  0x99   : > { %749 = vst [vmem:[%s10370_s7 + $0x890] sm:$0xff] %v748_v18  ;;  %751 = vst [vmem:[%s10370_s7 + $0x898] sm:$0xff] %v750_v19  ;;  %v752_v20 = vld [vmem:[%s10362_s6 + $0x1140] sm:$0xff]  ;;  %v754_v21 = vld [vmem:[%s10362_s6 + $0x1148] sm:$0xff] }
  0x9a   : > { %v756_v22 = vld [vmem:[%s10362_s6 + $0x1160] sm:$0xff]  ;;  %753 = vst [vmem:[%s10370_s7 + $0x8a0] sm:$0xff] %v752_v20  ;;  %755 = vst [vmem:[%s10370_s7 + $0x8a8] sm:$0xff] %v754_v21  ;;  %v758_v23 = vld [vmem:[%s10362_s6 + $0x1168] sm:$0xff] }
  0x9b   : > { %757 = vst [vmem:[%s10370_s7 + $0x8b0] sm:$0xff] %v756_v22  ;;  %v760_v24 = vld [vmem:[%s10362_s6 + $0x1180] sm:$0xff]  ;;  %v762_v25 = vld [vmem:[%s10362_s6 + $0x1188] sm:$0xff]  ;;  %759 = vst [vmem:[%s10370_s7 + $0x8b8] sm:$0xff] %v758_v23 }
  0x9c   : > { %761 = vst [vmem:[%s10370_s7 + $0x8c0] sm:$0xff] %v760_v24  ;;  %763 = vst [vmem:[%s10370_s7 + $0x8c8] sm:$0xff] %v762_v25  ;;  %v764_v26 = vld [vmem:[%s10362_s6 + $0x11a0] sm:$0xff]  ;;  %v766_v27 = vld [vmem:[%s10362_s6 + $0x11a8] sm:$0xff] }
  0x9d   : > { %v768_v28 = vld [vmem:[%s10362_s6 + $0x11c0] sm:$0xff]  ;;  %765 = vst [vmem:[%s10370_s7 + $0x8d0] sm:$0xff] %v764_v26  ;;  %767 = vst [vmem:[%s10370_s7 + $0x8d8] sm:$0xff] %v766_v27  ;;  %v770_v29 = vld [vmem:[%s10362_s6 + $0x11c8] sm:$0xff] }
  0x9e   : > { %769 = vst [vmem:[%s10370_s7 + $0x8e0] sm:$0xff] %v768_v28  ;;  %v772_v30 = vld [vmem:[%s10362_s6 + $0x11e0] sm:$0xff]  ;;  %v774_v31 = vld [vmem:[%s10362_s6 + $0x11e8] sm:$0xff]  ;;  %771 = vst [vmem:[%s10370_s7 + $0x8e8] sm:$0xff] %v770_v29 }
  0x9f   : > { %773 = vst [vmem:[%s10370_s7 + $0x8f0] sm:$0xff] %v772_v30  ;;  %775 = vst [vmem:[%s10370_s7 + $0x8f8] sm:$0xff] %v774_v31  ;;  %v776_v32 = vld [vmem:[%s10362_s6 + $0x1200] sm:$0xff]  ;;  %v778_v33 = vld [vmem:[%s10362_s6 + $0x1208] sm:$0xff] }
  0xa0   : > { %v780_v34 = vld [vmem:[%s10362_s6 + $0x1220] sm:$0xff]  ;;  %777 = vst [vmem:[%s10370_s7 + $0x900] sm:$0xff] %v776_v32  ;;  %779 = vst [vmem:[%s10370_s7 + $0x908] sm:$0xff] %v778_v33  ;;  %v782_v35 = vld [vmem:[%s10362_s6 + $0x1228] sm:$0xff] }
  0xa1   : > { %781 = vst [vmem:[%s10370_s7 + $0x910] sm:$0xff] %v780_v34  ;;  %v784_v36 = vld [vmem:[%s10362_s6 + $0x1240] sm:$0xff]  ;;  %v786_v37 = vld [vmem:[%s10362_s6 + $0x1248] sm:$0xff]  ;;  %783 = vst [vmem:[%s10370_s7 + $0x918] sm:$0xff] %v782_v35 }
  0xa2   : > { %785 = vst [vmem:[%s10370_s7 + $0x920] sm:$0xff] %v784_v36  ;;  %787 = vst [vmem:[%s10370_s7 + $0x928] sm:$0xff] %v786_v37  ;;  %v788_v38 = vld [vmem:[%s10362_s6 + $0x1260] sm:$0xff]  ;;  %v790_v39 = vld [vmem:[%s10362_s6 + $0x1268] sm:$0xff] }
  0xa3   : > { %v792_v40 = vld [vmem:[%s10362_s6 + $0x1280] sm:$0xff]  ;;  %789 = vst [vmem:[%s10370_s7 + $0x930] sm:$0xff] %v788_v38  ;;  %791 = vst [vmem:[%s10370_s7 + $0x938] sm:$0xff] %v790_v39  ;;  %v794_v41 = vld [vmem:[%s10362_s6 + $0x1288] sm:$0xff] }
  0xa4   : > { %793 = vst [vmem:[%s10370_s7 + $0x940] sm:$0xff] %v792_v40  ;;  %v796_v42 = vld [vmem:[%s10362_s6 + $0x12a0] sm:$0xff]  ;;  %v798_v43 = vld [vmem:[%s10362_s6 + $0x12a8] sm:$0xff]  ;;  %795 = vst [vmem:[%s10370_s7 + $0x948] sm:$0xff] %v794_v41 }
  0xa5   : > { %797 = vst [vmem:[%s10370_s7 + $0x950] sm:$0xff] %v796_v42  ;;  %799 = vst [vmem:[%s10370_s7 + $0x958] sm:$0xff] %v798_v43  ;;  %v800_v44 = vld [vmem:[%s10362_s6 + $0x12c0] sm:$0xff]  ;;  %v802_v45 = vld [vmem:[%s10362_s6 + $0x12c8] sm:$0xff] }
  0xa6   : > { %v804_v46 = vld [vmem:[%s10362_s6 + $0x12e0] sm:$0xff]  ;;  %801 = vst [vmem:[%s10370_s7 + $0x960] sm:$0xff] %v800_v44  ;;  %803 = vst [vmem:[%s10370_s7 + $0x968] sm:$0xff] %v802_v45  ;;  %v806_v47 = vld [vmem:[%s10362_s6 + $0x12e8] sm:$0xff] }
  0xa7   : > { %805 = vst [vmem:[%s10370_s7 + $0x970] sm:$0xff] %v804_v46  ;;  %v808_v48 = vld [vmem:[%s10362_s6 + $0x1300] sm:$0xff]  ;;  %v810_v49 = vld [vmem:[%s10362_s6 + $0x1308] sm:$0xff]  ;;  %807 = vst [vmem:[%s10370_s7 + $0x978] sm:$0xff] %v806_v47 }
  0xa8   : > { %809 = vst [vmem:[%s10370_s7 + $0x980] sm:$0xff] %v808_v48  ;;  %811 = vst [vmem:[%s10370_s7 + $0x988] sm:$0xff] %v810_v49  ;;  %v812_v50 = vld [vmem:[%s10362_s6 + $0x1320] sm:$0xff]  ;;  %v814_v51 = vld [vmem:[%s10362_s6 + $0x1328] sm:$0xff] }
  0xa9   : > { %v816_v52 = vld [vmem:[%s10362_s6 + $0x1340] sm:$0xff]  ;;  %813 = vst [vmem:[%s10370_s7 + $0x990] sm:$0xff] %v812_v50  ;;  %815 = vst [vmem:[%s10370_s7 + $0x998] sm:$0xff] %v814_v51  ;;  %v818_v53 = vld [vmem:[%s10362_s6 + $0x1348] sm:$0xff] }
  0xaa   : > { %817 = vst [vmem:[%s10370_s7 + $0x9a0] sm:$0xff] %v816_v52  ;;  %v820_v54 = vld [vmem:[%s10362_s6 + $0x1360] sm:$0xff]  ;;  %v822_v55 = vld [vmem:[%s10362_s6 + $0x1368] sm:$0xff]  ;;  %819 = vst [vmem:[%s10370_s7 + $0x9a8] sm:$0xff] %v818_v53 }
  0xab   : > { %821 = vst [vmem:[%s10370_s7 + $0x9b0] sm:$0xff] %v820_v54  ;;  %823 = vst [vmem:[%s10370_s7 + $0x9b8] sm:$0xff] %v822_v55  ;;  %v824_v56 = vld [vmem:[%s10362_s6 + $0x1380] sm:$0xff]  ;;  %v826_v57 = vld [vmem:[%s10362_s6 + $0x1388] sm:$0xff] }
  0xac   : > { %v828_v58 = vld [vmem:[%s10362_s6 + $0x13a0] sm:$0xff]  ;;  %825 = vst [vmem:[%s10370_s7 + $0x9c0] sm:$0xff] %v824_v56  ;;  %827 = vst [vmem:[%s10370_s7 + $0x9c8] sm:$0xff] %v826_v57  ;;  %v830_v59 = vld [vmem:[%s10362_s6 + $0x13a8] sm:$0xff] }
  0xad   : > { %829 = vst [vmem:[%s10370_s7 + $0x9d0] sm:$0xff] %v828_v58  ;;  %v832_v60 = vld [vmem:[%s10362_s6 + $0x13c0] sm:$0xff]  ;;  %v834_v61 = vld [vmem:[%s10362_s6 + $0x13c8] sm:$0xff]  ;;  %831 = vst [vmem:[%s10370_s7 + $0x9d8] sm:$0xff] %v830_v59 }
  0xae   : > { %833 = vst [vmem:[%s10370_s7 + $0x9e0] sm:$0xff] %v832_v60  ;;  %835 = vst [vmem:[%s10370_s7 + $0x9e8] sm:$0xff] %v834_v61  ;;  %v836_v62 = vld [vmem:[%s10362_s6 + $0x13e0] sm:$0xff]  ;;  %v838_v63 = vld [vmem:[%s10362_s6 + $0x13e8] sm:$0xff] }
  0xaf   : > { %v840_v0 = vld [vmem:[%s10362_s6 + $0x1400] sm:$0xff]  ;;  %837 = vst [vmem:[%s10370_s7 + $0x9f0] sm:$0xff] %v836_v62  ;;  %839 = vst [vmem:[%s10370_s7 + $0x9f8] sm:$0xff] %v838_v63  ;;  %v842_v1 = vld [vmem:[%s10362_s6 + $0x1408] sm:$0xff] }
  0xb0   : > { %841 = vst [vmem:[%s10370_s7 + $0xa00] sm:$0xff] %v840_v0  ;;  %v844_v2 = vld [vmem:[%s10362_s6 + $0x1420] sm:$0xff]  ;;  %v846_v3 = vld [vmem:[%s10362_s6 + $0x1428] sm:$0xff]  ;;  %843 = vst [vmem:[%s10370_s7 + $0xa08] sm:$0xff] %v842_v1 }
  0xb1   : > { %845 = vst [vmem:[%s10370_s7 + $0xa10] sm:$0xff] %v844_v2  ;;  %847 = vst [vmem:[%s10370_s7 + $0xa18] sm:$0xff] %v846_v3  ;;  %v848_v4 = vld [vmem:[%s10362_s6 + $0x1440] sm:$0xff]  ;;  %v850_v5 = vld [vmem:[%s10362_s6 + $0x1448] sm:$0xff] }
  0xb2   : > { %v852_v6 = vld [vmem:[%s10362_s6 + $0x1460] sm:$0xff]  ;;  %849 = vst [vmem:[%s10370_s7 + $0xa20] sm:$0xff] %v848_v4  ;;  %851 = vst [vmem:[%s10370_s7 + $0xa28] sm:$0xff] %v850_v5  ;;  %v854_v7 = vld [vmem:[%s10362_s6 + $0x1468] sm:$0xff] }
  0xb3   : > { %853 = vst [vmem:[%s10370_s7 + $0xa30] sm:$0xff] %v852_v6  ;;  %v856_v8 = vld [vmem:[%s10362_s6 + $0x1480] sm:$0xff]  ;;  %v858_v9 = vld [vmem:[%s10362_s6 + $0x1488] sm:$0xff]  ;;  %855 = vst [vmem:[%s10370_s7 + $0xa38] sm:$0xff] %v854_v7 }
  0xb4   : > { %857 = vst [vmem:[%s10370_s7 + $0xa40] sm:$0xff] %v856_v8  ;;  %859 = vst [vmem:[%s10370_s7 + $0xa48] sm:$0xff] %v858_v9  ;;  %v860_v10 = vld [vmem:[%s10362_s6 + $0x14a0] sm:$0xff]  ;;  %v862_v11 = vld [vmem:[%s10362_s6 + $0x14a8] sm:$0xff] }
  0xb5   : > { %v864_v12 = vld [vmem:[%s10362_s6 + $0x14c0] sm:$0xff]  ;;  %861 = vst [vmem:[%s10370_s7 + $0xa50] sm:$0xff] %v860_v10  ;;  %863 = vst [vmem:[%s10370_s7 + $0xa58] sm:$0xff] %v862_v11  ;;  %v866_v13 = vld [vmem:[%s10362_s6 + $0x14c8] sm:$0xff] }
  0xb6   : > { %865 = vst [vmem:[%s10370_s7 + $0xa60] sm:$0xff] %v864_v12  ;;  %v868_v14 = vld [vmem:[%s10362_s6 + $0x14e0] sm:$0xff]  ;;  %v870_v15 = vld [vmem:[%s10362_s6 + $0x14e8] sm:$0xff]  ;;  %867 = vst [vmem:[%s10370_s7 + $0xa68] sm:$0xff] %v866_v13 }
  0xb7   : > { %869 = vst [vmem:[%s10370_s7 + $0xa70] sm:$0xff] %v868_v14  ;;  %871 = vst [vmem:[%s10370_s7 + $0xa78] sm:$0xff] %v870_v15  ;;  %v872_v16 = vld [vmem:[%s10362_s6 + $0x1500] sm:$0xff]  ;;  %v874_v17 = vld [vmem:[%s10362_s6 + $0x1508] sm:$0xff] }
  0xb8   : > { %v876_v18 = vld [vmem:[%s10362_s6 + $0x1520] sm:$0xff]  ;;  %873 = vst [vmem:[%s10370_s7 + $0xa80] sm:$0xff] %v872_v16  ;;  %875 = vst [vmem:[%s10370_s7 + $0xa88] sm:$0xff] %v874_v17  ;;  %v878_v19 = vld [vmem:[%s10362_s6 + $0x1528] sm:$0xff] }
  0xb9   : > { %877 = vst [vmem:[%s10370_s7 + $0xa90] sm:$0xff] %v876_v18  ;;  %v880_v20 = vld [vmem:[%s10362_s6 + $0x1540] sm:$0xff]  ;;  %v882_v21 = vld [vmem:[%s10362_s6 + $0x1548] sm:$0xff]  ;;  %879 = vst [vmem:[%s10370_s7 + $0xa98] sm:$0xff] %v878_v19 }
  0xba   : > { %881 = vst [vmem:[%s10370_s7 + $0xaa0] sm:$0xff] %v880_v20  ;;  %883 = vst [vmem:[%s10370_s7 + $0xaa8] sm:$0xff] %v882_v21  ;;  %v884_v22 = vld [vmem:[%s10362_s6 + $0x1560] sm:$0xff]  ;;  %v886_v23 = vld [vmem:[%s10362_s6 + $0x1568] sm:$0xff] }
  0xbb   : > { %v888_v24 = vld [vmem:[%s10362_s6 + $0x1580] sm:$0xff]  ;;  %885 = vst [vmem:[%s10370_s7 + $0xab0] sm:$0xff] %v884_v22  ;;  %887 = vst [vmem:[%s10370_s7 + $0xab8] sm:$0xff] %v886_v23  ;;  %v890_v25 = vld [vmem:[%s10362_s6 + $0x1588] sm:$0xff] }
  0xbc   : > { %889 = vst [vmem:[%s10370_s7 + $0xac0] sm:$0xff] %v888_v24  ;;  %v892_v26 = vld [vmem:[%s10362_s6 + $0x15a0] sm:$0xff]  ;;  %v894_v27 = vld [vmem:[%s10362_s6 + $0x15a8] sm:$0xff]  ;;  %891 = vst [vmem:[%s10370_s7 + $0xac8] sm:$0xff] %v890_v25 }
  0xbd   : > { %893 = vst [vmem:[%s10370_s7 + $0xad0] sm:$0xff] %v892_v26  ;;  %895 = vst [vmem:[%s10370_s7 + $0xad8] sm:$0xff] %v894_v27  ;;  %v896_v28 = vld [vmem:[%s10362_s6 + $0x15c0] sm:$0xff]  ;;  %v898_v29 = vld [vmem:[%s10362_s6 + $0x15c8] sm:$0xff] }
  0xbe   : > { %v900_v30 = vld [vmem:[%s10362_s6 + $0x15e0] sm:$0xff]  ;;  %897 = vst [vmem:[%s10370_s7 + $0xae0] sm:$0xff] %v896_v28  ;;  %899 = vst [vmem:[%s10370_s7 + $0xae8] sm:$0xff] %v898_v29  ;;  %v902_v31 = vld [vmem:[%s10362_s6 + $0x15e8] sm:$0xff] }
  0xbf   : > { %901 = vst [vmem:[%s10370_s7 + $0xaf0] sm:$0xff] %v900_v30  ;;  %v904_v32 = vld [vmem:[%s10362_s6 + $0x1600] sm:$0xff]  ;;  %v906_v33 = vld [vmem:[%s10362_s6 + $0x1608] sm:$0xff]  ;;  %903 = vst [vmem:[%s10370_s7 + $0xaf8] sm:$0xff] %v902_v31 }
  0xc0   : > { %905 = vst [vmem:[%s10370_s7 + $0xb00] sm:$0xff] %v904_v32  ;;  %907 = vst [vmem:[%s10370_s7 + $0xb08] sm:$0xff] %v906_v33  ;;  %v908_v34 = vld [vmem:[%s10362_s6 + $0x1620] sm:$0xff]  ;;  %v910_v35 = vld [vmem:[%s10362_s6 + $0x1628] sm:$0xff] }
  0xc1   : > { %v912_v36 = vld [vmem:[%s10362_s6 + $0x1640] sm:$0xff]  ;;  %909 = vst [vmem:[%s10370_s7 + $0xb10] sm:$0xff] %v908_v34  ;;  %911 = vst [vmem:[%s10370_s7 + $0xb18] sm:$0xff] %v910_v35  ;;  %v914_v37 = vld [vmem:[%s10362_s6 + $0x1648] sm:$0xff] }
  0xc2   : > { %913 = vst [vmem:[%s10370_s7 + $0xb20] sm:$0xff] %v912_v36  ;;  %v916_v38 = vld [vmem:[%s10362_s6 + $0x1660] sm:$0xff]  ;;  %v918_v39 = vld [vmem:[%s10362_s6 + $0x1668] sm:$0xff]  ;;  %915 = vst [vmem:[%s10370_s7 + $0xb28] sm:$0xff] %v914_v37 }
  0xc3   : > { %917 = vst [vmem:[%s10370_s7 + $0xb30] sm:$0xff] %v916_v38  ;;  %919 = vst [vmem:[%s10370_s7 + $0xb38] sm:$0xff] %v918_v39  ;;  %v920_v40 = vld [vmem:[%s10362_s6 + $0x1680] sm:$0xff]  ;;  %v922_v41 = vld [vmem:[%s10362_s6 + $0x1688] sm:$0xff] }
  0xc4   : > { %v924_v42 = vld [vmem:[%s10362_s6 + $0x16a0] sm:$0xff]  ;;  %921 = vst [vmem:[%s10370_s7 + $0xb40] sm:$0xff] %v920_v40  ;;  %923 = vst [vmem:[%s10370_s7 + $0xb48] sm:$0xff] %v922_v41  ;;  %v926_v43 = vld [vmem:[%s10362_s6 + $0x16a8] sm:$0xff] }
  0xc5   : > { %925 = vst [vmem:[%s10370_s7 + $0xb50] sm:$0xff] %v924_v42  ;;  %v928_v44 = vld [vmem:[%s10362_s6 + $0x16c0] sm:$0xff]  ;;  %v930_v45 = vld [vmem:[%s10362_s6 + $0x16c8] sm:$0xff]  ;;  %927 = vst [vmem:[%s10370_s7 + $0xb58] sm:$0xff] %v926_v43 }
  0xc6   : > { %929 = vst [vmem:[%s10370_s7 + $0xb60] sm:$0xff] %v928_v44  ;;  %931 = vst [vmem:[%s10370_s7 + $0xb68] sm:$0xff] %v930_v45  ;;  %v932_v46 = vld [vmem:[%s10362_s6 + $0x16e0] sm:$0xff]  ;;  %v934_v47 = vld [vmem:[%s10362_s6 + $0x16e8] sm:$0xff] }
  0xc7   : > { %v936_v48 = vld [vmem:[%s10362_s6 + $0x1700] sm:$0xff]  ;;  %933 = vst [vmem:[%s10370_s7 + $0xb70] sm:$0xff] %v932_v46  ;;  %935 = vst [vmem:[%s10370_s7 + $0xb78] sm:$0xff] %v934_v47  ;;  %v938_v49 = vld [vmem:[%s10362_s6 + $0x1708] sm:$0xff] }
  0xc8   : > { %937 = vst [vmem:[%s10370_s7 + $0xb80] sm:$0xff] %v936_v48  ;;  %v940_v50 = vld [vmem:[%s10362_s6 + $0x1720] sm:$0xff]  ;;  %v942_v51 = vld [vmem:[%s10362_s6 + $0x1728] sm:$0xff]  ;;  %939 = vst [vmem:[%s10370_s7 + $0xb88] sm:$0xff] %v938_v49 }
  0xc9   : > { %941 = vst [vmem:[%s10370_s7 + $0xb90] sm:$0xff] %v940_v50  ;;  %943 = vst [vmem:[%s10370_s7 + $0xb98] sm:$0xff] %v942_v51  ;;  %v944_v52 = vld [vmem:[%s10362_s6 + $0x1740] sm:$0xff]  ;;  %v946_v53 = vld [vmem:[%s10362_s6 + $0x1748] sm:$0xff] }
  0xca   : > { %v948_v54 = vld [vmem:[%s10362_s6 + $0x1760] sm:$0xff]  ;;  %945 = vst [vmem:[%s10370_s7 + $0xba0] sm:$0xff] %v944_v52  ;;  %947 = vst [vmem:[%s10370_s7 + $0xba8] sm:$0xff] %v946_v53  ;;  %v950_v55 = vld [vmem:[%s10362_s6 + $0x1768] sm:$0xff] }
  0xcb   : > { %949 = vst [vmem:[%s10370_s7 + $0xbb0] sm:$0xff] %v948_v54  ;;  %v952_v56 = vld [vmem:[%s10362_s6 + $0x1780] sm:$0xff]  ;;  %v954_v57 = vld [vmem:[%s10362_s6 + $0x1788] sm:$0xff]  ;;  %951 = vst [vmem:[%s10370_s7 + $0xbb8] sm:$0xff] %v950_v55 }
  0xcc   : > { %953 = vst [vmem:[%s10370_s7 + $0xbc0] sm:$0xff] %v952_v56  ;;  %955 = vst [vmem:[%s10370_s7 + $0xbc8] sm:$0xff] %v954_v57  ;;  %v956_v58 = vld [vmem:[%s10362_s6 + $0x17a0] sm:$0xff]  ;;  %v958_v59 = vld [vmem:[%s10362_s6 + $0x17a8] sm:$0xff] }
  0xcd   : > { %v960_v60 = vld [vmem:[%s10362_s6 + $0x17c0] sm:$0xff]  ;;  %957 = vst [vmem:[%s10370_s7 + $0xbd0] sm:$0xff] %v956_v58  ;;  %959 = vst [vmem:[%s10370_s7 + $0xbd8] sm:$0xff] %v958_v59  ;;  %v962_v61 = vld [vmem:[%s10362_s6 + $0x17c8] sm:$0xff] }
  0xce   : > { %961 = vst [vmem:[%s10370_s7 + $0xbe0] sm:$0xff] %v960_v60  ;;  %v964_v62 = vld [vmem:[%s10362_s6 + $0x17e0] sm:$0xff]  ;;  %v966_v63 = vld [vmem:[%s10362_s6 + $0x17e8] sm:$0xff]  ;;  %963 = vst [vmem:[%s10370_s7 + $0xbe8] sm:$0xff] %v962_v61 }
  0xcf   : > { %965 = vst [vmem:[%s10370_s7 + $0xbf0] sm:$0xff] %v964_v62  ;;  %967 = vst [vmem:[%s10370_s7 + $0xbf8] sm:$0xff] %v966_v63  ;;  %v968_v0 = vld [vmem:[%s10362_s6 + $0x1800] sm:$0xff]  ;;  %v970_v1 = vld [vmem:[%s10362_s6 + $0x1808] sm:$0xff] }
  0xd0   : > { %v972_v2 = vld [vmem:[%s10362_s6 + $0x1820] sm:$0xff]  ;;  %969 = vst [vmem:[%s10370_s7 + $0xc00] sm:$0xff] %v968_v0  ;;  %971 = vst [vmem:[%s10370_s7 + $0xc08] sm:$0xff] %v970_v1  ;;  %v974_v3 = vld [vmem:[%s10362_s6 + $0x1828] sm:$0xff] }
  0xd1   : > { %973 = vst [vmem:[%s10370_s7 + $0xc10] sm:$0xff] %v972_v2  ;;  %v976_v4 = vld [vmem:[%s10362_s6 + $0x1840] sm:$0xff]  ;;  %v978_v5 = vld [vmem:[%s10362_s6 + $0x1848] sm:$0xff]  ;;  %975 = vst [vmem:[%s10370_s7 + $0xc18] sm:$0xff] %v974_v3 }
  0xd2   : > { %977 = vst [vmem:[%s10370_s7 + $0xc20] sm:$0xff] %v976_v4  ;;  %979 = vst [vmem:[%s10370_s7 + $0xc28] sm:$0xff] %v978_v5  ;;  %v980_v6 = vld [vmem:[%s10362_s6 + $0x1860] sm:$0xff]  ;;  %v982_v7 = vld [vmem:[%s10362_s6 + $0x1868] sm:$0xff] }
  0xd3   : > { %v984_v8 = vld [vmem:[%s10362_s6 + $0x1880] sm:$0xff]  ;;  %981 = vst [vmem:[%s10370_s7 + $0xc30] sm:$0xff] %v980_v6  ;;  %983 = vst [vmem:[%s10370_s7 + $0xc38] sm:$0xff] %v982_v7  ;;  %v986_v9 = vld [vmem:[%s10362_s6 + $0x1888] sm:$0xff] }
  0xd4   : > { %985 = vst [vmem:[%s10370_s7 + $0xc40] sm:$0xff] %v984_v8  ;;  %v988_v10 = vld [vmem:[%s10362_s6 + $0x18a0] sm:$0xff]  ;;  %v990_v11 = vld [vmem:[%s10362_s6 + $0x18a8] sm:$0xff]  ;;  %987 = vst [vmem:[%s10370_s7 + $0xc48] sm:$0xff] %v986_v9 }
  0xd5   : > { %989 = vst [vmem:[%s10370_s7 + $0xc50] sm:$0xff] %v988_v10  ;;  %991 = vst [vmem:[%s10370_s7 + $0xc58] sm:$0xff] %v990_v11  ;;  %v992_v12 = vld [vmem:[%s10362_s6 + $0x18c0] sm:$0xff]  ;;  %v994_v13 = vld [vmem:[%s10362_s6 + $0x18c8] sm:$0xff] }
  0xd6   : > { %v996_v14 = vld [vmem:[%s10362_s6 + $0x18e0] sm:$0xff]  ;;  %993 = vst [vmem:[%s10370_s7 + $0xc60] sm:$0xff] %v992_v12  ;;  %995 = vst [vmem:[%s10370_s7 + $0xc68] sm:$0xff] %v994_v13  ;;  %v998_v15 = vld [vmem:[%s10362_s6 + $0x18e8] sm:$0xff] }
  0xd7   : > { %997 = vst [vmem:[%s10370_s7 + $0xc70] sm:$0xff] %v996_v14  ;;  %v1000_v16 = vld [vmem:[%s10362_s6 + $0x1900] sm:$0xff]  ;;  %v1002_v17 = vld [vmem:[%s10362_s6 + $0x1908] sm:$0xff]  ;;  %999 = vst [vmem:[%s10370_s7 + $0xc78] sm:$0xff] %v998_v15 }
  0xd8   : > { %1001 = vst [vmem:[%s10370_s7 + $0xc80] sm:$0xff] %v1000_v16  ;;  %1003 = vst [vmem:[%s10370_s7 + $0xc88] sm:$0xff] %v1002_v17  ;;  %v1004_v18 = vld [vmem:[%s10362_s6 + $0x1920] sm:$0xff]  ;;  %v1006_v19 = vld [vmem:[%s10362_s6 + $0x1928] sm:$0xff] }
  0xd9   : > { %v1008_v20 = vld [vmem:[%s10362_s6 + $0x1940] sm:$0xff]  ;;  %1005 = vst [vmem:[%s10370_s7 + $0xc90] sm:$0xff] %v1004_v18  ;;  %1007 = vst [vmem:[%s10370_s7 + $0xc98] sm:$0xff] %v1006_v19  ;;  %v1010_v21 = vld [vmem:[%s10362_s6 + $0x1948] sm:$0xff] }
  0xda   : > { %1009 = vst [vmem:[%s10370_s7 + $0xca0] sm:$0xff] %v1008_v20  ;;  %v1012_v22 = vld [vmem:[%s10362_s6 + $0x1960] sm:$0xff]  ;;  %v1014_v23 = vld [vmem:[%s10362_s6 + $0x1968] sm:$0xff]  ;;  %1011 = vst [vmem:[%s10370_s7 + $0xca8] sm:$0xff] %v1010_v21 }
  0xdb   : > { %1013 = vst [vmem:[%s10370_s7 + $0xcb0] sm:$0xff] %v1012_v22  ;;  %1015 = vst [vmem:[%s10370_s7 + $0xcb8] sm:$0xff] %v1014_v23  ;;  %v1016_v24 = vld [vmem:[%s10362_s6 + $0x1980] sm:$0xff]  ;;  %v1018_v25 = vld [vmem:[%s10362_s6 + $0x1988] sm:$0xff] }
  0xdc   : > { %v1020_v26 = vld [vmem:[%s10362_s6 + $0x19a0] sm:$0xff]  ;;  %1017 = vst [vmem:[%s10370_s7 + $0xcc0] sm:$0xff] %v1016_v24  ;;  %1019 = vst [vmem:[%s10370_s7 + $0xcc8] sm:$0xff] %v1018_v25  ;;  %v1022_v27 = vld [vmem:[%s10362_s6 + $0x19a8] sm:$0xff] }
  0xdd   : > { %1021 = vst [vmem:[%s10370_s7 + $0xcd0] sm:$0xff] %v1020_v26  ;;  %v1024_v28 = vld [vmem:[%s10362_s6 + $0x19c0] sm:$0xff]  ;;  %v1026_v29 = vld [vmem:[%s10362_s6 + $0x19c8] sm:$0xff]  ;;  %1023 = vst [vmem:[%s10370_s7 + $0xcd8] sm:$0xff] %v1022_v27 }
  0xde   : > { %1025 = vst [vmem:[%s10370_s7 + $0xce0] sm:$0xff] %v1024_v28  ;;  %1027 = vst [vmem:[%s10370_s7 + $0xce8] sm:$0xff] %v1026_v29  ;;  %v1028_v30 = vld [vmem:[%s10362_s6 + $0x19e0] sm:$0xff]  ;;  %v1030_v31 = vld [vmem:[%s10362_s6 + $0x19e8] sm:$0xff] }
  0xdf   : > { %v1032_v32 = vld [vmem:[%s10362_s6 + $0x1a00] sm:$0xff]  ;;  %1029 = vst [vmem:[%s10370_s7 + $0xcf0] sm:$0xff] %v1028_v30  ;;  %1031 = vst [vmem:[%s10370_s7 + $0xcf8] sm:$0xff] %v1030_v31  ;;  %v1034_v33 = vld [vmem:[%s10362_s6 + $0x1a08] sm:$0xff] }
  0xe0   : > { %1033 = vst [vmem:[%s10370_s7 + $0xd00] sm:$0xff] %v1032_v32  ;;  %v1036_v34 = vld [vmem:[%s10362_s6 + $0x1a20] sm:$0xff]  ;;  %v1038_v35 = vld [vmem:[%s10362_s6 + $0x1a28] sm:$0xff]  ;;  %1035 = vst [vmem:[%s10370_s7 + $0xd08] sm:$0xff] %v1034_v33 }
  0xe1   : > { %1037 = vst [vmem:[%s10370_s7 + $0xd10] sm:$0xff] %v1036_v34  ;;  %1039 = vst [vmem:[%s10370_s7 + $0xd18] sm:$0xff] %v1038_v35  ;;  %v1040_v36 = vld [vmem:[%s10362_s6 + $0x1a40] sm:$0xff]  ;;  %v1042_v37 = vld [vmem:[%s10362_s6 + $0x1a48] sm:$0xff] }
  0xe2   : > { %v1044_v38 = vld [vmem:[%s10362_s6 + $0x1a60] sm:$0xff]  ;;  %1041 = vst [vmem:[%s10370_s7 + $0xd20] sm:$0xff] %v1040_v36  ;;  %1043 = vst [vmem:[%s10370_s7 + $0xd28] sm:$0xff] %v1042_v37  ;;  %v1046_v39 = vld [vmem:[%s10362_s6 + $0x1a68] sm:$0xff] }
  0xe3   : > { %1045 = vst [vmem:[%s10370_s7 + $0xd30] sm:$0xff] %v1044_v38  ;;  %v1048_v40 = vld [vmem:[%s10362_s6 + $0x1a80] sm:$0xff]  ;;  %v1050_v41 = vld [vmem:[%s10362_s6 + $0x1a88] sm:$0xff]  ;;  %1047 = vst [vmem:[%s10370_s7 + $0xd38] sm:$0xff] %v1046_v39 }
  0xe4   : > { %1049 = vst [vmem:[%s10370_s7 + $0xd40] sm:$0xff] %v1048_v40  ;;  %1051 = vst [vmem:[%s10370_s7 + $0xd48] sm:$0xff] %v1050_v41  ;;  %v1052_v42 = vld [vmem:[%s10362_s6 + $0x1aa0] sm:$0xff]  ;;  %v1054_v43 = vld [vmem:[%s10362_s6 + $0x1aa8] sm:$0xff] }
  0xe5   : > { %v1056_v44 = vld [vmem:[%s10362_s6 + $0x1ac0] sm:$0xff]  ;;  %1053 = vst [vmem:[%s10370_s7 + $0xd50] sm:$0xff] %v1052_v42  ;;  %1055 = vst [vmem:[%s10370_s7 + $0xd58] sm:$0xff] %v1054_v43  ;;  %v1058_v45 = vld [vmem:[%s10362_s6 + $0x1ac8] sm:$0xff] }
  0xe6   : > { %1057 = vst [vmem:[%s10370_s7 + $0xd60] sm:$0xff] %v1056_v44  ;;  %v1060_v46 = vld [vmem:[%s10362_s6 + $0x1ae0] sm:$0xff]  ;;  %v1062_v47 = vld [vmem:[%s10362_s6 + $0x1ae8] sm:$0xff]  ;;  %1059 = vst [vmem:[%s10370_s7 + $0xd68] sm:$0xff] %v1058_v45 }
  0xe7   : > { %1061 = vst [vmem:[%s10370_s7 + $0xd70] sm:$0xff] %v1060_v46  ;;  %1063 = vst [vmem:[%s10370_s7 + $0xd78] sm:$0xff] %v1062_v47  ;;  %v1064_v48 = vld [vmem:[%s10362_s6 + $0x1b00] sm:$0xff]  ;;  %v1066_v49 = vld [vmem:[%s10362_s6 + $0x1b08] sm:$0xff] }
  0xe8   : > { %v1068_v50 = vld [vmem:[%s10362_s6 + $0x1b20] sm:$0xff]  ;;  %1065 = vst [vmem:[%s10370_s7 + $0xd80] sm:$0xff] %v1064_v48  ;;  %1067 = vst [vmem:[%s10370_s7 + $0xd88] sm:$0xff] %v1066_v49  ;;  %v1070_v51 = vld [vmem:[%s10362_s6 + $0x1b28] sm:$0xff] }
  0xe9   : > { %1069 = vst [vmem:[%s10370_s7 + $0xd90] sm:$0xff] %v1068_v50  ;;  %v1072_v52 = vld [vmem:[%s10362_s6 + $0x1b40] sm:$0xff]  ;;  %v1074_v53 = vld [vmem:[%s10362_s6 + $0x1b48] sm:$0xff]  ;;  %1071 = vst [vmem:[%s10370_s7 + $0xd98] sm:$0xff] %v1070_v51 }
  0xea   : > { %1073 = vst [vmem:[%s10370_s7 + $0xda0] sm:$0xff] %v1072_v52  ;;  %1075 = vst [vmem:[%s10370_s7 + $0xda8] sm:$0xff] %v1074_v53  ;;  %v1076_v54 = vld [vmem:[%s10362_s6 + $0x1b60] sm:$0xff]  ;;  %v1078_v55 = vld [vmem:[%s10362_s6 + $0x1b68] sm:$0xff] }
  0xeb   : > { %v1080_v56 = vld [vmem:[%s10362_s6 + $0x1b80] sm:$0xff]  ;;  %1077 = vst [vmem:[%s10370_s7 + $0xdb0] sm:$0xff] %v1076_v54  ;;  %1079 = vst [vmem:[%s10370_s7 + $0xdb8] sm:$0xff] %v1078_v55  ;;  %v1082_v57 = vld [vmem:[%s10362_s6 + $0x1b88] sm:$0xff] }
  0xec   : > { %1081 = vst [vmem:[%s10370_s7 + $0xdc0] sm:$0xff] %v1080_v56  ;;  %v1084_v58 = vld [vmem:[%s10362_s6 + $0x1ba0] sm:$0xff]  ;;  %v1086_v59 = vld [vmem:[%s10362_s6 + $0x1ba8] sm:$0xff]  ;;  %1083 = vst [vmem:[%s10370_s7 + $0xdc8] sm:$0xff] %v1082_v57 }
  0xed   : > { %1085 = vst [vmem:[%s10370_s7 + $0xdd0] sm:$0xff] %v1084_v58  ;;  %1087 = vst [vmem:[%s10370_s7 + $0xdd8] sm:$0xff] %v1086_v59  ;;  %v1088_v60 = vld [vmem:[%s10362_s6 + $0x1bc0] sm:$0xff]  ;;  %v1090_v61 = vld [vmem:[%s10362_s6 + $0x1bc8] sm:$0xff] }
  0xee   : > { %v1092_v62 = vld [vmem:[%s10362_s6 + $0x1be0] sm:$0xff]  ;;  %1089 = vst [vmem:[%s10370_s7 + $0xde0] sm:$0xff] %v1088_v60  ;;  %1091 = vst [vmem:[%s10370_s7 + $0xde8] sm:$0xff] %v1090_v61  ;;  %v1094_v63 = vld [vmem:[%s10362_s6 + $0x1be8] sm:$0xff] }
  0xef   : > { %1093 = vst [vmem:[%s10370_s7 + $0xdf0] sm:$0xff] %v1092_v62  ;;  %v1096_v0 = vld [vmem:[%s10362_s6 + $0x1c00] sm:$0xff]  ;;  %v1098_v1 = vld [vmem:[%s10362_s6 + $0x1c08] sm:$0xff]  ;;  %1095 = vst [vmem:[%s10370_s7 + $0xdf8] sm:$0xff] %v1094_v63 }
  0xf0   : > { %1097 = vst [vmem:[%s10370_s7 + $0xe00] sm:$0xff] %v1096_v0  ;;  %1099 = vst [vmem:[%s10370_s7 + $0xe08] sm:$0xff] %v1098_v1  ;;  %v1100_v2 = vld [vmem:[%s10362_s6 + $0x1c20] sm:$0xff]  ;;  %v1102_v3 = vld [vmem:[%s10362_s6 + $0x1c28] sm:$0xff] }
  0xf1   : > { %v1104_v4 = vld [vmem:[%s10362_s6 + $0x1c40] sm:$0xff]  ;;  %1101 = vst [vmem:[%s10370_s7 + $0xe10] sm:$0xff] %v1100_v2  ;;  %1103 = vst [vmem:[%s10370_s7 + $0xe18] sm:$0xff] %v1102_v3  ;;  %v1106_v5 = vld [vmem:[%s10362_s6 + $0x1c48] sm:$0xff] }
  0xf2   : > { %1105 = vst [vmem:[%s10370_s7 + $0xe20] sm:$0xff] %v1104_v4  ;;  %v1108_v6 = vld [vmem:[%s10362_s6 + $0x1c60] sm:$0xff]  ;;  %v1110_v7 = vld [vmem:[%s10362_s6 + $0x1c68] sm:$0xff]  ;;  %1107 = vst [vmem:[%s10370_s7 + $0xe28] sm:$0xff] %v1106_v5 }
  0xf3   : > { %1109 = vst [vmem:[%s10370_s7 + $0xe30] sm:$0xff] %v1108_v6  ;;  %1111 = vst [vmem:[%s10370_s7 + $0xe38] sm:$0xff] %v1110_v7  ;;  %v1112_v8 = vld [vmem:[%s10362_s6 + $0x1c80] sm:$0xff]  ;;  %v1114_v9 = vld [vmem:[%s10362_s6 + $0x1c88] sm:$0xff] }
  0xf4   : > { %v1116_v10 = vld [vmem:[%s10362_s6 + $0x1ca0] sm:$0xff]  ;;  %1113 = vst [vmem:[%s10370_s7 + $0xe40] sm:$0xff] %v1112_v8  ;;  %1115 = vst [vmem:[%s10370_s7 + $0xe48] sm:$0xff] %v1114_v9  ;;  %v1118_v11 = vld [vmem:[%s10362_s6 + $0x1ca8] sm:$0xff] }
  0xf5   : > { %1117 = vst [vmem:[%s10370_s7 + $0xe50] sm:$0xff] %v1116_v10  ;;  %v1120_v12 = vld [vmem:[%s10362_s6 + $0x1cc0] sm:$0xff]  ;;  %v1122_v13 = vld [vmem:[%s10362_s6 + $0x1cc8] sm:$0xff]  ;;  %1119 = vst [vmem:[%s10370_s7 + $0xe58] sm:$0xff] %v1118_v11 }
  0xf6   : > { %1121 = vst [vmem:[%s10370_s7 + $0xe60] sm:$0xff] %v1120_v12  ;;  %1123 = vst [vmem:[%s10370_s7 + $0xe68] sm:$0xff] %v1122_v13  ;;  %v1124_v14 = vld [vmem:[%s10362_s6 + $0x1ce0] sm:$0xff]  ;;  %v1126_v15 = vld [vmem:[%s10362_s6 + $0x1ce8] sm:$0xff] }
  0xf7   : > { %v1128_v16 = vld [vmem:[%s10362_s6 + $0x1d00] sm:$0xff]  ;;  %1125 = vst [vmem:[%s10370_s7 + $0xe70] sm:$0xff] %v1124_v14  ;;  %1127 = vst [vmem:[%s10370_s7 + $0xe78] sm:$0xff] %v1126_v15  ;;  %v1130_v17 = vld [vmem:[%s10362_s6 + $0x1d08] sm:$0xff] }
  0xf8   : > { %1129 = vst [vmem:[%s10370_s7 + $0xe80] sm:$0xff] %v1128_v16  ;;  %v1132_v18 = vld [vmem:[%s10362_s6 + $0x1d20] sm:$0xff]  ;;  %v1134_v19 = vld [vmem:[%s10362_s6 + $0x1d28] sm:$0xff]  ;;  %1131 = vst [vmem:[%s10370_s7 + $0xe88] sm:$0xff] %v1130_v17 }
  0xf9   : > { %1133 = vst [vmem:[%s10370_s7 + $0xe90] sm:$0xff] %v1132_v18  ;;  %1135 = vst [vmem:[%s10370_s7 + $0xe98] sm:$0xff] %v1134_v19  ;;  %v1136_v20 = vld [vmem:[%s10362_s6 + $0x1d40] sm:$0xff]  ;;  %v1138_v21 = vld [vmem:[%s10362_s6 + $0x1d48] sm:$0xff] }
  0xfa   : > { %v1140_v22 = vld [vmem:[%s10362_s6 + $0x1d60] sm:$0xff]  ;;  %1137 = vst [vmem:[%s10370_s7 + $0xea0] sm:$0xff] %v1136_v20  ;;  %1139 = vst [vmem:[%s10370_s7 + $0xea8] sm:$0xff] %v1138_v21  ;;  %v1142_v23 = vld [vmem:[%s10362_s6 + $0x1d68] sm:$0xff] }
  0xfb   : > { %1141 = vst [vmem:[%s10370_s7 + $0xeb0] sm:$0xff] %v1140_v22  ;;  %v1144_v24 = vld [vmem:[%s10362_s6 + $0x1d80] sm:$0xff]  ;;  %v1146_v25 = vld [vmem:[%s10362_s6 + $0x1d88] sm:$0xff]  ;;  %1143 = vst [vmem:[%s10370_s7 + $0xeb8] sm:$0xff] %v1142_v23 }
  0xfc   : > { %1145 = vst [vmem:[%s10370_s7 + $0xec0] sm:$0xff] %v1144_v24  ;;  %1147 = vst [vmem:[%s10370_s7 + $0xec8] sm:$0xff] %v1146_v25  ;;  %v1148_v26 = vld [vmem:[%s10362_s6 + $0x1da0] sm:$0xff]  ;;  %v1150_v27 = vld [vmem:[%s10362_s6 + $0x1da8] sm:$0xff] }
  0xfd   : > { %v1152_v28 = vld [vmem:[%s10362_s6 + $0x1dc0] sm:$0xff]  ;;  %1149 = vst [vmem:[%s10370_s7 + $0xed0] sm:$0xff] %v1148_v26  ;;  %1151 = vst [vmem:[%s10370_s7 + $0xed8] sm:$0xff] %v1150_v27  ;;  %v1154_v29 = vld [vmem:[%s10362_s6 + $0x1dc8] sm:$0xff] }
  0xfe   : > { %1153 = vst [vmem:[%s10370_s7 + $0xee0] sm:$0xff] %v1152_v28  ;;  %v1156_v30 = vld [vmem:[%s10362_s6 + $0x1de0] sm:$0xff]  ;;  %v1158_v31 = vld [vmem:[%s10362_s6 + $0x1de8] sm:$0xff]  ;;  %1155 = vst [vmem:[%s10370_s7 + $0xee8] sm:$0xff] %v1154_v29 }
  0xff   : > { %1157 = vst [vmem:[%s10370_s7 + $0xef0] sm:$0xff] %v1156_v30  ;;  %1159 = vst [vmem:[%s10370_s7 + $0xef8] sm:$0xff] %v1158_v31  ;;  %v1160_v32 = vld [vmem:[%s10362_s6 + $0x1e00] sm:$0xff]  ;;  %v1162_v33 = vld [vmem:[%s10362_s6 + $0x1e08] sm:$0xff] }
 0x100   : > { %v1164_v34 = vld [vmem:[%s10362_s6 + $0x1e20] sm:$0xff]  ;;  %1161 = vst [vmem:[%s10370_s7 + $0xf00] sm:$0xff] %v1160_v32  ;;  %1163 = vst [vmem:[%s10370_s7 + $0xf08] sm:$0xff] %v1162_v33  ;;  %v1166_v35 = vld [vmem:[%s10362_s6 + $0x1e28] sm:$0xff] }
 0x101   : > { %1165 = vst [vmem:[%s10370_s7 + $0xf10] sm:$0xff] %v1164_v34  ;;  %v1168_v36 = vld [vmem:[%s10362_s6 + $0x1e40] sm:$0xff]  ;;  %v1170_v37 = vld [vmem:[%s10362_s6 + $0x1e48] sm:$0xff]  ;;  %1167 = vst [vmem:[%s10370_s7 + $0xf18] sm:$0xff] %v1166_v35 }
 0x102   : > { %1169 = vst [vmem:[%s10370_s7 + $0xf20] sm:$0xff] %v1168_v36  ;;  %1171 = vst [vmem:[%s10370_s7 + $0xf28] sm:$0xff] %v1170_v37  ;;  %v1172_v38 = vld [vmem:[%s10362_s6 + $0x1e60] sm:$0xff]  ;;  %v1174_v39 = vld [vmem:[%s10362_s6 + $0x1e68] sm:$0xff] }
 0x103   : > { %v1176_v40 = vld [vmem:[%s10362_s6 + $0x1e80] sm:$0xff]  ;;  %1173 = vst [vmem:[%s10370_s7 + $0xf30] sm:$0xff] %v1172_v38  ;;  %1175 = vst [vmem:[%s10370_s7 + $0xf38] sm:$0xff] %v1174_v39  ;;  %v1178_v41 = vld [vmem:[%s10362_s6 + $0x1e88] sm:$0xff] }
 0x104   : > { %1177 = vst [vmem:[%s10370_s7 + $0xf40] sm:$0xff] %v1176_v40  ;;  %v1180_v42 = vld [vmem:[%s10362_s6 + $0x1ea0] sm:$0xff]  ;;  %v1182_v43 = vld [vmem:[%s10362_s6 + $0x1ea8] sm:$0xff]  ;;  %1179 = vst [vmem:[%s10370_s7 + $0xf48] sm:$0xff] %v1178_v41 }
 0x105   : > { %1181 = vst [vmem:[%s10370_s7 + $0xf50] sm:$0xff] %v1180_v42  ;;  %1183 = vst [vmem:[%s10370_s7 + $0xf58] sm:$0xff] %v1182_v43  ;;  %v1184_v44 = vld [vmem:[%s10362_s6 + $0x1ec0] sm:$0xff]  ;;  %v1186_v45 = vld [vmem:[%s10362_s6 + $0x1ec8] sm:$0xff] }
 0x106   : > { %v1188_v46 = vld [vmem:[%s10362_s6 + $0x1ee0] sm:$0xff]  ;;  %1185 = vst [vmem:[%s10370_s7 + $0xf60] sm:$0xff] %v1184_v44  ;;  %1187 = vst [vmem:[%s10370_s7 + $0xf68] sm:$0xff] %v1186_v45  ;;  %v1190_v47 = vld [vmem:[%s10362_s6 + $0x1ee8] sm:$0xff] }
 0x107   : > { %1189 = vst [vmem:[%s10370_s7 + $0xf70] sm:$0xff] %v1188_v46  ;;  %v1192_v48 = vld [vmem:[%s10362_s6 + $0x1f00] sm:$0xff]  ;;  %v1194_v49 = vld [vmem:[%s10362_s6 + $0x1f08] sm:$0xff]  ;;  %1191 = vst [vmem:[%s10370_s7 + $0xf78] sm:$0xff] %v1190_v47 }
 0x108   : > { %1193 = vst [vmem:[%s10370_s7 + $0xf80] sm:$0xff] %v1192_v48  ;;  %1195 = vst [vmem:[%s10370_s7 + $0xf88] sm:$0xff] %v1194_v49  ;;  %v1196_v50 = vld [vmem:[%s10362_s6 + $0x1f20] sm:$0xff]  ;;  %v1198_v51 = vld [vmem:[%s10362_s6 + $0x1f28] sm:$0xff] }
 0x109   : > { %v1200_v52 = vld [vmem:[%s10362_s6 + $0x1f40] sm:$0xff]  ;;  %1197 = vst [vmem:[%s10370_s7 + $0xf90] sm:$0xff] %v1196_v50  ;;  %1199 = vst [vmem:[%s10370_s7 + $0xf98] sm:$0xff] %v1198_v51  ;;  %v1202_v53 = vld [vmem:[%s10362_s6 + $0x1f48] sm:$0xff] }
 0x10a   : > { %1201 = vst [vmem:[%s10370_s7 + $0xfa0] sm:$0xff] %v1200_v52  ;;  %v1204_v54 = vld [vmem:[%s10362_s6 + $0x1f60] sm:$0xff]  ;;  %v1206_v55 = vld [vmem:[%s10362_s6 + $0x1f68] sm:$0xff]  ;;  %1203 = vst [vmem:[%s10370_s7 + $0xfa8] sm:$0xff] %v1202_v53 }
 0x10b   : > { %1205 = vst [vmem:[%s10370_s7 + $0xfb0] sm:$0xff] %v1204_v54  ;;  %1207 = vst [vmem:[%s10370_s7 + $0xfb8] sm:$0xff] %v1206_v55  ;;  %v1208_v56 = vld [vmem:[%s10362_s6 + $0x1f80] sm:$0xff]  ;;  %v1210_v57 = vld [vmem:[%s10362_s6 + $0x1f88] sm:$0xff] }
 0x10c   : > { %v1212_v58 = vld [vmem:[%s10362_s6 + $0x1fa0] sm:$0xff]  ;;  %1209 = vst [vmem:[%s10370_s7 + $0xfc0] sm:$0xff] %v1208_v56  ;;  %1211 = vst [vmem:[%s10370_s7 + $0xfc8] sm:$0xff] %v1210_v57  ;;  %v1214_v59 = vld [vmem:[%s10362_s6 + $0x1fa8] sm:$0xff] }
 0x10d   : > { %1213 = vst [vmem:[%s10370_s7 + $0xfd0] sm:$0xff] %v1212_v58  ;;  %v1216_v60 = vld [vmem:[%s10362_s6 + $0x1fc0] sm:$0xff]  ;;  %v1218_v61 = vld [vmem:[%s10362_s6 + $0x1fc8] sm:$0xff]  ;;  %1215 = vst [vmem:[%s10370_s7 + $0xfd8] sm:$0xff] %v1214_v59 }
 0x10e   : > { %1217 = vst [vmem:[%s10370_s7 + $0xfe0] sm:$0xff] %v1216_v60  ;;  %1219 = vst [vmem:[%s10370_s7 + $0xfe8] sm:$0xff] %v1218_v61  ;;  %v1220_v62 = vld [vmem:[%s10362_s6 + $0x1fe0] sm:$0xff]  ;;  %v1222_v63 = vld [vmem:[%s10362_s6 + $0x1fe8] sm:$0xff] }
 0x10f   : > { %v1224_v0 = vld [vmem:[%s10362_s6 + $0x2000] sm:$0xff]  ;;  %1221 = vst [vmem:[%s10370_s7 + $0xff0] sm:$0xff] %v1220_v62  ;;  %1223 = vst [vmem:[%s10370_s7 + $0xff8] sm:$0xff] %v1222_v63  ;;  %v1226_v1 = vld [vmem:[%s10362_s6 + $0x2008] sm:$0xff] }
 0x110   : > { %1225 = vst [vmem:[%s10370_s7 + $0x1000] sm:$0xff] %v1224_v0  ;;  %v1228_v2 = vld [vmem:[%s10362_s6 + $0x2020] sm:$0xff]  ;;  %v1230_v3 = vld [vmem:[%s10362_s6 + $0x2028] sm:$0xff]  ;;  %1227 = vst [vmem:[%s10370_s7 + $0x1008] sm:$0xff] %v1226_v1 }
 0x111   : > { %1229 = vst [vmem:[%s10370_s7 + $0x1010] sm:$0xff] %v1228_v2  ;;  %1231 = vst [vmem:[%s10370_s7 + $0x1018] sm:$0xff] %v1230_v3  ;;  %v1232_v4 = vld [vmem:[%s10362_s6 + $0x2040] sm:$0xff]  ;;  %v1234_v5 = vld [vmem:[%s10362_s6 + $0x2048] sm:$0xff] }
 0x112   : > { %v1236_v6 = vld [vmem:[%s10362_s6 + $0x2060] sm:$0xff]  ;;  %1233 = vst [vmem:[%s10370_s7 + $0x1020] sm:$0xff] %v1232_v4  ;;  %1235 = vst [vmem:[%s10370_s7 + $0x1028] sm:$0xff] %v1234_v5  ;;  %v1238_v7 = vld [vmem:[%s10362_s6 + $0x2068] sm:$0xff] }
 0x113   : > { %1237 = vst [vmem:[%s10370_s7 + $0x1030] sm:$0xff] %v1236_v6  ;;  %v1240_v8 = vld [vmem:[%s10362_s6 + $0x2080] sm:$0xff]  ;;  %v1242_v9 = vld [vmem:[%s10362_s6 + $0x2088] sm:$0xff]  ;;  %1239 = vst [vmem:[%s10370_s7 + $0x1038] sm:$0xff] %v1238_v7 }
 0x114   : > { %1241 = vst [vmem:[%s10370_s7 + $0x1040] sm:$0xff] %v1240_v8  ;;  %1243 = vst [vmem:[%s10370_s7 + $0x1048] sm:$0xff] %v1242_v9  ;;  %v1244_v10 = vld [vmem:[%s10362_s6 + $0x20a0] sm:$0xff]  ;;  %v1246_v11 = vld [vmem:[%s10362_s6 + $0x20a8] sm:$0xff] }
 0x115   : > { %v1248_v12 = vld [vmem:[%s10362_s6 + $0x20c0] sm:$0xff]  ;;  %1245 = vst [vmem:[%s10370_s7 + $0x1050] sm:$0xff] %v1244_v10  ;;  %1247 = vst [vmem:[%s10370_s7 + $0x1058] sm:$0xff] %v1246_v11  ;;  %v1250_v13 = vld [vmem:[%s10362_s6 + $0x20c8] sm:$0xff] }
 0x116   : > { %1249 = vst [vmem:[%s10370_s7 + $0x1060] sm:$0xff] %v1248_v12  ;;  %v1252_v14 = vld [vmem:[%s10362_s6 + $0x20e0] sm:$0xff]  ;;  %v1254_v15 = vld [vmem:[%s10362_s6 + $0x20e8] sm:$0xff]  ;;  %1251 = vst [vmem:[%s10370_s7 + $0x1068] sm:$0xff] %v1250_v13 }
 0x117   : > { %1253 = vst [vmem:[%s10370_s7 + $0x1070] sm:$0xff] %v1252_v14  ;;  %1255 = vst [vmem:[%s10370_s7 + $0x1078] sm:$0xff] %v1254_v15  ;;  %v1256_v16 = vld [vmem:[%s10362_s6 + $0x2100] sm:$0xff]  ;;  %v1258_v17 = vld [vmem:[%s10362_s6 + $0x2108] sm:$0xff] }
 0x118   : > { %v1260_v18 = vld [vmem:[%s10362_s6 + $0x2120] sm:$0xff]  ;;  %1257 = vst [vmem:[%s10370_s7 + $0x1080] sm:$0xff] %v1256_v16  ;;  %1259 = vst [vmem:[%s10370_s7 + $0x1088] sm:$0xff] %v1258_v17  ;;  %v1262_v19 = vld [vmem:[%s10362_s6 + $0x2128] sm:$0xff] }
 0x119   : > { %1261 = vst [vmem:[%s10370_s7 + $0x1090] sm:$0xff] %v1260_v18  ;;  %v1264_v20 = vld [vmem:[%s10362_s6 + $0x2140] sm:$0xff]  ;;  %v1266_v21 = vld [vmem:[%s10362_s6 + $0x2148] sm:$0xff]  ;;  %1263 = vst [vmem:[%s10370_s7 + $0x1098] sm:$0xff] %v1262_v19 }
 0x11a   : > { %1265 = vst [vmem:[%s10370_s7 + $0x10a0] sm:$0xff] %v1264_v20  ;;  %1267 = vst [vmem:[%s10370_s7 + $0x10a8] sm:$0xff] %v1266_v21  ;;  %v1268_v22 = vld [vmem:[%s10362_s6 + $0x2160] sm:$0xff]  ;;  %v1270_v23 = vld [vmem:[%s10362_s6 + $0x2168] sm:$0xff] }
 0x11b   : > { %v1272_v24 = vld [vmem:[%s10362_s6 + $0x2180] sm:$0xff]  ;;  %1269 = vst [vmem:[%s10370_s7 + $0x10b0] sm:$0xff] %v1268_v22  ;;  %1271 = vst [vmem:[%s10370_s7 + $0x10b8] sm:$0xff] %v1270_v23  ;;  %v1274_v25 = vld [vmem:[%s10362_s6 + $0x2188] sm:$0xff] }
 0x11c   : > { %1273 = vst [vmem:[%s10370_s7 + $0x10c0] sm:$0xff] %v1272_v24  ;;  %v1276_v26 = vld [vmem:[%s10362_s6 + $0x21a0] sm:$0xff]  ;;  %v1278_v27 = vld [vmem:[%s10362_s6 + $0x21a8] sm:$0xff]  ;;  %1275 = vst [vmem:[%s10370_s7 + $0x10c8] sm:$0xff] %v1274_v25 }
 0x11d   : > { %1277 = vst [vmem:[%s10370_s7 + $0x10d0] sm:$0xff] %v1276_v26  ;;  %1279 = vst [vmem:[%s10370_s7 + $0x10d8] sm:$0xff] %v1278_v27  ;;  %v1280_v28 = vld [vmem:[%s10362_s6 + $0x21c0] sm:$0xff]  ;;  %v1282_v29 = vld [vmem:[%s10362_s6 + $0x21c8] sm:$0xff] }
 0x11e   : > { %v1284_v30 = vld [vmem:[%s10362_s6 + $0x21e0] sm:$0xff]  ;;  %1281 = vst [vmem:[%s10370_s7 + $0x10e0] sm:$0xff] %v1280_v28  ;;  %1283 = vst [vmem:[%s10370_s7 + $0x10e8] sm:$0xff] %v1282_v29  ;;  %v1286_v31 = vld [vmem:[%s10362_s6 + $0x21e8] sm:$0xff] }
 0x11f   : > { %1285 = vst [vmem:[%s10370_s7 + $0x10f0] sm:$0xff] %v1284_v30  ;;  %v1288_v32 = vld [vmem:[%s10362_s6 + $0x2200] sm:$0xff]  ;;  %v1290_v33 = vld [vmem:[%s10362_s6 + $0x2208] sm:$0xff]  ;;  %1287 = vst [vmem:[%s10370_s7 + $0x10f8] sm:$0xff] %v1286_v31 }
 0x120   : > { %1289 = vst [vmem:[%s10370_s7 + $0x1100] sm:$0xff] %v1288_v32  ;;  %1291 = vst [vmem:[%s10370_s7 + $0x1108] sm:$0xff] %v1290_v33  ;;  %v1292_v34 = vld [vmem:[%s10362_s6 + $0x2220] sm:$0xff]  ;;  %v1294_v35 = vld [vmem:[%s10362_s6 + $0x2228] sm:$0xff] }
 0x121   : > { %v1296_v36 = vld [vmem:[%s10362_s6 + $0x2240] sm:$0xff]  ;;  %1293 = vst [vmem:[%s10370_s7 + $0x1110] sm:$0xff] %v1292_v34  ;;  %1295 = vst [vmem:[%s10370_s7 + $0x1118] sm:$0xff] %v1294_v35  ;;  %v1298_v37 = vld [vmem:[%s10362_s6 + $0x2248] sm:$0xff] }
 0x122   : > { %1297 = vst [vmem:[%s10370_s7 + $0x1120] sm:$0xff] %v1296_v36  ;;  %v1300_v38 = vld [vmem:[%s10362_s6 + $0x2260] sm:$0xff]  ;;  %v1302_v39 = vld [vmem:[%s10362_s6 + $0x2268] sm:$0xff]  ;;  %1299 = vst [vmem:[%s10370_s7 + $0x1128] sm:$0xff] %v1298_v37 }
 0x123   : > { %1301 = vst [vmem:[%s10370_s7 + $0x1130] sm:$0xff] %v1300_v38  ;;  %1303 = vst [vmem:[%s10370_s7 + $0x1138] sm:$0xff] %v1302_v39  ;;  %v1304_v40 = vld [vmem:[%s10362_s6 + $0x2280] sm:$0xff]  ;;  %v1306_v41 = vld [vmem:[%s10362_s6 + $0x2288] sm:$0xff] }
 0x124   : > { %v1308_v42 = vld [vmem:[%s10362_s6 + $0x22a0] sm:$0xff]  ;;  %1305 = vst [vmem:[%s10370_s7 + $0x1140] sm:$0xff] %v1304_v40  ;;  %1307 = vst [vmem:[%s10370_s7 + $0x1148] sm:$0xff] %v1306_v41  ;;  %v1310_v43 = vld [vmem:[%s10362_s6 + $0x22a8] sm:$0xff] }
 0x125   : > { %1309 = vst [vmem:[%s10370_s7 + $0x1150] sm:$0xff] %v1308_v42  ;;  %v1312_v44 = vld [vmem:[%s10362_s6 + $0x22c0] sm:$0xff]  ;;  %v1314_v45 = vld [vmem:[%s10362_s6 + $0x22c8] sm:$0xff]  ;;  %1311 = vst [vmem:[%s10370_s7 + $0x1158] sm:$0xff] %v1310_v43 }
 0x126   : > { %1313 = vst [vmem:[%s10370_s7 + $0x1160] sm:$0xff] %v1312_v44  ;;  %1315 = vst [vmem:[%s10370_s7 + $0x1168] sm:$0xff] %v1314_v45  ;;  %v1316_v46 = vld [vmem:[%s10362_s6 + $0x22e0] sm:$0xff]  ;;  %v1318_v47 = vld [vmem:[%s10362_s6 + $0x22e8] sm:$0xff] }
 0x127   : > { %v1320_v48 = vld [vmem:[%s10362_s6 + $0x2300] sm:$0xff]  ;;  %1317 = vst [vmem:[%s10370_s7 + $0x1170] sm:$0xff] %v1316_v46  ;;  %1319 = vst [vmem:[%s10370_s7 + $0x1178] sm:$0xff] %v1318_v47  ;;  %v1322_v49 = vld [vmem:[%s10362_s6 + $0x2308] sm:$0xff] }
 0x128   : > { %1321 = vst [vmem:[%s10370_s7 + $0x1180] sm:$0xff] %v1320_v48  ;;  %v1324_v50 = vld [vmem:[%s10362_s6 + $0x2320] sm:$0xff]  ;;  %v1326_v51 = vld [vmem:[%s10362_s6 + $0x2328] sm:$0xff]  ;;  %1323 = vst [vmem:[%s10370_s7 + $0x1188] sm:$0xff] %v1322_v49 }
 0x129   : > { %1325 = vst [vmem:[%s10370_s7 + $0x1190] sm:$0xff] %v1324_v50  ;;  %1327 = vst [vmem:[%s10370_s7 + $0x1198] sm:$0xff] %v1326_v51  ;;  %v1328_v52 = vld [vmem:[%s10362_s6 + $0x2340] sm:$0xff]  ;;  %v1330_v53 = vld [vmem:[%s10362_s6 + $0x2348] sm:$0xff] }
 0x12a   : > { %v1332_v54 = vld [vmem:[%s10362_s6 + $0x2360] sm:$0xff]  ;;  %1329 = vst [vmem:[%s10370_s7 + $0x11a0] sm:$0xff] %v1328_v52  ;;  %1331 = vst [vmem:[%s10370_s7 + $0x11a8] sm:$0xff] %v1330_v53  ;;  %v1334_v55 = vld [vmem:[%s10362_s6 + $0x2368] sm:$0xff] }
 0x12b   : > { %1333 = vst [vmem:[%s10370_s7 + $0x11b0] sm:$0xff] %v1332_v54  ;;  %v1336_v56 = vld [vmem:[%s10362_s6 + $0x2380] sm:$0xff]  ;;  %v1338_v57 = vld [vmem:[%s10362_s6 + $0x2388] sm:$0xff]  ;;  %1335 = vst [vmem:[%s10370_s7 + $0x11b8] sm:$0xff] %v1334_v55 }
 0x12c   : > { %1337 = vst [vmem:[%s10370_s7 + $0x11c0] sm:$0xff] %v1336_v56  ;;  %1339 = vst [vmem:[%s10370_s7 + $0x11c8] sm:$0xff] %v1338_v57  ;;  %v1340_v58 = vld [vmem:[%s10362_s6 + $0x23a0] sm:$0xff]  ;;  %v1342_v59 = vld [vmem:[%s10362_s6 + $0x23a8] sm:$0xff] }
 0x12d   : > { %v1344_v60 = vld [vmem:[%s10362_s6 + $0x23c0] sm:$0xff]  ;;  %1341 = vst [vmem:[%s10370_s7 + $0x11d0] sm:$0xff] %v1340_v58  ;;  %1343 = vst [vmem:[%s10370_s7 + $0x11d8] sm:$0xff] %v1342_v59  ;;  %v1346_v61 = vld [vmem:[%s10362_s6 + $0x23c8] sm:$0xff] }
 0x12e   : > { %1345 = vst [vmem:[%s10370_s7 + $0x11e0] sm:$0xff] %v1344_v60  ;;  %v1348_v62 = vld [vmem:[%s10362_s6 + $0x23e0] sm:$0xff]  ;;  %v1350_v63 = vld [vmem:[%s10362_s6 + $0x23e8] sm:$0xff]  ;;  %1347 = vst [vmem:[%s10370_s7 + $0x11e8] sm:$0xff] %v1346_v61 }
 0x12f   : > { %1349 = vst [vmem:[%s10370_s7 + $0x11f0] sm:$0xff] %v1348_v62  ;;  %1351 = vst [vmem:[%s10370_s7 + $0x11f8] sm:$0xff] %v1350_v63  ;;  %v1352_v0 = vld [vmem:[%s10362_s6 + $0x2400] sm:$0xff]  ;;  %v1354_v1 = vld [vmem:[%s10362_s6 + $0x2408] sm:$0xff] }
 0x130   : > { %v1356_v2 = vld [vmem:[%s10362_s6 + $0x2420] sm:$0xff]  ;;  %1353 = vst [vmem:[%s10370_s7 + $0x1200] sm:$0xff] %v1352_v0  ;;  %1355 = vst [vmem:[%s10370_s7 + $0x1208] sm:$0xff] %v1354_v1  ;;  %v1358_v3 = vld [vmem:[%s10362_s6 + $0x2428] sm:$0xff] }
 0x131   : > { %1357 = vst [vmem:[%s10370_s7 + $0x1210] sm:$0xff] %v1356_v2  ;;  %v1360_v4 = vld [vmem:[%s10362_s6 + $0x2440] sm:$0xff]  ;;  %v1362_v5 = vld [vmem:[%s10362_s6 + $0x2448] sm:$0xff]  ;;  %1359 = vst [vmem:[%s10370_s7 + $0x1218] sm:$0xff] %v1358_v3 }
 0x132   : > { %1361 = vst [vmem:[%s10370_s7 + $0x1220] sm:$0xff] %v1360_v4  ;;  %1363 = vst [vmem:[%s10370_s7 + $0x1228] sm:$0xff] %v1362_v5  ;;  %v1364_v6 = vld [vmem:[%s10362_s6 + $0x2460] sm:$0xff]  ;;  %v1366_v7 = vld [vmem:[%s10362_s6 + $0x2468] sm:$0xff] }
 0x133   : > { %v1368_v8 = vld [vmem:[%s10362_s6 + $0x2480] sm:$0xff]  ;;  %1365 = vst [vmem:[%s10370_s7 + $0x1230] sm:$0xff] %v1364_v6  ;;  %1367 = vst [vmem:[%s10370_s7 + $0x1238] sm:$0xff] %v1366_v7  ;;  %v1370_v9 = vld [vmem:[%s10362_s6 + $0x2488] sm:$0xff] }
 0x134   : > { %1369 = vst [vmem:[%s10370_s7 + $0x1240] sm:$0xff] %v1368_v8  ;;  %v1372_v10 = vld [vmem:[%s10362_s6 + $0x24a0] sm:$0xff]  ;;  %v1374_v11 = vld [vmem:[%s10362_s6 + $0x24a8] sm:$0xff]  ;;  %1371 = vst [vmem:[%s10370_s7 + $0x1248] sm:$0xff] %v1370_v9 }
 0x135   : > { %1373 = vst [vmem:[%s10370_s7 + $0x1250] sm:$0xff] %v1372_v10  ;;  %1375 = vst [vmem:[%s10370_s7 + $0x1258] sm:$0xff] %v1374_v11  ;;  %v1376_v12 = vld [vmem:[%s10362_s6 + $0x24c0] sm:$0xff]  ;;  %v1378_v13 = vld [vmem:[%s10362_s6 + $0x24c8] sm:$0xff] }
 0x136   : > { %v1380_v14 = vld [vmem:[%s10362_s6 + $0x24e0] sm:$0xff]  ;;  %1377 = vst [vmem:[%s10370_s7 + $0x1260] sm:$0xff] %v1376_v12  ;;  %1379 = vst [vmem:[%s10370_s7 + $0x1268] sm:$0xff] %v1378_v13  ;;  %v1382_v15 = vld [vmem:[%s10362_s6 + $0x24e8] sm:$0xff] }
 0x137   : > { %1381 = vst [vmem:[%s10370_s7 + $0x1270] sm:$0xff] %v1380_v14  ;;  %v1384_v16 = vld [vmem:[%s10362_s6 + $0x2500] sm:$0xff]  ;;  %v1386_v17 = vld [vmem:[%s10362_s6 + $0x2508] sm:$0xff]  ;;  %1383 = vst [vmem:[%s10370_s7 + $0x1278] sm:$0xff] %v1382_v15 }
 0x138   : > { %1385 = vst [vmem:[%s10370_s7 + $0x1280] sm:$0xff] %v1384_v16  ;;  %1387 = vst [vmem:[%s10370_s7 + $0x1288] sm:$0xff] %v1386_v17  ;;  %v1388_v18 = vld [vmem:[%s10362_s6 + $0x2520] sm:$0xff]  ;;  %v1390_v19 = vld [vmem:[%s10362_s6 + $0x2528] sm:$0xff] }
 0x139   : > { %v1392_v20 = vld [vmem:[%s10362_s6 + $0x2540] sm:$0xff]  ;;  %1389 = vst [vmem:[%s10370_s7 + $0x1290] sm:$0xff] %v1388_v18  ;;  %1391 = vst [vmem:[%s10370_s7 + $0x1298] sm:$0xff] %v1390_v19  ;;  %v1394_v21 = vld [vmem:[%s10362_s6 + $0x2548] sm:$0xff] }
 0x13a   : > { %1393 = vst [vmem:[%s10370_s7 + $0x12a0] sm:$0xff] %v1392_v20  ;;  %v1396_v22 = vld [vmem:[%s10362_s6 + $0x2560] sm:$0xff]  ;;  %v1398_v23 = vld [vmem:[%s10362_s6 + $0x2568] sm:$0xff]  ;;  %1395 = vst [vmem:[%s10370_s7 + $0x12a8] sm:$0xff] %v1394_v21 }
 0x13b   : > { %1397 = vst [vmem:[%s10370_s7 + $0x12b0] sm:$0xff] %v1396_v22  ;;  %1399 = vst [vmem:[%s10370_s7 + $0x12b8] sm:$0xff] %v1398_v23  ;;  %v1400_v24 = vld [vmem:[%s10362_s6 + $0x2580] sm:$0xff]  ;;  %v1402_v25 = vld [vmem:[%s10362_s6 + $0x2588] sm:$0xff] }
 0x13c   : > { %v1404_v26 = vld [vmem:[%s10362_s6 + $0x25a0] sm:$0xff]  ;;  %1401 = vst [vmem:[%s10370_s7 + $0x12c0] sm:$0xff] %v1400_v24  ;;  %1403 = vst [vmem:[%s10370_s7 + $0x12c8] sm:$0xff] %v1402_v25  ;;  %v1406_v27 = vld [vmem:[%s10362_s6 + $0x25a8] sm:$0xff] }
 0x13d   : > { %1405 = vst [vmem:[%s10370_s7 + $0x12d0] sm:$0xff] %v1404_v26  ;;  %v1408_v28 = vld [vmem:[%s10362_s6 + $0x25c0] sm:$0xff]  ;;  %v1410_v29 = vld [vmem:[%s10362_s6 + $0x25c8] sm:$0xff]  ;;  %1407 = vst [vmem:[%s10370_s7 + $0x12d8] sm:$0xff] %v1406_v27 }
 0x13e   : > { %1409 = vst [vmem:[%s10370_s7 + $0x12e0] sm:$0xff] %v1408_v28  ;;  %1411 = vst [vmem:[%s10370_s7 + $0x12e8] sm:$0xff] %v1410_v29  ;;  %v1412_v30 = vld [vmem:[%s10362_s6 + $0x25e0] sm:$0xff]  ;;  %v1414_v31 = vld [vmem:[%s10362_s6 + $0x25e8] sm:$0xff] }
 0x13f   : > { %v1416_v32 = vld [vmem:[%s10362_s6 + $0x2600] sm:$0xff]  ;;  %1413 = vst [vmem:[%s10370_s7 + $0x12f0] sm:$0xff] %v1412_v30  ;;  %1415 = vst [vmem:[%s10370_s7 + $0x12f8] sm:$0xff] %v1414_v31  ;;  %v1418_v33 = vld [vmem:[%s10362_s6 + $0x2608] sm:$0xff] }
 0x140   : > { %1417 = vst [vmem:[%s10370_s7 + $0x1300] sm:$0xff] %v1416_v32  ;;  %v1420_v34 = vld [vmem:[%s10362_s6 + $0x2620] sm:$0xff]  ;;  %v1422_v35 = vld [vmem:[%s10362_s6 + $0x2628] sm:$0xff]  ;;  %1419 = vst [vmem:[%s10370_s7 + $0x1308] sm:$0xff] %v1418_v33 }
 0x141   : > { %1421 = vst [vmem:[%s10370_s7 + $0x1310] sm:$0xff] %v1420_v34  ;;  %1423 = vst [vmem:[%s10370_s7 + $0x1318] sm:$0xff] %v1422_v35  ;;  %v1424_v36 = vld [vmem:[%s10362_s6 + $0x2640] sm:$0xff]  ;;  %v1426_v37 = vld [vmem:[%s10362_s6 + $0x2648] sm:$0xff] }
 0x142   : > { %v1428_v38 = vld [vmem:[%s10362_s6 + $0x2660] sm:$0xff]  ;;  %1425 = vst [vmem:[%s10370_s7 + $0x1320] sm:$0xff] %v1424_v36  ;;  %1427 = vst [vmem:[%s10370_s7 + $0x1328] sm:$0xff] %v1426_v37  ;;  %v1430_v39 = vld [vmem:[%s10362_s6 + $0x2668] sm:$0xff] }
 0x143   : > { %1429 = vst [vmem:[%s10370_s7 + $0x1330] sm:$0xff] %v1428_v38  ;;  %v1432_v40 = vld [vmem:[%s10362_s6 + $0x2680] sm:$0xff]  ;;  %v1434_v41 = vld [vmem:[%s10362_s6 + $0x2688] sm:$0xff]  ;;  %1431 = vst [vmem:[%s10370_s7 + $0x1338] sm:$0xff] %v1430_v39 }
 0x144   : > { %1433 = vst [vmem:[%s10370_s7 + $0x1340] sm:$0xff] %v1432_v40  ;;  %1435 = vst [vmem:[%s10370_s7 + $0x1348] sm:$0xff] %v1434_v41  ;;  %v1436_v42 = vld [vmem:[%s10362_s6 + $0x26a0] sm:$0xff]  ;;  %v1438_v43 = vld [vmem:[%s10362_s6 + $0x26a8] sm:$0xff] }
 0x145   : > { %v1440_v44 = vld [vmem:[%s10362_s6 + $0x26c0] sm:$0xff]  ;;  %1437 = vst [vmem:[%s10370_s7 + $0x1350] sm:$0xff] %v1436_v42  ;;  %1439 = vst [vmem:[%s10370_s7 + $0x1358] sm:$0xff] %v1438_v43  ;;  %v1442_v45 = vld [vmem:[%s10362_s6 + $0x26c8] sm:$0xff] }
 0x146   : > { %1441 = vst [vmem:[%s10370_s7 + $0x1360] sm:$0xff] %v1440_v44  ;;  %v1444_v46 = vld [vmem:[%s10362_s6 + $0x26e0] sm:$0xff]  ;;  %v1446_v47 = vld [vmem:[%s10362_s6 + $0x26e8] sm:$0xff]  ;;  %1443 = vst [vmem:[%s10370_s7 + $0x1368] sm:$0xff] %v1442_v45 }
 0x147   : > { %1445 = vst [vmem:[%s10370_s7 + $0x1370] sm:$0xff] %v1444_v46  ;;  %1447 = vst [vmem:[%s10370_s7 + $0x1378] sm:$0xff] %v1446_v47  ;;  %v1448_v48 = vld [vmem:[%s10362_s6 + $0x2700] sm:$0xff]  ;;  %v1450_v49 = vld [vmem:[%s10362_s6 + $0x2708] sm:$0xff] }
 0x148   : > { %v1452_v50 = vld [vmem:[%s10362_s6 + $0x2720] sm:$0xff]  ;;  %1449 = vst [vmem:[%s10370_s7 + $0x1380] sm:$0xff] %v1448_v48  ;;  %1451 = vst [vmem:[%s10370_s7 + $0x1388] sm:$0xff] %v1450_v49  ;;  %v1454_v51 = vld [vmem:[%s10362_s6 + $0x2728] sm:$0xff] }
 0x149   : > { %1453 = vst [vmem:[%s10370_s7 + $0x1390] sm:$0xff] %v1452_v50  ;;  %v1456_v52 = vld [vmem:[%s10362_s6 + $0x2740] sm:$0xff]  ;;  %v1458_v53 = vld [vmem:[%s10362_s6 + $0x2748] sm:$0xff]  ;;  %1455 = vst [vmem:[%s10370_s7 + $0x1398] sm:$0xff] %v1454_v51 }
 0x14a   : > { %1457 = vst [vmem:[%s10370_s7 + $0x13a0] sm:$0xff] %v1456_v52  ;;  %1459 = vst [vmem:[%s10370_s7 + $0x13a8] sm:$0xff] %v1458_v53  ;;  %v1460_v54 = vld [vmem:[%s10362_s6 + $0x2760] sm:$0xff]  ;;  %v1462_v55 = vld [vmem:[%s10362_s6 + $0x2768] sm:$0xff] }
 0x14b   : > { %v1464_v56 = vld [vmem:[%s10362_s6 + $0x2780] sm:$0xff]  ;;  %1461 = vst [vmem:[%s10370_s7 + $0x13b0] sm:$0xff] %v1460_v54  ;;  %1463 = vst [vmem:[%s10370_s7 + $0x13b8] sm:$0xff] %v1462_v55  ;;  %v1466_v57 = vld [vmem:[%s10362_s6 + $0x2788] sm:$0xff] }
 0x14c   : > { %1465 = vst [vmem:[%s10370_s7 + $0x13c0] sm:$0xff] %v1464_v56  ;;  %v1468_v58 = vld [vmem:[%s10362_s6 + $0x27a0] sm:$0xff]  ;;  %v1470_v59 = vld [vmem:[%s10362_s6 + $0x27a8] sm:$0xff]  ;;  %1467 = vst [vmem:[%s10370_s7 + $0x13c8] sm:$0xff] %v1466_v57 }
 0x14d   : > { %1469 = vst [vmem:[%s10370_s7 + $0x13d0] sm:$0xff] %v1468_v58  ;;  %1471 = vst [vmem:[%s10370_s7 + $0x13d8] sm:$0xff] %v1470_v59  ;;  %v1472_v60 = vld [vmem:[%s10362_s6 + $0x27c0] sm:$0xff]  ;;  %v1474_v61 = vld [vmem:[%s10362_s6 + $0x27c8] sm:$0xff] }
 0x14e   : > { %v1476_v62 = vld [vmem:[%s10362_s6 + $0x27e0] sm:$0xff]  ;;  %1473 = vst [vmem:[%s10370_s7 + $0x13e0] sm:$0xff] %v1472_v60  ;;  %1475 = vst [vmem:[%s10370_s7 + $0x13e8] sm:$0xff] %v1474_v61  ;;  %v1478_v63 = vld [vmem:[%s10362_s6 + $0x27e8] sm:$0xff] }
 0x14f   : > { %1477 = vst [vmem:[%s10370_s7 + $0x13f0] sm:$0xff] %v1476_v62  ;;  %v1480_v0 = vld [vmem:[%s10362_s6 + $0x2800] sm:$0xff]  ;;  %v1482_v1 = vld [vmem:[%s10362_s6 + $0x2808] sm:$0xff]  ;;  %1479 = vst [vmem:[%s10370_s7 + $0x13f8] sm:$0xff] %v1478_v63 }
 0x150   : > { %1481 = vst [vmem:[%s10370_s7 + $0x1400] sm:$0xff] %v1480_v0  ;;  %1483 = vst [vmem:[%s10370_s7 + $0x1408] sm:$0xff] %v1482_v1  ;;  %v1484_v2 = vld [vmem:[%s10362_s6 + $0x2820] sm:$0xff]  ;;  %v1486_v3 = vld [vmem:[%s10362_s6 + $0x2828] sm:$0xff] }
 0x151   : > { %v1488_v4 = vld [vmem:[%s10362_s6 + $0x2840] sm:$0xff]  ;;  %1485 = vst [vmem:[%s10370_s7 + $0x1410] sm:$0xff] %v1484_v2  ;;  %1487 = vst [vmem:[%s10370_s7 + $0x1418] sm:$0xff] %v1486_v3  ;;  %v1490_v5 = vld [vmem:[%s10362_s6 + $0x2848] sm:$0xff] }
 0x152   : > { %1489 = vst [vmem:[%s10370_s7 + $0x1420] sm:$0xff] %v1488_v4  ;;  %v1492_v6 = vld [vmem:[%s10362_s6 + $0x2860] sm:$0xff]  ;;  %v1494_v7 = vld [vmem:[%s10362_s6 + $0x2868] sm:$0xff]  ;;  %1491 = vst [vmem:[%s10370_s7 + $0x1428] sm:$0xff] %v1490_v5 }
 0x153   : > { %1493 = vst [vmem:[%s10370_s7 + $0x1430] sm:$0xff] %v1492_v6  ;;  %1495 = vst [vmem:[%s10370_s7 + $0x1438] sm:$0xff] %v1494_v7  ;;  %v1496_v8 = vld [vmem:[%s10362_s6 + $0x2880] sm:$0xff]  ;;  %v1498_v9 = vld [vmem:[%s10362_s6 + $0x2888] sm:$0xff] }
 0x154   : > { %v1500_v10 = vld [vmem:[%s10362_s6 + $0x28a0] sm:$0xff]  ;;  %1497 = vst [vmem:[%s10370_s7 + $0x1440] sm:$0xff] %v1496_v8  ;;  %1499 = vst [vmem:[%s10370_s7 + $0x1448] sm:$0xff] %v1498_v9  ;;  %v1502_v11 = vld [vmem:[%s10362_s6 + $0x28a8] sm:$0xff] }
 0x155   : > { %1501 = vst [vmem:[%s10370_s7 + $0x1450] sm:$0xff] %v1500_v10  ;;  %v1504_v12 = vld [vmem:[%s10362_s6 + $0x28c0] sm:$0xff]  ;;  %v1506_v13 = vld [vmem:[%s10362_s6 + $0x28c8] sm:$0xff]  ;;  %1503 = vst [vmem:[%s10370_s7 + $0x1458] sm:$0xff] %v1502_v11 }
 0x156   : > { %1505 = vst [vmem:[%s10370_s7 + $0x1460] sm:$0xff] %v1504_v12  ;;  %1507 = vst [vmem:[%s10370_s7 + $0x1468] sm:$0xff] %v1506_v13  ;;  %v1508_v14 = vld [vmem:[%s10362_s6 + $0x28e0] sm:$0xff]  ;;  %v1510_v15 = vld [vmem:[%s10362_s6 + $0x28e8] sm:$0xff] }
 0x157   : > { %v1512_v16 = vld [vmem:[%s10362_s6 + $0x2900] sm:$0xff]  ;;  %1509 = vst [vmem:[%s10370_s7 + $0x1470] sm:$0xff] %v1508_v14  ;;  %1511 = vst [vmem:[%s10370_s7 + $0x1478] sm:$0xff] %v1510_v15  ;;  %v1514_v17 = vld [vmem:[%s10362_s6 + $0x2908] sm:$0xff] }
 0x158   : > { %1513 = vst [vmem:[%s10370_s7 + $0x1480] sm:$0xff] %v1512_v16  ;;  %v1516_v18 = vld [vmem:[%s10362_s6 + $0x2920] sm:$0xff]  ;;  %v1518_v19 = vld [vmem:[%s10362_s6 + $0x2928] sm:$0xff]  ;;  %1515 = vst [vmem:[%s10370_s7 + $0x1488] sm:$0xff] %v1514_v17 }
 0x159   : > { %1517 = vst [vmem:[%s10370_s7 + $0x1490] sm:$0xff] %v1516_v18  ;;  %1519 = vst [vmem:[%s10370_s7 + $0x1498] sm:$0xff] %v1518_v19  ;;  %v1520_v20 = vld [vmem:[%s10362_s6 + $0x2940] sm:$0xff]  ;;  %v1522_v21 = vld [vmem:[%s10362_s6 + $0x2948] sm:$0xff] }
 0x15a   : > { %v1524_v22 = vld [vmem:[%s10362_s6 + $0x2960] sm:$0xff]  ;;  %1521 = vst [vmem:[%s10370_s7 + $0x14a0] sm:$0xff] %v1520_v20  ;;  %1523 = vst [vmem:[%s10370_s7 + $0x14a8] sm:$0xff] %v1522_v21  ;;  %v1526_v23 = vld [vmem:[%s10362_s6 + $0x2968] sm:$0xff] }
 0x15b   : > { %1525 = vst [vmem:[%s10370_s7 + $0x14b0] sm:$0xff] %v1524_v22  ;;  %v1528_v24 = vld [vmem:[%s10362_s6 + $0x2980] sm:$0xff]  ;;  %v1530_v25 = vld [vmem:[%s10362_s6 + $0x2988] sm:$0xff]  ;;  %1527 = vst [vmem:[%s10370_s7 + $0x14b8] sm:$0xff] %v1526_v23 }
 0x15c   : > { %1529 = vst [vmem:[%s10370_s7 + $0x14c0] sm:$0xff] %v1528_v24  ;;  %1531 = vst [vmem:[%s10370_s7 + $0x14c8] sm:$0xff] %v1530_v25  ;;  %v1532_v26 = vld [vmem:[%s10362_s6 + $0x29a0] sm:$0xff]  ;;  %v1534_v27 = vld [vmem:[%s10362_s6 + $0x29a8] sm:$0xff] }
 0x15d   : > { %v1536_v28 = vld [vmem:[%s10362_s6 + $0x29c0] sm:$0xff]  ;;  %1533 = vst [vmem:[%s10370_s7 + $0x14d0] sm:$0xff] %v1532_v26  ;;  %1535 = vst [vmem:[%s10370_s7 + $0x14d8] sm:$0xff] %v1534_v27  ;;  %v1538_v29 = vld [vmem:[%s10362_s6 + $0x29c8] sm:$0xff] }
 0x15e   : > { %1537 = vst [vmem:[%s10370_s7 + $0x14e0] sm:$0xff] %v1536_v28  ;;  %v1540_v30 = vld [vmem:[%s10362_s6 + $0x29e0] sm:$0xff]  ;;  %v1542_v31 = vld [vmem:[%s10362_s6 + $0x29e8] sm:$0xff]  ;;  %1539 = vst [vmem:[%s10370_s7 + $0x14e8] sm:$0xff] %v1538_v29 }
 0x15f   : > { %1541 = vst [vmem:[%s10370_s7 + $0x14f0] sm:$0xff] %v1540_v30  ;;  %1543 = vst [vmem:[%s10370_s7 + $0x14f8] sm:$0xff] %v1542_v31  ;;  %v1544_v32 = vld [vmem:[%s10362_s6 + $0x2a00] sm:$0xff]  ;;  %v1546_v33 = vld [vmem:[%s10362_s6 + $0x2a08] sm:$0xff] }
 0x160   : > { %v1548_v34 = vld [vmem:[%s10362_s6 + $0x2a20] sm:$0xff]  ;;  %1545 = vst [vmem:[%s10370_s7 + $0x1500] sm:$0xff] %v1544_v32  ;;  %1547 = vst [vmem:[%s10370_s7 + $0x1508] sm:$0xff] %v1546_v33  ;;  %v1550_v35 = vld [vmem:[%s10362_s6 + $0x2a28] sm:$0xff] }
 0x161   : > { %1549 = vst [vmem:[%s10370_s7 + $0x1510] sm:$0xff] %v1548_v34  ;;  %v1552_v36 = vld [vmem:[%s10362_s6 + $0x2a40] sm:$0xff]  ;;  %v1554_v37 = vld [vmem:[%s10362_s6 + $0x2a48] sm:$0xff]  ;;  %1551 = vst [vmem:[%s10370_s7 + $0x1518] sm:$0xff] %v1550_v35 }
 0x162   : > { %1553 = vst [vmem:[%s10370_s7 + $0x1520] sm:$0xff] %v1552_v36  ;;  %1555 = vst [vmem:[%s10370_s7 + $0x1528] sm:$0xff] %v1554_v37  ;;  %v1556_v38 = vld [vmem:[%s10362_s6 + $0x2a60] sm:$0xff]  ;;  %v1558_v39 = vld [vmem:[%s10362_s6 + $0x2a68] sm:$0xff] }
 0x163   : > { %v1560_v40 = vld [vmem:[%s10362_s6 + $0x2a80] sm:$0xff]  ;;  %1557 = vst [vmem:[%s10370_s7 + $0x1530] sm:$0xff] %v1556_v38  ;;  %1559 = vst [vmem:[%s10370_s7 + $0x1538] sm:$0xff] %v1558_v39  ;;  %v1562_v41 = vld [vmem:[%s10362_s6 + $0x2a88] sm:$0xff] }
 0x164   : > { %1561 = vst [vmem:[%s10370_s7 + $0x1540] sm:$0xff] %v1560_v40  ;;  %v1564_v42 = vld [vmem:[%s10362_s6 + $0x2aa0] sm:$0xff]  ;;  %v1566_v43 = vld [vmem:[%s10362_s6 + $0x2aa8] sm:$0xff]  ;;  %1563 = vst [vmem:[%s10370_s7 + $0x1548] sm:$0xff] %v1562_v41 }
 0x165   : > { %1565 = vst [vmem:[%s10370_s7 + $0x1550] sm:$0xff] %v1564_v42  ;;  %1567 = vst [vmem:[%s10370_s7 + $0x1558] sm:$0xff] %v1566_v43  ;;  %v1568_v44 = vld [vmem:[%s10362_s6 + $0x2ac0] sm:$0xff]  ;;  %v1570_v45 = vld [vmem:[%s10362_s6 + $0x2ac8] sm:$0xff] }
 0x166   : > { %v1572_v46 = vld [vmem:[%s10362_s6 + $0x2ae0] sm:$0xff]  ;;  %1569 = vst [vmem:[%s10370_s7 + $0x1560] sm:$0xff] %v1568_v44  ;;  %1571 = vst [vmem:[%s10370_s7 + $0x1568] sm:$0xff] %v1570_v45  ;;  %v1574_v47 = vld [vmem:[%s10362_s6 + $0x2ae8] sm:$0xff] }
 0x167   : > { %1573 = vst [vmem:[%s10370_s7 + $0x1570] sm:$0xff] %v1572_v46  ;;  %v1576_v48 = vld [vmem:[%s10362_s6 + $0x2b00] sm:$0xff]  ;;  %v1578_v49 = vld [vmem:[%s10362_s6 + $0x2b08] sm:$0xff]  ;;  %1575 = vst [vmem:[%s10370_s7 + $0x1578] sm:$0xff] %v1574_v47 }
 0x168   : > { %1577 = vst [vmem:[%s10370_s7 + $0x1580] sm:$0xff] %v1576_v48  ;;  %1579 = vst [vmem:[%s10370_s7 + $0x1588] sm:$0xff] %v1578_v49  ;;  %v1580_v50 = vld [vmem:[%s10362_s6 + $0x2b20] sm:$0xff]  ;;  %v1582_v51 = vld [vmem:[%s10362_s6 + $0x2b28] sm:$0xff] }
 0x169   : > { %v1584_v52 = vld [vmem:[%s10362_s6 + $0x2b40] sm:$0xff]  ;;  %1581 = vst [vmem:[%s10370_s7 + $0x1590] sm:$0xff] %v1580_v50  ;;  %1583 = vst [vmem:[%s10370_s7 + $0x1598] sm:$0xff] %v1582_v51  ;;  %v1586_v53 = vld [vmem:[%s10362_s6 + $0x2b48] sm:$0xff] }
 0x16a   : > { %1585 = vst [vmem:[%s10370_s7 + $0x15a0] sm:$0xff] %v1584_v52  ;;  %v1588_v54 = vld [vmem:[%s10362_s6 + $0x2b60] sm:$0xff]  ;;  %v1590_v55 = vld [vmem:[%s10362_s6 + $0x2b68] sm:$0xff]  ;;  %1587 = vst [vmem:[%s10370_s7 + $0x15a8] sm:$0xff] %v1586_v53 }
 0x16b   : > { %1589 = vst [vmem:[%s10370_s7 + $0x15b0] sm:$0xff] %v1588_v54  ;;  %1591 = vst [vmem:[%s10370_s7 + $0x15b8] sm:$0xff] %v1590_v55  ;;  %v1592_v56 = vld [vmem:[%s10362_s6 + $0x2b80] sm:$0xff]  ;;  %v1594_v57 = vld [vmem:[%s10362_s6 + $0x2b88] sm:$0xff] }
 0x16c   : > { %v1596_v58 = vld [vmem:[%s10362_s6 + $0x2ba0] sm:$0xff]  ;;  %1593 = vst [vmem:[%s10370_s7 + $0x15c0] sm:$0xff] %v1592_v56  ;;  %1595 = vst [vmem:[%s10370_s7 + $0x15c8] sm:$0xff] %v1594_v57  ;;  %v1598_v59 = vld [vmem:[%s10362_s6 + $0x2ba8] sm:$0xff] }
 0x16d   : > { %1597 = vst [vmem:[%s10370_s7 + $0x15d0] sm:$0xff] %v1596_v58  ;;  %v1600_v60 = vld [vmem:[%s10362_s6 + $0x2bc0] sm:$0xff]  ;;  %v1602_v61 = vld [vmem:[%s10362_s6 + $0x2bc8] sm:$0xff]  ;;  %1599 = vst [vmem:[%s10370_s7 + $0x15d8] sm:$0xff] %v1598_v59 }
 0x16e   : > { %1601 = vst [vmem:[%s10370_s7 + $0x15e0] sm:$0xff] %v1600_v60  ;;  %1603 = vst [vmem:[%s10370_s7 + $0x15e8] sm:$0xff] %v1602_v61  ;;  %v1604_v62 = vld [vmem:[%s10362_s6 + $0x2be0] sm:$0xff]  ;;  %v1606_v63 = vld [vmem:[%s10362_s6 + $0x2be8] sm:$0xff] }
 0x16f   : > { %v1608_v0 = vld [vmem:[%s10362_s6 + $0x2c00] sm:$0xff]  ;;  %1605 = vst [vmem:[%s10370_s7 + $0x15f0] sm:$0xff] %v1604_v62  ;;  %1607 = vst [vmem:[%s10370_s7 + $0x15f8] sm:$0xff] %v1606_v63  ;;  %v1610_v1 = vld [vmem:[%s10362_s6 + $0x2c08] sm:$0xff] }
 0x170   : > { %1609 = vst [vmem:[%s10370_s7 + $0x1600] sm:$0xff] %v1608_v0  ;;  %v1612_v2 = vld [vmem:[%s10362_s6 + $0x2c20] sm:$0xff]  ;;  %v1614_v3 = vld [vmem:[%s10362_s6 + $0x2c28] sm:$0xff]  ;;  %1611 = vst [vmem:[%s10370_s7 + $0x1608] sm:$0xff] %v1610_v1 }
 0x171   : > { %1613 = vst [vmem:[%s10370_s7 + $0x1610] sm:$0xff] %v1612_v2  ;;  %1615 = vst [vmem:[%s10370_s7 + $0x1618] sm:$0xff] %v1614_v3  ;;  %v1616_v4 = vld [vmem:[%s10362_s6 + $0x2c40] sm:$0xff]  ;;  %v1618_v5 = vld [vmem:[%s10362_s6 + $0x2c48] sm:$0xff] }
 0x172   : > { %v1620_v6 = vld [vmem:[%s10362_s6 + $0x2c60] sm:$0xff]  ;;  %1617 = vst [vmem:[%s10370_s7 + $0x1620] sm:$0xff] %v1616_v4  ;;  %1619 = vst [vmem:[%s10370_s7 + $0x1628] sm:$0xff] %v1618_v5  ;;  %v1622_v7 = vld [vmem:[%s10362_s6 + $0x2c68] sm:$0xff] }
 0x173   : > { %1621 = vst [vmem:[%s10370_s7 + $0x1630] sm:$0xff] %v1620_v6  ;;  %v1624_v8 = vld [vmem:[%s10362_s6 + $0x2c80] sm:$0xff]  ;;  %v1626_v9 = vld [vmem:[%s10362_s6 + $0x2c88] sm:$0xff]  ;;  %1623 = vst [vmem:[%s10370_s7 + $0x1638] sm:$0xff] %v1622_v7 }
 0x174   : > { %1625 = vst [vmem:[%s10370_s7 + $0x1640] sm:$0xff] %v1624_v8  ;;  %1627 = vst [vmem:[%s10370_s7 + $0x1648] sm:$0xff] %v1626_v9  ;;  %v1628_v10 = vld [vmem:[%s10362_s6 + $0x2ca0] sm:$0xff]  ;;  %v1630_v11 = vld [vmem:[%s10362_s6 + $0x2ca8] sm:$0xff] }
 0x175   : > { %v1632_v12 = vld [vmem:[%s10362_s6 + $0x2cc0] sm:$0xff]  ;;  %1629 = vst [vmem:[%s10370_s7 + $0x1650] sm:$0xff] %v1628_v10  ;;  %1631 = vst [vmem:[%s10370_s7 + $0x1658] sm:$0xff] %v1630_v11  ;;  %v1634_v13 = vld [vmem:[%s10362_s6 + $0x2cc8] sm:$0xff] }
 0x176   : > { %1633 = vst [vmem:[%s10370_s7 + $0x1660] sm:$0xff] %v1632_v12  ;;  %v1636_v14 = vld [vmem:[%s10362_s6 + $0x2ce0] sm:$0xff]  ;;  %v1638_v15 = vld [vmem:[%s10362_s6 + $0x2ce8] sm:$0xff]  ;;  %1635 = vst [vmem:[%s10370_s7 + $0x1668] sm:$0xff] %v1634_v13 }
 0x177   : > { %1637 = vst [vmem:[%s10370_s7 + $0x1670] sm:$0xff] %v1636_v14  ;;  %1639 = vst [vmem:[%s10370_s7 + $0x1678] sm:$0xff] %v1638_v15  ;;  %v1640_v16 = vld [vmem:[%s10362_s6 + $0x2d00] sm:$0xff]  ;;  %v1642_v17 = vld [vmem:[%s10362_s6 + $0x2d08] sm:$0xff] }
 0x178   : > { %v1644_v18 = vld [vmem:[%s10362_s6 + $0x2d20] sm:$0xff]  ;;  %1641 = vst [vmem:[%s10370_s7 + $0x1680] sm:$0xff] %v1640_v16  ;;  %1643 = vst [vmem:[%s10370_s7 + $0x1688] sm:$0xff] %v1642_v17  ;;  %v1646_v19 = vld [vmem:[%s10362_s6 + $0x2d28] sm:$0xff] }
 0x179   : > { %1645 = vst [vmem:[%s10370_s7 + $0x1690] sm:$0xff] %v1644_v18  ;;  %v1648_v20 = vld [vmem:[%s10362_s6 + $0x2d40] sm:$0xff]  ;;  %v1650_v21 = vld [vmem:[%s10362_s6 + $0x2d48] sm:$0xff]  ;;  %1647 = vst [vmem:[%s10370_s7 + $0x1698] sm:$0xff] %v1646_v19 }
 0x17a   : > { %1649 = vst [vmem:[%s10370_s7 + $0x16a0] sm:$0xff] %v1648_v20  ;;  %1651 = vst [vmem:[%s10370_s7 + $0x16a8] sm:$0xff] %v1650_v21  ;;  %v1652_v22 = vld [vmem:[%s10362_s6 + $0x2d60] sm:$0xff]  ;;  %v1654_v23 = vld [vmem:[%s10362_s6 + $0x2d68] sm:$0xff] }
 0x17b   : > { %v1656_v24 = vld [vmem:[%s10362_s6 + $0x2d80] sm:$0xff]  ;;  %1653 = vst [vmem:[%s10370_s7 + $0x16b0] sm:$0xff] %v1652_v22  ;;  %1655 = vst [vmem:[%s10370_s7 + $0x16b8] sm:$0xff] %v1654_v23  ;;  %v1658_v25 = vld [vmem:[%s10362_s6 + $0x2d88] sm:$0xff] }
 0x17c   : > { %1657 = vst [vmem:[%s10370_s7 + $0x16c0] sm:$0xff] %v1656_v24  ;;  %v1660_v26 = vld [vmem:[%s10362_s6 + $0x2da0] sm:$0xff]  ;;  %v1662_v27 = vld [vmem:[%s10362_s6 + $0x2da8] sm:$0xff]  ;;  %1659 = vst [vmem:[%s10370_s7 + $0x16c8] sm:$0xff] %v1658_v25 }
 0x17d   : > { %1661 = vst [vmem:[%s10370_s7 + $0x16d0] sm:$0xff] %v1660_v26  ;;  %1663 = vst [vmem:[%s10370_s7 + $0x16d8] sm:$0xff] %v1662_v27  ;;  %v1664_v28 = vld [vmem:[%s10362_s6 + $0x2dc0] sm:$0xff]  ;;  %v1666_v29 = vld [vmem:[%s10362_s6 + $0x2dc8] sm:$0xff] }
 0x17e   : > { %v1668_v30 = vld [vmem:[%s10362_s6 + $0x2de0] sm:$0xff]  ;;  %1665 = vst [vmem:[%s10370_s7 + $0x16e0] sm:$0xff] %v1664_v28  ;;  %1667 = vst [vmem:[%s10370_s7 + $0x16e8] sm:$0xff] %v1666_v29  ;;  %v1670_v31 = vld [vmem:[%s10362_s6 + $0x2de8] sm:$0xff] }
 0x17f   : > { %1669 = vst [vmem:[%s10370_s7 + $0x16f0] sm:$0xff] %v1668_v30  ;;  %v1672_v32 = vld [vmem:[%s10362_s6 + $0x2e00] sm:$0xff]  ;;  %v1674_v33 = vld [vmem:[%s10362_s6 + $0x2e08] sm:$0xff]  ;;  %1671 = vst [vmem:[%s10370_s7 + $0x16f8] sm:$0xff] %v1670_v31 }
 0x180   : > { %1673 = vst [vmem:[%s10370_s7 + $0x1700] sm:$0xff] %v1672_v32  ;;  %1675 = vst [vmem:[%s10370_s7 + $0x1708] sm:$0xff] %v1674_v33  ;;  %v1676_v34 = vld [vmem:[%s10362_s6 + $0x2e20] sm:$0xff]  ;;  %v1678_v35 = vld [vmem:[%s10362_s6 + $0x2e28] sm:$0xff] }
 0x181   : > { %v1680_v36 = vld [vmem:[%s10362_s6 + $0x2e40] sm:$0xff]  ;;  %1677 = vst [vmem:[%s10370_s7 + $0x1710] sm:$0xff] %v1676_v34  ;;  %1679 = vst [vmem:[%s10370_s7 + $0x1718] sm:$0xff] %v1678_v35  ;;  %v1682_v37 = vld [vmem:[%s10362_s6 + $0x2e48] sm:$0xff] }
 0x182   : > { %1681 = vst [vmem:[%s10370_s7 + $0x1720] sm:$0xff] %v1680_v36  ;;  %v1684_v38 = vld [vmem:[%s10362_s6 + $0x2e60] sm:$0xff]  ;;  %v1686_v39 = vld [vmem:[%s10362_s6 + $0x2e68] sm:$0xff]  ;;  %1683 = vst [vmem:[%s10370_s7 + $0x1728] sm:$0xff] %v1682_v37 }
 0x183   : > { %1685 = vst [vmem:[%s10370_s7 + $0x1730] sm:$0xff] %v1684_v38  ;;  %1687 = vst [vmem:[%s10370_s7 + $0x1738] sm:$0xff] %v1686_v39  ;;  %v1688_v40 = vld [vmem:[%s10362_s6 + $0x2e80] sm:$0xff]  ;;  %v1690_v41 = vld [vmem:[%s10362_s6 + $0x2e88] sm:$0xff] }
 0x184   : > { %v1692_v42 = vld [vmem:[%s10362_s6 + $0x2ea0] sm:$0xff]  ;;  %1689 = vst [vmem:[%s10370_s7 + $0x1740] sm:$0xff] %v1688_v40  ;;  %1691 = vst [vmem:[%s10370_s7 + $0x1748] sm:$0xff] %v1690_v41  ;;  %v1694_v43 = vld [vmem:[%s10362_s6 + $0x2ea8] sm:$0xff] }
 0x185   : > { %1693 = vst [vmem:[%s10370_s7 + $0x1750] sm:$0xff] %v1692_v42  ;;  %v1696_v44 = vld [vmem:[%s10362_s6 + $0x2ec0] sm:$0xff]  ;;  %v1698_v45 = vld [vmem:[%s10362_s6 + $0x2ec8] sm:$0xff]  ;;  %1695 = vst [vmem:[%s10370_s7 + $0x1758] sm:$0xff] %v1694_v43 }
 0x186   : > { %1697 = vst [vmem:[%s10370_s7 + $0x1760] sm:$0xff] %v1696_v44  ;;  %1699 = vst [vmem:[%s10370_s7 + $0x1768] sm:$0xff] %v1698_v45  ;;  %v1700_v46 = vld [vmem:[%s10362_s6 + $0x2ee0] sm:$0xff]  ;;  %v1702_v47 = vld [vmem:[%s10362_s6 + $0x2ee8] sm:$0xff] }
 0x187   : > { %v1704_v48 = vld [vmem:[%s10362_s6 + $0x2f00] sm:$0xff]  ;;  %1701 = vst [vmem:[%s10370_s7 + $0x1770] sm:$0xff] %v1700_v46  ;;  %1703 = vst [vmem:[%s10370_s7 + $0x1778] sm:$0xff] %v1702_v47  ;;  %v1706_v49 = vld [vmem:[%s10362_s6 + $0x2f08] sm:$0xff] }
 0x188   : > { %1705 = vst [vmem:[%s10370_s7 + $0x1780] sm:$0xff] %v1704_v48  ;;  %v1708_v50 = vld [vmem:[%s10362_s6 + $0x2f20] sm:$0xff]  ;;  %v1710_v51 = vld [vmem:[%s10362_s6 + $0x2f28] sm:$0xff]  ;;  %1707 = vst [vmem:[%s10370_s7 + $0x1788] sm:$0xff] %v1706_v49 }
 0x189   : > { %1709 = vst [vmem:[%s10370_s7 + $0x1790] sm:$0xff] %v1708_v50  ;;  %1711 = vst [vmem:[%s10370_s7 + $0x1798] sm:$0xff] %v1710_v51  ;;  %v1712_v52 = vld [vmem:[%s10362_s6 + $0x2f40] sm:$0xff]  ;;  %v1714_v53 = vld [vmem:[%s10362_s6 + $0x2f48] sm:$0xff] }
 0x18a   : > { %v1716_v54 = vld [vmem:[%s10362_s6 + $0x2f60] sm:$0xff]  ;;  %1713 = vst [vmem:[%s10370_s7 + $0x17a0] sm:$0xff] %v1712_v52  ;;  %1715 = vst [vmem:[%s10370_s7 + $0x17a8] sm:$0xff] %v1714_v53  ;;  %v1718_v55 = vld [vmem:[%s10362_s6 + $0x2f68] sm:$0xff] }
 0x18b   : > { %1717 = vst [vmem:[%s10370_s7 + $0x17b0] sm:$0xff] %v1716_v54  ;;  %v1720_v56 = vld [vmem:[%s10362_s6 + $0x2f80] sm:$0xff]  ;;  %v1722_v57 = vld [vmem:[%s10362_s6 + $0x2f88] sm:$0xff]  ;;  %1719 = vst [vmem:[%s10370_s7 + $0x17b8] sm:$0xff] %v1718_v55 }
 0x18c   : > { %1721 = vst [vmem:[%s10370_s7 + $0x17c0] sm:$0xff] %v1720_v56  ;;  %1723 = vst [vmem:[%s10370_s7 + $0x17c8] sm:$0xff] %v1722_v57  ;;  %v1724_v58 = vld [vmem:[%s10362_s6 + $0x2fa0] sm:$0xff]  ;;  %v1726_v59 = vld [vmem:[%s10362_s6 + $0x2fa8] sm:$0xff] }
 0x18d   : > { %v1728_v60 = vld [vmem:[%s10362_s6 + $0x2fc0] sm:$0xff]  ;;  %1725 = vst [vmem:[%s10370_s7 + $0x17d0] sm:$0xff] %v1724_v58  ;;  %1727 = vst [vmem:[%s10370_s7 + $0x17d8] sm:$0xff] %v1726_v59  ;;  %v1730_v61 = vld [vmem:[%s10362_s6 + $0x2fc8] sm:$0xff] }
 0x18e   : > { %1729 = vst [vmem:[%s10370_s7 + $0x17e0] sm:$0xff] %v1728_v60  ;;  %v1732_v62 = vld [vmem:[%s10362_s6 + $0x2fe0] sm:$0xff]  ;;  %v1734_v63 = vld [vmem:[%s10362_s6 + $0x2fe8] sm:$0xff]  ;;  %1731 = vst [vmem:[%s10370_s7 + $0x17e8] sm:$0xff] %v1730_v61 }
 0x18f   : > { %1733 = vst [vmem:[%s10370_s7 + $0x17f0] sm:$0xff] %v1732_v62  ;;  %1735 = vst [vmem:[%s10370_s7 + $0x17f8] sm:$0xff] %v1734_v63  ;;  %v1736_v0 = vld [vmem:[%s10362_s6 + $0x3000] sm:$0xff]  ;;  %v1738_v1 = vld [vmem:[%s10362_s6 + $0x3008] sm:$0xff] }
 0x190   : > { %v1740_v2 = vld [vmem:[%s10362_s6 + $0x3020] sm:$0xff]  ;;  %1737 = vst [vmem:[%s10370_s7 + $0x1800] sm:$0xff] %v1736_v0  ;;  %1739 = vst [vmem:[%s10370_s7 + $0x1808] sm:$0xff] %v1738_v1  ;;  %v1742_v3 = vld [vmem:[%s10362_s6 + $0x3028] sm:$0xff] }
 0x191   : > { %1741 = vst [vmem:[%s10370_s7 + $0x1810] sm:$0xff] %v1740_v2  ;;  %v1744_v4 = vld [vmem:[%s10362_s6 + $0x3040] sm:$0xff]  ;;  %v1746_v5 = vld [vmem:[%s10362_s6 + $0x3048] sm:$0xff]  ;;  %1743 = vst [vmem:[%s10370_s7 + $0x1818] sm:$0xff] %v1742_v3 }
 0x192   : > { %1745 = vst [vmem:[%s10370_s7 + $0x1820] sm:$0xff] %v1744_v4  ;;  %1747 = vst [vmem:[%s10370_s7 + $0x1828] sm:$0xff] %v1746_v5  ;;  %v1748_v6 = vld [vmem:[%s10362_s6 + $0x3060] sm:$0xff]  ;;  %v1750_v7 = vld [vmem:[%s10362_s6 + $0x3068] sm:$0xff] }
 0x193   : > { %v1752_v8 = vld [vmem:[%s10362_s6 + $0x3080] sm:$0xff]  ;;  %1749 = vst [vmem:[%s10370_s7 + $0x1830] sm:$0xff] %v1748_v6  ;;  %1751 = vst [vmem:[%s10370_s7 + $0x1838] sm:$0xff] %v1750_v7  ;;  %v1754_v9 = vld [vmem:[%s10362_s6 + $0x3088] sm:$0xff] }
 0x194   : > { %1753 = vst [vmem:[%s10370_s7 + $0x1840] sm:$0xff] %v1752_v8  ;;  %v1756_v10 = vld [vmem:[%s10362_s6 + $0x30a0] sm:$0xff]  ;;  %v1758_v11 = vld [vmem:[%s10362_s6 + $0x30a8] sm:$0xff]  ;;  %1755 = vst [vmem:[%s10370_s7 + $0x1848] sm:$0xff] %v1754_v9 }
 0x195   : > { %1757 = vst [vmem:[%s10370_s7 + $0x1850] sm:$0xff] %v1756_v10  ;;  %1759 = vst [vmem:[%s10370_s7 + $0x1858] sm:$0xff] %v1758_v11  ;;  %v1760_v12 = vld [vmem:[%s10362_s6 + $0x30c0] sm:$0xff]  ;;  %v1762_v13 = vld [vmem:[%s10362_s6 + $0x30c8] sm:$0xff] }
 0x196   : > { %v1764_v14 = vld [vmem:[%s10362_s6 + $0x30e0] sm:$0xff]  ;;  %1761 = vst [vmem:[%s10370_s7 + $0x1860] sm:$0xff] %v1760_v12  ;;  %1763 = vst [vmem:[%s10370_s7 + $0x1868] sm:$0xff] %v1762_v13  ;;  %v1766_v15 = vld [vmem:[%s10362_s6 + $0x30e8] sm:$0xff] }
 0x197   : > { %1765 = vst [vmem:[%s10370_s7 + $0x1870] sm:$0xff] %v1764_v14  ;;  %1767 = vst [vmem:[%s10370_s7 + $0x1878] sm:$0xff] %v1766_v15 }
 0x198 PF: > { %p8152_p5 = scmp.ge.s32.totalorder %s10289_s20, 1  ;;  %p1789_p6 = scmp.lt.s32.totalorder %s10289_s20, 3 }
 0x19a   : > { %p1790_p7 = pnand %p8152_p5, %p1789_p6 }
 0x19b   : > { %s1796_s8 = sand.u32 (!%p1790_p7), 1, %s10281_s18   ;;  %s8153_s9 = sshll.u32 (!%p1790_p7), %s10342_s21, 2 }
 0x19c   : > { %1793 = sbr.rel (%p1790_p7) target bundleno = 1791 (0x6ff), region = 59  ;;  %p1829_p8 = scmp.lt.s32.totalorder (!%p1790_p7), %s8153_s9, 7 }
 0x19d   : > { %s9022_s10 = smul.u32 (!%p1790_p7), 6272, %s1796_s8  ;;  %s8154_s11 = sshll.u32 (!%p1790_p7), %s10342_s21, 6 }
 0x19e   : > { %p1834_p9 = scmp.lt.s32.totalorder (!%p1790_p7), %s8154_s11, 127  ;;  %p8156_p10 = scmp.ne.s32.totalorder (!%p1790_p7), %s10342_s21, 0 }
 0x19f   : > { %s11949_s23 = scalar_lea.vmem (!%p1790_p7), [#allocation3], %s9022_s10 }
 0x1a1   : > { %s13095_s9 = smov (!%p1829_p8, %s8153_s9), 7  ;;  %s13097_s11 = smov (!%p1834_p9, %s8154_s11), 127 }
 0x1a2   : > { %s11942_s14 = scalar_lea.vmem %s13087_s2, %s13095_s9  ;;  %s8155_s15 = sshll.u32 %s13097_s11, 3 }
 0x1a3   : > { %s11947_s20 = scalar_lea.vmem %s13088_s3, %s8155_s15  ;;  %1843 = sbr.rel (%p8156_p10) target bundleno = 426 (0x1aa), region = 67 }
 0x1a8   : > { %vm1844_vm0 = vcmask 50176   ;;  %v10291_v16 = vmov 0.0  }
 0x1a9   : > { %1845 = vst.msk [vmem:[#allocation2] sm:$0x3] %vm1844_vm0, %v10291_v16 }
 0x1aa PF: > { %v9058_v17 = vld [vmem:[%s11949_s23 + $0xe4] ss:$16 sps:$4 sm:$0xff]   ;;  %v9062_v19 = vld [vmem:[%s11949_s23 + $0xe0] ss:$16 sps:$4 sm:$0xff]   ;;  %v2636_v53 = vlaneseq  ;;  %v10292_v54 = vmov 1966171168  }
 0x1ab   : > { %v9060_v18 = vld [vmem:[%s11949_s23 + $0x2e4] ss:$16 sps:$4 sm:$0xff]   ;;  %6769 = vmatprep.subr.bf16.mxu0 %v9058_v17  ;;  %v9063_v20 = vld [vmem:[%s11949_s23 + $0x2e0] ss:$16 sps:$4 sm:$0xff]   ;;  %v2662_v55 = vunpack.c.l.s4 %v10292_v54  ;;  %vm6765_vm1 = vcmask 523264   ;;  %vm8045_vm2 = vcmask 50176  }
 0x1ac   : > { %6810 = vmatprep.subr.bf16.mxu1 %v9060_v18  ;;  %v9064_v21 = vld [vmem:[%s11949_s23 + $0xc4] ss:$16 sps:$4 sm:$0xff]   ;;  %6770 = vmatpush1.bf16.msra.mxu0 %v9062_v19  ;;  %v9068_v23 = vld [vmem:[%s11949_s23 + $0xc0] ss:$16 sps:$4 sm:$0xff]   ;;  %v11991_v59 = vshrl.u32 %v2636_v53, 7  ;;  %p8944_p11 = scmp.ne.s32.totalorder %s10342_s21, 1 }
 0x1ad   : > { %6811 = vmatpush1.bf16.msra.mxu1 %v9063_v20  ;;  %v9066_v22 = vld [vmem:[%s11949_s23 + $0x2c4] ss:$16 sps:$4 sm:$0xff]   ;;  %6771 = vmatprep.subr.bf16.mxu0 %v9064_v21  ;;  %v9069_v24 = vld [vmem:[%s11949_s23 + $0x2c0] ss:$16 sps:$4 sm:$0xff]   ;;  %v2663_v60 = vunpack.c.0.s8 %v2662_v55 }
 0x1ae   : > { %6812 = vmatprep.subr.bf16.mxu1 %v9066_v22  ;;  %v9070_v25 = vld [vmem:[%s11949_s23 + $0xa4] ss:$16 sps:$4 sm:$0xff]   ;;  %v9074_v27 = vld [vmem:[%s11949_s23 + $0xa0] ss:$16 sps:$4 sm:$0xff]  }
 0x1af   : > { %v9072_v26 = vld [vmem:[%s11949_s23 + $0x2a4] ss:$16 sps:$4 sm:$0xff]   ;;  %v9075_v28 = vld [vmem:[%s11949_s23 + $0x2a0] ss:$16 sps:$4 sm:$0xff]   ;;  %v11999_v2 = vsub.s32 %v2663_v60, %v11991_v59 }
 0x1b0   : > { %6772 = vmatpush1.bf16.msra.mxu0 %v9068_v23  ;;  %v9076_v29 = vld [vmem:[%s11949_s23 + $0x84] ss:$16 sps:$4 sm:$0xff]   ;;  %v9080_v31 = vld [vmem:[%s11949_s23 + $0x80] ss:$16 sps:$4 sm:$0xff]  }
 0x1b1   : > { %6813 = vmatpush1.bf16.msra.mxu1 %v9069_v24  ;;  %6773 = vmatprep.subr.bf16.mxu0 %v9070_v25  ;;  %v9078_v30 = vld [vmem:[%s11949_s23 + $0x284] ss:$16 sps:$4 sm:$0xff]   ;;  %v9081_v32 = vld [vmem:[%s11949_s23 + $0x280] ss:$16 sps:$4 sm:$0xff]  }
 0x1b2   : > { %6814 = vmatprep.subr.bf16.mxu1 %v9072_v26  ;;  %v9082_v33 = vld [vmem:[%s11949_s23 + $0x64] ss:$16 sps:$4 sm:$0xff]   ;;  %v9086_v35 = vld [vmem:[%s11949_s23 + $0x60] ss:$16 sps:$4 sm:$0xff]  }
 0x1b3   : > { %v9084_v34 = vld [vmem:[%s11949_s23 + $0x264] ss:$16 sps:$4 sm:$0xff]   ;;  %v9087_v36 = vld [vmem:[%s11949_s23 + $0x260] ss:$16 sps:$4 sm:$0xff]  }
 0x1b4   : > { %6774 = vmatpush1.bf16.msra.mxu0 %v9074_v27  ;;  %v9088_v37 = vld [vmem:[%s11949_s23 + $0x44] ss:$16 sps:$4 sm:$0xff]   ;;  %v9092_v39 = vld [vmem:[%s11949_s23 + $0x40] ss:$16 sps:$4 sm:$0xff]  }
 0x1b5   : > { %6815 = vmatpush1.bf16.msra.mxu1 %v9075_v28  ;;  %6775 = vmatprep.subr.bf16.mxu0 %v9076_v29  ;;  %v9090_v38 = vld [vmem:[%s11949_s23 + $0x244] ss:$16 sps:$4 sm:$0xff]   ;;  %v9093_v40 = vld [vmem:[%s11949_s23 + $0x240] ss:$16 sps:$4 sm:$0xff]  }
 0x1b6   : > { %6816 = vmatprep.subr.bf16.mxu1 %v9078_v30  ;;  %v9094_v41 = vld [vmem:[%s11949_s23 + $0x24] ss:$16 sps:$4 sm:$0xff]   ;;  %v9098_v43 = vld [vmem:[%s11949_s23 + $0x20] ss:$16 sps:$4 sm:$0xff]  }
 0x1b7   : > { %v9096_v42 = vld [vmem:[%s11949_s23 + $0x224] ss:$16 sps:$4 sm:$0xff]   ;;  %v9099_v44 = vld [vmem:[%s11949_s23 + $0x220] ss:$16 sps:$4 sm:$0xff]  }
 0x1b8   : > { %6776 = vmatpush1.bf16.msra.mxu0 %v9080_v31  ;;  %v9100_v45 = vld [vmem:[%s11949_s23 + $0x4] ss:$16 sps:$4 sm:$0xff]   ;;  %v9104_v47 = vld [vmem:[%s11949_s23] ss:$16 sps:$4 sm:$0xff]  }
 0x1b9   : > { %6817 = vmatpush1.bf16.msra.mxu1 %v9081_v32  ;;  %6777 = vmatprep.subr.bf16.mxu0 %v9082_v33  ;;  %v9102_v46 = vld [vmem:[%s11949_s23 + $0x204] ss:$16 sps:$4 sm:$0xff]   ;;  %v9105_v48 = vld [vmem:[%s11949_s23 + $0x200] ss:$16 sps:$4 sm:$0xff]  }
 0x1ba   : > { %6818 = vmatprep.subr.bf16.mxu1 %v9084_v34  ;;  %v9106_v49 = vld [vmem:[%s11949_s23 + $0x1e4] ss:$16 sps:$4 sm:$0xff]   ;;  %v9110_v51 = vld [vmem:[%s11949_s23 + $0x1e0] ss:$16 sps:$4 sm:$0xff]  }
 0x1bb   : > { %v9108_v50 = vld [vmem:[%s11949_s23 + $0x3e4] ss:$16 sps:$4 sm:$0xff]   ;;  %v9111_v52 = vld [vmem:[%s11949_s23 + $0x3e0] ss:$16 sps:$4 sm:$0xff]  }
 0x1bc   : > { %6778 = vmatpush1.bf16.msra.mxu0 %v9086_v35  ;;  %v9112_v56 = vld [vmem:[%s11949_s23 + $0x1c4] ss:$16 sps:$4 sm:$0xff]   ;;  %v9116_v58 = vld [vmem:[%s11949_s23 + $0x1c0] ss:$16 sps:$4 sm:$0xff]  }
 0x1bd   : > { %6819 = vmatpush1.bf16.msra.mxu1 %v9087_v36  ;;  %6779 = vmatprep.subr.bf16.mxu0 %v9088_v37  ;;  %v9114_v57 = vld [vmem:[%s11949_s23 + $0x3c4] ss:$16 sps:$4 sm:$0xff]   ;;  %v9117_v61 = vld [vmem:[%s11949_s23 + $0x3c0] ss:$16 sps:$4 sm:$0xff]  }
 0x1be   : > { %6820 = vmatprep.subr.bf16.mxu1 %v9090_v38  ;;  %v9118_v62 = vld [vmem:[%s11949_s23 + $0x1a4] ss:$16 sps:$4 sm:$0xff]   ;;  %v9122_v0 = vld [vmem:[%s11949_s23 + $0x1a0] ss:$16 sps:$4 sm:$0xff]  }
 0x1bf   : > { %v9120_v63 = vld [vmem:[%s11949_s23 + $0x3a4] ss:$16 sps:$4 sm:$0xff]   ;;  %v9123_v1 = vld [vmem:[%s11949_s23 + $0x3a0] ss:$16 sps:$4 sm:$0xff]  }
 0x1c0   : > { %6780 = vmatpush1.bf16.msra.mxu0 %v9092_v39  ;;  %v9124_v3 = vld [vmem:[%s11949_s23 + $0x184] ss:$16 sps:$4 sm:$0xff]   ;;  %v9128_v6 = vld [vmem:[%s11949_s23 + $0x180] ss:$16 sps:$4 sm:$0xff]  }
 0x1c1   : > { %6821 = vmatpush1.bf16.msra.mxu1 %v9093_v40  ;;  %6781 = vmatprep.subr.bf16.mxu0 %v9094_v41  ;;  %v9126_v4 = vld [vmem:[%s11949_s23 + $0x384] ss:$16 sps:$4 sm:$0xff]   ;;  %v9129_v8 = vld [vmem:[%s11949_s23 + $0x380] ss:$16 sps:$4 sm:$0xff]  }
 0x1c2   : > { %6822 = vmatprep.subr.bf16.mxu1 %v9096_v42  ;;  %v1846_v5 = vld [vmem:[%s13085_s0] sm:$0xff] }
 0x1c3   : > { %v2667_v7 = vrot.slane %v1846_v5, %v11999_v2  ;;  %v9130_v9 = vld [vmem:[%s11949_s23 + $0x164] ss:$16 sps:$4 sm:$0xff]   ;;  %v9134_v12 = vld [vmem:[%s11949_s23 + $0x160] ss:$16 sps:$4 sm:$0xff]   ;;  %v2660_v18 = vcombine.high %v1846_v5, %v1846_v5 }
 0x1c4   : > { %6782 = vmatpush1.bf16.msra.mxu0 %v9098_v43  ;;  %v9132_v10 = vld [vmem:[%s11949_s23 + $0x364] ss:$16 sps:$4 sm:$0xff]   ;;  %v9135_v14 = vld [vmem:[%s11949_s23 + $0x360] ss:$16 sps:$4 sm:$0xff]  }
 0x1c5   : > { %6823 = vmatpush1.bf16.msra.mxu1 %v9099_v44  ;;  %6783 = vmatprep.subr.bf16.mxu0 %v9100_v45  ;;  %v2675_v11 = vcombine.high %v2667_v7, %v2667_v7  ;;  %v9136_v15 = vld [vmem:[%s11949_s23 + $0x144] ss:$16 sps:$4 sm:$0xff]   ;;  %v9140_v19 = vld [vmem:[%s11949_s23 + $0x140] ss:$16 sps:$4 sm:$0xff]   ;;  %v12029_v23 = vrot.slane %v2660_v18, %v11999_v2  ;;  %v12039_v30 = vrot.slane %v2667_v7, %v11999_v2 }
 0x1c6   : > { %6824 = vmatprep.subr.bf16.mxu1 %v9102_v46  ;;  %v9138_v16 = vld [vmem:[%s11949_s23 + $0x344] ss:$16 sps:$4 sm:$0xff]   ;;  %v9141_v20 = vld [vmem:[%s11949_s23 + $0x340] ss:$16 sps:$4 sm:$0xff]  }
 0x1c7   : > { %v12013_v13 = vrot.slane %v2675_v11, %v11999_v2  ;;  %v9142_v21 = vld [vmem:[%s11949_s23 + $0x124] ss:$16 sps:$4 sm:$0xff]   ;;  %v9146_v24 = vld [vmem:[%s11949_s23 + $0x120] ss:$16 sps:$4 sm:$0xff]   ;;  %v2676_v28 = vcombine.high %v12029_v23, %v12029_v23  ;;  %v12049_v35 = vcombine.high %v12039_v30, %v12039_v30 }
 0x1c8   : > { %6784 = vmatpush1.bf16.msra.mxu0 %v9104_v47  ;;  %v9144_v22 = vld [vmem:[%s11949_s23 + $0x324] ss:$16 sps:$4 sm:$0xff]   ;;  %v9147_v25 = vld [vmem:[%s11949_s23 + $0x320] ss:$16 sps:$4 sm:$0xff]  }
 0x1c9   : > { %6825 = vmatpush1.bf16.msra.mxu1 %v9105_v48  ;;  %6785 = vmatprep.subr.bf16.mxu0 %v9106_v49  ;;  %v12020_v17 = vcombine.high %v12013_v13, %v12013_v13  ;;  %v9148_v26 = vld [vmem:[%s11949_s23 + $0x104] ss:$16 sps:$4 sm:$0xff]   ;;  %v9152_v29 = vld [vmem:[%s11949_s23 + $0x100] ss:$16 sps:$4 sm:$0xff]   ;;  %v12045_v34 = vrot.slane %v2676_v28, %v11999_v2 }
 0x1ca   : > { %6826 = vmatprep.subr.bf16.mxu1 %v9108_v50  ;;  %6801 = vmatprep.mubr.bf16.mxu0 %v12013_v13  ;;  %v9150_v27 = vld [vmem:[%s11949_s23 + $0x304] ss:$16 sps:$4 sm:$0xff]   ;;  %v9153_v31 = vld [vmem:[%s11949_s23 + $0x300] ss:$16 sps:$4 sm:$0xff]  }
 0x1cb   : > { %6842 = vmatprep.mubr.bf16.mxu1 %v12020_v17  ;;  %v9156_v32 = vld [vmem:[%s11949_s23 + $0x4e4] ss:$16 sps:$4 sm:$0xff]   ;;  %v9154_v36 = vld [vmem:[%s11949_s23 + $0x4e0] ss:$16 sps:$4 sm:$0xff]   ;;  %v12057_v40 = vcombine.high %v12045_v34, %v12045_v34 }
 0x1cc   : > { %6786 = vmatpush2.bf16.msra.mxu0 %v9110_v51  ;;  %v9159_v33 = vld [vmem:[%s11949_s23 + $0x6e4] ss:$16 sps:$4 sm:$0xff]   ;;  %v9157_v37 = vld [vmem:[%s11949_s23 + $0x6e0] ss:$16 sps:$4 sm:$0xff]  }
 0x1cd   : > { %6827 = vmatpush2.bf16.msra.mxu1 %v9111_v52  ;;  %6787 = vmatprep.subr.bf16.mxu0 %v9112_v56  ;;  %v9162_v38 = vld [vmem:[%s11949_s23 + $0x4c4] ss:$16 sps:$4 sm:$0xff]   ;;  %v9160_v41 = vld [vmem:[%s11949_s23 + $0x4c0] ss:$16 sps:$4 sm:$0xff]  }
 0x1ce   : > { %6828 = vmatprep.subr.bf16.mxu1 %v9114_v57  ;;  %v9165_v39 = vld [vmem:[%s11949_s23 + $0x6c4] ss:$16 sps:$4 sm:$0xff]   ;;  %v9163_v42 = vld [vmem:[%s11949_s23 + $0x6c0] ss:$16 sps:$4 sm:$0xff]  }
 0x1cf   : > { %v9168_v43 = vld [vmem:[%s11949_s23 + $0x4a4] ss:$16 sps:$4 sm:$0xff]   ;;  %v9166_v45 = vld [vmem:[%s11949_s23 + $0x4a0] ss:$16 sps:$4 sm:$0xff]  }
 0x1d0   : > { %6788 = vmatpush2.bf16.msra.mxu0 %v9116_v58  ;;  %v9171_v44 = vld [vmem:[%s11949_s23 + $0x6a4] ss:$16 sps:$4 sm:$0xff]   ;;  %v9169_v46 = vld [vmem:[%s11949_s23 + $0x6a0] ss:$16 sps:$4 sm:$0xff]  }
 0x1d1   : > { %6829 = vmatpush2.bf16.msra.mxu1 %v9117_v61  ;;  %6789 = vmatprep.subr.bf16.mxu0 %v9118_v62  ;;  %v9174_v47 = vld [vmem:[%s11949_s23 + $0x484] ss:$16 sps:$4 sm:$0xff]   ;;  %v9172_v49 = vld [vmem:[%s11949_s23 + $0x480] ss:$16 sps:$4 sm:$0xff]  }
 0x1d2   : > { %6830 = vmatprep.subr.bf16.mxu1 %v9120_v63  ;;  %v9177_v48 = vld [vmem:[%s11949_s23 + $0x684] ss:$16 sps:$4 sm:$0xff]   ;;  %v9175_v50 = vld [vmem:[%s11949_s23 + $0x680] ss:$16 sps:$4 sm:$0xff]  }
 0x1d3   : > { %v9180_v51 = vld [vmem:[%s11949_s23 + $0x464] ss:$16 sps:$4 sm:$0xff]   ;;  %v9178_v53 = vld [vmem:[%s11949_s23 + $0x460] ss:$16 sps:$4 sm:$0xff]  }
 0x1d4   : > { %6790 = vmatpush2.bf16.msra.mxu0 %v9122_v0  ;;  %v9183_v52 = vld [vmem:[%s11949_s23 + $0x664] ss:$16 sps:$4 sm:$0xff]   ;;  %v9181_v54 = vld [vmem:[%s11949_s23 + $0x660] ss:$16 sps:$4 sm:$0xff]  }
 0x1d5   : > { %6831 = vmatpush2.bf16.msra.mxu1 %v9123_v1  ;;  %6791 = vmatprep.subr.bf16.mxu0 %v9124_v3  ;;  %v9186_v55 = vld [vmem:[%s11949_s23 + $0x444] ss:$16 sps:$4 sm:$0xff]   ;;  %v9184_v57 = vld [vmem:[%s11949_s23 + $0x440] ss:$16 sps:$4 sm:$0xff]  }
 0x1d6   : > { %6832 = vmatprep.subr.bf16.mxu1 %v9126_v4  ;;  %v9189_v56 = vld [vmem:[%s11949_s23 + $0x644] ss:$16 sps:$4 sm:$0xff]   ;;  %v9187_v58 = vld [vmem:[%s11949_s23 + $0x640] ss:$16 sps:$4 sm:$0xff]  }
 0x1d7   : > { %v9192_v60 = vld [vmem:[%s11949_s23 + $0x424] ss:$16 sps:$4 sm:$0xff]   ;;  %v9190_v62 = vld [vmem:[%s11949_s23 + $0x420] ss:$16 sps:$4 sm:$0xff]  }
 0x1d8   : > { %6792 = vmatpush2.bf16.msra.mxu0 %v9128_v6  ;;  %v9195_v61 = vld [vmem:[%s11949_s23 + $0x624] ss:$16 sps:$4 sm:$0xff]   ;;  %v9193_v63 = vld [vmem:[%s11949_s23 + $0x620] ss:$16 sps:$4 sm:$0xff]  }
 0x1d9   : > { %6833 = vmatpush2.bf16.msra.mxu1 %v9129_v8  ;;  %6793 = vmatprep.subr.bf16.mxu0 %v9130_v9  ;;  %v9198_v0 = vld [vmem:[%s11949_s23 + $0x404] ss:$16 sps:$4 sm:$0xff]   ;;  %v9196_v3 = vld [vmem:[%s11949_s23 + $0x400] ss:$16 sps:$4 sm:$0xff]  }
 0x1da   : > { %6834 = vmatprep.subr.bf16.mxu1 %v9132_v10  ;;  %v9201_v1 = vld [vmem:[%s11949_s23 + $0x604] ss:$16 sps:$4 sm:$0xff]   ;;  %v9199_v4 = vld [vmem:[%s11949_s23 + $0x600] ss:$16 sps:$4 sm:$0xff]  }
 0x1db   : > { %v9204_v5 = vld [vmem:[%s11949_s23 + $0x5e4] ss:$16 sps:$4 sm:$0xff]   ;;  %v9202_v7 = vld [vmem:[%s11949_s23 + $0x5e0] ss:$16 sps:$4 sm:$0xff]  }
 0x1dc   : > { %6794 = vmatpush2.bf16.msra.mxu0 %v9134_v12  ;;  %v9207_v6 = vld [vmem:[%s11949_s23 + $0x7e4] ss:$16 sps:$4 sm:$0xff]   ;;  %v9205_v8 = vld [vmem:[%s11949_s23 + $0x7e0] ss:$16 sps:$4 sm:$0xff]  }
 0x1dd   : > { %6835 = vmatpush2.bf16.msra.mxu1 %v9135_v14  ;;  %6795 = vmatprep.subr.bf16.mxu0 %v9136_v15  ;;  %v9210_v9 = vld [vmem:[%s11949_s23 + $0x5c4] ss:$16 sps:$4 sm:$0xff]   ;;  %v9208_v11 = vld [vmem:[%s11949_s23 + $0x5c0] ss:$16 sps:$4 sm:$0xff]  }
 0x1de   : > { %6836 = vmatprep.subr.bf16.mxu1 %v9138_v16  ;;  %v9213_v10 = vld [vmem:[%s11949_s23 + $0x7c4] ss:$16 sps:$4 sm:$0xff]   ;;  %v9211_v12 = vld [vmem:[%s11949_s23 + $0x7c0] ss:$16 sps:$4 sm:$0xff]  }
 0x1df   : > { %v9216_v14 = vld [vmem:[%s11949_s23 + $0x5a4] ss:$16 sps:$4 sm:$0xff]   ;;  %v9214_v16 = vld [vmem:[%s11949_s23 + $0x5a0] ss:$16 sps:$4 sm:$0xff]  }
 0x1e0   : > { %6796 = vmatpush2.bf16.msra.mxu0 %v9140_v19  ;;  %v9219_v15 = vld [vmem:[%s11949_s23 + $0x7a4] ss:$16 sps:$4 sm:$0xff]   ;;  %v9217_v18 = vld [vmem:[%s11949_s23 + $0x7a0] ss:$16 sps:$4 sm:$0xff]  }
 0x1e1   : > { %6837 = vmatpush2.bf16.msra.mxu1 %v9141_v20  ;;  %6797 = vmatprep.subr.bf16.mxu0 %v9142_v21  ;;  %v9222_v19 = vld [vmem:[%s11949_s23 + $0x584] ss:$16 sps:$4 sm:$0xff]   ;;  %v9220_v21 = vld [vmem:[%s11949_s23 + $0x580] ss:$16 sps:$4 sm:$0xff]  }
 0x1e2   : > { %6838 = vmatprep.subr.bf16.mxu1 %v9144_v22  ;;  %v9225_v20 = vld [vmem:[%s11949_s23 + $0x784] ss:$16 sps:$4 sm:$0xff]   ;;  %v9223_v22 = vld [vmem:[%s11949_s23 + $0x780] ss:$16 sps:$4 sm:$0xff]  }
 0x1e3   : > { %v9234_v28 = vld [vmem:[%s11949_s23 + $0x544] ss:$16 sps:$4 sm:$0xff]  }
 0x1e4   : > { %6798 = vmatpush2.bf16.msra.mxu0 %v9146_v24  ;;  %v9228_v24 = vld [vmem:[%s11949_s23 + $0x564] ss:$16 sps:$4 sm:$0xff]  }
 0x1e5   : > { %6839 = vmatpush2.bf16.msra.mxu1 %v9147_v25  ;;  %6799 = vmatprep.subr.bf16.mxu0 %v9148_v26  ;;  %v9231_v25 = vld [vmem:[%s11949_s23 + $0x764] ss:$16 sps:$4 sm:$0xff]   ;;  %v9226_v26 = vld [vmem:[%s11949_s23 + $0x560] ss:$16 sps:$4 sm:$0xff]  }
 0x1e6   : > { %6840 = vmatprep.subr.bf16.mxu1 %v9150_v27  ;;  %v9229_v27 = vld [vmem:[%s11949_s23 + $0x760] ss:$16 sps:$4 sm:$0xff]  }
 0x1e8   : > { %6800 = vmatpush2.bf16.msra.mxu0 %v9152_v29  ;;  %v9237_v29 = vld [vmem:[%s11949_s23 + $0x744] ss:$16 sps:$4 sm:$0xff]  }
 0x1e9   : > { %6841 = vmatpush2.bf16.msra.mxu1 %v9153_v31  ;;  %6851 = vmatprep.subr.bf16.mxu0 %v9156_v32  ;;  %v9232_v31 = vld [vmem:[%s11949_s23 + $0x540] ss:$16 sps:$4 sm:$0xff]  }
 0x1ea   : > { %6892 = vmatprep.subr.bf16.mxu1 %v9159_v33  ;;  %v9235_v32 = vld [vmem:[%s11949_s23 + $0x740] ss:$16 sps:$4 sm:$0xff]   ;;  %v9240_v33 = vld [vmem:[%s11949_s23 + $0x524] ss:$16 sps:$4 sm:$0xff]  }
 0x1eb   : > { %6802 = vmatmul.mubr.bf16.vlgmr.msra.gmra.mxu0 %v12039_v30 }
 0x1ec   : > { %6843 = vmatmul.mubr.bf16.vlgmr.msra.gmra.mxu1 %v12049_v35  ;;  %6852 = vmatpush1.bf16.msra.mxu0 %v9154_v36  ;;  %v9243_v36 = vld [vmem:[%s11949_s23 + $0x724] ss:$16 sps:$4 sm:$0xff]  }
 0x1ed   : > { %6893 = vmatpush1.bf16.msra.mxu1 %v9157_v37  ;;  %6853 = vmatprep.subr.bf16.mxu0 %v9162_v38  ;;  %v9238_v37 = vld [vmem:[%s11949_s23 + $0x520] ss:$16 sps:$4 sm:$0xff]  }
 0x1ee   : > { %6894 = vmatprep.subr.bf16.mxu1 %v9165_v39  ;;  %6883 = vmatprep.mubr.bf16.mxu0 %v12045_v34  ;;  %v9241_v38 = vld [vmem:[%s11949_s23 + $0x720] ss:$16 sps:$4 sm:$0xff]   ;;  %v9246_v39 = vld [vmem:[%s11949_s23 + $0x504] ss:$16 sps:$4 sm:$0xff]  }
 0x1ef   : > { %6924 = vmatprep.mubr.bf16.mxu1 %v12057_v40 }
 0x1f0   : > { %6854 = vmatpush1.bf16.msra.mxu0 %v9160_v41  ;;  %v9249_v41 = vld [vmem:[%s11949_s23 + $0x704] ss:$16 sps:$4 sm:$0xff]  }
 0x1f1   : > { %6895 = vmatpush1.bf16.msra.mxu1 %v9163_v42  ;;  %6855 = vmatprep.subr.bf16.mxu0 %v9168_v43  ;;  %v9244_v42 = vld [vmem:[%s11949_s23 + $0x500] ss:$16 sps:$4 sm:$0xff]   ;;  %v12122_v43 = vrot.slane %v12029_v23, %v11999_v2 }
 0x1f2   : > { %6896 = vmatprep.subr.bf16.mxu1 %v9171_v44  ;;  %v9247_v44 = vld [vmem:[%s11949_s23 + $0x700] ss:$16 sps:$4 sm:$0xff]  }
 0x1f3   : > { %v9254_v23 = vld [vmem:[%s11949_s23 + $0xae0] ss:$16 sps:$4 sm:$0xff]  }
 0x1f4   : > { %6856 = vmatpush1.bf16.msra.mxu0 %v9166_v45  ;;  %v9253_v45 = vld [vmem:[%s11949_s23 + $0x8e4] ss:$16 sps:$4 sm:$0xff]  }
 0x1f5   : > { %6897 = vmatpush1.bf16.msra.mxu1 %v9169_v46  ;;  %6857 = vmatprep.subr.bf16.mxu0 %v9174_v47  ;;  %v9256_v46 = vld [vmem:[%s11949_s23 + $0xae4] ss:$16 sps:$4 sm:$0xff]   ;;  %v12129_v47 = vcombine.high %v12122_v43, %v12122_v43 }
 0x1f6   : > { %6898 = vmatprep.subr.bf16.mxu1 %v9177_v48  ;;  %v9251_v48 = vld [vmem:[%s11949_s23 + $0x8e0] ss:$16 sps:$4 sm:$0xff]  }
 0x1f8   : > { %6858 = vmatpush1.bf16.msra.mxu0 %v9172_v49  ;;  %v12136_v49 = vld [vmem:[%s13085_s0 + $0x8] sm:$0xff] }
 0x1f9   : > { %6899 = vmatpush1.bf16.msra.mxu1 %v9175_v50  ;;  %6859 = vmatprep.subr.bf16.mxu0 %v9180_v51  ;;  %v9259_v50 = vld [vmem:[%s11949_s23 + $0x8c4] ss:$16 sps:$4 sm:$0xff]  }
 0x1fa   : > { %6900 = vmatprep.subr.bf16.mxu1 %v9183_v52  ;;  %v9262_v51 = vld [vmem:[%s11949_s23 + $0xac4] ss:$16 sps:$4 sm:$0xff]   ;;  %v12142_v52 = vrot.slane %v12136_v49, %v11999_v2 }
 0x1fc   : > { %6860 = vmatpush1.bf16.msra.mxu0 %v9178_v53  ;;  %v2724_v53 = vcombine.high %v12142_v52, %v12142_v52 }
 0x1fd   : > { %6901 = vmatpush1.bf16.msra.mxu1 %v9181_v54  ;;  %6861 = vmatprep.subr.bf16.mxu0 %v9186_v55  ;;  %v9257_v54 = vld [vmem:[%s11949_s23 + $0x8c0] ss:$16 sps:$4 sm:$0xff]  }
 0x1fe   : > { %6902 = vmatprep.subr.bf16.mxu1 %v9189_v56  ;;  %v9260_v55 = vld [vmem:[%s11949_s23 + $0xac0] ss:$16 sps:$4 sm:$0xff]   ;;  %v9265_v56 = vld [vmem:[%s11949_s23 + $0x8a4] ss:$16 sps:$4 sm:$0xff]  }
 0x200   : > { %6862 = vmatpush1.bf16.msra.mxu0 %v9184_v57  ;;  %v9268_v57 = vld [vmem:[%s11949_s23 + $0xaa4] ss:$16 sps:$4 sm:$0xff]  }
 0x201   : > { %6903 = vmatpush1.bf16.msra.mxu1 %v9187_v58  ;;  %6863 = vmatprep.subr.bf16.mxu0 %v9192_v60  ;;  %v12153_v58 = vrot.slane %v2724_v53, %v11999_v2  ;;  %v9329_v53 = vld [vmem:[%s11949_s23 + $0x940] ss:$16 sps:$4 sm:$0xff]  }
 0x202   : > { %6904 = vmatprep.subr.bf16.mxu1 %v9195_v61  ;;  %v9263_v61 = vld [vmem:[%s11949_s23 + $0x8a0] ss:$16 sps:$4 sm:$0xff]  }
 0x203   : > { %v12158_v60 = vcombine.high %v12153_v58, %v12153_v58 }
 0x204   : > { %6864 = vmatpush1.bf16.msra.mxu0 %v9190_v62  ;;  %v9266_v62 = vld [vmem:[%s11949_s23 + $0xaa0] ss:$16 sps:$4 sm:$0xff]  }
 0x205   : > { %6905 = vmatpush1.bf16.msra.mxu1 %v9193_v63  ;;  %6865 = vmatprep.subr.bf16.mxu0 %v9198_v0  ;;  %v9271_v63 = vld [vmem:[%s11949_s23 + $0x884] ss:$16 sps:$4 sm:$0xff]  }
 0x206   : > { %6906 = vmatprep.subr.bf16.mxu1 %v9201_v1  ;;  %v9274_v0 = vld [vmem:[%s11949_s23 + $0xa84] ss:$16 sps:$4 sm:$0xff]   ;;  %v9269_v1 = vld [vmem:[%s11949_s23 + $0x880] ss:$16 sps:$4 sm:$0xff]  }
 0x208   : > { %6866 = vmatpush1.bf16.msra.mxu0 %v9196_v3  ;;  %v9272_v3 = vld [vmem:[%s11949_s23 + $0xa80] ss:$16 sps:$4 sm:$0xff]  }
 0x209   : > { %6907 = vmatpush1.bf16.msra.mxu1 %v9199_v4  ;;  %6867 = vmatprep.subr.bf16.mxu0 %v9204_v5  ;;  %v9277_v4 = vld [vmem:[%s11949_s23 + $0x864] ss:$16 sps:$4 sm:$0xff]  }
 0x20a   : > { %6908 = vmatprep.subr.bf16.mxu1 %v9207_v6  ;;  %v9280_v5 = vld [vmem:[%s11949_s23 + $0xa64] ss:$16 sps:$4 sm:$0xff]   ;;  %v9275_v6 = vld [vmem:[%s11949_s23 + $0x860] ss:$16 sps:$4 sm:$0xff]  }
 0x20c   : > { %6868 = vmatpush2.bf16.msra.mxu0 %v9202_v7  ;;  %v9278_v7 = vld [vmem:[%s11949_s23 + $0xa60] ss:$16 sps:$4 sm:$0xff]  }
 0x20d   : > { %6909 = vmatpush2.bf16.msra.mxu1 %v9205_v8  ;;  %6869 = vmatprep.subr.bf16.mxu0 %v9210_v9  ;;  %v9283_v8 = vld [vmem:[%s11949_s23 + $0x844] ss:$16 sps:$4 sm:$0xff]  }
 0x20e   : > { %6910 = vmatprep.subr.bf16.mxu1 %v9213_v10  ;;  %v9286_v9 = vld [vmem:[%s11949_s23 + $0xa44] ss:$16 sps:$4 sm:$0xff]   ;;  %v9281_v10 = vld [vmem:[%s11949_s23 + $0x840] ss:$16 sps:$4 sm:$0xff]  }
 0x210   : > { %6870 = vmatpush2.bf16.msra.mxu0 %v9208_v11  ;;  %v9284_v11 = vld [vmem:[%s11949_s23 + $0xa40] ss:$16 sps:$4 sm:$0xff]  }
 0x211   : > { %6911 = vmatpush2.bf16.msra.mxu1 %v9211_v12  ;;  %6871 = vmatprep.subr.bf16.mxu0 %v9216_v14  ;;  %v9289_v12 = vld [vmem:[%s11949_s23 + $0x824] ss:$16 sps:$4 sm:$0xff]  }
 0x212   : > { %6912 = vmatprep.subr.bf16.mxu1 %v9219_v15  ;;  %v9292_v14 = vld [vmem:[%s11949_s23 + $0xa24] ss:$16 sps:$4 sm:$0xff]   ;;  %v9287_v15 = vld [vmem:[%s11949_s23 + $0x820] ss:$16 sps:$4 sm:$0xff]  }
 0x214   : > { %6872 = vmatpush2.bf16.msra.mxu0 %v9214_v16  ;;  %v9290_v16 = vld [vmem:[%s11949_s23 + $0xa20] ss:$16 sps:$4 sm:$0xff]  }
 0x215   : > { %6913 = vmatpush2.bf16.msra.mxu1 %v9217_v18  ;;  %6873 = vmatprep.subr.bf16.mxu0 %v9222_v19  ;;  %v9295_v18 = vld [vmem:[%s11949_s23 + $0x804] ss:$16 sps:$4 sm:$0xff]  }
 0x216   : > { %6914 = vmatprep.subr.bf16.mxu1 %v9225_v20  ;;  %v9298_v19 = vld [vmem:[%s11949_s23 + $0xa04] ss:$16 sps:$4 sm:$0xff]   ;;  %v9293_v20 = vld [vmem:[%s11949_s23 + $0x800] ss:$16 sps:$4 sm:$0xff]  }
 0x218   : > { %6874 = vmatpush2.bf16.msra.mxu0 %v9220_v21  ;;  %v9296_v21 = vld [vmem:[%s11949_s23 + $0xa00] ss:$16 sps:$4 sm:$0xff]  }
 0x219   : > { %6915 = vmatpush2.bf16.msra.mxu1 %v9223_v22  ;;  %6875 = vmatprep.subr.bf16.mxu0 %v9228_v24  ;;  %v9301_v22 = vld [vmem:[%s11949_s23 + $0x9e4] ss:$16 sps:$4 sm:$0xff]  }
 0x21a   : > { %6916 = vmatprep.subr.bf16.mxu1 %v9231_v25  ;;  %v9304_v24 = vld [vmem:[%s11949_s23 + $0xbe4] ss:$16 sps:$4 sm:$0xff]   ;;  %v9299_v25 = vld [vmem:[%s11949_s23 + $0x9e0] ss:$16 sps:$4 sm:$0xff]  }
 0x21c   : > { %6876 = vmatpush2.bf16.msra.mxu0 %v9226_v26  ;;  %v9302_v26 = vld [vmem:[%s11949_s23 + $0xbe0] ss:$16 sps:$4 sm:$0xff]  }
 0x21d   : > { %6917 = vmatpush2.bf16.msra.mxu1 %v9229_v27  ;;  %6877 = vmatprep.subr.bf16.mxu0 %v9234_v28  ;;  %v9307_v27 = vld [vmem:[%s11949_s23 + $0x9c4] ss:$16 sps:$4 sm:$0xff]  }
 0x21e   : > { %6918 = vmatprep.subr.bf16.mxu1 %v9237_v29  ;;  %v9310_v28 = vld [vmem:[%s11949_s23 + $0xbc4] ss:$16 sps:$4 sm:$0xff]   ;;  %v9305_v29 = vld [vmem:[%s11949_s23 + $0x9c0] ss:$16 sps:$4 sm:$0xff]  }
 0x220   : > { %6878 = vmatpush2.bf16.msra.mxu0 %v9232_v31  ;;  %v9308_v31 = vld [vmem:[%s11949_s23 + $0xbc0] ss:$16 sps:$4 sm:$0xff]  }
 0x221   : > { %6919 = vmatpush2.bf16.msra.mxu1 %v9235_v32  ;;  %6879 = vmatprep.subr.bf16.mxu0 %v9240_v33  ;;  %v9313_v32 = vld [vmem:[%s11949_s23 + $0x9a4] ss:$16 sps:$4 sm:$0xff]  }
 0x222   : > { %6920 = vmatprep.subr.bf16.mxu1 %v9243_v36  ;;  %v9316_v33 = vld [vmem:[%s11949_s23 + $0xba4] ss:$16 sps:$4 sm:$0xff]   ;;  %v9311_v36 = vld [vmem:[%s11949_s23 + $0x9a0] ss:$16 sps:$4 sm:$0xff]  }
 0x224   : > { %6880 = vmatpush2.bf16.msra.mxu0 %v9238_v37  ;;  %v9314_v37 = vld [vmem:[%s11949_s23 + $0xba0] ss:$16 sps:$4 sm:$0xff]  }
 0x225   : > { %6921 = vmatpush2.bf16.msra.mxu1 %v9241_v38  ;;  %6881 = vmatprep.subr.bf16.mxu0 %v9246_v39  ;;  %v9319_v38 = vld [vmem:[%s11949_s23 + $0x984] ss:$16 sps:$4 sm:$0xff]  }
 0x226   : > { %6922 = vmatprep.subr.bf16.mxu1 %v9249_v41  ;;  %v9322_v39 = vld [vmem:[%s11949_s23 + $0xb84] ss:$16 sps:$4 sm:$0xff]   ;;  %v9317_v41 = vld [vmem:[%s11949_s23 + $0x980] ss:$16 sps:$4 sm:$0xff]  }
 0x228   : > { %6882 = vmatpush2.bf16.msra.mxu0 %v9244_v42  ;;  %v9320_v42 = vld [vmem:[%s11949_s23 + $0xb80] ss:$16 sps:$4 sm:$0xff]  }
 0x229   : > { %6923 = vmatpush2.bf16.msra.mxu1 %v9247_v44  ;;  %6933 = vmatprep.subr.bf16.mxu0 %v9253_v45  ;;  %v9325_v44 = vld [vmem:[%s11949_s23 + $0x964] ss:$16 sps:$4 sm:$0xff]  }
 0x22a   : > { %6974 = vmatprep.subr.bf16.mxu1 %v9256_v46  ;;  %v9328_v45 = vld [vmem:[%s11949_s23 + $0xb64] ss:$16 sps:$4 sm:$0xff]   ;;  %v9323_v46 = vld [vmem:[%s11949_s23 + $0x960] ss:$16 sps:$4 sm:$0xff]  }
 0x22b   : > { %6884 = vmatmul.mubr.bf16.vlgmr.msra.gmra.mxu0 %v12122_v43 }
 0x22c   : > { %6925 = vmatmul.mubr.bf16.vlgmr.msra.gmra.mxu1 %v12129_v47  ;;  %6934 = vmatpush1.bf16.msra.mxu0 %v9251_v48  ;;  %v9326_v48 = vld [vmem:[%s11949_s23 + $0xb60] ss:$16 sps:$4 sm:$0xff]  }
 0x22d   : > { %6975 = vmatpush1.bf16.msra.mxu1 %v9254_v23  ;;  %6935 = vmatprep.subr.bf16.mxu0 %v9259_v50  ;;  %v9331_v23 = vld [vmem:[%s11949_s23 + $0x944] ss:$16 sps:$4 sm:$0xff]  }
 0x22e   : > { %6976 = vmatprep.subr.bf16.mxu1 %v9262_v51  ;;  %6965 = vmatprep.mubr.bf16.mxu0 %v12153_v58  ;;  %v9334_v50 = vld [vmem:[%s11949_s23 + $0xb44] ss:$16 sps:$4 sm:$0xff]   ;;  %v2709_v51 = vcombine.high %v12136_v49, %v12136_v49  ;;  %v9338_v49 = vld [vmem:[%s11949_s23 + $0xb20] ss:$16 sps:$4 sm:$0xff]  }
 0x22f   : > { %7006 = vmatprep.mubr.bf16.mxu1 %v12158_v60 }
 0x230   : > { %6936 = vmatpush1.bf16.msra.mxu0 %v9257_v54  ;;  %v9332_v54 = vld [vmem:[%s11949_s23 + $0xb40] ss:$16 sps:$4 sm:$0xff]  }
 0x231   : > { %6977 = vmatpush1.bf16.msra.mxu1 %v9260_v55  ;;  %6937 = vmatprep.subr.bf16.mxu0 %v9265_v56  ;;  %v9337_v55 = vld [vmem:[%s11949_s23 + $0x924] ss:$16 sps:$4 sm:$0xff]  }
 0x232   : > { %6978 = vmatprep.subr.bf16.mxu1 %v9268_v57  ;;  %v9340_v56 = vld [vmem:[%s11949_s23 + $0xb24] ss:$16 sps:$4 sm:$0xff]   ;;  %v12212_v57 = vrot.slane %v2709_v51, %v11999_v2  ;;  %v9398_v51 = vld [vmem:[%s11949_s23 + $0xfe0] ss:$16 sps:$4 sm:$0xff]  }
 0x234   : > { %6938 = vmatpush1.bf16.msra.mxu0 %v9263_v61  ;;  %v9335_v61 = vld [vmem:[%s11949_s23 + $0x920] ss:$16 sps:$4 sm:$0xff]  }
 0x235   : > { %6979 = vmatpush1.bf16.msra.mxu1 %v9266_v62  ;;  %6939 = vmatprep.subr.bf16.mxu0 %v9271_v63  ;;  %v9343_v62 = vld [vmem:[%s11949_s23 + $0x904] ss:$16 sps:$4 sm:$0xff]  }
 0x236   : > { %6980 = vmatprep.subr.bf16.mxu1 %v9274_v0  ;;  %v9346_v63 = vld [vmem:[%s11949_s23 + $0xb04] ss:$16 sps:$4 sm:$0xff]   ;;  %v2725_v0 = vcombine.high %v12212_v57, %v12212_v57 }
 0x238   : > { %6940 = vmatpush1.bf16.msra.mxu0 %v9269_v1  ;;  %v9341_v1 = vld [vmem:[%s11949_s23 + $0x900] ss:$16 sps:$4 sm:$0xff]  }
 0x239   : > { %6981 = vmatpush1.bf16.msra.mxu1 %v9272_v3  ;;  %6941 = vmatprep.subr.bf16.mxu0 %v9277_v4  ;;  %v12223_v3 = vrot.slane %v12142_v52, %v11999_v2  ;;  %v9344_v4 = vld [vmem:[%s11949_s23 + $0xb00] ss:$16 sps:$4 sm:$0xff]  }
 0x23a   : > { %6982 = vmatprep.subr.bf16.mxu1 %v9280_v5  ;;  %v9349_v5 = vld [vmem:[%s11949_s23 + $0xce4] ss:$16 sps:$4 sm:$0xff]   ;;  %v9347_v52 = vld [vmem:[%s11949_s23 + $0xce0] ss:$16 sps:$4 sm:$0xff]  }
 0x23c   : > { %6942 = vmatpush1.bf16.msra.mxu0 %v9275_v6  ;;  %v9352_v6 = vld [vmem:[%s11949_s23 + $0xee4] ss:$16 sps:$4 sm:$0xff]  }
 0x23d   : > { %6983 = vmatpush1.bf16.msra.mxu1 %v9278_v7  ;;  %6943 = vmatprep.subr.bf16.mxu0 %v9283_v8  ;;  %v12229_v7 = vrot.slane %v2725_v0, %v11999_v2  ;;  %v12233_v8 = vcombine.high %v12223_v3, %v12223_v3  ;;  %v9415_v0 = vld [vmem:[%s11949_s23 + $0xd84] ss:$16 sps:$4 sm:$0xff]  }
 0x23e   : > { %6984 = vmatprep.subr.bf16.mxu1 %v9286_v9  ;;  %v9350_v9 = vld [vmem:[%s11949_s23 + $0xee0] ss:$16 sps:$4 sm:$0xff]  }
 0x240   : > { %6944 = vmatpush1.bf16.msra.mxu0 %v9281_v10  ;;  %v9355_v10 = vld [vmem:[%s11949_s23 + $0xcc4] ss:$16 sps:$4 sm:$0xff]  }
 0x241   : > { %6985 = vmatpush1.bf16.msra.mxu1 %v9284_v11  ;;  %6945 = vmatprep.subr.bf16.mxu0 %v9289_v12  ;;  %v9358_v11 = vld [vmem:[%s11949_s23 + $0xec4] ss:$16 sps:$4 sm:$0xff]   ;;  %v12241_v12 = vcombine.high %v12229_v7, %v12229_v7 }
 0x242   : > { %6986 = vmatprep.subr.bf16.mxu1 %v9292_v14  ;;  %v9353_v14 = vld [vmem:[%s11949_s23 + $0xcc0] ss:$16 sps:$4 sm:$0xff]  }
 0x244   : > { %6946 = vmatpush1.bf16.msra.mxu0 %v9287_v15  ;;  %v9356_v15 = vld [vmem:[%s11949_s23 + $0xec0] ss:$16 sps:$4 sm:$0xff]  }
 0x245   : > { %6987 = vmatpush1.bf16.msra.mxu1 %v9290_v16  ;;  %6947 = vmatprep.subr.bf16.mxu0 %v9295_v18  ;;  %v9361_v16 = vld [vmem:[%s11949_s23 + $0xca4] ss:$16 sps:$4 sm:$0xff]  }
 0x246   : > { %6988 = vmatprep.subr.bf16.mxu1 %v9298_v19  ;;  %v9364_v18 = vld [vmem:[%s11949_s23 + $0xea4] ss:$16 sps:$4 sm:$0xff]   ;;  %v9359_v19 = vld [vmem:[%s11949_s23 + $0xca0] ss:$16 sps:$4 sm:$0xff]  }
 0x248   : > { %6948 = vmatpush1.bf16.msra.mxu0 %v9293_v20  ;;  %v9362_v20 = vld [vmem:[%s11949_s23 + $0xea0] ss:$16 sps:$4 sm:$0xff]  }
 0x249   : > { %6989 = vmatpush1.bf16.msra.mxu1 %v9296_v21  ;;  %6949 = vmatprep.subr.bf16.mxu0 %v9301_v22  ;;  %v9367_v21 = vld [vmem:[%s11949_s23 + $0xc84] ss:$16 sps:$4 sm:$0xff]  }
 0x24a   : > { %6990 = vmatprep.subr.bf16.mxu1 %v9304_v24  ;;  %v9370_v22 = vld [vmem:[%s11949_s23 + $0xe84] ss:$16 sps:$4 sm:$0xff]   ;;  %v9365_v24 = vld [vmem:[%s11949_s23 + $0xc80] ss:$16 sps:$4 sm:$0xff]  }
 0x24c   : > { %6950 = vmatpush2.bf16.msra.mxu0 %v9299_v25  ;;  %v9368_v25 = vld [vmem:[%s11949_s23 + $0xe80] ss:$16 sps:$4 sm:$0xff]  }
 0x24d   : > { %6991 = vmatpush2.bf16.msra.mxu1 %v9302_v26  ;;  %6951 = vmatprep.subr.bf16.mxu0 %v9307_v27  ;;  %v9373_v26 = vld [vmem:[%s11949_s23 + $0xc64] ss:$16 sps:$4 sm:$0xff]  }
 0x24e   : > { %6992 = vmatprep.subr.bf16.mxu1 %v9310_v28  ;;  %v9376_v27 = vld [vmem:[%s11949_s23 + $0xe64] ss:$16 sps:$4 sm:$0xff]   ;;  %v9371_v28 = vld [vmem:[%s11949_s23 + $0xc60] ss:$16 sps:$4 sm:$0xff]  }
 0x250   : > { %6952 = vmatpush2.bf16.msra.mxu0 %v9305_v29  ;;  %v9374_v29 = vld [vmem:[%s11949_s23 + $0xe60] ss:$16 sps:$4 sm:$0xff]  }
 0x251   : > { %6993 = vmatpush2.bf16.msra.mxu1 %v9308_v31  ;;  %6953 = vmatprep.subr.bf16.mxu0 %v9313_v32  ;;  %v9379_v31 = vld [vmem:[%s11949_s23 + $0xc44] ss:$16 sps:$4 sm:$0xff]  }
 0x252   : > { %6994 = vmatprep.subr.bf16.mxu1 %v9316_v33  ;;  %v9382_v32 = vld [vmem:[%s11949_s23 + $0xe44] ss:$16 sps:$4 sm:$0xff]   ;;  %v9377_v33 = vld [vmem:[%s11949_s23 + $0xc40] ss:$16 sps:$4 sm:$0xff]  }
 0x254   : > { %6954 = vmatpush2.bf16.msra.mxu0 %v9311_v36  ;;  %v9380_v36 = vld [vmem:[%s11949_s23 + $0xe40] ss:$16 sps:$4 sm:$0xff]  }
 0x255   : > { %6995 = vmatpush2.bf16.msra.mxu1 %v9314_v37  ;;  %6955 = vmatprep.subr.bf16.mxu0 %v9319_v38  ;;  %v9385_v37 = vld [vmem:[%s11949_s23 + $0xc24] ss:$16 sps:$4 sm:$0xff]  }
 0x256   : > { %6996 = vmatprep.subr.bf16.mxu1 %v9322_v39  ;;  %v9388_v38 = vld [vmem:[%s11949_s23 + $0xe24] ss:$16 sps:$4 sm:$0xff]   ;;  %v9383_v39 = vld [vmem:[%s11949_s23 + $0xc20] ss:$16 sps:$4 sm:$0xff]  }
 0x258   : > { %6956 = vmatpush2.bf16.msra.mxu0 %v9317_v41  ;;  %v9386_v41 = vld [vmem:[%s11949_s23 + $0xe20] ss:$16 sps:$4 sm:$0xff]  }
 0x259   : > { %6997 = vmatpush2.bf16.msra.mxu1 %v9320_v42  ;;  %6957 = vmatprep.subr.bf16.mxu0 %v9325_v44  ;;  %v9391_v42 = vld [vmem:[%s11949_s23 + $0xc04] ss:$16 sps:$4 sm:$0xff]  }
 0x25a   : > { %6998 = vmatprep.subr.bf16.mxu1 %v9328_v45  ;;  %v9394_v44 = vld [vmem:[%s11949_s23 + $0xe04] ss:$16 sps:$4 sm:$0xff]   ;;  %v9389_v45 = vld [vmem:[%s11949_s23 + $0xc00] ss:$16 sps:$4 sm:$0xff]  }
 0x25c   : > { %6958 = vmatpush2.bf16.msra.mxu0 %v9323_v46  ;;  %v9392_v46 = vld [vmem:[%s11949_s23 + $0xe00] ss:$16 sps:$4 sm:$0xff]  }
 0x25d   : > { %6999 = vmatpush2.bf16.msra.mxu1 %v9326_v48  ;;  %6959 = vmatprep.subr.bf16.mxu0 %v9331_v23  ;;  %v9397_v48 = vld [vmem:[%s11949_s23 + $0xde4] ss:$16 sps:$4 sm:$0xff]  }
 0x25e   : > { %7000 = vmatprep.subr.bf16.mxu1 %v9334_v50  ;;  %v9400_v23 = vld [vmem:[%s11949_s23 + $0xfe4] ss:$16 sps:$4 sm:$0xff]   ;;  %v9395_v50 = vld [vmem:[%s11949_s23 + $0xde0] ss:$16 sps:$4 sm:$0xff]  }
 0x260   : > { %6960 = vmatpush2.bf16.msra.mxu0 %v9329_v53  ;;  %v9403_v53 = vld [vmem:[%s11949_s23 + $0xdc4] ss:$16 sps:$4 sm:$0xff]  }
 0x261   : > { %7001 = vmatpush2.bf16.msra.mxu1 %v9332_v54  ;;  %6961 = vmatprep.subr.bf16.mxu0 %v9337_v55  ;;  %v9406_v54 = vld [vmem:[%s11949_s23 + $0xfc4] ss:$16 sps:$4 sm:$0xff]   ;;  %v9401_v55 = vld [vmem:[%s11949_s23 + $0xdc0] ss:$16 sps:$4 sm:$0xff]  }
 0x262   : > { %7002 = vmatprep.subr.bf16.mxu1 %v9340_v56  ;;  %v9404_v56 = vld [vmem:[%s11949_s23 + $0xfc0] ss:$16 sps:$4 sm:$0xff]  }
 0x264   : > { %6962 = vmatpush2.bf16.msra.mxu0 %v9335_v61  ;;  %v9409_v61 = vld [vmem:[%s11949_s23 + $0xda4] ss:$16 sps:$4 sm:$0xff]  }
 0x265   : > { %7003 = vmatpush2.bf16.msra.mxu1 %v9338_v49  ;;  %6963 = vmatprep.subr.bf16.mxu0 %v9343_v62  ;;  %v9412_v49 = vld [vmem:[%s11949_s23 + $0xfa4] ss:$16 sps:$4 sm:$0xff]   ;;  %v9407_v62 = vld [vmem:[%s11949_s23 + $0xda0] ss:$16 sps:$4 sm:$0xff]  }
 0x266   : > { %7004 = vmatprep.subr.bf16.mxu1 %v9346_v63  ;;  %v9410_v63 = vld [vmem:[%s11949_s23 + $0xfa0] ss:$16 sps:$4 sm:$0xff]  }
 0x268   : > { %6964 = vmatpush2.bf16.msra.mxu0 %v9341_v1  ;;  %v9418_v1 = vld [vmem:[%s11949_s23 + $0xf84] ss:$16 sps:$4 sm:$0xff]  }
 0x269   : > { %7005 = vmatpush2.bf16.msra.mxu1 %v9344_v4  ;;  %7015 = vmatprep.subr.bf16.mxu0 %v9349_v5  ;;  %v9413_v4 = vld [vmem:[%s11949_s23 + $0xd80] ss:$16 sps:$4 sm:$0xff]  }
 0x26a   : > { %7056 = vmatprep.subr.bf16.mxu1 %v9352_v6  ;;  %v9416_v5 = vld [vmem:[%s11949_s23 + $0xf80] ss:$16 sps:$4 sm:$0xff]   ;;  %v9421_v6 = vld [vmem:[%s11949_s23 + $0xd64] ss:$16 sps:$4 sm:$0xff]  }
 0x26b   : > { %6966 = vmatmul.mubr.bf16.vlgmr.msra.gmra.mxu0 %v12223_v3 }
 0x26c   : > { %7007 = vmatmul.mubr.bf16.vlgmr.msra.gmra.mxu1 %v12233_v8  ;;  %7016 = vmatpush1.bf16.msra.mxu0 %v9347_v52  ;;  %v9424_v52 = vld [vmem:[%s11949_s23 + $0xf64] ss:$16 sps:$4 sm:$0xff]  }
 0x26d   : > { %7057 = vmatpush1.bf16.msra.mxu1 %v9350_v9  ;;  %7017 = vmatprep.subr.bf16.mxu0 %v9355_v10  ;;  %v9419_v9 = vld [vmem:[%s11949_s23 + $0xd60] ss:$16 sps:$4 sm:$0xff]  }
 0x26e   : > { %7058 = vmatprep.subr.bf16.mxu1 %v9358_v11  ;;  %7047 = vmatprep.mubr.bf16.mxu0 %v12229_v7  ;;  %v9422_v10 = vld [vmem:[%s11949_s23 + $0xf60] ss:$16 sps:$4 sm:$0xff]   ;;  %v9427_v11 = vld [vmem:[%s11949_s23 + $0xd44] ss:$16 sps:$4 sm:$0xff]  }
 0x26f   : > { %7088 = vmatprep.mubr.bf16.mxu1 %v12241_v12 }
 0x270   : > { %7018 = vmatpush1.bf16.msra.mxu0 %v9353_v14  ;;  %v9430_v14 = vld [vmem:[%s11949_s23 + $0xf44] ss:$16 sps:$4 sm:$0xff]  }
 0x271   : > { %7059 = vmatpush1.bf16.msra.mxu1 %v9356_v15  ;;  %7019 = vmatprep.subr.bf16.mxu0 %v9361_v16  ;;  %v9425_v15 = vld [vmem:[%s11949_s23 + $0xd40] ss:$16 sps:$4 sm:$0xff]  }
 0x272   : > { %7060 = vmatprep.subr.bf16.mxu1 %v9364_v18  ;;  %v9428_v16 = vld [vmem:[%s11949_s23 + $0xf40] ss:$16 sps:$4 sm:$0xff]  }
 0x273   : > { %v12300_v18 = vld [vmem:[%s13085_s0 + $0x10] sm:$0xff] }
 0x274   : > { %7020 = vmatpush1.bf16.msra.mxu0 %v9359_v19  ;;  %v9433_v19 = vld [vmem:[%s11949_s23 + $0xd24] ss:$16 sps:$4 sm:$0xff]  }
 0x275   : > { %7061 = vmatpush1.bf16.msra.mxu1 %v9362_v20  ;;  %7021 = vmatprep.subr.bf16.mxu0 %v9367_v21  ;;  %v9436_v20 = vld [vmem:[%s11949_s23 + $0xf24] ss:$16 sps:$4 sm:$0xff]   ;;  %v12306_v21 = vrot.slane %v12300_v18, %v11999_v2 }
 0x276   : > { %7062 = vmatprep.subr.bf16.mxu1 %v9370_v22  ;;  %v9431_v22 = vld [vmem:[%s11949_s23 + $0xd20] ss:$16 sps:$4 sm:$0xff]  }
 0x278   : > { %7022 = vmatpush1.bf16.msra.mxu0 %v9365_v24  ;;  %v9434_v24 = vld [vmem:[%s11949_s23 + $0xf20] ss:$16 sps:$4 sm:$0xff]  }
 0x279   : > { %7063 = vmatpush1.bf16.msra.mxu1 %v9368_v25  ;;  %7023 = vmatprep.subr.bf16.mxu0 %v9373_v26  ;;  %v9439_v25 = vld [vmem:[%s11949_s23 + $0xd04] ss:$16 sps:$4 sm:$0xff]  }
 0x27a   : > { %7064 = vmatprep.subr.bf16.mxu1 %v9376_v27  ;;  %v9442_v26 = vld [vmem:[%s11949_s23 + $0xf04] ss:$16 sps:$4 sm:$0xff]   ;;  %v9437_v27 = vld [vmem:[%s11949_s23 + $0xd00] ss:$16 sps:$4 sm:$0xff]  }
 0x27c   : > { %7024 = vmatpush1.bf16.msra.mxu0 %v9371_v28  ;;  %v2773_v28 = vcombine.high %v12306_v21, %v12306_v21 }
 0x27d   : > { %7065 = vmatpush1.bf16.msra.mxu1 %v9374_v29  ;;  %7025 = vmatprep.subr.bf16.mxu0 %v9379_v31  ;;  %v9440_v29 = vld [vmem:[%s11949_s23 + $0xf00] ss:$16 sps:$4 sm:$0xff]  }
 0x27e   : > { %7066 = vmatprep.subr.bf16.mxu1 %v9382_v32  ;;  %v2634_v31 = vld [vmem:[%s11942_s14] sm:$0xf]  ;;  %v12319_v32 = vrot.slane %v12212_v57, %v11999_v2 }
 0x27f   : > { %v9444_v57 = vld [vmem:[%s11949_s23 + $0x10e0] ss:$16 sps:$4 sm:$0xff]  }
 0x280   : > { %7026 = vmatpush1.bf16.msra.mxu0 %v9377_v33  ;;  %v2638_v33 = vsub.s32 0, %v11991_v59 }
 0x281   : > { %7067 = vmatpush1.bf16.msra.mxu1 %v9380_v36  ;;  %7027 = vmatprep.subr.bf16.mxu0 %v9385_v37  ;;  %v9446_v36 = vld [vmem:[%s11949_s23 + $0x10e4] ss:$16 sps:$4 sm:$0xff]  }
 0x282   : > { %7068 = vmatprep.subr.bf16.mxu1 %v9388_v38  ;;  %v9449_v37 = vld [vmem:[%s11949_s23 + $0x12e4] ss:$16 sps:$4 sm:$0xff]   ;;  %v2642_v38 = vsub.s32 1, %v11991_v59 }
 0x284   : > { %7028 = vmatpush1.bf16.msra.mxu0 %v9383_v39  ;;  %v12326_v39 = vrot.slane %v2773_v28, %v11999_v2  ;;  %v9477_v28 = vld [vmem:[%s11949_s23 + $0x1240] ss:$16 sps:$4 sm:$0xff]  }
 0x285   : > { %7069 = vmatpush1.bf16.msra.mxu1 %v9386_v41  ;;  %7029 = vmatprep.subr.bf16.mxu0 %v9391_v42  ;;  %v12330_v41 = vcombine.high %v12319_v32, %v12319_v32  ;;  %v9447_v42 = vld [vmem:[%s11949_s23 + $0x12e0] ss:$16 sps:$4 sm:$0xff]  }
 0x286   : > { %7070 = vmatprep.subr.bf16.mxu1 %v9394_v44  ;;  %v2639_v44 = vrot.slane %v2634_v31, %v2638_v33  ;;  %v9480_v33 = vld [vmem:[%s11949_s23 + $0x1020] ss:$16 sps:$4 sm:$0xff]  }
 0x288   : > { %7030 = vmatpush1.bf16.msra.mxu0 %v9389_v45  ;;  %v9452_v45 = vld [vmem:[%s11949_s23 + $0x10c4] ss:$16 sps:$4 sm:$0xff]  }
 0x289   : > { %7071 = vmatpush1.bf16.msra.mxu1 %v9392_v46  ;;  %7031 = vmatprep.subr.bf16.mxu0 %v9397_v48  ;;  %v9455_v46 = vld [vmem:[%s11949_s23 + $0x12c4] ss:$16 sps:$4 sm:$0xff]   ;;  %v2643_v48 = vrot.slane %v2634_v31, %v2642_v38 }
 0x28a   : > { %7072 = vmatprep.subr.bf16.mxu1 %v9400_v23  ;;  %v12338_v23 = vcombine.high %v12326_v39, %v12326_v39  ;;  %v9485_v31 = vld [vmem:[%s11949_s23 + $0x1224] ss:$16 sps:$4 sm:$0xff]  }
 0x28b   : > { %v9491_v38 = vld [vmem:[%s11949_s23 + $0x1204] ss:$16 sps:$4 sm:$0xff]  }
 0x28c   : > { %7032 = vmatpush2.bf16.msra.mxu0 %v9395_v50 }
 0x28d   : > { %7073 = vmatpush2.bf16.msra.mxu1 %v9398_v51  ;;  %7033 = vmatprep.subr.bf16.mxu0 %v9403_v53  ;;  %v9450_v53 = vld [vmem:[%s11949_s23 + $0x10c0] ss:$16 sps:$4 sm:$0xff]  }
 0x28e   : > { %7074 = vmatprep.subr.bf16.mxu1 %v9406_v54  ;;  %v9453_v54 = vld [vmem:[%s11949_s23 + $0x12c0] ss:$16 sps:$4 sm:$0xff]  }
 0x290   : > { %7034 = vmatpush2.bf16.msra.mxu0 %v9401_v55 }
 0x291   : > { %7075 = vmatpush2.bf16.msra.mxu1 %v9404_v56  ;;  %7035 = vmatprep.subr.bf16.mxu0 %v9409_v61 }
 0x292   : > { %7076 = vmatprep.subr.bf16.mxu1 %v9412_v49  ;;  %v9458_v49 = vld [vmem:[%s11949_s23 + $0x10a4] ss:$16 sps:$4 sm:$0xff]  }
 0x294   : > { %7036 = vmatpush2.bf16.msra.mxu0 %v9407_v62  ;;  %v9461_v62 = vld [vmem:[%s11949_s23 + $0x12a4] ss:$16 sps:$4 sm:$0xff]  }
 0x295   : > { %7077 = vmatpush2.bf16.msra.mxu1 %v9410_v63  ;;  %7037 = vmatprep.subr.bf16.mxu0 %v9415_v0 }
 0x296   : > { %7078 = vmatprep.subr.bf16.mxu1 %v9418_v1  ;;  %v9456_v1 = vld [vmem:[%s11949_s23 + $0x10a0] ss:$16 sps:$4 sm:$0xff]  }
 0x298   : > { %7038 = vmatpush2.bf16.msra.mxu0 %v9413_v4  ;;  %v9459_v4 = vld [vmem:[%s11949_s23 + $0x12a0] ss:$16 sps:$4 sm:$0xff]  }
 0x299   : > { %7079 = vmatpush2.bf16.msra.mxu1 %v9416_v5  ;;  %7039 = vmatprep.subr.bf16.mxu0 %v9421_v6 }
 0x29a   : > { %7080 = vmatprep.subr.bf16.mxu1 %v9424_v52 }
 0x29c   : > { %7040 = vmatpush2.bf16.msra.mxu0 %v9419_v9 }
 0x29d   : > { %7081 = vmatpush2.bf16.msra.mxu1 %v9422_v10  ;;  %7041 = vmatprep.subr.bf16.mxu0 %v9427_v11  ;;  %v9464_v11 = vld [vmem:[%s11949_s23 + $0x1084] ss:$16 sps:$4 sm:$0xff]  }
 0x29e   : > { %7082 = vmatprep.subr.bf16.mxu1 %v9430_v14  ;;  %v9467_v14 = vld [vmem:[%s11949_s23 + $0x1284] ss:$16 sps:$4 sm:$0xff]  }
 0x2a0   : > { %7042 = vmatpush2.bf16.msra.mxu0 %v9425_v15  ;;  %v9462_v15 = vld [vmem:[%s11949_s23 + $0x1080] ss:$16 sps:$4 sm:$0xff]  }
 0x2a1   : > { %7083 = vmatpush2.bf16.msra.mxu1 %v9428_v16  ;;  %7043 = vmatprep.subr.bf16.mxu0 %v9433_v19  ;;  %v9465_v16 = vld [vmem:[%s11949_s23 + $0x1280] ss:$16 sps:$4 sm:$0xff]   ;;  %v9470_v19 = vld [vmem:[%s11949_s23 + $0x1064] ss:$16 sps:$4 sm:$0xff]  }
 0x2a2   : > { %7084 = vmatprep.subr.bf16.mxu1 %v9436_v20  ;;  %v9473_v20 = vld [vmem:[%s11949_s23 + $0x1264] ss:$16 sps:$4 sm:$0xff]  }
 0x2a4   : > { %7044 = vmatpush2.bf16.msra.mxu0 %v9431_v22  ;;  %v9468_v22 = vld [vmem:[%s11949_s23 + $0x1060] ss:$16 sps:$4 sm:$0xff]  }
 0x2a5   : > { %7085 = vmatpush2.bf16.msra.mxu1 %v9434_v24  ;;  %7045 = vmatprep.subr.bf16.mxu0 %v9439_v25  ;;  %v9471_v24 = vld [vmem:[%s11949_s23 + $0x1260] ss:$16 sps:$4 sm:$0xff]   ;;  %v9476_v25 = vld [vmem:[%s11949_s23 + $0x1044] ss:$16 sps:$4 sm:$0xff]  }
 0x2a6   : > { %7086 = vmatprep.subr.bf16.mxu1 %v9442_v26  ;;  %v9479_v26 = vld [vmem:[%s11949_s23 + $0x1244] ss:$16 sps:$4 sm:$0xff]  }
 0x2a8   : > { %7046 = vmatpush2.bf16.msra.mxu0 %v9437_v27  ;;  %v9474_v27 = vld [vmem:[%s11949_s23 + $0x1040] ss:$16 sps:$4 sm:$0xff]  }
 0x2a9   : > { %7087 = vmatpush2.bf16.msra.mxu1 %v9440_v29  ;;  %7097 = vmatprep.subr.bf16.mxu0 %v9446_v36  ;;  %v9482_v29 = vld [vmem:[%s11949_s23 + $0x1024] ss:$16 sps:$4 sm:$0xff]   ;;  %v9483_v36 = vld [vmem:[%s11949_s23 + $0x1220] ss:$16 sps:$4 sm:$0xff]  }
 0x2aa   : > { %7138 = vmatprep.subr.bf16.mxu1 %v9449_v37  ;;  %v9488_v37 = vld [vmem:[%s11949_s23 + $0x1004] ss:$16 sps:$4 sm:$0xff]  }
 0x2ab   : > { %v6803_v50 = vpop.f32.mrf.mxu0  ;;  %7048 = vmatmul.mubr.bf16.vlgmr.msra.gmra.mxu0 %v12319_v32 }
 0x2ac   : > { %v6844_v51 = vpop.f32.mrf.mxu1  ;;  %7089 = vmatmul.mubr.bf16.vlgmr.msra.gmra.mxu1 %v12330_v41  ;;  %v6804_v55 = vadd.f32 %v6803_v50, %v2639_v44  ;;  %7098 = vmatpush1.bf16.msra.mxu0 %v9444_v57  ;;  %v9486_v57 = vld [vmem:[%s11949_s23 + $0x1000] ss:$16 sps:$4 sm:$0xff]   ;;  %v9494_v44 = vld [vmem:[%s11949_s23 + $0x11e4] ss:$16 sps:$4 sm:$0xff]  }
 0x2ad   : > { %7139 = vmatpush1.bf16.msra.mxu1 %v9447_v42  ;;  %v6805_v56 = vpop.f32.mrf.mxu0  ;;  %7099 = vmatprep.subr.bf16.mxu0 %v9452_v45  ;;  %v9489_v42 = vld [vmem:[%s11949_s23 + $0x1200] ss:$16 sps:$4 sm:$0xff]   ;;  %v9497_v45 = vld [vmem:[%s11949_s23 + $0x13e4] ss:$16 sps:$4 sm:$0xff]  }
 0x2ae   : > { %v6846_v61 = vpop.f32.mrf.mxu1  ;;  %7140 = vmatprep.subr.bf16.mxu1 %v9455_v46  ;;  %v12346_v63 = vadd.f32 %v6844_v51, %v6804_v55  ;;  %v6806_v0 = vadd.f32 %v6805_v56, %v2643_v48  ;;  %7129 = vmatprep.mubr.bf16.mxu0 %v12326_v39  ;;  %v9492_v46 = vld [vmem:[%s11949_s23 + $0x11e0] ss:$16 sps:$4 sm:$0xff]   ;;  %v9500_v50 = vld [vmem:[%s11949_s23 + $0x11c4] ss:$16 sps:$4 sm:$0xff]  }
 0x2af   : > { %7170 = vmatprep.mubr.bf16.mxu1 %v12338_v23  ;;  %v6807_v5 = vpop.f32.mrf.mxu0  ;;  %v9495_v48 = vld [vmem:[%s11949_s23 + $0x13e0] ss:$16 sps:$4 sm:$0xff]   ;;  %v9503_v51 = vld [vmem:[%s11949_s23 + $0x13c4] ss:$16 sps:$4 sm:$0xff]  }
 0x2b0   : > { %v6848_v6 = vpop.f32.mrf.mxu1  ;;  %v12352_v52 = vadd.f32 %v6846_v61, %v6806_v0  ;;  %7100 = vmatpush1.bf16.msra.mxu0 %v9450_v53  ;;  %v9498_v53 = vld [vmem:[%s11949_s23 + $0x11c0] ss:$16 sps:$4 sm:$0xff]   ;;  %v9506_v55 = vld [vmem:[%s11949_s23 + $0x11a4] ss:$16 sps:$4 sm:$0xff]  }
 0x2b1   : > { %7141 = vmatpush1.bf16.msra.mxu1 %v9453_v54  ;;  %v6808_v9 = vpop.f32.mrf.mxu0  ;;  %7101 = vmatprep.subr.bf16.mxu0 %v9458_v49  ;;  %v9501_v54 = vld [vmem:[%s11949_s23 + $0x13c0] ss:$16 sps:$4 sm:$0xff]   ;;  %v9509_v56 = vld [vmem:[%s11949_s23 + $0x13a4] ss:$16 sps:$4 sm:$0xff]  }
 0x2b2   : > { %v6849_v10 = vpop.f32.mrf.mxu1  ;;  %7142 = vmatprep.subr.bf16.mxu1 %v9461_v62  ;;  %v9504_v61 = vld [vmem:[%s11949_s23 + $0x11a0] ss:$16 sps:$4 sm:$0xff]   ;;  %v9512_v62 = vld [vmem:[%s11949_s23 + $0x1184] ss:$16 sps:$4 sm:$0xff]  }
 0x2b3   : > { %v9507_v49 = vld [vmem:[%s11949_s23 + $0x13a0] ss:$16 sps:$4 sm:$0xff]   ;;  %v9515_v0 = vld [vmem:[%s11949_s23 + $0x1384] ss:$16 sps:$4 sm:$0xff]  }
 0x2b4   : > { %7102 = vmatpush1.bf16.msra.mxu0 %v9456_v1  ;;  %v9510_v1 = vld [vmem:[%s11949_s23 + $0x1180] ss:$16 sps:$4 sm:$0xff]   ;;  %v9518_v5 = vld [vmem:[%s11949_s23 + $0x1164] ss:$16 sps:$4 sm:$0xff]  }
 0x2b5   : > { %7143 = vmatpush1.bf16.msra.mxu1 %v9459_v4  ;;  %7103 = vmatprep.subr.bf16.mxu0 %v9464_v11  ;;  %v9513_v4 = vld [vmem:[%s11949_s23 + $0x1380] ss:$16 sps:$4 sm:$0xff]   ;;  %v9521_v6 = vld [vmem:[%s11949_s23 + $0x1364] ss:$16 sps:$4 sm:$0xff]  }
 0x2b6   : > { %7144 = vmatprep.subr.bf16.mxu1 %v9467_v14  ;;  %v9516_v9 = vld [vmem:[%s11949_s23 + $0x1160] ss:$16 sps:$4 sm:$0xff]   ;;  %v9524_v11 = vld [vmem:[%s11949_s23 + $0x1144] ss:$16 sps:$4 sm:$0xff]  }
 0x2b7   : > { %v9519_v10 = vld [vmem:[%s11949_s23 + $0x1360] ss:$16 sps:$4 sm:$0xff]   ;;  %v9527_v14 = vld [vmem:[%s11949_s23 + $0x1344] ss:$16 sps:$4 sm:$0xff]  }
 0x2b8   : > { %7104 = vmatpush1.bf16.msra.mxu0 %v9462_v15  ;;  %v2758_v15 = vcombine.high %v12300_v18, %v12300_v18  ;;  %v9528_v18 = vld [vmem:[%s11949_s23 + $0x1120] ss:$16 sps:$4 sm:$0xff]  }
 0x2b9   : > { %7145 = vmatpush1.bf16.msra.mxu1 %v9465_v16  ;;  %7105 = vmatprep.subr.bf16.mxu0 %v9470_v19  ;;  %v9522_v16 = vld [vmem:[%s11949_s23 + $0x1140] ss:$16 sps:$4 sm:$0xff]  }
 0x2ba   : > { %7146 = vmatprep.subr.bf16.mxu1 %v9473_v20  ;;  %v9525_v19 = vld [vmem:[%s11949_s23 + $0x1340] ss:$16 sps:$4 sm:$0xff]   ;;  %v9530_v20 = vld [vmem:[%s11949_s23 + $0x1124] ss:$16 sps:$4 sm:$0xff]  }
 0x2bc   : > { %7106 = vmatpush1.bf16.msra.mxu0 %v9468_v22  ;;  %v9533_v22 = vld [vmem:[%s11949_s23 + $0x1324] ss:$16 sps:$4 sm:$0xff]  }
 0x2bd   : > { %7147 = vmatpush1.bf16.msra.mxu1 %v9471_v24  ;;  %7107 = vmatprep.subr.bf16.mxu0 %v9476_v25  ;;  %v12403_v24 = vrot.slane %v2758_v15, %v11999_v2  ;;  %v9531_v25 = vld [vmem:[%s11949_s23 + $0x1320] ss:$16 sps:$4 sm:$0xff]  }
 0x2be   : > { %7148 = vmatprep.subr.bf16.mxu1 %v9479_v26  ;;  %v9536_v26 = vld [vmem:[%s11949_s23 + $0x1104] ss:$16 sps:$4 sm:$0xff]   ;;  %v9561_v15 = vld [vmem:[%s11949_s23 + $0x1680] ss:$16 sps:$4 sm:$0xff]  }
 0x2c0   : > { %7108 = vmatpush1.bf16.msra.mxu0 %v9474_v27  ;;  %v9539_v27 = vld [vmem:[%s11949_s23 + $0x1304] ss:$16 sps:$4 sm:$0xff]  }
 0x2c1   : > { %7149 = vmatpush1.bf16.msra.mxu1 %v9477_v28  ;;  %7109 = vmatprep.subr.bf16.mxu0 %v9482_v29  ;;  %v2774_v28 = vcombine.high %v12403_v24, %v12403_v24  ;;  %v12413_v29 = vrot.slane %v12306_v21, %v11999_v2 }
 0x2c2   : > { %7150 = vmatprep.subr.bf16.mxu1 %v9485_v31  ;;  %v9534_v31 = vld [vmem:[%s11949_s23 + $0x1100] ss:$16 sps:$4 sm:$0xff]  }
 0x2c3   : > { %v12426_v21 = vcombine.high %v12413_v29, %v12413_v29 }
 0x2c4   : > { %7110 = vmatpush1.bf16.msra.mxu0 %v9480_v33  ;;  %v9537_v33 = vld [vmem:[%s11949_s23 + $0x1300] ss:$16 sps:$4 sm:$0xff]  }
 0x2c5   : > { %7151 = vmatpush1.bf16.msra.mxu1 %v9483_v36  ;;  %7111 = vmatprep.subr.bf16.mxu0 %v9488_v37  ;;  %v9542_v36 = vld [vmem:[%s11949_s23 + $0x14e4] ss:$16 sps:$4 sm:$0xff]  }
 0x2c6   : > { %7152 = vmatprep.subr.bf16.mxu1 %v9491_v38  ;;  %v9545_v37 = vld [vmem:[%s11949_s23 + $0x16e4] ss:$16 sps:$4 sm:$0xff]   ;;  %v9540_v38 = vld [vmem:[%s11949_s23 + $0x14e0] ss:$16 sps:$4 sm:$0xff]  }
 0x2c8   : > { %7112 = vmatpush1.bf16.msra.mxu0 %v9486_v57  ;;  %v9543_v57 = vld [vmem:[%s11949_s23 + $0x16e0] ss:$16 sps:$4 sm:$0xff]  }
 0x2c9   : > { %7153 = vmatpush1.bf16.msra.mxu1 %v9489_v42  ;;  %7113 = vmatprep.subr.bf16.mxu0 %v9494_v44  ;;  %v12422_v42 = vrot.slane %v2774_v28, %v11999_v2  ;;  %v9548_v44 = vld [vmem:[%s11949_s23 + $0x14c4] ss:$16 sps:$4 sm:$0xff]  }
 0x2ca   : > { %7154 = vmatprep.subr.bf16.mxu1 %v9497_v45  ;;  %v9551_v45 = vld [vmem:[%s11949_s23 + $0x16c4] ss:$16 sps:$4 sm:$0xff]  }
 0x2cb   : > { %v9578_v28 = vld [vmem:[%s11949_s23 + $0x1424] ss:$16 sps:$4 sm:$0xff]  }
 0x2cc   : > { %7114 = vmatpush2.bf16.msra.mxu0 %v9492_v46  ;;  %v9546_v46 = vld [vmem:[%s11949_s23 + $0x14c0] ss:$16 sps:$4 sm:$0xff]  }
 0x2cd   : > { %7155 = vmatpush2.bf16.msra.mxu1 %v9495_v48  ;;  %7115 = vmatprep.subr.bf16.mxu0 %v9500_v50  ;;  %v9549_v48 = vld [vmem:[%s11949_s23 + $0x16c0] ss:$16 sps:$4 sm:$0xff]   ;;  %v12434_v50 = vcombine.high %v12422_v42, %v12422_v42 }
 0x2ce   : > { %7156 = vmatprep.subr.bf16.mxu1 %v9503_v51 }
 0x2d0   : > { %7116 = vmatpush2.bf16.msra.mxu0 %v9498_v53 }
 0x2d1   : > { %7157 = vmatpush2.bf16.msra.mxu1 %v9501_v54  ;;  %7117 = vmatprep.subr.bf16.mxu0 %v9506_v55 }
 0x2d2   : > { %7158 = vmatprep.subr.bf16.mxu1 %v9509_v56 }
 0x2d4   : > { %7118 = vmatpush2.bf16.msra.mxu0 %v9504_v61  ;;  %v9554_v61 = vld [vmem:[%s11949_s23 + $0x14a4] ss:$16 sps:$4 sm:$0xff]  }
 0x2d5   : > { %7159 = vmatpush2.bf16.msra.mxu1 %v9507_v49  ;;  %7119 = vmatprep.subr.bf16.mxu0 %v9512_v62  ;;  %v9557_v49 = vld [vmem:[%s11949_s23 + $0x16a4] ss:$16 sps:$4 sm:$0xff]  }
 0x2d6   : > { %7160 = vmatprep.subr.bf16.mxu1 %v9515_v0 }
 0x2d8   : > { %7120 = vmatpush2.bf16.msra.mxu0 %v9510_v1  ;;  %v9552_v1 = vld [vmem:[%s11949_s23 + $0x14a0] ss:$16 sps:$4 sm:$0xff]  }
 0x2d9   : > { %7161 = vmatpush2.bf16.msra.mxu1 %v9513_v4  ;;  %7121 = vmatprep.subr.bf16.mxu0 %v9518_v5  ;;  %v9555_v4 = vld [vmem:[%s11949_s23 + $0x16a0] ss:$16 sps:$4 sm:$0xff]  }
 0x2da   : > { %7162 = vmatprep.subr.bf16.mxu1 %v9521_v6 }
 0x2dc   : > { %7122 = vmatpush2.bf16.msra.mxu0 %v9516_v9 }
 0x2dd   : > { %7163 = vmatpush2.bf16.msra.mxu1 %v9519_v10  ;;  %7123 = vmatprep.subr.bf16.mxu0 %v9524_v11  ;;  %v9560_v10 = vld [vmem:[%s11949_s23 + $0x1484] ss:$16 sps:$4 sm:$0xff]  }
 0x2de   : > { %7164 = vmatprep.subr.bf16.mxu1 %v9527_v14  ;;  %v9563_v11 = vld [vmem:[%s11949_s23 + $0x1684] ss:$16 sps:$4 sm:$0xff]   ;;  %v9558_v14 = vld [vmem:[%s11949_s23 + $0x1480] ss:$16 sps:$4 sm:$0xff]  }
 0x2e0   : > { %7124 = vmatpush2.bf16.msra.mxu0 %v9522_v16  ;;  %v9566_v16 = vld [vmem:[%s11949_s23 + $0x1464] ss:$16 sps:$4 sm:$0xff]  }
 0x2e1   : > { %7165 = vmatpush2.bf16.msra.mxu1 %v9525_v19  ;;  %7125 = vmatprep.subr.bf16.mxu0 %v9530_v20  ;;  %v9569_v19 = vld [vmem:[%s11949_s23 + $0x1664] ss:$16 sps:$4 sm:$0xff]   ;;  %v9564_v20 = vld [vmem:[%s11949_s23 + $0x1460] ss:$16 sps:$4 sm:$0xff]  }
 0x2e2   : > { %7166 = vmatprep.subr.bf16.mxu1 %v9533_v22  ;;  %v9567_v22 = vld [vmem:[%s11949_s23 + $0x1660] ss:$16 sps:$4 sm:$0xff]  }
 0x2e4   : > { %7126 = vmatpush2.bf16.msra.mxu0 %v9528_v18  ;;  %v9572_v18 = vld [vmem:[%s11949_s23 + $0x1444] ss:$16 sps:$4 sm:$0xff]  }
 0x2e5   : > { %7167 = vmatpush2.bf16.msra.mxu1 %v9531_v25  ;;  %7127 = vmatprep.subr.bf16.mxu0 %v9536_v26  ;;  %v9575_v25 = vld [vmem:[%s11949_s23 + $0x1644] ss:$16 sps:$4 sm:$0xff]   ;;  %v9570_v26 = vld [vmem:[%s11949_s23 + $0x1440] ss:$16 sps:$4 sm:$0xff]  }
 0x2e6   : > { %7168 = vmatprep.subr.bf16.mxu1 %v9539_v27  ;;  %v9573_v27 = vld [vmem:[%s11949_s23 + $0x1640] ss:$16 sps:$4 sm:$0xff]  }
 0x2e8   : > { %7128 = vmatpush2.bf16.msra.mxu0 %v9534_v31  ;;  %v9581_v31 = vld [vmem:[%s11949_s23 + $0x1624] ss:$16 sps:$4 sm:$0xff]  }
 0x2e9   : > { %7169 = vmatpush2.bf16.msra.mxu1 %v9537_v33  ;;  %7179 = vmatprep.subr.bf16.mxu0 %v9542_v36  ;;  %v9576_v33 = vld [vmem:[%s11949_s23 + $0x1420] ss:$16 sps:$4 sm:$0xff]  }
 0x2ea   : > { %7220 = vmatprep.subr.bf16.mxu1 %v9545_v37  ;;  %v9579_v36 = vld [vmem:[%s11949_s23 + $0x1620] ss:$16 sps:$4 sm:$0xff]   ;;  %v9584_v37 = vld [vmem:[%s11949_s23 + $0x1404] ss:$16 sps:$4 sm:$0xff]  }
 0x2eb   : > { %v6885_v51 = vpop.f32.mrf.mxu0  ;;  %7130 = vmatmul.mubr.bf16.vlgmr.msra.gmra.mxu0 %v12413_v29 }
 0x2ec   : > { %v6926_v53 = vpop.f32.mrf.mxu1  ;;  %7171 = vmatmul.mubr.bf16.vlgmr.msra.gmra.mxu1 %v12426_v21  ;;  %v6886_v54 = vadd.f32 %v6885_v51, %v12346_v63  ;;  %7180 = vmatpush1.bf16.msra.mxu0 %v9540_v38  ;;  %v9587_v38 = vld [vmem:[%s11949_s23 + $0x1604] ss:$16 sps:$4 sm:$0xff]   ;;  %v9591_v51 = vld [vmem:[%s11949_s23 + $0x17e0] ss:$16 sps:$4 sm:$0xff]  }
 0x2ed   : > { %7221 = vmatpush1.bf16.msra.mxu1 %v9543_v57  ;;  %v6887_v55 = vpop.f32.mrf.mxu0  ;;  %7181 = vmatprep.subr.bf16.mxu0 %v9548_v44  ;;  %v9582_v57 = vld [vmem:[%s11949_s23 + $0x1400] ss:$16 sps:$4 sm:$0xff]  }
 0x2ee   : > { %v6928_v56 = vpop.f32.mrf.mxu1  ;;  %7222 = vmatprep.subr.bf16.mxu1 %v9551_v45  ;;  %v12441_v62 = vadd.f32 %v6926_v53, %v6886_v54  ;;  %v6888_v0 = vadd.f32 %v6887_v55, %v12352_v52  ;;  %7211 = vmatprep.mubr.bf16.mxu0 %v12422_v42  ;;  %v9585_v44 = vld [vmem:[%s11949_s23 + $0x1600] ss:$16 sps:$4 sm:$0xff]   ;;  %v9590_v45 = vld [vmem:[%s11949_s23 + $0x15e4] ss:$16 sps:$4 sm:$0xff]  }
 0x2ef   : > { %7252 = vmatprep.mubr.bf16.mxu1 %v12434_v50  ;;  %v6889_v63 = vpop.f32.mrf.mxu0  ;;  %v9596_v53 = vld [vmem:[%s11949_s23 + $0x15c4] ss:$16 sps:$4 sm:$0xff]   ;;  %v9594_v55 = vld [vmem:[%s11949_s23 + $0x15c0] ss:$16 sps:$4 sm:$0xff]  }
 0x2f0   : > { %v6930_v5 = vpop.f32.mrf.mxu1  ;;  %v12448_v6 = vadd.f32 %v6928_v56, %v6888_v0  ;;  %7182 = vmatpush1.bf16.msra.mxu0 %v9546_v46  ;;  %v9593_v46 = vld [vmem:[%s11949_s23 + $0x17e4] ss:$16 sps:$4 sm:$0xff]   ;;  %v9597_v56 = vld [vmem:[%s11949_s23 + $0x17c0] ss:$16 sps:$4 sm:$0xff]  }
 0x2f1   : > { %7223 = vmatpush1.bf16.msra.mxu1 %v9549_v48  ;;  %v6890_v9 = vpop.f32.mrf.mxu0  ;;  %7183 = vmatprep.subr.bf16.mxu0 %v9554_v61  ;;  %v9588_v48 = vld [vmem:[%s11949_s23 + $0x15e0] ss:$16 sps:$4 sm:$0xff]   ;;  %v9599_v54 = vld [vmem:[%s11949_s23 + $0x17c4] ss:$16 sps:$4 sm:$0xff]  }
 0x2f2   : > { %v6931_v52 = vpop.f32.mrf.mxu1  ;;  %7224 = vmatprep.subr.bf16.mxu1 %v9557_v49  ;;  %v9602_v61 = vld [vmem:[%s11949_s23 + $0x15a4] ss:$16 sps:$4 sm:$0xff]   ;;  %v9600_v0 = vld [vmem:[%s11949_s23 + $0x15a0] ss:$16 sps:$4 sm:$0xff]  }
 0x2f3   : > { %v9605_v49 = vld [vmem:[%s11949_s23 + $0x17a4] ss:$16 sps:$4 sm:$0xff]   ;;  %v9606_v5 = vld [vmem:[%s11949_s23 + $0x1580] ss:$16 sps:$4 sm:$0xff]  }
 0x2f4   : > { %7184 = vmatpush1.bf16.msra.mxu0 %v9552_v1  ;;  %v9603_v1 = vld [vmem:[%s11949_s23 + $0x17a0] ss:$16 sps:$4 sm:$0xff]   ;;  %v9611_v63 = vld [vmem:[%s11949_s23 + $0x1784] ss:$16 sps:$4 sm:$0xff]  }
 0x2f5   : > { %7225 = vmatpush1.bf16.msra.mxu1 %v9555_v4  ;;  %7185 = vmatprep.subr.bf16.mxu0 %v9560_v10  ;;  %v9608_v4 = vld [vmem:[%s11949_s23 + $0x1584] ss:$16 sps:$4 sm:$0xff]   ;;  %v9609_v9 = vld [vmem:[%s11949_s23 + $0x1780] ss:$16 sps:$4 sm:$0xff]  }
 0x2f6   : > { %7226 = vmatprep.subr.bf16.mxu1 %v9563_v11  ;;  %v9614_v52 = vld [vmem:[%s11949_s23 + $0x1564] ss:$16 sps:$4 sm:$0xff]   ;;  %v9612_v11 = vld [vmem:[%s11949_s23 + $0x1560] ss:$16 sps:$4 sm:$0xff]  }
 0x2f7   : > { %v9617_v10 = vld [vmem:[%s11949_s23 + $0x1764] ss:$16 sps:$4 sm:$0xff]  }
 0x2f8   : > { %7186 = vmatpush1.bf16.msra.mxu0 %v9558_v14  ;;  %v9615_v14 = vld [vmem:[%s11949_s23 + $0x1760] ss:$16 sps:$4 sm:$0xff]  }
 0x2f9   : > { %7227 = vmatpush1.bf16.msra.mxu1 %v9561_v15  ;;  %7187 = vmatprep.subr.bf16.mxu0 %v9566_v16  ;;  %v9620_v15 = vld [vmem:[%s11949_s23 + $0x1544] ss:$16 sps:$4 sm:$0xff]  }
 0x2fa   : > { %7228 = vmatprep.subr.bf16.mxu1 %v9569_v19  ;;  %v9623_v16 = vld [vmem:[%s11949_s23 + $0x1744] ss:$16 sps:$4 sm:$0xff]   ;;  %v9618_v19 = vld [vmem:[%s11949_s23 + $0x1540] ss:$16 sps:$4 sm:$0xff]  }
 0x2fc   : > { %7188 = vmatpush1.bf16.msra.mxu0 %v9564_v20  ;;  %v9621_v20 = vld [vmem:[%s11949_s23 + $0x1740] ss:$16 sps:$4 sm:$0xff]  }
 0x2fd   : > { %7229 = vmatpush1.bf16.msra.mxu1 %v9567_v22  ;;  %7189 = vmatprep.subr.bf16.mxu0 %v9572_v18  ;;  %v9626_v22 = vld [vmem:[%s11949_s23 + $0x1524] ss:$16 sps:$4 sm:$0xff]  }
 0x2fe   : > { %7230 = vmatprep.subr.bf16.mxu1 %v9575_v25  ;;  %v9629_v18 = vld [vmem:[%s11949_s23 + $0x1724] ss:$16 sps:$4 sm:$0xff]   ;;  %v9624_v25 = vld [vmem:[%s11949_s23 + $0x1520] ss:$16 sps:$4 sm:$0xff]  }
 0x300   : > { %7190 = vmatpush1.bf16.msra.mxu0 %v9570_v26  ;;  %v9627_v26 = vld [vmem:[%s11949_s23 + $0x1720] ss:$16 sps:$4 sm:$0xff]  }
 0x301   : > { %7231 = vmatpush1.bf16.msra.mxu1 %v9573_v27  ;;  %7191 = vmatprep.subr.bf16.mxu0 %v9578_v28  ;;  %v9632_v27 = vld [vmem:[%s11949_s23 + $0x1504] ss:$16 sps:$4 sm:$0xff]  }
 0x302   : > { %7232 = vmatprep.subr.bf16.mxu1 %v9581_v31  ;;  %v9635_v28 = vld [vmem:[%s11949_s23 + $0x1704] ss:$16 sps:$4 sm:$0xff]   ;;  %v12502_v31 = vrot.slane %v12403_v24, %v11999_v2 }
 0x303   : > { %v9645_v24 = vld [vmem:[%s11949_s23 + $0x1844] ss:$16 sps:$4 sm:$0xff]  }
 0x304   : > { %7192 = vmatpush1.bf16.msra.mxu0 %v9576_v33  ;;  %v9630_v33 = vld [vmem:[%s11949_s23 + $0x1500] ss:$16 sps:$4 sm:$0xff]  }
 0x305   : > { %7233 = vmatpush1.bf16.msra.mxu1 %v9579_v36  ;;  %7193 = vmatprep.subr.bf16.mxu0 %v9584_v37  ;;  %v9633_v36 = vld [vmem:[%s11949_s23 + $0x1700] ss:$16 sps:$4 sm:$0xff]   ;;  %v9639_v37 = vld [vmem:[%s11949_s23 + $0x1864] ss:$16 sps:$4 sm:$0xff]  }
 0x306   : > { %7234 = vmatprep.subr.bf16.mxu1 %v9587_v38  ;;  %v9642_v38 = vld [vmem:[%s11949_s23 + $0xec] ss:$16 sps:$4 sm:$0xff]  }
 0x308   : > { %7194 = vmatpush1.bf16.msra.mxu0 %v9582_v57  ;;  %v9637_v57 = vld [vmem:[%s11949_s23 + $0x1860] ss:$16 sps:$4 sm:$0xff]  }
 0x309   : > { %7235 = vmatpush1.bf16.msra.mxu1 %v9585_v44  ;;  %7195 = vmatprep.subr.bf16.mxu0 %v9590_v45  ;;  %v9640_v44 = vld [vmem:[%s11949_s23 + $0xe8] ss:$16 sps:$4 sm:$0xff]   ;;  %v12512_v45 = vcombine.high %v12502_v31, %v12502_v31 }
 0x30a   : > { %7236 = vmatprep.subr.bf16.mxu1 %v9593_v46  ;;  %v9648_v46 = vld [vmem:[%s11949_s23 + $0xcc] ss:$16 sps:$4 sm:$0xff]  }
 0x30c   : > { %7196 = vmatpush2.bf16.msra.mxu0 %v9588_v48  ;;  %v9643_v48 = vld [vmem:[%s11949_s23 + $0x1840] ss:$16 sps:$4 sm:$0xff]  }
 0x30d   : > { %7237 = vmatpush2.bf16.msra.mxu1 %v9591_v51  ;;  %7197 = vmatprep.subr.bf16.mxu0 %v9596_v53  ;;  %v9646_v51 = vld [vmem:[%s11949_s23 + $0xc8] ss:$16 sps:$4 sm:$0xff]  }
 0x30e   : > { %7238 = vmatprep.subr.bf16.mxu1 %v9599_v54 }
 0x310   : > { %7198 = vmatpush2.bf16.msra.mxu0 %v9594_v55 }
 0x311   : > { %7239 = vmatpush2.bf16.msra.mxu1 %v9597_v56  ;;  %7199 = vmatprep.subr.bf16.mxu0 %v9602_v61 }
 0x312   : > { %7240 = vmatprep.subr.bf16.mxu1 %v9605_v49  ;;  %v9651_v49 = vld [vmem:[%s11949_s23 + $0x1824] ss:$16 sps:$4 sm:$0xff]  }
 0x314   : > { %7200 = vmatpush2.bf16.msra.mxu0 %v9600_v0  ;;  %v9654_v0 = vld [vmem:[%s11949_s23 + $0xac] ss:$16 sps:$4 sm:$0xff]  }
 0x315   : > { %7241 = vmatpush2.bf16.msra.mxu1 %v9603_v1  ;;  %7201 = vmatprep.subr.bf16.mxu0 %v9608_v4 }
 0x316   : > { %7242 = vmatprep.subr.bf16.mxu1 %v9611_v63  ;;  %v9649_v63 = vld [vmem:[%s11949_s23 + $0x1820] ss:$16 sps:$4 sm:$0xff]  }
 0x318   : > { %7202 = vmatpush2.bf16.msra.mxu0 %v9606_v5  ;;  %v9652_v5 = vld [vmem:[%s11949_s23 + $0xa8] ss:$16 sps:$4 sm:$0xff]  }
 0x319   : > { %7243 = vmatpush2.bf16.msra.mxu1 %v9609_v9  ;;  %7203 = vmatprep.subr.bf16.mxu0 %v9614_v52  ;;  %v10293_v9 = vmov 0  }
 0x31a   : > { %7244 = vmatprep.subr.bf16.mxu1 %v9617_v10 }
 0x31c   : > { %7204 = vmatpush2.bf16.msra.mxu0 %v9612_v11 }
 0x31d   : > { %7245 = vmatpush2.bf16.msra.mxu1 %v9615_v14  ;;  %7205 = vmatprep.subr.bf16.mxu0 %v9620_v15  ;;  %v9657_v14 = vld [vmem:[%s11949_s23 + $0x1804] ss:$16 sps:$4 sm:$0xff]   ;;  %v9660_v15 = vld [vmem:[%s11949_s23 + $0x8c] ss:$16 sps:$4 sm:$0xff]  }
 0x31e   : > { %7246 = vmatprep.subr.bf16.mxu1 %v9623_v16  ;;  %v9655_v16 = vld [vmem:[%s11949_s23 + $0x1800] ss:$16 sps:$4 sm:$0xff]  }
 0x320   : > { %7206 = vmatpush2.bf16.msra.mxu0 %v9618_v19  ;;  %v9658_v19 = vld [vmem:[%s11949_s23 + $0x88] ss:$16 sps:$4 sm:$0xff]  }
 0x321   : > { %7247 = vmatpush2.bf16.msra.mxu1 %v9621_v20  ;;  %7207 = vmatprep.subr.bf16.mxu0 %v9626_v22  ;;  %v9663_v20 = vld [vmem:[%s11949_s23 + $0x6c] ss:$16 sps:$4 sm:$0xff]  }
 0x322   : > { %7248 = vmatprep.subr.bf16.mxu1 %v9629_v18  ;;  %v9666_v22 = vld [vmem:[%s11949_s23 + $0x2ec] ss:$16 sps:$4 sm:$0xff]   ;;  %v9661_v18 = vld [vmem:[%s11949_s23 + $0x68] ss:$16 sps:$4 sm:$0xff]  }
 0x324   : > { %7208 = vmatpush2.bf16.msra.mxu0 %v9624_v25  ;;  %v9664_v25 = vld [vmem:[%s11949_s23 + $0x2e8] ss:$16 sps:$4 sm:$0xff]  }
 0x325   : > { %7249 = vmatpush2.bf16.msra.mxu1 %v9627_v26  ;;  %7209 = vmatprep.subr.bf16.mxu0 %v9632_v27  ;;  %v9669_v27 = vld [vmem:[%s11949_s23 + $0x4c] ss:$16 sps:$4 sm:$0xff]  }
 0x326   : > { %7250 = vmatprep.subr.bf16.mxu1 %v9635_v28  ;;  %v9672_v28 = vld [vmem:[%s11949_s23 + $0x2cc] ss:$16 sps:$4 sm:$0xff]  }
 0x328   : > { %7210 = vmatpush2.bf16.msra.mxu0 %v9630_v33  ;;  %v9667_v33 = vld [vmem:[%s11949_s23 + $0x48] ss:$16 sps:$4 sm:$0xff]  }
 0x329   : > { %7251 = vmatpush2.bf16.msra.mxu1 %v9633_v36  ;;  %7269 = vmatprep.subr.bf16.mxu0 %v9639_v37  ;;  %v9675_v36 = vld [vmem:[%s11949_s23 + $0x2c] ss:$16 sps:$4 sm:$0xff]  }
 0x32a   : > { %7302 = vmatprep.subr.bf16.mxu1 %v9642_v38  ;;  %v9678_v37 = vld [vmem:[%s11949_s23 + $0x2ac] ss:$16 sps:$4 sm:$0xff]   ;;  %v9673_v38 = vld [vmem:[%s11949_s23 + $0x28] ss:$16 sps:$4 sm:$0xff]  }
 0x32b   : > { %v6967_v53 = vpop.f32.mrf.mxu0  ;;  %7212 = vmatmul.mubr.bf16.vlgmr.msra.gmra.mxu0 %v12502_v31 }
 0x32c   : > { %v7008_v54 = vpop.f32.mrf.mxu1  ;;  %7253 = vmatmul.mubr.bf16.vlgmr.msra.gmra.mxu1 %v12512_v45  ;;  %v6968_v55 = vadd.f32 %v6967_v53, %v12441_v62  ;;  %7270 = vmatpush1.bf16.msra.mxu0 %v9637_v57  ;;  %v9676_v57 = vld [vmem:[%s11949_s23 + $0x2a8] ss:$16 sps:$4 sm:$0xff]  }
 0x32d   : > { %7303 = vmatpush1.bf16.msra.mxu1 %v9640_v44  ;;  %v6969_v56 = vpop.f32.mrf.mxu0  ;;  %7271 = vmatprep.subr.bf16.mxu0 %v9645_v24  ;;  %v9681_v44 = vld [vmem:[%s11949_s23 + $0xc] ss:$16 sps:$4 sm:$0xff]   ;;  %v9685_v53 = vld [vmem:[%s11949_s23 + $0x1e8] ss:$16 sps:$4 sm:$0xff]  }
 0x32e   : > { %v7010_v61 = vpop.f32.mrf.mxu1  ;;  %7304 = vmatprep.subr.bf16.mxu1 %v9648_v46  ;;  %v12523_v1 = vadd.f32 %v7008_v54, %v6968_v55  ;;  %v6970_v4 = vadd.f32 %v6969_v56, %v12448_v6  ;;  %7293 = vmatprep.mubr.bf16.mxu0 %v10293_v9  ;;  %v9684_v24 = vld [vmem:[%s11949_s23 + $0x28c] ss:$16 sps:$4 sm:$0xff]   ;;  %v9679_v46 = vld [vmem:[%s11949_s23 + $0x8] ss:$16 sps:$4 sm:$0xff]  }
 0x32f   : > { %7334 = vmatprep.mubr.bf16.mxu1 %v12013_v13  ;;  %v6971_v62 = vpop.f32.mrf.mxu0  ;;  %v8157_v13 = vld.sshfl [vmem:[%s13085_s0 + $0x18] sm:$0x1 pattern:$0x75316420]  ;;  %v9688_v54 = vld [vmem:[%s11949_s23 + $0x268] ss:$16 sps:$4 sm:$0xff]  }
 0x330   : > { %v7012_v52 = vpop.f32.mrf.mxu1  ;;  %v12530_v10 = vadd.f32 %v7010_v61, %v6970_v4  ;;  %7272 = vmatpush1.bf16.msra.mxu0 %v9643_v48  ;;  %v12544_v26 = vrot.slane %v8157_v13, %v11999_v2  ;;  %v9670_v2 = vld [vmem:[%s11949_s23 + $0x2c8] ss:$16 sps:$4 sm:$0xff]   ;;  %v9693_v55 = vld [vmem:[%s11949_s23 + $0x1cc] ss:$16 sps:$4 sm:$0xff]  }
 0x331   : > { %7305 = vmatpush1.bf16.msra.mxu1 %v9646_v51  ;;  %v6972_v6 = vpop.f32.mrf.mxu0  ;;  %7273 = vmatprep.subr.bf16.mxu0 %v9651_v49  ;;  %v9682_v48 = vld [vmem:[%s11949_s23 + $0x288] ss:$16 sps:$4 sm:$0xff]   ;;  %v9690_v51 = vld [vmem:[%s11949_s23 + $0x26c] ss:$16 sps:$4 sm:$0xff]  }
 0x332   : > { %v7013_v11 = vpop.f32.mrf.mxu1  ;;  %7306 = vmatprep.subr.bf16.mxu1 %v9654_v0  ;;  %v9696_v56 = vld [vmem:[%s11949_s23 + $0x24c] ss:$16 sps:$4 sm:$0xff]   ;;  %v9691_v61 = vld [vmem:[%s11949_s23 + $0x1c8] ss:$16 sps:$4 sm:$0xff]  }
 0x333   : > { %v9694_v49 = vld [vmem:[%s11949_s23 + $0x248] ss:$16 sps:$4 sm:$0xff]   ;;  %v9699_v0 = vld [vmem:[%s11949_s23 + $0x1ac] ss:$16 sps:$4 sm:$0xff]  }
 0x334   : > { %7274 = vmatpush1.bf16.msra.mxu0 %v9649_v63  ;;  %v9702_v4 = vld [vmem:[%s11949_s23 + $0x22c] ss:$16 sps:$4 sm:$0xff]   ;;  %v9697_v63 = vld [vmem:[%s11949_s23 + $0x1a8] ss:$16 sps:$4 sm:$0xff]  }
 0x335   : > { %7307 = vmatpush1.bf16.msra.mxu1 %v9652_v5  ;;  %7275 = vmatprep.subr.bf16.mxu0 %v9657_v14  ;;  %v9700_v5 = vld [vmem:[%s11949_s23 + $0x228] ss:$16 sps:$4 sm:$0xff]   ;;  %v9705_v62 = vld [vmem:[%s11949_s23 + $0x18c] ss:$16 sps:$4 sm:$0xff]  }
 0x336   : > { %7308 = vmatprep.subr.bf16.mxu1 %v9660_v15  ;;  %v9708_v52 = vld [vmem:[%s11949_s23 + $0x20c] ss:$16 sps:$4 sm:$0xff]   ;;  %v9703_v6 = vld [vmem:[%s11949_s23 + $0x188] ss:$16 sps:$4 sm:$0xff]  }
 0x337   : > { %v9706_v11 = vld [vmem:[%s11949_s23 + $0x208] ss:$16 sps:$4 sm:$0xff]   ;;  %v9711_v14 = vld [vmem:[%s11949_s23 + $0x16c] ss:$16 sps:$4 sm:$0xff]  }
 0x338   : > { %7276 = vmatpush1.bf16.msra.mxu0 %v9655_v16  ;;  %v9714_v15 = vld [vmem:[%s11949_s23 + $0x3ec] ss:$16 sps:$4 sm:$0xff]   ;;  %v9709_v16 = vld [vmem:[%s11949_s23 + $0x168] ss:$16 sps:$4 sm:$0xff]  }
 0x339   : > { %7309 = vmatpush1.bf16.msra.mxu1 %v9658_v19  ;;  %7343 = vmatprep.subr.bf16.mxu0 %v9666_v22  ;;  %v9712_v19 = vld [vmem:[%s11949_s23 + $0x3e8] ss:$16 sps:$4 sm:$0xff]   ;;  %v9717_v13 = vld [vmem:[%s11949_s23 + $0x14c] ss:$16 sps:$4 sm:$0xff]  }
 0x33a   : > { %7310 = vmatprep.subr.bf16.mxu1 %v9663_v20  ;;  %v9720_v20 = vld [vmem:[%s11949_s23 + $0x3cc] ss:$16 sps:$4 sm:$0xff]   ;;  %v9715_v22 = vld [vmem:[%s11949_s23 + $0x148] ss:$16 sps:$4 sm:$0xff]  }
 0x33b   : > { %8942 = vmatmul.mubr.msk.bf16.vlgmr.msra.gmra.mxu0 %vm6765_vm1, %v12544_v26 }
 0x33c   : > { %7344 = vmatpush1.bf16.msra.mxu0 %v9664_v25  ;;  %7375 = vmatprep.mubr.bf16.mxu0 %v12020_v17  ;;  %v9687_v17 = vld [vmem:[%s11949_s23 + $0x1ec] ss:$16 sps:$4 sm:$0xff]  }
 0x33d   : > { %7311 = vmatpush1.bf16.msra.mxu1 %v9661_v18  ;;  %7345 = vmatprep.subr.bf16.mxu0 %v9672_v28  ;;  %v9718_v18 = vld [vmem:[%s11949_s23 + $0x3c8] ss:$16 sps:$4 sm:$0xff]   ;;  %v9723_v25 = vld [vmem:[%s11949_s23 + $0x12c] ss:$16 sps:$4 sm:$0xff]  }
 0x33e   : > { %7312 = vmatprep.subr.bf16.mxu1 %v9669_v27  ;;  %v9726_v27 = vld [vmem:[%s11949_s23 + $0x3ac] ss:$16 sps:$4 sm:$0xff]   ;;  %v9721_v28 = vld [vmem:[%s11949_s23 + $0x128] ss:$16 sps:$4 sm:$0xff]  }
 0x340   : > { %7346 = vmatpush1.bf16.msra.mxu0 %v9670_v2  ;;  %v9729_v2 = vld [vmem:[%s11949_s23 + $0x10c] ss:$16 sps:$4 sm:$0xff]  }
 0x341   : > { %7313 = vmatpush1.bf16.msra.mxu1 %v9667_v33  ;;  %7347 = vmatprep.subr.bf16.mxu0 %v9678_v37  ;;  %v9724_v33 = vld [vmem:[%s11949_s23 + $0x3a8] ss:$16 sps:$4 sm:$0xff]  }
 0x342   : > { %7314 = vmatprep.subr.bf16.mxu1 %v9675_v36  ;;  %v9732_v36 = vld [vmem:[%s11949_s23 + $0x38c] ss:$16 sps:$4 sm:$0xff]   ;;  %v9727_v37 = vld [vmem:[%s11949_s23 + $0x108] ss:$16 sps:$4 sm:$0xff]  }
 0x344   : > { %7348 = vmatpush1.bf16.msra.mxu0 %v9676_v57  ;;  %v9735_v57 = vld [vmem:[%s11949_s23 + $0x36c] ss:$16 sps:$4 sm:$0xff]  }
 0x345   : > { %7315 = vmatpush1.bf16.msra.mxu1 %v9673_v38  ;;  %7349 = vmatprep.subr.bf16.mxu0 %v9684_v24  ;;  %v9730_v38 = vld [vmem:[%s11949_s23 + $0x388] ss:$16 sps:$4 sm:$0xff]  }
 0x346   : > { %7316 = vmatprep.subr.bf16.mxu1 %v9681_v44  ;;  %v9738_v44 = vld [vmem:[%s11949_s23 + $0x4ec] ss:$16 sps:$4 sm:$0xff]   ;;  %v9733_v24 = vld [vmem:[%s11949_s23 + $0x368] ss:$16 sps:$4 sm:$0xff]  }
 0x348   : > { %7350 = vmatpush1.bf16.msra.mxu0 %v9682_v48  ;;  %v9741_v48 = vld [vmem:[%s11949_s23 + $0x34c] ss:$16 sps:$4 sm:$0xff]  }
 0x349   : > { %7317 = vmatpush1.bf16.msra.mxu1 %v9679_v46  ;;  %7351 = vmatprep.subr.bf16.mxu0 %v9690_v51  ;;  %v9736_v46 = vld [vmem:[%s11949_s23 + $0x4e8] ss:$16 sps:$4 sm:$0xff]  }
 0x34a   : > { %7318 = vmatprep.subr.bf16.mxu1 %v9687_v17  ;;  %v9744_v17 = vld [vmem:[%s11949_s23 + $0x4cc] ss:$16 sps:$4 sm:$0xff]   ;;  %v9739_v51 = vld [vmem:[%s11949_s23 + $0x348] ss:$16 sps:$4 sm:$0xff]  }
 0x34c   : > { %7352 = vmatpush1.bf16.msra.mxu0 %v9688_v54 }
 0x34d   : > { %7319 = vmatpush2.bf16.msra.mxu1 %v9685_v53  ;;  %7353 = vmatprep.subr.bf16.mxu0 %v9696_v56  ;;  %v9742_v53 = vld [vmem:[%s11949_s23 + $0x4c8] ss:$16 sps:$4 sm:$0xff]  }
 0x34e   : > { %7320 = vmatprep.subr.bf16.mxu1 %v9693_v55 }
 0x350   : > { %7354 = vmatpush1.bf16.msra.mxu0 %v9694_v49 }
 0x351   : > { %7321 = vmatpush2.bf16.msra.mxu1 %v9691_v61  ;;  %7355 = vmatprep.subr.bf16.mxu0 %v9702_v4  ;;  %v9750_v4 = vld [vmem:[%s11949_s23 + $0x4ac] ss:$16 sps:$4 sm:$0xff]  }
 0x352   : > { %7322 = vmatprep.subr.bf16.mxu1 %v9699_v0  ;;  %v9747_v0 = vld [vmem:[%s11949_s23 + $0x32c] ss:$16 sps:$4 sm:$0xff]  }
 0x354   : > { %7356 = vmatpush1.bf16.msra.mxu0 %v9700_v5 }
 0x355   : > { %7323 = vmatpush2.bf16.msra.mxu1 %v9697_v63  ;;  %7357 = vmatprep.subr.bf16.mxu0 %v9708_v52  ;;  %v9748_v52 = vld [vmem:[%s11949_s23 + $0x4a8] ss:$16 sps:$4 sm:$0xff]  }
 0x356   : > { %7324 = vmatprep.subr.bf16.mxu1 %v9705_v62  ;;  %v9745_v62 = vld [vmem:[%s11949_s23 + $0x328] ss:$16 sps:$4 sm:$0xff]  }
 0x358   : > { %7358 = vmatpush1.bf16.msra.mxu0 %v9706_v11 }
 0x359   : > { %7325 = vmatpush2.bf16.msra.mxu1 %v9703_v6  ;;  %7359 = vmatprep.subr.bf16.mxu0 %v9714_v15  ;;  %v9756_v15 = vld [vmem:[%s11949_s23 + $0x48c] ss:$16 sps:$4 sm:$0xff]  }
 0x35a   : > { %7326 = vmatprep.subr.bf16.mxu1 %v9711_v14 }
 0x35c   : > { %7360 = vmatpush2.bf16.msra.mxu0 %v9712_v19  ;;  %v9759_v19 = vld [vmem:[%s11949_s23 + $0x46c] ss:$16 sps:$4 sm:$0xff]  }
 0x35d   : > { %7327 = vmatpush2.bf16.msra.mxu1 %v9709_v16  ;;  %7361 = vmatprep.subr.bf16.mxu0 %v9720_v20  ;;  %v9754_v16 = vld [vmem:[%s11949_s23 + $0x488] ss:$16 sps:$4 sm:$0xff]  }
 0x35e   : > { %7328 = vmatprep.subr.bf16.mxu1 %v9717_v13  ;;  %v9762_v13 = vld [vmem:[%s11949_s23 + $0x6ec] ss:$16 sps:$4 sm:$0xff]   ;;  %v9757_v20 = vld [vmem:[%s11949_s23 + $0x468] ss:$16 sps:$4 sm:$0xff]  }
 0x360   : > { %7362 = vmatpush2.bf16.msra.mxu0 %v9718_v18  ;;  %v9765_v18 = vld [vmem:[%s11949_s23 + $0x44c] ss:$16 sps:$4 sm:$0xff]  }
 0x361   : > { %7329 = vmatpush2.bf16.msra.mxu1 %v9715_v22  ;;  %7363 = vmatprep.subr.bf16.mxu0 %v9726_v27  ;;  %v9760_v22 = vld [vmem:[%s11949_s23 + $0x6e8] ss:$16 sps:$4 sm:$0xff]  }
 0x362   : > { %7330 = vmatprep.subr.bf16.mxu1 %v9723_v25  ;;  %v9768_v25 = vld [vmem:[%s11949_s23 + $0x6cc] ss:$16 sps:$4 sm:$0xff]   ;;  %v9763_v27 = vld [vmem:[%s11949_s23 + $0x448] ss:$16 sps:$4 sm:$0xff]  }
 0x364   : > { %7364 = vmatpush2.bf16.msra.mxu0 %v9724_v33  ;;  %v9771_v33 = vld [vmem:[%s11949_s23 + $0x42c] ss:$16 sps:$4 sm:$0xff]  }
 0x365   : > { %7331 = vmatpush2.bf16.msra.mxu1 %v9721_v28  ;;  %7365 = vmatprep.subr.bf16.mxu0 %v9732_v36  ;;  %v9766_v28 = vld [vmem:[%s11949_s23 + $0x6c8] ss:$16 sps:$4 sm:$0xff]  }
 0x366   : > { %7332 = vmatprep.subr.bf16.mxu1 %v9729_v2  ;;  %v9774_v2 = vld [vmem:[%s11949_s23 + $0x6ac] ss:$16 sps:$4 sm:$0xff]   ;;  %v9769_v36 = vld [vmem:[%s11949_s23 + $0x428] ss:$16 sps:$4 sm:$0xff]  }
 0x368   : > { %7366 = vmatpush2.bf16.msra.mxu0 %v9730_v38  ;;  %v9780_v38 = vld [vmem:[%s11949_s23 + $0x68c] ss:$16 sps:$4 sm:$0xff]  }
 0x369   : > { %7333 = vmatpush2.bf16.msra.mxu1 %v9727_v37  ;;  %7367 = vmatprep.subr.bf16.mxu0 %v9735_v57  ;;  %v9777_v37 = vld [vmem:[%s11949_s23 + $0x40c] ss:$16 sps:$4 sm:$0xff]   ;;  %v9775_v57 = vld [vmem:[%s11949_s23 + $0x408] ss:$16 sps:$4 sm:$0xff]  }
 0x36a   : > { %7384 = vmatprep.subr.bf16.mxu1 %v9738_v44  ;;  %v9778_v44 = vld [vmem:[%s11949_s23 + $0x688] ss:$16 sps:$4 sm:$0xff]  }
 0x36b   : > { %v7049_v54 = vpop.f32.mrf.mxu0 }
 0x36c   : > { %v7090_v55 = vpop.f32.mrf.mxu1  ;;  %7335 = vmatmul.mubr.bf16.vlgmr.msra.gmra.mxu1 %v12039_v30  ;;  %v7050_v56 = vadd.f32 %v7049_v54, %v12523_v1  ;;  %7368 = vmatpush2.bf16.msra.mxu0 %v9733_v24  ;;  %v9786_v24 = vld [vmem:[%s11949_s23 + $0x66c] ss:$16 sps:$4 sm:$0xff]   ;;  %v9790_v54 = vld [vmem:[%s11949_s23 + $0x648] ss:$16 sps:$4 sm:$0xff]  }
 0x36d   : > { %7385 = vmatpush1.bf16.msra.mxu1 %v9736_v46  ;;  %v7051_v61 = vpop.f32.mrf.mxu0  ;;  %7369 = vmatprep.subr.bf16.mxu0 %v9741_v48  ;;  %v9781_v46 = vld [vmem:[%s11949_s23 + $0x5e8] ss:$16 sps:$4 sm:$0xff]  }
 0x36e   : > { %v7092_v49 = vpop.f32.mrf.mxu1  ;;  %7386 = vmatprep.subr.bf16.mxu1 %v9744_v17  ;;  %v12605_v63 = vadd.f32 %v7090_v55, %v7050_v56  ;;  %v7052_v5 = vadd.f32 %v7051_v61, %v12530_v10  ;;  %7416 = vmatprep.mubr.bf16.mxu1 %v12045_v34  ;;  %v9753_v10 = vld [vmem:[%s11949_s23 + $0x30c] ss:$16 sps:$4 sm:$0xff]   ;;  %v9751_v34 = vld [vmem:[%s11949_s23 + $0x308] ss:$16 sps:$4 sm:$0xff]  }
 0x36f   : > { %v7053_v30 = vpop.f32.mrf.mxu0  ;;  %v9784_v48 = vld [vmem:[%s11949_s23 + $0x668] ss:$16 sps:$4 sm:$0xff]   ;;  %v9789_v17 = vld [vmem:[%s11949_s23 + $0x5cc] ss:$16 sps:$4 sm:$0xff]  }
 0x370   : > { %v7094_v1 = vpop.f32.mrf.mxu1  ;;  %v12611_v6 = vadd.f32 %v7092_v49, %v7052_v5  ;;  %7370 = vmatpush2.bf16.msra.mxu0 %v9739_v51  ;;  %v9792_v51 = vld [vmem:[%s11949_s23 + $0x64c] ss:$16 sps:$4 sm:$0xff]   ;;  %v9793_v61 = vld [vmem:[%s11949_s23 + $0x5a8] ss:$16 sps:$4 sm:$0xff]  }
 0x371   : > { %7387 = vmatpush1.bf16.msra.mxu1 %v9742_v53  ;;  %v7054_v11 = vpop.f32.mrf.mxu0  ;;  %7371 = vmatprep.subr.bf16.mxu0 %v9747_v0  ;;  %v9787_v53 = vld [vmem:[%s11949_s23 + $0x5c8] ss:$16 sps:$4 sm:$0xff]   ;;  %v9795_v55 = vld [vmem:[%s11949_s23 + $0x5ac] ss:$16 sps:$4 sm:$0xff]  }
 0x372   : > { %v7095_v14 = vpop.f32.mrf.mxu1  ;;  %7388 = vmatprep.subr.bf16.mxu1 %v9750_v4  ;;  %v9798_v56 = vld [vmem:[%s11949_s23 + $0x62c] ss:$16 sps:$4 sm:$0xff]   ;;  %v9796_v49 = vld [vmem:[%s11949_s23 + $0x628] ss:$16 sps:$4 sm:$0xff]  }
 0x373   : > { %v9801_v0 = vld [vmem:[%s11949_s23 + $0x58c] ss:$16 sps:$4 sm:$0xff]   ;;  %v9799_v5 = vld [vmem:[%s11949_s23 + $0x588] ss:$16 sps:$4 sm:$0xff]  }
 0x374   : > { %7372 = vmatpush2.bf16.msra.mxu0 %v9745_v62  ;;  %v9804_v4 = vld [vmem:[%s11949_s23 + $0x60c] ss:$16 sps:$4 sm:$0xff]   ;;  %v9802_v62 = vld [vmem:[%s11949_s23 + $0x608] ss:$16 sps:$4 sm:$0xff]  }
 0x375   : > { %7389 = vmatpush1.bf16.msra.mxu1 %v9748_v52  ;;  %7373 = vmatprep.subr.bf16.mxu0 %v9753_v10  ;;  %v9807_v52 = vld [vmem:[%s11949_s23 + $0x56c] ss:$16 sps:$4 sm:$0xff]   ;;  %v9805_v1 = vld [vmem:[%s11949_s23 + $0x568] ss:$16 sps:$4 sm:$0xff]  }
 0x376   : > { %7390 = vmatprep.subr.bf16.mxu1 %v9756_v15  ;;  %v9810_v30 = vld [vmem:[%s11949_s23 + $0x7ec] ss:$16 sps:$4 sm:$0xff]   ;;  %v9808_v11 = vld [vmem:[%s11949_s23 + $0x7e8] ss:$16 sps:$4 sm:$0xff]  }
 0x377   : > { %v9813_v14 = vld [vmem:[%s11949_s23 + $0x54c] ss:$16 sps:$4 sm:$0xff]   ;;  %v9811_v15 = vld [vmem:[%s11949_s23 + $0x548] ss:$16 sps:$4 sm:$0xff]  }
 0x378   : > { %7374 = vmatpush2.bf16.msra.mxu0 %v9751_v34  ;;  %v9816_v10 = vld [vmem:[%s11949_s23 + $0x7cc] ss:$16 sps:$4 sm:$0xff]   ;;  %v9814_v34 = vld [vmem:[%s11949_s23 + $0x7c8] ss:$16 sps:$4 sm:$0xff]  }
 0x379   : > { %7391 = vmatpush1.bf16.msra.mxu1 %v9754_v16  ;;  %7425 = vmatprep.subr.bf16.mxu0 %v9762_v13  ;;  %v9819_v16 = vld [vmem:[%s11949_s23 + $0x52c] ss:$16 sps:$4 sm:$0xff]   ;;  %v9817_v13 = vld [vmem:[%s11949_s23 + $0x528] ss:$16 sps:$4 sm:$0xff]  }
 0x37a   : > { %7392 = vmatprep.subr.bf16.mxu1 %v9759_v19  ;;  %v9822_v19 = vld [vmem:[%s11949_s23 + $0x7ac] ss:$16 sps:$4 sm:$0xff]  }
 0x37b   : > { %7376 = vmatmul.mubr.bf16.vlgmr.msra.gmra.mxu0 %v12049_v35  ;;  %v9772_v35 = vld [vmem:[%s11949_s23 + $0x6a8] ss:$16 sps:$4 sm:$0xff]  }
 0x37c   : > { %7426 = vmatpush1.bf16.msra.mxu0 %v9760_v22  ;;  %7457 = vmatprep.mubr.bf16.mxu0 %v12057_v40  ;;  %v9783_v40 = vld [vmem:[%s11949_s23 + $0x5ec] ss:$16 sps:$4 sm:$0xff]  }
 0x37d   : > { %7393 = vmatpush1.bf16.msra.mxu1 %v9757_v20  ;;  %7427 = vmatprep.subr.bf16.mxu0 %v9768_v25  ;;  %v9820_v20 = vld [vmem:[%s11949_s23 + $0x7a8] ss:$16 sps:$4 sm:$0xff]   ;;  %v9825_v22 = vld [vmem:[%s11949_s23 + $0x50c] ss:$16 sps:$4 sm:$0xff]  }
 0x37e   : > { %7394 = vmatprep.subr.bf16.mxu1 %v9765_v18  ;;  %v9828_v18 = vld [vmem:[%s11949_s23 + $0x78c] ss:$16 sps:$4 sm:$0xff]   ;;  %v9823_v25 = vld [vmem:[%s11949_s23 + $0x508] ss:$16 sps:$4 sm:$0xff]  }
 0x380   : > { %7428 = vmatpush1.bf16.msra.mxu0 %v9766_v28  ;;  %v9831_v28 = vld [vmem:[%s11949_s23 + $0x76c] ss:$16 sps:$4 sm:$0xff]  }
 0x381   : > { %7395 = vmatpush1.bf16.msra.mxu1 %v9763_v27  ;;  %7429 = vmatprep.subr.bf16.mxu0 %v9774_v2  ;;  %v9826_v27 = vld [vmem:[%s11949_s23 + $0x788] ss:$16 sps:$4 sm:$0xff]  }
 0x382   : > { %7396 = vmatprep.subr.bf16.mxu1 %v9771_v33  ;;  %v9834_v33 = vld [vmem:[%s11949_s23 + $0x8ec] ss:$16 sps:$4 sm:$0xff]   ;;  %v9829_v2 = vld [vmem:[%s11949_s23 + $0x768] ss:$16 sps:$4 sm:$0xff]  }
 0x384   : > { %7430 = vmatpush1.bf16.msra.mxu0 %v9772_v35  ;;  %v9837_v35 = vld [vmem:[%s11949_s23 + $0x74c] ss:$16 sps:$4 sm:$0xff]  }
 0x385   : > { %7397 = vmatpush1.bf16.msra.mxu1 %v9769_v36  ;;  %7431 = vmatprep.subr.bf16.mxu0 %v9780_v38  ;;  %v9832_v36 = vld [vmem:[%s11949_s23 + $0x8e8] ss:$16 sps:$4 sm:$0xff]  }
 0x386   : > { %7398 = vmatprep.subr.bf16.mxu1 %v9777_v37  ;;  %v9840_v37 = vld [vmem:[%s11949_s23 + $0x8cc] ss:$16 sps:$4 sm:$0xff]  }
 0x388   : > { %7432 = vmatpush1.bf16.msra.mxu0 %v9778_v44 }
 0x389   : > { %7399 = vmatpush1.bf16.msra.mxu1 %v9775_v57  ;;  %7433 = vmatprep.subr.bf16.mxu0 %v9786_v24  ;;  %v9838_v24 = vld [vmem:[%s11949_s23 + $0x8c8] ss:$16 sps:$4 sm:$0xff]  }
 0x38a   : > { %7400 = vmatprep.subr.bf16.mxu1 %v9783_v40  ;;  %v9835_v40 = vld [vmem:[%s11949_s23 + $0x748] ss:$16 sps:$4 sm:$0xff]  }
 0x38c   : > { %7434 = vmatpush1.bf16.msra.mxu0 %v9784_v48 }
 0x38d   : > { %7401 = vmatpush2.bf16.msra.mxu1 %v9781_v46  ;;  %7435 = vmatprep.subr.bf16.mxu0 %v9792_v51  ;;  %v9846_v51 = vld [vmem:[%s11949_s23 + $0x8ac] ss:$16 sps:$4 sm:$0xff]  }
 0x38e   : > { %7402 = vmatprep.subr.bf16.mxu1 %v9789_v17  ;;  %v9843_v17 = vld [vmem:[%s11949_s23 + $0x72c] ss:$16 sps:$4 sm:$0xff]  }
 0x390   : > { %7436 = vmatpush1.bf16.msra.mxu0 %v9790_v54 }
 0x391   : > { %7403 = vmatpush2.bf16.msra.mxu1 %v9787_v53  ;;  %7437 = vmatprep.subr.bf16.mxu0 %v9798_v56  ;;  %v9841_v56 = vld [vmem:[%s11949_s23 + $0x728] ss:$16 sps:$4 sm:$0xff]  }
 0x392   : > { %7404 = vmatprep.subr.bf16.mxu1 %v9795_v55 }
 0x394   : > { %7438 = vmatpush1.bf16.msra.mxu0 %v9796_v49 }
 0x395   : > { %7405 = vmatpush2.bf16.msra.mxu1 %v9793_v61  ;;  %7439 = vmatprep.subr.bf16.mxu0 %v9804_v4  ;;  %v9844_v61 = vld [vmem:[%s11949_s23 + $0x8a8] ss:$16 sps:$4 sm:$0xff]  }
 0x396   : > { %7406 = vmatprep.subr.bf16.mxu1 %v9801_v0  ;;  %v9847_v4 = vld [vmem:[%s11949_s23 + $0x708] ss:$16 sps:$4 sm:$0xff]  }
 0x398   : > { %7440 = vmatpush1.bf16.msra.mxu0 %v9802_v62  ;;  %v9855_v62 = vld [vmem:[%s11949_s23 + $0x86c] ss:$16 sps:$4 sm:$0xff]  }
 0x399   : > { %7407 = vmatpush2.bf16.msra.mxu1 %v9799_v5  ;;  %7441 = vmatprep.subr.bf16.mxu0 %v9810_v30  ;;  %v9850_v5 = vld [vmem:[%s11949_s23 + $0x888] ss:$16 sps:$4 sm:$0xff]  }
 0x39a   : > { %7408 = vmatprep.subr.bf16.mxu1 %v9807_v52  ;;  %v9858_v52 = vld [vmem:[%s11949_s23 + $0xaec] ss:$16 sps:$4 sm:$0xff]   ;;  %v9853_v30 = vld [vmem:[%s11949_s23 + $0x868] ss:$16 sps:$4 sm:$0xff]  }
 0x39c   : > { %7442 = vmatpush2.bf16.msra.mxu0 %v9808_v11  ;;  %v9861_v11 = vld [vmem:[%s11949_s23 + $0x84c] ss:$16 sps:$4 sm:$0xff]  }
 0x39d   : > { %7409 = vmatpush2.bf16.msra.mxu1 %v9805_v1  ;;  %7443 = vmatprep.subr.bf16.mxu0 %v9816_v10  ;;  %v9856_v1 = vld [vmem:[%s11949_s23 + $0xae8] ss:$16 sps:$4 sm:$0xff]  }
 0x39e   : > { %7410 = vmatprep.subr.bf16.mxu1 %v9813_v14  ;;  %v9864_v14 = vld [vmem:[%s11949_s23 + $0xacc] ss:$16 sps:$4 sm:$0xff]   ;;  %v9859_v10 = vld [vmem:[%s11949_s23 + $0x848] ss:$16 sps:$4 sm:$0xff]  }
 0x3a0   : > { %7444 = vmatpush2.bf16.msra.mxu0 %v9814_v34  ;;  %v9867_v34 = vld [vmem:[%s11949_s23 + $0x82c] ss:$16 sps:$4 sm:$0xff]  }
 0x3a1   : > { %7411 = vmatpush2.bf16.msra.mxu1 %v9811_v15  ;;  %7445 = vmatprep.subr.bf16.mxu0 %v9822_v19  ;;  %v9862_v15 = vld [vmem:[%s11949_s23 + $0xac8] ss:$16 sps:$4 sm:$0xff]  }
 0x3a2   : > { %7412 = vmatprep.subr.bf16.mxu1 %v9819_v16  ;;  %v9870_v16 = vld [vmem:[%s11949_s23 + $0xaac] ss:$16 sps:$4 sm:$0xff]   ;;  %v9865_v19 = vld [vmem:[%s11949_s23 + $0x828] ss:$16 sps:$4 sm:$0xff]  }
 0x3a4   : > { %7446 = vmatpush2.bf16.msra.mxu0 %v9820_v20  ;;  %v9876_v20 = vld [vmem:[%s11949_s23 + $0xa8c] ss:$16 sps:$4 sm:$0xff]  }
 0x3a5   : > { %7413 = vmatpush2.bf16.msra.mxu1 %v9817_v13  ;;  %7447 = vmatprep.subr.bf16.mxu0 %v9828_v18  ;;  %v9873_v13 = vld [vmem:[%s11949_s23 + $0x80c] ss:$16 sps:$4 sm:$0xff]   ;;  %v9874_v18 = vld [vmem:[%s11949_s23 + $0xa88] ss:$16 sps:$4 sm:$0xff]  }
 0x3a6   : > { %7414 = vmatprep.subr.bf16.mxu1 %v9825_v22  ;;  %v9871_v22 = vld [vmem:[%s11949_s23 + $0x808] ss:$16 sps:$4 sm:$0xff]  }
 0x3a8   : > { %7448 = vmatpush2.bf16.msra.mxu0 %v9826_v27  ;;  %v9877_v27 = vld [vmem:[%s11949_s23 + $0x9e8] ss:$16 sps:$4 sm:$0xff]  }
 0x3a9   : > { %7415 = vmatpush2.bf16.msra.mxu1 %v9823_v25  ;;  %7449 = vmatprep.subr.bf16.mxu0 %v9831_v28  ;;  %v9882_v25 = vld [vmem:[%s11949_s23 + $0xa6c] ss:$16 sps:$4 sm:$0xff]   ;;  %v9880_v28 = vld [vmem:[%s11949_s23 + $0xa68] ss:$16 sps:$4 sm:$0xff]  }
 0x3aa   : > { %7466 = vmatprep.subr.bf16.mxu1 %v9834_v33  ;;  %v9885_v33 = vld [vmem:[%s11949_s23 + $0x9cc] ss:$16 sps:$4 sm:$0xff]  }
 0x3ab   : > { %v7131_v38 = vpop.f32.mrf.mxu0 }
 0x3ac   : > { %v7172_v57 = vpop.f32.mrf.mxu1  ;;  %7417 = vmatmul.mubr.bf16.vlgmr.msra.gmra.mxu1 %v12122_v43  ;;  %v7132_v44 = vadd.f32 %v7131_v38, %v12605_v63  ;;  %7450 = vmatpush2.bf16.msra.mxu0 %v9829_v2  ;;  %v9888_v2 = vld [vmem:[%s11949_s23 + $0xa4c] ss:$16 sps:$4 sm:$0xff]  }
 0x3ad   : > { %7467 = vmatpush1.bf16.msra.mxu1 %v9832_v36  ;;  %v7133_v46 = vpop.f32.mrf.mxu0  ;;  %7451 = vmatprep.subr.bf16.mxu0 %v9837_v35  ;;  %v9883_v36 = vld [vmem:[%s11949_s23 + $0x9c8] ss:$16 sps:$4 sm:$0xff]   ;;  %v9894_v38 = vld [vmem:[%s11949_s23 + $0xa2c] ss:$16 sps:$4 sm:$0xff]  }
 0x3ae   : > { %v7174_v48 = vpop.f32.mrf.mxu1  ;;  %7468 = vmatprep.subr.bf16.mxu1 %v9840_v37  ;;  %v12679_v53 = vadd.f32 %v7172_v57, %v7132_v44  ;;  %v7134_v43 = vadd.f32 %v7133_v46, %v12611_v6  ;;  %7498 = vmatprep.mubr.bf16.mxu1 %v12153_v58  ;;  %v9849_v6 = vld [vmem:[%s11949_s23 + $0x70c] ss:$16 sps:$4 sm:$0xff]   ;;  %v9886_v35 = vld [vmem:[%s11949_s23 + $0xa48] ss:$16 sps:$4 sm:$0xff]  }
 0x3af   : > { %v7135_v63 = vpop.f32.mrf.mxu0  ;;  %v9852_v58 = vld [vmem:[%s11949_s23 + $0x88c] ss:$16 sps:$4 sm:$0xff]   ;;  %v9889_v57 = vld [vmem:[%s11949_s23 + $0x9a8] ss:$16 sps:$4 sm:$0xff]  }
 0x3b0   : > { %v7176_v54 = vpop.f32.mrf.mxu1  ;;  %v12683_v55 = vadd.f32 %v7174_v48, %v7134_v43  ;;  %7452 = vmatpush2.bf16.msra.mxu0 %v9835_v40  ;;  %v9891_v37 = vld [vmem:[%s11949_s23 + $0x9ac] ss:$16 sps:$4 sm:$0xff]   ;;  %v9892_v44 = vld [vmem:[%s11949_s23 + $0xa28] ss:$16 sps:$4 sm:$0xff]  }
 0x3b1   : > { %7469 = vmatpush1.bf16.msra.mxu1 %v9838_v24  ;;  %v7136_v49 = vpop.f32.mrf.mxu0  ;;  %7453 = vmatprep.subr.bf16.mxu0 %v9843_v17  ;;  %v9897_v40 = vld [vmem:[%s11949_s23 + $0x98c] ss:$16 sps:$4 sm:$0xff]   ;;  %v9895_v46 = vld [vmem:[%s11949_s23 + $0x988] ss:$16 sps:$4 sm:$0xff]  }
 0x3b2   : > { %v7177_v0 = vpop.f32.mrf.mxu1  ;;  %7470 = vmatprep.subr.bf16.mxu1 %v9846_v51  ;;  %v9900_v24 = vld [vmem:[%s11949_s23 + $0xa0c] ss:$16 sps:$4 sm:$0xff]   ;;  %v9898_v48 = vld [vmem:[%s11949_s23 + $0xa08] ss:$16 sps:$4 sm:$0xff]  }
 0x3b3   : > { %v9903_v17 = vld [vmem:[%s11949_s23 + $0x96c] ss:$16 sps:$4 sm:$0xff]   ;;  %v9901_v43 = vld [vmem:[%s11949_s23 + $0x968] ss:$16 sps:$4 sm:$0xff]  }
 0x3b4   : > { %7454 = vmatpush2.bf16.msra.mxu0 %v9841_v56  ;;  %v9906_v51 = vld [vmem:[%s11949_s23 + $0xbec] ss:$16 sps:$4 sm:$0xff]   ;;  %v9904_v63 = vld [vmem:[%s11949_s23 + $0xbe8] ss:$16 sps:$4 sm:$0xff]  }
 0x3b5   : > { %7471 = vmatpush1.bf16.msra.mxu1 %v9844_v61  ;;  %7455 = vmatprep.subr.bf16.mxu0 %v9849_v6  ;;  %v9909_v54 = vld [vmem:[%s11949_s23 + $0x94c] ss:$16 sps:$4 sm:$0xff]   ;;  %v9907_v61 = vld [vmem:[%s11949_s23 + $0x948] ss:$16 sps:$4 sm:$0xff]  }
 0x3b6   : > { %7472 = vmatprep.subr.bf16.mxu1 %v9852_v58  ;;  %v9912_v56 = vld [vmem:[%s11949_s23 + $0xbcc] ss:$16 sps:$4 sm:$0xff]   ;;  %v9910_v49 = vld [vmem:[%s11949_s23 + $0xbc8] ss:$16 sps:$4 sm:$0xff]  }
 0x3b7   : > { %v9915_v0 = vld [vmem:[%s11949_s23 + $0x92c] ss:$16 sps:$4 sm:$0xff]   ;;  %v9913_v58 = vld [vmem:[%s11949_s23 + $0x928] ss:$16 sps:$4 sm:$0xff]  }
 0x3b8   : > { %7456 = vmatpush2.bf16.msra.mxu0 %v9847_v4  ;;  %v9918_v6 = vld [vmem:[%s11949_s23 + $0xbac] ss:$16 sps:$4 sm:$0xff]   ;;  %v9916_v4 = vld [vmem:[%s11949_s23 + $0xba8] ss:$16 sps:$4 sm:$0xff]  }
 0x3b9   : > { %7473 = vmatpush1.bf16.msra.mxu1 %v9850_v5  ;;  %7507 = vmatprep.subr.bf16.mxu0 %v9858_v52  ;;  %v9921_v5 = vld [vmem:[%s11949_s23 + $0x90c] ss:$16 sps:$4 sm:$0xff]   ;;  %v9919_v52 = vld [vmem:[%s11949_s23 + $0x908] ss:$16 sps:$4 sm:$0xff]  }
 0x3ba   : > { %7474 = vmatprep.subr.bf16.mxu1 %v9855_v62  ;;  %v9924_v62 = vld [vmem:[%s11949_s23 + $0xb8c] ss:$16 sps:$4 sm:$0xff]  }
 0x3bb   : > { %7458 = vmatmul.mubr.bf16.vlgmr.msra.gmra.mxu0 %v12129_v47  ;;  %v9868_v47 = vld [vmem:[%s11949_s23 + $0xaa8] ss:$16 sps:$4 sm:$0xff]  }
 0x3bc   : > { %7508 = vmatpush1.bf16.msra.mxu0 %v9856_v1  ;;  %7539 = vmatprep.mubr.bf16.mxu0 %v12158_v60  ;;  %v9879_v60 = vld [vmem:[%s11949_s23 + $0x9ec] ss:$16 sps:$4 sm:$0xff]  }
 0x3bd   : > { %7475 = vmatpush1.bf16.msra.mxu1 %v9853_v30  ;;  %7509 = vmatprep.subr.bf16.mxu0 %v9864_v14  ;;  %v9922_v30 = vld [vmem:[%s11949_s23 + $0xb88] ss:$16 sps:$4 sm:$0xff]   ;;  %v9927_v1 = vld [vmem:[%s11949_s23 + $0xb6c] ss:$16 sps:$4 sm:$0xff]  }
 0x3be   : > { %7476 = vmatprep.subr.bf16.mxu1 %v9861_v11  ;;  %v9930_v11 = vld [vmem:[%s11949_s23 + $0xcec] ss:$16 sps:$4 sm:$0xff]   ;;  %v9925_v14 = vld [vmem:[%s11949_s23 + $0xb68] ss:$16 sps:$4 sm:$0xff]  }
 0x3c0   : > { %7510 = vmatpush1.bf16.msra.mxu0 %v9862_v15  ;;  %v9933_v15 = vld [vmem:[%s11949_s23 + $0xb4c] ss:$16 sps:$4 sm:$0xff]  }
 0x3c1   : > { %7477 = vmatpush1.bf16.msra.mxu1 %v9859_v10  ;;  %7511 = vmatprep.subr.bf16.mxu0 %v9870_v16  ;;  %v9928_v10 = vld [vmem:[%s11949_s23 + $0xce8] ss:$16 sps:$4 sm:$0xff]  }
 0x3c2   : > { %7478 = vmatprep.subr.bf16.mxu1 %v9867_v34  ;;  %v9936_v34 = vld [vmem:[%s11949_s23 + $0xccc] ss:$16 sps:$4 sm:$0xff]  }
 0x3c4   : > { %7512 = vmatpush1.bf16.msra.mxu0 %v9868_v47 }
 0x3c5   : > { %7479 = vmatpush1.bf16.msra.mxu1 %v9865_v19  ;;  %7513 = vmatprep.subr.bf16.mxu0 %v9876_v20  ;;  %v9934_v20 = vld [vmem:[%s11949_s23 + $0xcc8] ss:$16 sps:$4 sm:$0xff]  }
 0x3c6   : > { %7480 = vmatprep.subr.bf16.mxu1 %v9873_v13  ;;  %v9931_v13 = vld [vmem:[%s11949_s23 + $0xb48] ss:$16 sps:$4 sm:$0xff]  }
 0x3c8   : > { %7514 = vmatpush1.bf16.msra.mxu0 %v9874_v18 }
 0x3c9   : > { %7481 = vmatpush1.bf16.msra.mxu1 %v9871_v22  ;;  %7515 = vmatprep.subr.bf16.mxu0 %v9882_v25  ;;  %v9942_v25 = vld [vmem:[%s11949_s23 + $0xcac] ss:$16 sps:$4 sm:$0xff]  }
 0x3ca   : > { %7482 = vmatprep.subr.bf16.mxu1 %v9879_v60  ;;  %v9939_v60 = vld [vmem:[%s11949_s23 + $0xb2c] ss:$16 sps:$4 sm:$0xff]  }
 0x3cc   : > { %7516 = vmatpush1.bf16.msra.mxu0 %v9880_v28 }
 0x3cd   : > { %7483 = vmatpush2.bf16.msra.mxu1 %v9877_v27  ;;  %7517 = vmatprep.subr.bf16.mxu0 %v9888_v2  ;;  %v9937_v2 = vld [vmem:[%s11949_s23 + $0xb28] ss:$16 sps:$4 sm:$0xff]  }
 0x3ce   : > { %7484 = vmatprep.subr.bf16.mxu1 %v9885_v33 }
 0x3d0   : > { %7518 = vmatpush1.bf16.msra.mxu0 %v9886_v35 }
 0x3d1   : > { %7485 = vmatpush2.bf16.msra.mxu1 %v9883_v36  ;;  %7519 = vmatprep.subr.bf16.mxu0 %v9894_v38  ;;  %v9940_v36 = vld [vmem:[%s11949_s23 + $0xca8] ss:$16 sps:$4 sm:$0xff]  }
 0x3d2   : > { %7486 = vmatprep.subr.bf16.mxu1 %v9891_v37  ;;  %v9943_v38 = vld [vmem:[%s11949_s23 + $0xb08] ss:$16 sps:$4 sm:$0xff]  }
 0x3d4   : > { %7520 = vmatpush1.bf16.msra.mxu0 %v9892_v44  ;;  %v9951_v44 = vld [vmem:[%s11949_s23 + $0xc6c] ss:$16 sps:$4 sm:$0xff]  }
 0x3d5   : > { %7487 = vmatpush2.bf16.msra.mxu1 %v9889_v57  ;;  %7521 = vmatprep.subr.bf16.mxu0 %v9900_v24  ;;  %v9946_v57 = vld [vmem:[%s11949_s23 + $0xc88] ss:$16 sps:$4 sm:$0xff]  }
 0x3d6   : > { %7488 = vmatprep.subr.bf16.mxu1 %v9897_v40  ;;  %v9954_v40 = vld [vmem:[%s11949_s23 + $0xeec] ss:$16 sps:$4 sm:$0xff]   ;;  %v9949_v24 = vld [vmem:[%s11949_s23 + $0xc68] ss:$16 sps:$4 sm:$0xff]  }
 0x3d8   : > { %7522 = vmatpush1.bf16.msra.mxu0 %v9898_v48  ;;  %v9957_v48 = vld [vmem:[%s11949_s23 + $0xc4c] ss:$16 sps:$4 sm:$0xff]  }
 0x3d9   : > { %7489 = vmatpush2.bf16.msra.mxu1 %v9895_v46  ;;  %7523 = vmatprep.subr.bf16.mxu0 %v9906_v51  ;;  %v9952_v46 = vld [vmem:[%s11949_s23 + $0xee8] ss:$16 sps:$4 sm:$0xff]  }
 0x3da   : > { %7490 = vmatprep.subr.bf16.mxu1 %v9903_v17  ;;  %v9960_v17 = vld [vmem:[%s11949_s23 + $0xecc] ss:$16 sps:$4 sm:$0xff]  }
 0x3dc   : > { %7524 = vmatpush2.bf16.msra.mxu0 %v9904_v63  ;;  %v9955_v63 = vld [vmem:[%s11949_s23 + $0xc48] ss:$16 sps:$4 sm:$0xff]  }
 0x3dd   : > { %7491 = vmatpush2.bf16.msra.mxu1 %v9901_v43  ;;  %7525 = vmatprep.subr.bf16.mxu0 %v9912_v56 }
 0x3de   : > { %7492 = vmatprep.subr.bf16.mxu1 %v9909_v54  ;;  %v9958_v54 = vld [vmem:[%s11949_s23 + $0xec8] ss:$16 sps:$4 sm:$0xff]  }
 0x3e0   : > { %7526 = vmatpush2.bf16.msra.mxu0 %v9910_v49  ;;  %v9966_v49 = vld [vmem:[%s11949_s23 + $0xeac] ss:$16 sps:$4 sm:$0xff]  }
 0x3e1   : > { %7493 = vmatpush2.bf16.msra.mxu1 %v9907_v61  ;;  %7527 = vmatprep.subr.bf16.mxu0 %v9918_v6  ;;  %v9963_v61 = vld [vmem:[%s11949_s23 + $0xc2c] ss:$16 sps:$4 sm:$0xff]   ;;  %v9961_v6 = vld [vmem:[%s11949_s23 + $0xc28] ss:$16 sps:$4 sm:$0xff]  }
 0x3e2   : > { %7494 = vmatprep.subr.bf16.mxu1 %v9915_v0 }
 0x3e4   : > { %7528 = vmatpush2.bf16.msra.mxu0 %v9916_v4 }
 0x3e5   : > { %7495 = vmatpush2.bf16.msra.mxu1 %v9913_v58  ;;  %7529 = vmatprep.subr.bf16.mxu0 %v9924_v62  ;;  %v9964_v58 = vld [vmem:[%s11949_s23 + $0xea8] ss:$16 sps:$4 sm:$0xff]   ;;  %v9972_v62 = vld [vmem:[%s11949_s23 + $0xe8c] ss:$16 sps:$4 sm:$0xff]  }
 0x3e6   : > { %7496 = vmatprep.subr.bf16.mxu1 %v9921_v5  ;;  %v9969_v5 = vld [vmem:[%s11949_s23 + $0xc0c] ss:$16 sps:$4 sm:$0xff]  }
 0x3e8   : > { %7530 = vmatpush2.bf16.msra.mxu0 %v9922_v30  ;;  %v9975_v30 = vld [vmem:[%s11949_s23 + $0xdec] ss:$16 sps:$4 sm:$0xff]  }
 0x3e9   : > { %7497 = vmatpush2.bf16.msra.mxu1 %v9919_v52  ;;  %7531 = vmatprep.subr.bf16.mxu0 %v9927_v1  ;;  %v9967_v52 = vld [vmem:[%s11949_s23 + $0xc08] ss:$16 sps:$4 sm:$0xff]   ;;  %v9978_v1 = vld [vmem:[%s11949_s23 + $0xe6c] ss:$16 sps:$4 sm:$0xff]  }
 0x3ea   : > { %7548 = vmatprep.subr.bf16.mxu1 %v9930_v11  ;;  %v9973_v11 = vld [vmem:[%s11949_s23 + $0xde8] ss:$16 sps:$4 sm:$0xff]  }
 0x3eb   : > { %v7213_v16 = vpop.f32.mrf.mxu0 }
 0x3ec   : > { %v7254_v19 = vpop.f32.mrf.mxu1  ;;  %7499 = vmatmul.mubr.bf16.vlgmr.msra.gmra.mxu1 %v12223_v3  ;;  %v7214_v47 = vadd.f32 %v7213_v16, %v12679_v53  ;;  %7532 = vmatpush2.bf16.msra.mxu0 %v9925_v14  ;;  %v9976_v14 = vld [vmem:[%s11949_s23 + $0xe68] ss:$16 sps:$4 sm:$0xff]  }
 0x3ed   : > { %7549 = vmatpush1.bf16.msra.mxu1 %v9928_v10  ;;  %v7215_v22 = vpop.f32.mrf.mxu0  ;;  %7533 = vmatprep.subr.bf16.mxu0 %v9933_v15  ;;  %v9981_v10 = vld [vmem:[%s11949_s23 + $0xdcc] ss:$16 sps:$4 sm:$0xff]   ;;  %v9982_v16 = vld [vmem:[%s11949_s23 + $0xe48] ss:$16 sps:$4 sm:$0xff]  }
 0x3ee   : > { %v7256_v18 = vpop.f32.mrf.mxu1  ;;  %7550 = vmatprep.subr.bf16.mxu1 %v9936_v34  ;;  %v7255_v27 = vadd.f32 %v7254_v19, %v7214_v47  ;;  %v7216_v28 = vadd.f32 %v7215_v22, %v12683_v55  ;;  %7580 = vmatprep.mubr.bf16.mxu1 %v12229_v7  ;;  %v9945_v55 = vld [vmem:[%s11949_s23 + $0xb0c] ss:$16 sps:$4 sm:$0xff]   ;;  %v9979_v34 = vld [vmem:[%s11949_s23 + $0xdc8] ss:$16 sps:$4 sm:$0xff]  }
 0x3ef   : > { %v7217_v3 = vpop.f32.mrf.mxu0  ;;  %v9948_v7 = vld [vmem:[%s11949_s23 + $0xc8c] ss:$16 sps:$4 sm:$0xff]  }
 0x3f0   : > { %v7258_v53 = vpop.f32.mrf.mxu1  ;;  %v7257_v33 = vadd.f32 %v7256_v18, %v7216_v28  ;;  %7534 = vmatpush2.bf16.msra.mxu0 %v9931_v13  ;;  %v9984_v15 = vld [vmem:[%s11949_s23 + $0xe4c] ss:$16 sps:$4 sm:$0xff]   ;;  %v9985_v13 = vld [vmem:[%s11949_s23 + $0xda8] ss:$16 sps:$4 sm:$0xff]  }
 0x3f1   : > { %7551 = vmatpush1.bf16.msra.mxu1 %v9934_v20  ;;  %v7218_v35 = vpop.f32.mrf.mxu0  ;;  %7535 = vmatprep.subr.bf16.mxu0 %v9939_v60  ;;  %v9987_v19 = vld [vmem:[%s11949_s23 + $0xdac] ss:$16 sps:$4 sm:$0xff]   ;;  %v9988_v20 = vld [vmem:[%s11949_s23 + $0xe28] ss:$16 sps:$4 sm:$0xff]  }
 0x3f2   : > { %v7259_v37 = vpop.f32.mrf.mxu1  ;;  %7552 = vmatprep.subr.bf16.mxu1 %v9942_v25  ;;  %v9990_v47 = vld [vmem:[%s11949_s23 + $0xe2c] ss:$16 sps:$4 sm:$0xff]   ;;  %v9991_v60 = vld [vmem:[%s11949_s23 + $0xd88] ss:$16 sps:$4 sm:$0xff]  }
 0x3f3   : > { %v9993_v22 = vld [vmem:[%s11949_s23 + $0xd8c] ss:$16 sps:$4 sm:$0xff]   ;;  %v9994_v25 = vld [vmem:[%s11949_s23 + $0xe08] ss:$16 sps:$4 sm:$0xff]  }
 0x3f4   : > { %7536 = vmatpush2.bf16.msra.mxu0 %v9937_v2  ;;  %v9996_v18 = vld [vmem:[%s11949_s23 + $0xe0c] ss:$16 sps:$4 sm:$0xff]   ;;  %v9997_v3 = vld [vmem:[%s11949_s23 + $0xd68] ss:$16 sps:$4 sm:$0xff]  }
 0x3f5   : > { %7553 = vmatpush1.bf16.msra.mxu1 %v9940_v36  ;;  %7537 = vmatprep.subr.bf16.mxu0 %v9945_v55  ;;  %v10002_v28 = vld [vmem:[%s11949_s23 + $0xfec] ss:$16 sps:$4 sm:$0xff]   ;;  %v10000_v53 = vld [vmem:[%s11949_s23 + $0xfe8] ss:$16 sps:$4 sm:$0xff]  }
 0x3f6   : > { %7554 = vmatprep.subr.bf16.mxu1 %v9948_v7  ;;  %v10008_v2 = vld [vmem:[%s11949_s23 + $0xfcc] ss:$16 sps:$4 sm:$0xff]   ;;  %v10003_v36 = vld [vmem:[%s11949_s23 + $0xd48] ss:$16 sps:$4 sm:$0xff]  }
 0x3f7   : > { %v10006_v35 = vld [vmem:[%s11949_s23 + $0xfc8] ss:$16 sps:$4 sm:$0xff]   ;;  %v10011_v37 = vld [vmem:[%s11949_s23 + $0xd2c] ss:$16 sps:$4 sm:$0xff]  }
 0x3f8   : > { %7538 = vmatpush2.bf16.msra.mxu0 %v9943_v38  ;;  %v10014_v55 = vld [vmem:[%s11949_s23 + $0xfac] ss:$16 sps:$4 sm:$0xff]   ;;  %v10009_v7 = vld [vmem:[%s11949_s23 + $0xd28] ss:$16 sps:$4 sm:$0xff]  }
 0x3f9   : > { %7555 = vmatpush1.bf16.msra.mxu1 %v9946_v57  ;;  %7589 = vmatprep.subr.bf16.mxu0 %v9954_v40  ;;  %v10012_v38 = vld [vmem:[%s11949_s23 + $0xfa8] ss:$16 sps:$4 sm:$0xff]   ;;  %v10017_v57 = vld [vmem:[%s11949_s23 + $0xd0c] ss:$16 sps:$4 sm:$0xff]  }
 0x3fa   : > { %7556 = vmatprep.subr.bf16.mxu1 %v9951_v44  ;;  %v10020_v44 = vld [vmem:[%s11949_s23 + $0xf8c] ss:$16 sps:$4 sm:$0xff]   ;;  %v10015_v40 = vld [vmem:[%s11949_s23 + $0xd08] ss:$16 sps:$4 sm:$0xff]  }
 0x3fb   : > { %v7295_v51 = vpop.f32.mrf.mxu0  ;;  %7540 = vmatmul.mubr.bf16.vlgmr.msra.gmra.mxu0 %v12233_v8 }
 0x3fc   : > { %v12768_v43 = vadd.f32 %v7295_v51, %v7255_v27  ;;  %7590 = vmatpush1.bf16.msra.mxu0 %v9952_v46  ;;  %7621 = vmatprep.mubr.bf16.mxu0 %v12241_v12  ;;  %v9970_v12 = vld [vmem:[%s11949_s23 + $0xe88] ss:$16 sps:$4 sm:$0xff]   ;;  %v9999_v27 = vld [vmem:[%s11949_s23 + $0xd6c] ss:$16 sps:$4 sm:$0xff]  }
 0x3fd   : > { %7557 = vmatpush1.bf16.msra.mxu1 %v9949_v24  ;;  %v7297_v56 = vpop.f32.mrf.mxu0  ;;  %7591 = vmatprep.subr.bf16.mxu0 %v9960_v17  ;;  %v10018_v24 = vld [vmem:[%s11949_s23 + $0xf88] ss:$16 sps:$4 sm:$0xff]   ;;  %v10023_v46 = vld [vmem:[%s11949_s23 + $0xf6c] ss:$16 sps:$4 sm:$0xff]  }
 0x3fe   : > { %7558 = vmatprep.subr.bf16.mxu1 %v9957_v48  ;;  %v12774_v0 = vadd.f32 %v7297_v56, %v7257_v33  ;;  %v10005_v33 = vld [vmem:[%s11949_s23 + $0xd4c] ss:$16 sps:$4 sm:$0xff]   ;;  %v10021_v17 = vld [vmem:[%s11949_s23 + $0xf68] ss:$16 sps:$4 sm:$0xff]  }
 0x3ff   : > { %v7299_v8 = vpop.f32.mrf.mxu0  ;;  %v10026_v48 = vld [vmem:[%s11949_s23 + $0x10ec] ss:$16 sps:$4 sm:$0xff]   ;;  %v10024_v51 = vld [vmem:[%s11949_s23 + $0x10e8] ss:$16 sps:$4 sm:$0xff]  }
 0x400   : > { %7592 = vmatpush1.bf16.msra.mxu0 %v9958_v54  ;;  %v10032_v54 = vld [vmem:[%s11949_s23 + $0x10cc] ss:$16 sps:$4 sm:$0xff]  }
 0x401   : > { %7559 = vmatpush1.bf16.msra.mxu1 %v9955_v63  ;;  %v7300_v4 = vpop.f32.mrf.mxu0  ;;  %7593 = vmatprep.subr.bf16.mxu0 %v9966_v49  ;;  %v10029_v63 = vld [vmem:[%s11949_s23 + $0xf4c] ss:$16 sps:$4 sm:$0xff]   ;;  %v10030_v49 = vld [vmem:[%s11949_s23 + $0x10c8] ss:$16 sps:$4 sm:$0xff]  }
 0x402   : > { %7560 = vmatprep.subr.bf16.mxu1 %v9963_v61  ;;  %v10027_v61 = vld [vmem:[%s11949_s23 + $0xf48] ss:$16 sps:$4 sm:$0xff]  }
 0x404   : > { %7594 = vmatpush1.bf16.msra.mxu0 %v9964_v58  ;;  %v10038_v58 = vld [vmem:[%s11949_s23 + $0x10ac] ss:$16 sps:$4 sm:$0xff]  }
 0x405   : > { %7561 = vmatpush1.bf16.msra.mxu1 %v9961_v6  ;;  %7595 = vmatprep.subr.bf16.mxu0 %v9972_v62  ;;  %v10035_v6 = vld [vmem:[%s11949_s23 + $0xf2c] ss:$16 sps:$4 sm:$0xff]  }
 0x406   : > { %7562 = vmatprep.subr.bf16.mxu1 %v9969_v5  ;;  %v10036_v5 = vld [vmem:[%s11949_s23 + $0x10a8] ss:$16 sps:$4 sm:$0xff]  }
 0x408   : > { %7596 = vmatpush1.bf16.msra.mxu0 %v9970_v12  ;;  %v10044_v12 = vld [vmem:[%s11949_s23 + $0x108c] ss:$16 sps:$4 sm:$0xff]  }
 0x409   : > { %7563 = vmatpush1.bf16.msra.mxu1 %v9967_v52  ;;  %7597 = vmatprep.subr.bf16.mxu0 %v9978_v1  ;;  %v10041_v52 = vld [vmem:[%s11949_s23 + $0xf0c] ss:$16 sps:$4 sm:$0xff]   ;;  %v10039_v1 = vld [vmem:[%s11949_s23 + $0xf08] ss:$16 sps:$4 sm:$0xff]  }
 0x40a   : > { %7564 = vmatprep.subr.bf16.mxu1 %v9975_v30  ;;  %v2646_v30 = vsub.s32 2, %v11991_v59 }
 0x40c   : > { %7598 = vmatpush1.bf16.msra.mxu0 %v9976_v14  ;;  %v10047_v14 = vld [vmem:[%s11949_s23 + $0x106c] ss:$16 sps:$4 sm:$0xff]  }
 0x40d   : > { %7565 = vmatpush2.bf16.msra.mxu1 %v9973_v11  ;;  %7599 = vmatprep.subr.bf16.mxu0 %v9984_v15  ;;  %v10042_v11 = vld [vmem:[%s11949_s23 + $0x1088] ss:$16 sps:$4 sm:$0xff]   ;;  %v10237_v15 = vld [vmem:[%s11942_s14] sm:$0xf] }
 0x40e   : > { %7566 = vmatprep.subr.bf16.mxu1 %v9981_v10  ;;  %v10050_v10 = vld [vmem:[%s11949_s23 + $0x12ec] ss:$16 sps:$4 sm:$0xff]  }
 0x410   : > { %7600 = vmatpush1.bf16.msra.mxu0 %v9982_v16 }
 0x411   : > { %7567 = vmatpush2.bf16.msra.mxu1 %v9979_v34  ;;  %7601 = vmatprep.subr.bf16.mxu0 %v9990_v47  ;;  %v2647_v34 = vrot.slane %v10237_v15, %v2646_v30  ;;  %v10048_v47 = vld [vmem:[%s11949_s23 + $0x12e8] ss:$16 sps:$4 sm:$0xff]  }
 0x412   : > { %7568 = vmatprep.subr.bf16.mxu1 %v9987_v19  ;;  %v10045_v19 = vld [vmem:[%s11949_s23 + $0x1068] ss:$16 sps:$4 sm:$0xff]  }
 0x413   : > { %v10102_v30 = vld [vmem:[%s11949_s23 + $0x13c8] ss:$16 sps:$4 sm:$0xff]  }
 0x414   : > { %7602 = vmatpush1.bf16.msra.mxu0 %v9988_v20 }
 0x415   : > { %7569 = vmatpush2.bf16.msra.mxu1 %v9985_v13  ;;  %7603 = vmatprep.subr.bf16.mxu0 %v9996_v18  ;;  %v10056_v13 = vld [vmem:[%s11949_s23 + $0x12cc] ss:$16 sps:$4 sm:$0xff]  }
 0x416   : > { %7570 = vmatprep.subr.bf16.mxu1 %v9993_v22 }
 0x418   : > { %7604 = vmatpush1.bf16.msra.mxu0 %v9994_v25  ;;  %v10051_v25 = vld [vmem:[%s11949_s23 + $0x1048] ss:$16 sps:$4 sm:$0xff]  }
 0x419   : > { %7571 = vmatpush2.bf16.msra.mxu1 %v9991_v60  ;;  %7605 = vmatprep.subr.bf16.mxu0 %v10002_v28 }
 0x41a   : > { %7572 = vmatprep.subr.bf16.mxu1 %v9999_v27  ;;  %v10054_v27 = vld [vmem:[%s11949_s23 + $0x12c8] ss:$16 sps:$4 sm:$0xff]  }
 0x41c   : > { %7606 = vmatpush2.bf16.msra.mxu0 %v10000_v53  ;;  %v10062_v53 = vld [vmem:[%s11949_s23 + $0x12ac] ss:$16 sps:$4 sm:$0xff]  }
 0x41d   : > { %7573 = vmatpush2.bf16.msra.mxu1 %v9997_v3  ;;  %7607 = vmatprep.subr.bf16.mxu0 %v10008_v2  ;;  %v10059_v3 = vld [vmem:[%s11949_s23 + $0x102c] ss:$16 sps:$4 sm:$0xff]   ;;  %v10057_v2 = vld [vmem:[%s11949_s23 + $0x1028] ss:$16 sps:$4 sm:$0xff]  }
 0x41e   : > { %7574 = vmatprep.subr.bf16.mxu1 %v10005_v33 }
 0x420   : > { %7608 = vmatpush2.bf16.msra.mxu0 %v10006_v35 }
 0x421   : > { %7575 = vmatpush2.bf16.msra.mxu1 %v10003_v36  ;;  %7609 = vmatprep.subr.bf16.mxu0 %v10014_v55  ;;  %v10060_v36 = vld [vmem:[%s11949_s23 + $0x12a8] ss:$16 sps:$4 sm:$0xff]   ;;  %v10068_v55 = vld [vmem:[%s11949_s23 + $0x128c] ss:$16 sps:$4 sm:$0xff]  }
 0x422   : > { %7576 = vmatprep.subr.bf16.mxu1 %v10011_v37  ;;  %v10065_v37 = vld [vmem:[%s11949_s23 + $0x100c] ss:$16 sps:$4 sm:$0xff]  }
 0x424   : > { %7610 = vmatpush2.bf16.msra.mxu0 %v10012_v38  ;;  %v10071_v38 = vld [vmem:[%s11949_s23 + $0x11ec] ss:$16 sps:$4 sm:$0xff]  }
 0x425   : > { %7577 = vmatpush2.bf16.msra.mxu1 %v10009_v7  ;;  %7611 = vmatprep.subr.bf16.mxu0 %v10020_v44  ;;  %v10063_v7 = vld [vmem:[%s11949_s23 + $0x1008] ss:$16 sps:$4 sm:$0xff]  }
 0x426   : > { %7578 = vmatprep.subr.bf16.mxu1 %v10017_v57  ;;  %v10074_v57 = vld [vmem:[%s11949_s23 + $0x126c] ss:$16 sps:$4 sm:$0xff]   ;;  %v10069_v44 = vld [vmem:[%s11949_s23 + $0x11e8] ss:$16 sps:$4 sm:$0xff]  }
 0x428   : > { %7612 = vmatpush2.bf16.msra.mxu0 %v10018_v24  ;;  %v10077_v24 = vld [vmem:[%s11949_s23 + $0x11cc] ss:$16 sps:$4 sm:$0xff]  }
 0x429   : > { %7579 = vmatpush2.bf16.msra.mxu1 %v10015_v40  ;;  %7613 = vmatprep.subr.bf16.mxu0 %v10023_v46  ;;  %v10072_v40 = vld [vmem:[%s11949_s23 + $0x1268] ss:$16 sps:$4 sm:$0xff]   ;;  %v10080_v46 = vld [vmem:[%s11949_s23 + $0x124c] ss:$16 sps:$4 sm:$0xff]  }
 0x42a   : > { %7630 = vmatprep.subr.bf16.mxu1 %v10026_v48  ;;  %v10075_v48 = vld [vmem:[%s11949_s23 + $0x11c8] ss:$16 sps:$4 sm:$0xff]  }
 0x42c   : > { %v7336_v56 = vpop.f32.mrf.mxu1  ;;  %7581 = vmatmul.mubr.bf16.vlgmr.msra.gmra.mxu1 %v12319_v32  ;;  %7614 = vmatpush2.bf16.msra.mxu0 %v10021_v17  ;;  %v10033_v32 = vld [vmem:[%s11949_s23 + $0xf28] ss:$16 sps:$4 sm:$0xff]  }
 0x42d   : > { %7631 = vmatpush1.bf16.msra.mxu1 %v10024_v51  ;;  %7615 = vmatprep.subr.bf16.mxu0 %v10029_v63  ;;  %v7337_v20 = vadd.f32 %v7336_v56, %v2647_v34  ;;  %v10078_v17 = vld [vmem:[%s11949_s23 + $0x1248] ss:$16 sps:$4 sm:$0xff]   ;;  %v10083_v51 = vld [vmem:[%s11949_s23 + $0x11ac] ss:$16 sps:$4 sm:$0xff]  }
 0x42e   : > { %v7338_v8 = vpop.f32.mrf.mxu1  ;;  %7632 = vmatprep.subr.bf16.mxu1 %v10032_v54  ;;  %7662 = vmatprep.mubr.bf16.mxu1 %v12326_v39  ;;  %v2650_v39 = vsub.s32 3, %v11991_v59  ;;  %v10053_v59 = vld [vmem:[%s11949_s23 + $0x104c] ss:$16 sps:$4 sm:$0xff]   ;;  %v10081_v54 = vld [vmem:[%s11949_s23 + $0x11a8] ss:$16 sps:$4 sm:$0xff]  }
 0x42f   : > { %v10086_v63 = vld [vmem:[%s11949_s23 + $0x122c] ss:$16 sps:$4 sm:$0xff]   ;;  %v10084_v56 = vld [vmem:[%s11949_s23 + $0x1228] ss:$16 sps:$4 sm:$0xff]  }
 0x430   : > { %v7340_v4 = vpop.f32.mrf.mxu1  ;;  %7616 = vmatpush2.bf16.msra.mxu0 %v10027_v61  ;;  %v2651_v16 = vrot.slane %v10237_v15, %v2650_v39  ;;  %v10089_v61 = vld [vmem:[%s11949_s23 + $0x118c] ss:$16 sps:$4 sm:$0xff]   ;;  %v10111_v34 = vld [vmem:[%s11949_s23 + $0x1108] ss:$16 sps:$4 sm:$0xff]  }
 0x431   : > { %7633 = vmatpush1.bf16.msra.mxu1 %v10030_v49  ;;  %7617 = vmatprep.subr.bf16.mxu0 %v10035_v6  ;;  %v10092_v49 = vld [vmem:[%s11949_s23 + $0x120c] ss:$16 sps:$4 sm:$0xff]   ;;  %v10090_v6 = vld [vmem:[%s11949_s23 + $0x1208] ss:$16 sps:$4 sm:$0xff]  }
 0x432   : > { %v7341_v62 = vpop.f32.mrf.mxu1  ;;  %7634 = vmatprep.subr.bf16.mxu1 %v10038_v58  ;;  %v7339_v18 = vadd.f32 %v7338_v8, %v2651_v16  ;;  %v10087_v8 = vld [vmem:[%s11949_s23 + $0x1188] ss:$16 sps:$4 sm:$0xff]   ;;  %v10095_v58 = vld [vmem:[%s11949_s23 + $0x116c] ss:$16 sps:$4 sm:$0xff]  }
 0x433   : > { %v10098_v4 = vld [vmem:[%s11949_s23 + $0x13ec] ss:$16 sps:$4 sm:$0xff]   ;;  %v10114_v16 = vld [vmem:[%s11949_s23 + $0x1388] ss:$16 sps:$4 sm:$0xff]  }
 0x434   : > { %7618 = vmatpush2.bf16.msra.mxu0 %v10033_v32  ;;  %v10093_v32 = vld [vmem:[%s11949_s23 + $0x1168] ss:$16 sps:$4 sm:$0xff]   ;;  %v10101_v62 = vld [vmem:[%s11949_s23 + $0x114c] ss:$16 sps:$4 sm:$0xff]  }
 0x435   : > { %7635 = vmatpush1.bf16.msra.mxu1 %v10036_v5  ;;  %7619 = vmatprep.subr.bf16.mxu0 %v10041_v52  ;;  %v10096_v5 = vld [vmem:[%s11949_s23 + $0x13e8] ss:$16 sps:$4 sm:$0xff]   ;;  %v10104_v52 = vld [vmem:[%s11949_s23 + $0x13cc] ss:$16 sps:$4 sm:$0xff]  }
 0x436   : > { %7636 = vmatprep.subr.bf16.mxu1 %v10044_v12  ;;  %v10099_v12 = vld [vmem:[%s11949_s23 + $0x1148] ss:$16 sps:$4 sm:$0xff]   ;;  %v10107_v39 = vld [vmem:[%s11949_s23 + $0x112c] ss:$16 sps:$4 sm:$0xff]  }
 0x437   : > { %v10116_v15 = vld [vmem:[%s11949_s23 + $0x138c] ss:$16 sps:$4 sm:$0xff]  }
 0x438   : > { %7620 = vmatpush2.bf16.msra.mxu0 %v10039_v1  ;;  %v10110_v1 = vld [vmem:[%s11949_s23 + $0x13ac] ss:$16 sps:$4 sm:$0xff]  }
 0x439   : > { %7637 = vmatpush1.bf16.msra.mxu1 %v10042_v11  ;;  %7671 = vmatprep.subr.bf16.mxu0 %v10050_v10  ;;  %v10105_v11 = vld [vmem:[%s11949_s23 + $0x1128] ss:$16 sps:$4 sm:$0xff]   ;;  %v10113_v10 = vld [vmem:[%s11949_s23 + $0x110c] ss:$16 sps:$4 sm:$0xff]  }
 0x43a   : > { %7638 = vmatprep.subr.bf16.mxu1 %v10047_v14  ;;  %v10108_v14 = vld [vmem:[%s11949_s23 + $0x13a8] ss:$16 sps:$4 sm:$0xff]  }
 0x43b   : > { %v7377_v22 = vpop.f32.mrf.mxu0  ;;  %7622 = vmatmul.mubr.bf16.vlgmr.msra.gmra.mxu0 %v12330_v41 }
 0x43c   : > { %v12843_v60 = vadd.f32 %v7377_v22, %v7337_v20  ;;  %7672 = vmatpush1.bf16.msra.mxu0 %v10048_v47  ;;  %7703 = vmatprep.mubr.bf16.mxu0 %v12338_v23  ;;  %v10066_v23 = vld [vmem:[%s11949_s23 + $0x1288] ss:$16 sps:$4 sm:$0xff]   ;;  %v10122_v47 = vld [vmem:[%s11949_s23 + $0x14ec] ss:$16 sps:$4 sm:$0xff]  }
 0x43d   : > { %7639 = vmatpush1.bf16.msra.mxu1 %v10045_v19  ;;  %v7379_v28 = vpop.f32.mrf.mxu0  ;;  %7673 = vmatprep.subr.bf16.mxu0 %v10056_v13  ;;  %v10119_v19 = vld [vmem:[%s11949_s23 + $0x136c] ss:$16 sps:$4 sm:$0xff]   ;;  %v10120_v13 = vld [vmem:[%s11949_s23 + $0x14e8] ss:$16 sps:$4 sm:$0xff]  }
 0x43e   : > { %7640 = vmatprep.subr.bf16.mxu1 %v10053_v59  ;;  %v12849_v33 = vadd.f32 %v7379_v28, %v7339_v18  ;;  %v10117_v59 = vld [vmem:[%s11949_s23 + $0x1368] ss:$16 sps:$4 sm:$0xff]   ;;  %v10125_v20 = vld [vmem:[%s11949_s23 + $0x134c] ss:$16 sps:$4 sm:$0xff]  }
 0x43f   : > { %v7381_v41 = vpop.f32.mrf.mxu0  ;;  %v10128_v22 = vld [vmem:[%s11949_s23 + $0x14cc] ss:$16 sps:$4 sm:$0xff]   ;;  %v10126_v28 = vld [vmem:[%s11949_s23 + $0x14c8] ss:$16 sps:$4 sm:$0xff]  }
 0x440   : > { %7674 = vmatpush1.bf16.msra.mxu0 %v10054_v27  ;;  %v10123_v27 = vld [vmem:[%s11949_s23 + $0x1348] ss:$16 sps:$4 sm:$0xff]   ;;  %v10134_v41 = vld [vmem:[%s11949_s23 + $0x14ac] ss:$16 sps:$4 sm:$0xff]  }
 0x441   : > { %7641 = vmatpush1.bf16.msra.mxu1 %v10051_v25  ;;  %v7382_v35 = vpop.f32.mrf.mxu0  ;;  %7675 = vmatprep.subr.bf16.mxu0 %v10062_v53  ;;  %v10131_v53 = vld [vmem:[%s11949_s23 + $0x132c] ss:$16 sps:$4 sm:$0xff]  }
 0x442   : > { %7642 = vmatprep.subr.bf16.mxu1 %v10059_v3 }
 0x444   : > { %7676 = vmatpush1.bf16.msra.mxu0 %v10060_v36  ;;  %v10132_v36 = vld [vmem:[%s11949_s23 + $0x14a8] ss:$16 sps:$4 sm:$0xff]  }
 0x445   : > { %7643 = vmatpush1.bf16.msra.mxu1 %v10057_v2  ;;  %7677 = vmatprep.subr.bf16.mxu0 %v10068_v55  ;;  %v10140_v55 = vld [vmem:[%s11949_s23 + $0x148c] ss:$16 sps:$4 sm:$0xff]  }
 0x446   : > { %7644 = vmatprep.subr.bf16.mxu1 %v10065_v37  ;;  %v10137_v37 = vld [vmem:[%s11949_s23 + $0x130c] ss:$16 sps:$4 sm:$0xff]  }
 0x448   : > { %7678 = vmatpush1.bf16.msra.mxu0 %v10066_v23  ;;  %v10146_v23 = vld [vmem:[%s11949_s23 + $0x16ec] ss:$16 sps:$4 sm:$0xff]  }
 0x449   : > { %7645 = vmatpush1.bf16.msra.mxu1 %v10063_v7  ;;  %7679 = vmatprep.subr.bf16.mxu0 %v10074_v57  ;;  %v10143_v7 = vld [vmem:[%s11949_s23 + $0x146c] ss:$16 sps:$4 sm:$0xff]   ;;  %v10144_v57 = vld [vmem:[%s11949_s23 + $0x16e8] ss:$16 sps:$4 sm:$0xff]  }
 0x44a   : > { %7646 = vmatprep.subr.bf16.mxu1 %v10071_v38  ;;  %v10141_v38 = vld [vmem:[%s11949_s23 + $0x1468] ss:$16 sps:$4 sm:$0xff]  }
 0x44c   : > { %7680 = vmatpush1.bf16.msra.mxu0 %v10072_v40  ;;  %v10152_v40 = vld [vmem:[%s11949_s23 + $0x16cc] ss:$16 sps:$4 sm:$0xff]  }
 0x44d   : > { %7647 = vmatpush2.bf16.msra.mxu1 %v10069_v44  ;;  %7681 = vmatprep.subr.bf16.mxu0 %v10080_v46  ;;  %v10149_v44 = vld [vmem:[%s11949_s23 + $0x144c] ss:$16 sps:$4 sm:$0xff]  }
 0x44e   : > { %7648 = vmatprep.subr.bf16.mxu1 %v10077_v24 }
 0x450   : > { %7682 = vmatpush1.bf16.msra.mxu0 %v10078_v17  ;;  %v10150_v17 = vld [vmem:[%s11949_s23 + $0x16c8] ss:$16 sps:$4 sm:$0xff]  }
 0x451   : > { %7649 = vmatpush2.bf16.msra.mxu1 %v10075_v48  ;;  %7683 = vmatprep.subr.bf16.mxu0 %v10086_v63  ;;  %v10147_v48 = vld [vmem:[%s11949_s23 + $0x1448] ss:$16 sps:$4 sm:$0xff]   ;;  %v10155_v63 = vld [vmem:[%s11949_s23 + $0x142c] ss:$16 sps:$4 sm:$0xff]  }
 0x452   : > { %7650 = vmatprep.subr.bf16.mxu1 %v10083_v51 }
 0x454   : > { %7684 = vmatpush1.bf16.msra.mxu0 %v10084_v56 }
 0x455   : > { %7651 = vmatpush2.bf16.msra.mxu1 %v10081_v54  ;;  %7685 = vmatprep.subr.bf16.mxu0 %v10092_v49  ;;  %v10158_v54 = vld [vmem:[%s11949_s23 + $0x16ac] ss:$16 sps:$4 sm:$0xff]   ;;  %v10156_v49 = vld [vmem:[%s11949_s23 + $0x16a8] ss:$16 sps:$4 sm:$0xff]  }
 0x456   : > { %7652 = vmatprep.subr.bf16.mxu1 %v10089_v61  ;;  %v10153_v61 = vld [vmem:[%s11949_s23 + $0x1428] ss:$16 sps:$4 sm:$0xff]  }
 0x458   : > { %7686 = vmatpush1.bf16.msra.mxu0 %v10090_v6  ;;  %v10161_v6 = vld [vmem:[%s11949_s23 + $0x140c] ss:$16 sps:$4 sm:$0xff]  }
 0x459   : > { %7653 = vmatpush2.bf16.msra.mxu1 %v10087_v8  ;;  %7687 = vmatprep.subr.bf16.mxu0 %v10098_v4  ;;  %v10159_v4 = vld [vmem:[%s11949_s23 + $0x1408] ss:$16 sps:$4 sm:$0xff]  }
 0x45a   : > { %7654 = vmatprep.subr.bf16.mxu1 %v10095_v58  ;;  %v10164_v58 = vld [vmem:[%s11949_s23 + $0x168c] ss:$16 sps:$4 sm:$0xff]  }
 0x45c   : > { %7688 = vmatpush2.bf16.msra.mxu0 %v10096_v5  ;;  %v10170_v5 = vld [vmem:[%s11949_s23 + $0x166c] ss:$16 sps:$4 sm:$0xff]  }
 0x45d   : > { %7655 = vmatpush2.bf16.msra.mxu1 %v10093_v32  ;;  %7689 = vmatprep.subr.bf16.mxu0 %v10104_v52  ;;  %v10167_v32 = vld [vmem:[%s11949_s23 + $0x15ec] ss:$16 sps:$4 sm:$0xff]   ;;  %v10168_v52 = vld [vmem:[%s11949_s23 + $0x1668] ss:$16 sps:$4 sm:$0xff]  }
 0x45e   : > { %7656 = vmatprep.subr.bf16.mxu1 %v10101_v62  ;;  %v10165_v62 = vld [vmem:[%s11949_s23 + $0x15e8] ss:$16 sps:$4 sm:$0xff]  }
 0x460   : > { %7690 = vmatpush2.bf16.msra.mxu0 %v10102_v30  ;;  %v10176_v30 = vld [vmem:[%s11949_s23 + $0x164c] ss:$16 sps:$4 sm:$0xff]  }
 0x461   : > { %7657 = vmatpush2.bf16.msra.mxu1 %v10099_v12  ;;  %7691 = vmatprep.subr.bf16.mxu0 %v10110_v1  ;;  %v10173_v12 = vld [vmem:[%s11949_s23 + $0x15cc] ss:$16 sps:$4 sm:$0xff]   ;;  %v10174_v1 = vld [vmem:[%s11949_s23 + $0x1648] ss:$16 sps:$4 sm:$0xff]  }
 0x462   : > { %7658 = vmatprep.subr.bf16.mxu1 %v10107_v39  ;;  %v10171_v39 = vld [vmem:[%s11949_s23 + $0x15c8] ss:$16 sps:$4 sm:$0xff]  }
 0x464   : > { %7692 = vmatpush2.bf16.msra.mxu0 %v10108_v14  ;;  %v10182_v14 = vld [vmem:[%s11949_s23 + $0x162c] ss:$16 sps:$4 sm:$0xff]  }
 0x465   : > { %7659 = vmatpush2.bf16.msra.mxu1 %v10105_v11  ;;  %7693 = vmatprep.subr.bf16.mxu0 %v10116_v15  ;;  %v10179_v11 = vld [vmem:[%s11949_s23 + $0x15ac] ss:$16 sps:$4 sm:$0xff]   ;;  %v10180_v15 = vld [vmem:[%s11949_s23 + $0x1628] ss:$16 sps:$4 sm:$0xff]  }
 0x466   : > { %7660 = vmatprep.subr.bf16.mxu1 %v10113_v10  ;;  %v10177_v10 = vld [vmem:[%s11949_s23 + $0x15a8] ss:$16 sps:$4 sm:$0xff]  }
 0x468   : > { %7694 = vmatpush2.bf16.msra.mxu0 %v10114_v16  ;;  %v10188_v16 = vld [vmem:[%s11949_s23 + $0x160c] ss:$16 sps:$4 sm:$0xff]  }
 0x469   : > { %7661 = vmatpush2.bf16.msra.mxu1 %v10111_v34  ;;  %7695 = vmatprep.subr.bf16.mxu0 %v10119_v19  ;;  %v10185_v34 = vld [vmem:[%s11949_s23 + $0x158c] ss:$16 sps:$4 sm:$0xff]   ;;  %v10183_v19 = vld [vmem:[%s11949_s23 + $0x1588] ss:$16 sps:$4 sm:$0xff]  }
 0x46a   : > { %7712 = vmatprep.subr.bf16.mxu1 %v10122_v47  ;;  %v10186_v47 = vld [vmem:[%s11949_s23 + $0x1608] ss:$16 sps:$4 sm:$0xff]  }
 0x46c   : > { %v7418_v18 = vpop.f32.mrf.mxu1  ;;  %7663 = vmatmul.mubr.bf16.vlgmr.msra.gmra.mxu1 %v12413_v29  ;;  %7696 = vmatpush2.bf16.msra.mxu0 %v10117_v59  ;;  %v10191_v59 = vld [vmem:[%s11949_s23 + $0x156c] ss:$16 sps:$4 sm:$0xff]  }
 0x46d   : > { %v7419_v25 = vadd.f32 %v7418_v18, %v12843_v60  ;;  %7713 = vmatpush1.bf16.msra.mxu1 %v10120_v13  ;;  %7697 = vmatprep.subr.bf16.mxu0 %v10125_v20  ;;  %v10129_v60 = vld [vmem:[%s11949_s23 + $0x1328] ss:$16 sps:$4 sm:$0xff]   ;;  %v10194_v13 = vld [vmem:[%s11949_s23 + $0x17ec] ss:$16 sps:$4 sm:$0xff]  }
 0x46e   : > { %v7420_v3 = vpop.f32.mrf.mxu1  ;;  %7714 = vmatprep.subr.bf16.mxu1 %v10128_v22  ;;  %7744 = vmatprep.mubr.bf16.mxu1 %v12422_v42  ;;  %v10138_v42 = vld [vmem:[%s11949_s23 + $0x1488] ss:$16 sps:$4 sm:$0xff]   ;;  %v10197_v18 = vld [vmem:[%s11949_s23 + $0x154c] ss:$16 sps:$4 sm:$0xff]  }
 0x46f   : > { %v7421_v2 = vadd.f32 %v7420_v3, %v12849_v33  ;;  %v10135_v33 = vld [vmem:[%s11949_s23 + $0x1308] ss:$16 sps:$4 sm:$0xff]   ;;  %v10203_v3 = vld [vmem:[%s11949_s23 + $0x152c] ss:$16 sps:$4 sm:$0xff]  }
 0x470   : > { %v7422_v29 = vpop.f32.mrf.mxu1  ;;  %7698 = vmatpush2.bf16.msra.mxu0 %v10123_v27  ;;  %v10189_v20 = vld [vmem:[%s11949_s23 + $0x1568] ss:$16 sps:$4 sm:$0xff]  }
 0x471   : > { %7715 = vmatpush1.bf16.msra.mxu1 %v10126_v28  ;;  %7699 = vmatprep.subr.bf16.mxu0 %v10131_v53  ;;  %v10192_v22 = vld [vmem:[%s11949_s23 + $0x17e8] ss:$16 sps:$4 sm:$0xff]   ;;  %v10206_v53 = vld [vmem:[%s11949_s23 + $0x17ac] ss:$16 sps:$4 sm:$0xff]  }
 0x472   : > { %v7423_v35 = vpop.f32.mrf.mxu1  ;;  %7716 = vmatprep.subr.bf16.mxu1 %v10134_v41  ;;  %v10195_v27 = vld [vmem:[%s11949_s23 + $0x1548] ss:$16 sps:$4 sm:$0xff]   ;;  %v10209_v29 = vld [vmem:[%s11949_s23 + $0x150c] ss:$16 sps:$4 sm:$0xff]  }
 0x473   : > { %v10198_v28 = vld [vmem:[%s11949_s23 + $0x17c8] ss:$16 sps:$4 sm:$0xff]  }
 0x474   : > { %7700 = vmatpush2.bf16.msra.mxu0 %v10129_v60  ;;  %v10201_v41 = vld [vmem:[%s11949_s23 + $0x1528] ss:$16 sps:$4 sm:$0xff]   ;;  %v10212_v60 = vld [vmem:[%s11949_s23 + $0x178c] ss:$16 sps:$4 sm:$0xff]  }
 0x475   : > { %7717 = vmatpush1.bf16.msra.mxu1 %v10132_v36  ;;  %7701 = vmatprep.subr.bf16.mxu0 %v10137_v37  ;;  %v10207_v36 = vld [vmem:[%s11949_s23 + $0x1508] ss:$16 sps:$4 sm:$0xff]   ;;  %v10215_v37 = vld [vmem:[%s11949_s23 + $0x176c] ss:$16 sps:$4 sm:$0xff]  }
 0x476   : > { %7718 = vmatprep.subr.bf16.mxu1 %v10140_v55  ;;  %v10210_v35 = vld [vmem:[%s11949_s23 + $0x1788] ss:$16 sps:$4 sm:$0xff]   ;;  %v10218_v55 = vld [vmem:[%s11949_s23 + $0x186c] ss:$16 sps:$4 sm:$0xff]  }
 0x478   : > { %7702 = vmatpush2.bf16.msra.mxu0 %v10135_v33  ;;  %v10213_v33 = vld [vmem:[%s11949_s23 + $0x1768] ss:$16 sps:$4 sm:$0xff]  }
 0x479   : > { %7719 = vmatpush1.bf16.msra.mxu1 %v10138_v42  ;;  %7753 = vmatprep.subr.bf16.mxu0 %v10146_v23  ;;  %v10216_v42 = vld [vmem:[%s11949_s23 + $0x1868] ss:$16 sps:$4 sm:$0xff]   ;;  %v10224_v23 = vld [vmem:[%s11949_s23 + $0x184c] ss:$16 sps:$4 sm:$0xff]  }
 0x47a   : > { %7720 = vmatprep.subr.bf16.mxu1 %v10143_v7  ;;  %v10221_v7 = vld [vmem:[%s11949_s23 + $0x174c] ss:$16 sps:$4 sm:$0xff]  }
 0x47b   : > { %v7459_v24 = vpop.f32.mrf.mxu0  ;;  %7704 = vmatmul.mubr.bf16.vlgmr.msra.gmra.mxu0 %v12426_v21 }
 0x47c   : > { %v12917_v46 = vadd.f32 %v7459_v24, %v7419_v25  ;;  %7754 = vmatpush1.bf16.msra.mxu0 %v10144_v57  ;;  %7785 = vmatprep.mubr.bf16.mxu0 %v12434_v50  ;;  %v10162_v50 = vld [vmem:[%s11949_s23 + $0x1688] ss:$16 sps:$4 sm:$0xff]   ;;  %v10200_v25 = vld [vmem:[%s11949_s23 + $0x17cc] ss:$16 sps:$4 sm:$0xff]  }
 0x47d   : > { %7721 = vmatpush1.bf16.msra.mxu1 %v10141_v38  ;;  %v7461_v51 = vpop.f32.mrf.mxu0  ;;  %7755 = vmatprep.subr.bf16.mxu0 %v10152_v40  ;;  %v10222_v40 = vld [vmem:[%s11949_s23 + $0x1848] ss:$16 sps:$4 sm:$0xff]  }
 0x47e   : > { %7722 = vmatprep.subr.bf16.mxu1 %v10149_v44  ;;  %v12923_v56 = vadd.f32 %v7461_v51, %v7421_v2  ;;  %v10204_v2 = vld [vmem:[%s11949_s23 + $0x17a8] ss:$16 sps:$4 sm:$0xff]  }
 0x47f   : > { %v7463_v21 = vpop.f32.mrf.mxu0  ;;  %v10219_v44 = vld [vmem:[%s11949_s23 + $0x1748] ss:$16 sps:$4 sm:$0xff]  }
 0x480   : > { %7756 = vmatpush1.bf16.msra.mxu0 %v10150_v17  ;;  %v10230_v17 = vld [vmem:[%s11949_s23 + $0x182c] ss:$16 sps:$4 sm:$0xff]  }
 0x481   : > { %7723 = vmatpush1.bf16.msra.mxu1 %v10147_v48  ;;  %v7464_v8 = vpop.f32.mrf.mxu0  ;;  %7757 = vmatprep.subr.bf16.mxu0 %v10158_v54  ;;  %v10227_v48 = vld [vmem:[%s11949_s23 + $0x172c] ss:$16 sps:$4 sm:$0xff]  }
 0x482   : > { %7724 = vmatprep.subr.bf16.mxu1 %v10155_v63  ;;  %v10228_v63 = vld [vmem:[%s11949_s23 + $0x1828] ss:$16 sps:$4 sm:$0xff]   ;;  %v10233_v21 = vld [vmem:[%s11949_s23 + $0x170c] ss:$16 sps:$4 sm:$0xff]  }
 0x483   : > { %v7855_v8 = vld [vmem:[%s11947_s20 + $0x78] sm:$0xff] }
 0x484   : > { %7758 = vmatpush1.bf16.msra.mxu0 %v10156_v49  ;;  %v10231_v49 = vld [vmem:[%s11949_s23 + $0x1708] ss:$16 sps:$4 sm:$0xff]  }
 0x485   : > { %7725 = vmatpush1.bf16.msra.mxu1 %v10153_v61  ;;  %7759 = vmatprep.subr.bf16.mxu0 %v10164_v58  ;;  %v10236_v61 = vld [vmem:[%s11949_s23 + $0x180c] ss:$16 sps:$4 sm:$0xff]  }
 0x486   : > { %7726 = vmatprep.subr.bf16.mxu1 %v10161_v6  ;;  %v7836_v6 = vmax.f32 %v12774_v0, 0.0  ;;  %v7870_v58 = vld [vmem:[%s11947_s20 + $0xf0] sm:$0xff]  ;;  %v7853_v0 = vld [vmem:[%s11947_s20 + $0x68] sm:$0xff] }
 0x488   : > { %7760 = vmatpush1.bf16.msra.mxu0 %v10162_v50  ;;  %v7854_v50 = vld [vmem:[%s11947_s20 + $0x70] sm:$0xff] }
 0x489   : > { %7727 = vmatpush1.bf16.msra.mxu1 %v10159_v4  ;;  %7761 = vmatprep.subr.bf16.mxu0 %v10170_v5  ;;  %v7869_v5 = vld [vmem:[%s11947_s20 + $0xe8] sm:$0xff] }
 0x48a   : > { %7728 = vmatprep.subr.bf16.mxu1 %v10167_v32 }
 0x48c   : > { %7762 = vmatpush1.bf16.msra.mxu0 %v10168_v52 }
 0x48d   : > { %7729 = vmatpush2.bf16.msra.mxu1 %v10165_v62  ;;  %7763 = vmatprep.subr.bf16.mxu0 %v10176_v30  ;;  %v7867_v30 = vld [vmem:[%s11947_s20 + $0xd8] sm:$0xff] }
 0x48e   : > { %7730 = vmatprep.subr.bf16.mxu1 %v10173_v12  ;;  %v7852_v12 = vld [vmem:[%s11947_s20 + $0x60] sm:$0xff] }
 0x490   : > { %7764 = vmatpush1.bf16.msra.mxu0 %v10174_v1 }
 0x491   : > { %7731 = vmatpush2.bf16.msra.mxu1 %v10171_v39  ;;  %7765 = vmatprep.subr.bf16.mxu0 %v10182_v14  ;;  %v7851_v39 = vld [vmem:[%s11947_s20 + $0x58] sm:$0xff] }
 0x492   : > { %7732 = vmatprep.subr.bf16.mxu1 %v10179_v11  ;;  %v7903_v11 = vld [vmem:[%s11947_s20 + $0x1f8] sm:$0xff] }
 0x493   : > { %v7887_v14 = vld [vmem:[%s11947_s20 + $0x178] sm:$0xff] }
 0x494   : > { %7766 = vmatpush1.bf16.msra.mxu0 %v10180_v15  ;;  %v7866_v15 = vld [vmem:[%s11947_s20 + $0xd0] sm:$0xff] }
 0x495   : > { %7733 = vmatpush2.bf16.msra.mxu1 %v10177_v10  ;;  %7767 = vmatprep.subr.bf16.mxu0 %v10188_v16  ;;  %v7902_v10 = vld [vmem:[%s11947_s20 + $0x1f0] sm:$0xff] }
 0x496   : > { %7734 = vmatprep.subr.bf16.mxu1 %v10185_v34  ;;  %v7886_v34 = vld [vmem:[%s11947_s20 + $0x170] sm:$0xff] }
 0x497   : > { %v7850_v16 = vld [vmem:[%s11947_s20 + $0x50] sm:$0xff] }
 0x498   : > { %7768 = vmatpush1.bf16.msra.mxu0 %v10186_v47  ;;  %v7865_v47 = vld [vmem:[%s11947_s20 + $0xc8] sm:$0xff] }
 0x499   : > { %7735 = vmatpush2.bf16.msra.mxu1 %v10183_v19  ;;  %7769 = vmatprep.subr.bf16.mxu0 %v10194_v13  ;;  %v7901_v19 = vld [vmem:[%s11947_s20 + $0x1e8] sm:$0xff] }
 0x49a   : > { %7736 = vmatprep.subr.bf16.mxu1 %v10191_v59  ;;  %v7885_v59 = vld [vmem:[%s11947_s20 + $0x168] sm:$0xff] }
 0x49b   : > { %v7849_v13 = vld [vmem:[%s11947_s20 + $0x48] sm:$0xff] }
 0x49c   : > { %7770 = vmatpush2.bf16.msra.mxu0 %v10192_v22  ;;  %v7848_v22 = vld [vmem:[%s11947_s20 + $0x40] sm:$0xff] }
 0x49d   : > { %7737 = vmatpush2.bf16.msra.mxu1 %v10189_v20  ;;  %7771 = vmatprep.subr.bf16.mxu0 %v10200_v25  ;;  %v7864_v20 = vld [vmem:[%s11947_s20 + $0xc0] sm:$0xff]  ;;  %v7847_v25 = vld [vmem:[%s11947_s20 + $0x38] sm:$0xff] }
 0x49e   : > { %7738 = vmatprep.subr.bf16.mxu1 %v10197_v18  ;;  %v7863_v18 = vld [vmem:[%s11947_s20 + $0xb8] sm:$0xff] }
 0x4a0   : > { %7772 = vmatpush2.bf16.msra.mxu0 %v10198_v28  ;;  %v7846_v28 = vld [vmem:[%s11947_s20 + $0x30] sm:$0xff] }
 0x4a1   : > { %7739 = vmatpush2.bf16.msra.mxu1 %v10195_v27  ;;  %7773 = vmatprep.subr.bf16.mxu0 %v10206_v53  ;;  %v7862_v27 = vld [vmem:[%s11947_s20 + $0xb0] sm:$0xff]  ;;  %v7845_v53 = vld [vmem:[%s11947_s20 + $0x28] sm:$0xff] }
 0x4a2   : > { %7740 = vmatprep.subr.bf16.mxu1 %v10203_v3  ;;  %v7861_v3 = vld [vmem:[%s11947_s20 + $0xa8] sm:$0xff] }
 0x4a4   : > { %7774 = vmatpush2.bf16.msra.mxu0 %v10204_v2  ;;  %v7844_v2 = vld [vmem:[%s11947_s20 + $0x20] sm:$0xff] }
 0x4a5   : > { %7741 = vmatpush2.bf16.msra.mxu1 %v10201_v41  ;;  %7775 = vmatprep.subr.bf16.mxu0 %v10212_v60  ;;  %v7860_v41 = vld [vmem:[%s11947_s20 + $0xa0] sm:$0xff]  ;;  %v7843_v60 = vld [vmem:[%s11947_s20 + $0x18] sm:$0xff] }
 0x4a6   : > { %7742 = vmatprep.subr.bf16.mxu1 %v10209_v29  ;;  %v7859_v29 = vld [vmem:[%s11947_s20 + $0x98] sm:$0xff] }
 0x4a8   : > { %7776 = vmatpush2.bf16.msra.mxu0 %v10210_v35  ;;  %v7842_v35 = vld [vmem:[%s11947_s20 + $0x10] sm:$0xff] }
 0x4a9   : > { %7743 = vmatpush2.bf16.msra.mxu1 %v10207_v36  ;;  %7777 = vmatprep.subr.bf16.mxu0 %v10215_v37  ;;  %v7858_v36 = vld [vmem:[%s11947_s20 + $0x90] sm:$0xff]  ;;  %v7857_v37 = vld [vmem:[%s11947_s20 + $0x88] sm:$0xff] }
 0x4aa   : > { %7802 = vmatprep.subr.bf16.mxu1 %v10218_v55  ;;  %v7841_v55 = vld [vmem:[%s11947_s20 + $0x8] sm:$0xff] }
 0x4ac   : > { %v7500_v38 = vpop.f32.mrf.mxu1  ;;  %7745 = vmatmul.mubr.bf16.vlgmr.msra.gmra.mxu1 %v12502_v31  ;;  %7778 = vmatpush2.bf16.msra.mxu0 %v10213_v33  ;;  %v7856_v33 = vld [vmem:[%s11947_s20 + $0x80] sm:$0xff] }
 0x4ad   : > { %v7501_v57 = vadd.f32 %v7500_v38, %v12917_v46  ;;  %7803 = vmatpush1.bf16.msra.mxu1 %v10216_v42  ;;  %7779 = vmatprep.subr.bf16.mxu0 %v10221_v7  ;;  %v10225_v46 = vld [vmem:[%s11949_s23 + $0x1728] ss:$16 sps:$4 sm:$0xff]   ;;  %v7840_v42 = vld [vmem:[%s11947_s20] sm:$0xff]  ;;  %v7835_v7 = vmax.f32 %v12768_v43, 0.0 }
 0x4ae   : > { %v7502_v24 = vpop.f32.mrf.mxu1  ;;  %7804 = vmatprep.subr.bf16.mxu1 %v10224_v23  ;;  %7826 = vmatprep.mubr.bf16.mxu1 %v10293_v9  ;;  %v7871_v9 = vld [vmem:[%s11947_s20 + $0xf8] sm:$0xff]  ;;  %v7900_v23 = vld [vmem:[%s11947_s20 + $0x1e0] sm:$0xff] }
 0x4af   : > { %v7503_v51 = vadd.f32 %v7502_v24, %v12923_v56  ;;  %v10234_v56 = vld [vmem:[%s11949_s23 + $0x1808] ss:$16 sps:$4 sm:$0xff]  }
 0x4b0   : > { %v7504_v31 = vpop.f32.mrf.mxu1  ;;  %7780 = vmatpush2.bf16.msra.mxu0 %v10219_v44  ;;  %v7883_v43 = vld [vmem:[%s11947_s20 + $0x158] sm:$0xff] }
 0x4b1   : > { %7805 = vmatpush1.bf16.msra.mxu1 %v10222_v40  ;;  %7781 = vmatprep.subr.bf16.mxu0 %v10227_v48  ;;  %v7899_v40 = vld [vmem:[%s11947_s20 + $0x1d8] sm:$0xff]  ;;  %v7882_v31 = vld [vmem:[%s11947_s20 + $0x150] sm:$0xff] }
 0x4b2   : > { %v7505_v54 = vpop.f32.mrf.mxu1  ;;  %7806 = vmatprep.subr.bf16.mxu1 %v10230_v17  ;;  %v7898_v17 = vld [vmem:[%s11947_s20 + $0x1d0] sm:$0xff] }
 0x4b3   : > { %v7881_v54 = vld [vmem:[%s11947_s20 + $0x148] sm:$0xff] }
 0x4b4   : > { %7782 = vmatpush2.bf16.msra.mxu0 %v10225_v46  ;;  %v7897_v46 = vld [vmem:[%s11947_s20 + $0x1c8] sm:$0xff] }
 0x4b5   : > { %7807 = vmatpush1.bf16.msra.mxu1 %v10228_v63  ;;  %7783 = vmatprep.subr.bf16.mxu0 %v10233_v21  ;;  %v7896_v21 = vld [vmem:[%s11947_s20 + $0x1c0] sm:$0xff] }
 0x4b6   : > { %7808 = vmatprep.subr.bf16.mxu1 %v10236_v61  ;;  %v7880_v61 = vld [vmem:[%s11947_s20 + $0x140] sm:$0xff] }
 0x4b8   : > { %7784 = vmatpush2.bf16.msra.mxu0 %v10231_v49  ;;  %v7895_v49 = vld [vmem:[%s11947_s20 + $0x1b8] sm:$0xff] }
 0x4b9   : > { %7809 = vmatpush1.bf16.msra.mxu1 %v10234_v56  ;;  %8951 = vmatprep.subr.mxu0 %v7871_v9  ;;  %v7879_v56 = vld [vmem:[%s11947_s20 + $0x138] sm:$0xff]  ;;  %v7894_v9 = vld [vmem:[%s11947_s20 + $0x1b0] sm:$0xff] }
 0x4ba   : > { %8986 = vmatprep.subr.mxu1 %v7903_v11  ;;  %v7873_v11 = vld [vmem:[%s11947_s20 + $0x108] sm:$0xff] }
 0x4bb   : > { %v7541_v4 = vpop.f32.mrf.mxu0  ;;  %7786 = vmatmul.mubr.bf16.vlgmr.msra.gmra.mxu0 %v12512_v45  ;;  %v7868_v45 = vld [vmem:[%s11947_s20 + $0xe0] sm:$0xff] }
 0x4bc   : > { %8943 = vmatmul.mubr.msk.bf16.vlgmr.msra.gmra.mxu1 %vm6765_vm1, %v12544_v26  ;;  %v12992_v32 = vadd.f32 %v7541_v4, %v7501_v57  ;;  %8952 = vmatpush3.msra.mxu0 %v7855_v8  ;;  %v7884_v57 = vld [vmem:[%s11947_s20 + $0x160] sm:$0xff]  ;;  %v7878_v8 = vld [vmem:[%s11947_s20 + $0x130] sm:$0xff] }
 0x4bd   : > { %7968 = vmatprep.mubr.f32.mxu0 %v7836_v6  ;;  %v7543_v62 = vpop.f32.mrf.mxu0  ;;  %8953 = vmatprep.subr.mxu0 %v7870_v58  ;;  %v7893_v6 = vld [vmem:[%s11947_s20 + $0x1a8] sm:$0xff]  ;;  %v7892_v4 = vld [vmem:[%s11947_s20 + $0x1a0] sm:$0xff] }
 0x4be   : > { %v12996_v52 = vadd.f32 %v7543_v62, %v7503_v51  ;;  %8954 = vmatpush3.msra.mxu0 %v7854_v50  ;;  %8987 = vmatpush3.msra.mxu1 %v7887_v14  ;;  %v7877_v58 = vld [vmem:[%s11947_s20 + $0x128] sm:$0xff]  ;;  %v7891_v62 = vld [vmem:[%s11947_s20 + $0x198] sm:$0xff]  ;;  %v7888_v14 = vld [vmem:[%s11947_s20 + $0x180] sm:$0xff] }
 0x4bf   : > { %v7545_v26 = vpop.f32.mrf.mxu0  ;;  %8955 = vmatprep.subr.mxu0 %v7869_v5  ;;  %8988 = vmatprep.subr.mxu1 %v7902_v10  ;;  %v7872_v10 = vld [vmem:[%s11947_s20 + $0x100] sm:$0xff] }
 0x4c0   : > { %8956 = vmatpush3.msra.mxu0 %v7853_v0  ;;  %8989 = vmatpush3.msra.mxu1 %v7886_v34  ;;  %v7890_v26 = vld [vmem:[%s11947_s20 + $0x190] sm:$0xff] }
 0x4c1   : > { %v7546_v1 = vpop.f32.mrf.mxu0  ;;  %8957 = vmatprep.subr.mxu0 %v7868_v45  ;;  %8990 = vmatprep.subr.mxu1 %v7901_v19 }
 0x4c2   : > { %8958 = vmatpush3.msra.mxu0 %v7852_v12  ;;  %8991 = vmatpush3.msra.mxu1 %v7885_v59 }
 0x4c3   : > { %8959 = vmatprep.subr.mxu0 %v7867_v30  ;;  %8992 = vmatprep.subr.mxu1 %v7900_v23  ;;  %v7874_v30 = vld [vmem:[%s11947_s20 + $0x110] sm:$0xff] }
 0x4c4   : > { %8960 = vmatpush3.msra.mxu0 %v7851_v39  ;;  %8993 = vmatpush3.msra.mxu1 %v7884_v57  ;;  %v7889_v39 = vld [vmem:[%s11947_s20 + $0x188] sm:$0xff] }
 0x4c5   : > { %8961 = vmatprep.subr.mxu0 %v7866_v15  ;;  %8994 = vmatprep.subr.mxu1 %v7899_v40 }
 0x4c6   : > { %8962 = vmatpush3.msra.mxu0 %v7850_v16  ;;  %8995 = vmatpush3.msra.mxu1 %v7883_v43 }
 0x4c7   : > { %8963 = vmatprep.subr.mxu0 %v7865_v47  ;;  %8996 = vmatprep.subr.mxu1 %v7898_v17 }
 0x4c8   : > { %8964 = vmatpush3.msra.mxu0 %v7849_v13  ;;  %8997 = vmatpush3.msra.mxu1 %v7882_v31 }
 0x4c9   : > { %8965 = vmatprep.subr.mxu0 %v7864_v20  ;;  %8998 = vmatprep.subr.mxu1 %v7897_v46 }
 0x4ca   : > { %8966 = vmatpush3.msra.mxu0 %v7848_v22  ;;  %8999 = vmatpush3.msra.mxu1 %v7881_v54 }
 0x4cb   : > { %8967 = vmatprep.subr.mxu0 %v7863_v18  ;;  %9000 = vmatprep.subr.mxu1 %v7896_v21 }
 0x4cc   : > { %8968 = vmatpush3.msra.mxu0 %v7847_v25  ;;  %9001 = vmatpush3.msra.mxu1 %v7880_v61 }
 0x4cd   : > { %8969 = vmatprep.subr.mxu0 %v7862_v27  ;;  %9002 = vmatprep.subr.mxu1 %v7895_v49 }
 0x4ce   : > { %8970 = vmatpush3.msra.mxu0 %v7846_v28  ;;  %9003 = vmatpush3.msra.mxu1 %v7879_v56 }
 0x4cf   : > { %8971 = vmatprep.subr.mxu0 %v7861_v3  ;;  %9004 = vmatprep.subr.mxu1 %v7894_v9 }
 0x4d0   : > { %8972 = vmatpush3.msra.mxu0 %v7845_v53  ;;  %9005 = vmatpush3.msra.mxu1 %v7878_v8 }
 0x4d1   : > { %8973 = vmatprep.subr.mxu0 %v7860_v41  ;;  %9006 = vmatprep.subr.mxu1 %v7893_v6 }
 0x4d2   : > { %8974 = vmatpush3.msra.mxu0 %v7844_v2  ;;  %9007 = vmatpush3.msra.mxu1 %v7877_v58 }
 0x4d3   : > { %8975 = vmatprep.subr.mxu0 %v7859_v29  ;;  %9008 = vmatprep.subr.mxu1 %v7892_v4 }
 0x4d4   : > { %8976 = vmatpush3.msra.mxu0 %v7843_v60 }
 0x4d5   : > { %8977 = vmatprep.subr.mxu0 %v7858_v36 }
 0x4d6   : > { %8978 = vmatpush3.msra.mxu0 %v7842_v35 }
 0x4d7   : > { %8979 = vmatprep.subr.mxu0 %v7857_v37 }
 0x4d8   : > { %8980 = vmatpush3.msra.mxu0 %v7841_v55 }
 0x4d9   : > { %8981 = vmatprep.subr.mxu0 %v7856_v33 }
 0x4da   : > { %8982 = vmatpush3.msra.mxu0 %v7840_v42 }
 0x4db   : > { %7969 = vmatmul.mubr.f32.vlgmr.msra.gmra.mxu0 %v7835_v7 }
 0x4ec   : > { %v7582_v38 = vpop.f32.mrf.mxu1 }
 0x4ed   : > { %v7583_v44 = vadd.f32 %v7582_v38, %v12992_v32  ;;  %v7876_v32 = vld [vmem:[%s11947_s20 + $0x120] sm:$0xff] }
 0x4ee   : > { %v7584_v24 = vpop.f32.mrf.mxu1  ;;  %9009 = vmatpush3.msra.mxu1 %v7876_v32 }
 0x4ef   : > { %v7585_v48 = vadd.f32 %v7584_v24, %v12996_v52  ;;  %9010 = vmatprep.subr.mxu1 %v7891_v62  ;;  %v7875_v52 = vld [vmem:[%s11947_s20 + $0x118] sm:$0xff] }
 0x4f0   : > { %v7586_v51 = vpop.f32.mrf.mxu1  ;;  %9011 = vmatpush3.msra.mxu1 %v7875_v52 }
 0x4f1   : > { %9012 = vmatprep.subr.mxu1 %v7890_v26 }
 0x4f2   : > { %v7587_v63 = vpop.f32.mrf.mxu1  ;;  %9013 = vmatpush3.msra.mxu1 %v7874_v30 }
 0x4f3   : > { %9014 = vmatprep.subr.mxu1 %v7889_v39  ;;  %v7839_v63 = vld [vmem:[#allocation2] sm:$0x3] }
 0x4f4   : > { %9015 = vmatpush3.msra.mxu1 %v7873_v11 }
 0x4f5   : > { %9016 = vmatprep.subr.mxu1 %v7888_v14 }
 0x4f6   : > { %9017 = vmatpush3.msra.mxu1 %v7872_v10 }
 0x4fb   : > { %v7623_v50 = vpop.f32.mrf.mxu0 }
 0x4fc   : > { %v7624_v5 = vadd.f32 %v7623_v50, %v7583_v44 }
 0x4fd   : > { %v7625_v0 = vpop.f32.mrf.mxu0 }
 0x4fe   : > { %v7626_v45 = vadd.f32 %v7625_v0, %v7585_v48 }
 0x4ff   : > { %v7627_v12 = vpop.f32.mrf.mxu0 }
 0x501   : > { %v7628_v1 = vpop.f32.mrf.mxu0 }
 0x52c   : > { %v7664_v15 = vpop.f32.mrf.mxu1 }
 0x52d   : > { %v7665_v34 = vadd.f32 %v7664_v15, %v7624_v5 }
 0x52e   : > { %v7666_v16 = vpop.f32.mrf.mxu1 }
 0x52f   : > { %v7667_v19 = vadd.f32 %v7666_v16, %v7626_v45 }
 0x530   : > { %v7668_v47 = vpop.f32.mrf.mxu1 }
 0x532   : > { %v7669_v59 = vpop.f32.mrf.mxu1 }
 0x53b   : > { %v7705_v13 = vpop.f32.mrf.mxu0 }
 0x53c   : > { %v7706_v53 = vadd.f32 %v7705_v13, %v7665_v34 }
 0x53d   : > { %v7707_v20 = vpop.f32.mrf.mxu0 }
 0x53e   : > { %v7708_v41 = vadd.f32 %v7707_v20, %v7667_v19 }
 0x53f   : > { %v7709_v22 = vpop.f32.mrf.mxu0 }
 0x541   : > { %v7710_v18 = vpop.f32.mrf.mxu0 }
 0x56c   : > { %v7746_v25 = vpop.f32.mrf.mxu1 }
 0x56d   : > { %v7747_v2 = vadd.f32 %v7746_v25, %v7706_v53 }
 0x56e   : > { %v7748_v27 = vpop.f32.mrf.mxu1 }
 0x56f   : > { %v7749_v36 = vadd.f32 %v7748_v27, %v7708_v41 }
 0x570   : > { %v7750_v28 = vpop.f32.mrf.mxu1 }
 0x572   : > { %v7751_v3 = vpop.f32.mrf.mxu1 }
 0x57b   : > { %v7787_v29 = vpop.f32.mrf.mxu0 }
 0x57c   : > { %v7828_v60 = vpop.f32.mrf.mxu1  ;;  %v7788_v35 = vadd.f32 %v7787_v29, %v7747_v2 }
 0x57d   : > { %v7789_v37 = vpop.f32.mrf.mxu0 }
 0x57e   : > { %v7830_v55 = vpop.f32.mrf.mxu1  ;;  %v7790_v33 = vadd.f32 %v7789_v37, %v7749_v36  ;;  %v7829_v42 = vadd.f32 %v7828_v60, %v7788_v35 }
 0x57f   : > { %v7791_v7 = vpop.f32.mrf.mxu0 }
 0x580   : > { %v7832_v23 = vpop.f32.mrf.mxu1  ;;  %v7831_v38 = vadd.f32 %v7830_v55, %v7790_v33  ;;  %v7837_v24 = vmax.f32 %v7829_v42, 0.0 }
 0x581   : > { %v7792_v57 = vpop.f32.mrf.mxu0 }
 0x582   : > { %v7833_v44 = vpop.f32.mrf.mxu1  ;;  %v7838_v40 = vmax.f32 %v7831_v38, 0.0 }
 0x584   : > { %8038 = vmatprep.mubr.f32.mxu1 %v7838_v40 }
 0x585   : > { %8039 = vmatmul.mubr.f32.vlgmr.msra.gmra.mxu1 %v7837_v24 }
 0x59b   : > { %v8983_v43 = vpop.f32.mrf.mxu0 }
 0x59d   : > { %v8984_v48 = vpop.f32.mrf.mxu0 }
 0x59e   : > { %v8985_v31 = vadd.f32 %v8984_v48, %v8983_v43 }
 0x645   : > { %v9018_v17 = vpop.f32.mrf.mxu1 }
 0x647   : > { %v9019_v51 = vpop.f32.mrf.mxu1 }
 0x648   : > { %v9020_v46 = vadd.f32 %v9019_v51, %v9018_v17 }
 0x64a   : > { %v8041_v54 = vadd.f32 %v9020_v46, %v8985_v31  ;;  %8050 = sbr.rel (%p8944_p11) target bundleno = 1776 (0x6f0), region = 71 }
 0x64c   : > { %v8044_v21 = vadd.f32 %v8041_v54, %v7839_v63 }
 0x64e   : > { %8046 = vst.msk [vmem:[#allocation2] sm:$0x3] %vm8045_vm2, %v8044_v21 }
 0x64f   : > { %v8945_v49 = vld [vmem:[%s13089_s4] ss:$0 sm:$0xff]  ;;  %vm8066_vm3 = vcmask 41984   ;;  %v10294_v9 = vmov 6  }
 0x650   : > { %10238 = vset.pattern.permute.xlu0 %v10294_v9 }
 0x655   : > { %v8051_v61 = vld [vmem:[#allocation2] sm:$0x3] }
 0x656   : > { %v8059_v56 = vadd.f32 %v8945_v49, %v8051_v61 }
 0x658   : > { %v8067_v8 = vsel %vm8066_vm3, %v8059_v56, 0.0 }
 0x659   : > { %8068 = vadd.xlane.f32.xlu0 %v8067_v8 }
 0x66f   : > { %8062 = vperm.xlu0 %10238, %v8059_v56  }
 0x6e2   : > { %v8069_v6 = vpop.xlane.xlu0 %8068 }
 0x6e3   : > { %v8071_v4 = vmul.f32 0.16666667, %v8069_v6 }
 0x6ea   : > { %v8063_v58 = vpop.permute.xlu0 %8062 }
 0x6eb   : > { %v8065_v50 = vadd.f32 %v8063_v58, %v8059_v56 }
 0x6ed   : > { %v8072_v32 = vsub.f32 %v8065_v50, %v8071_v4 }
 0x6ef   : > { %8073 = vst.msk [vmem:[#allocation4] sm:$0x3] %vm8066_vm3, %v8072_v32 }
 0x6f0 PF: > { %p9027_p12 = scmp.eq.s32.totalorder %s10342_s21, 1  ;;  %s10295_s9 = smov [#allocation4]  }
 0x6f1   : > { %s8081_s10 = sshll.u32 %s10295_s9, 4  ;;  %s8082_s10 = int_to_ptr.vmem [resolvable:$true] %s8081_s10 }
 0x6f2   : > { %s10239_s11 = scalar_lea.vmem %s8082_s10, 32  ;;  %p10246_p2 = scmp.lt.s32.totalorder %s8082_s10, %s8082_s10 }
 0x6f3   : > { %p10240_p13 = scmp.ne.s32.totalorder %s8082_s10, %s10239_s11  ;;  %p10247_p3 = scmp.lt.s32.totalorder %s10239_s11, %s10239_s11 }
 0x6f5   : > { %p10241_p0 = pnand %p10240_p13, %p9027_p12  ;;  %p10248_p4 = por %p10247_p3, %p10246_p2 }
 0x6f7   : > { %p10242_p1 = pneg %p10241_p0 }
 0x6f9   : > { %p10249_p5 = pnand %p10248_p4, %p10242_p1 }
 0x6fb   : > { %10252 = shalt.err (!%p10249_p5)
}
 0x6fc   : > { %9024 = dma.vmem_to_hbm [thread:$0]  (%p9027_p12), %s8082_s10, 32, %s13090_s5, [#allocation5]  }
 0x6fd   : > { %10276 = dma.done.wait (%p9027_p12), [#allocation5], 32  }
 0x6fe   : > { %10278 = vsyncadd (%p9027_p12), [#allocation5], 4294967264 }
 0x6ff PF: > { %p13_p6 = scmp.ge.s32.totalorder %s10345_s22, 4   ;;  %s13091_s18 = smov %s10285_s19 }
 0x700   : > { %s13092_s19 = smov %s10354_s25  ;;  %s13093_s20 = smov %s10345_s22 }
 0x701   :  { %15 = sbr.rel (!%p13_p6) target bundleno = 2 (0x2), region = 109 }
 0x706   :  { %8094 = vsyncpa [#allocation5], 1 }
 0x707   :  { %8096 = vsyncpa [#allocation5 + $0x1], 1 }

</bundles_post_ra>
